<compile_context>
chip_gen: v7x
topology: tpu7x:2x2x1
jax: 0.10.0
libtpu: 0.0.40
codegen_flags: <defaults>
</compile_context>

<pallas_src>
import functools

import jax
import jax.numpy as jnp
from jax import lax
from jax.experimental import pallas as pl
from jax.experimental.pallas import tpu as pltpu


# ----------------------------------------------------------------------------
# In-kernel helpers
# ----------------------------------------------------------------------------
def _zero_halo(ref, n, H, W, C):
    """Zero only the 1-pixel halo ring of an (n, H+2, W+2, C) padded buffer."""
    zrow = jnp.zeros((n, 1, W + 2, C), jnp.float32)
    zcol = jnp.zeros((n, H + 2, 1, C), jnp.float32)
    ref[:, 0:1, :, :] = zrow
    ref[:, H + 1:H + 2, :, :] = zrow
    ref[:, :, 0:1, :] = zcol
    ref[:, :, W + 1:W + 2, :] = zcol


def _conv3x3_acc(load_tap, w_taps_ref, M, cin, cout):
    """3x3 'same' conv as 9 accumulated per-tap MXU matmuls.

    load_tap(kh, kw) returns an (n, H, W, cin) f32 window; w_taps_ref is a
    (9, cin, cout) bf16 ref.  Returns the (M, cout) f32 pre-activation.
    """
    acc = jnp.zeros((M, cout), jnp.float32)
    t = 0
    for kh in range(3):
        for kw in range(3):
            tap = load_tap(kh, kw).reshape(M, cin).astype(jnp.bfloat16)
            acc = acc + jnp.dot(tap, w_taps_ref[t],
                                preferred_element_type=jnp.float32)
            t += 1
    return acc


def _conv3x3_acc_t(load_tap, w_taps_t_ref, M, cin, cout):
    """Like _conv3x3_acc but emits the transposed (cout, M) result so the
    final output store is lane-dense.  w_taps_t_ref is (9, cout, cin) bf16."""
    acc = jnp.zeros((cout, M), jnp.float32)
    t = 0
    for kh in range(3):
        for kw in range(3):
            tap = load_tap(kh, kw).reshape(M, cin).astype(jnp.bfloat16)
            acc = acc + lax.dot_general(
                w_taps_t_ref[t], tap,
                dimension_numbers=(((1,), (1,)), ((), ())),
                preferred_element_type=jnp.float32)
            t += 1
    return acc


def _bcast_rows(v, reps):
    """(n, C) -> (n*reps, C): repeat each row `reps` times (per-image bcast)."""
    n, c = v.shape
    return jnp.broadcast_to(v[:, None, :], (n, reps, c)).reshape(n * reps, c)


# ----------------------------------------------------------------------------
# Fused kernel: encoders -> style head -> generator for bps image pairs
# ----------------------------------------------------------------------------
def _aesfa_fused_kernel(
        patches_ref,
        w1f_ref, b1f_ref, w2f_ref, b2f_ref,
        stg_w_ref, stg_b_ref, stb_w_ref, stb_b_ref,
        gw1_ref, gb1_ref, gw2t_ref, gb2_ref,
        pool_ref, up_ref, gpool_ref, cmean_ref,
        o_ref,
        pad1, pad2,
        *, H, W, nf, bps, eps=1e-5):
    HW = H * W
    HWc = (H // 2) * (W // 2)
    Ms = bps * HW           # rows per stream (content or style) in this step
    Mc = bps * HWc

    # Zero only the halo rings; every interior is overwritten before its use.
    _zero_halo(pad1, 2 * bps, H, W, nf)
    _zero_halo(pad2, bps, H, W, 2 * nf)

    # ---- fused encoder conv1: [A|B] patches along M, [e_w1|s_w1] along cout
    h1 = jnp.dot(patches_ref[0], w1f_ref[...],
                 preferred_element_type=jnp.float32) + b1f_ref[...]
    h1 = jnp.maximum(h1, 0.0)                                   # (2*Ms, 2nf)
    pad1[0:bps, 1:H + 1, 1:W + 1, :] = h1[:Ms, :nf].reshape(bps, H, W, nf)
    pad1[bps:2 * bps, 1:H + 1, 1:W + 1, :] = h1[Ms:, nf:].reshape(bps, H, W, nf)

    # ---- fused encoder conv2 (per-tap accumulated matmuls) ------------------
    h2 = _conv3x3_acc(lambda kh, kw: pad1[:, kh:kh + H, kw:kw + W, :],
                      w2f_ref, 2 * Ms, nf, 4 * nf)
    h2 = jnp.maximum(h2 + b2f_ref[...], 0.0)                    # (2*Ms, 4nf)
    content = h2[:Ms, :2 * nf]                                  # netE features
    style = h2[Ms:, 2 * nf:]                                    # netS features

    # ---- style head: per-image global average pool -> (gamma, beta) --------
    pooled = jnp.dot(gpool_ref[...], style,
                     preferred_element_type=jnp.float32)        # (bps, 2nf)
    pooled_bf = pooled.astype(jnp.bfloat16)
    gamma = jnp.dot(pooled_bf, stg_w_ref[...],
                    preferred_element_type=jnp.float32) + stg_b_ref[...]
    beta = jnp.dot(pooled_bf, stb_w_ref[...],
                   preferred_element_type=jnp.float32) + stb_b_ref[...]

    # ---- content 2x2 average pool (per-image, exact f32 matmul) ------------
    cpool = jnp.dot(pool_ref[...], content,
                    preferred_element_type=jnp.float32)         # (Mc, 2nf)

    # ---- AdaIN: per-image instance norm + (gamma, beta) modulation ---------
    mean = jnp.dot(cmean_ref[...], cpool,
                   preferred_element_type=jnp.float32)          # (bps, 2nf)
    centered = cpool - _bcast_rows(mean, HWc)
    var = jnp.dot(cmean_ref[...], centered * centered,
                  preferred_element_type=jnp.float32)           # (bps, 2nf)
    scale = lax.rsqrt(var + eps) * (1.0 + gamma)
    mod = centered * _bcast_rows(scale, HWc) + _bcast_rows(beta, HWc)

    # ---- 2x nearest-neighbour upsample (per-image f32 matmul) --------------
    up = jnp.dot(up_ref[...], mod,
                 preferred_element_type=jnp.float32)            # (Ms, 2nf)
    pad2[:, 1:H + 1, 1:W + 1, :] = up.reshape(bps, H, W, 2 * nf)

    # ---- generator conv1 + ReLU ---------------------------------------------
    g1 = _conv3x3_acc(lambda kh, kw: pad2[:, kh:kh + H, kw:kw + W, :],
                      gw1_ref, Ms, 2 * nf, nf)
    g1 = jnp.maximum(g1 + gb1_ref[...], 0.0)                    # (Ms, nf)
    pad1[0:bps, 1:H + 1, 1:W + 1, :] = g1.reshape(bps, H, W, nf)

    # ---- final conv, transposed -> lane-dense (3, Ms) flattened NCHW -------
    out_t = _conv3x3_acc_t(
        lambda kh, kw: pad1[0:bps, kh:kh + H, kw:kw + W, :],
        gw2t_ref, Ms, nf, 3)
    o_ref[0] = jnp.tanh(out_t + gb2_ref[...])


# ----------------------------------------------------------------------------
# Wrapper
# ----------------------------------------------------------------------------
def _pairs_per_step(batch):
    """Image pairs folded into one grid step.  Whole batch on single-TC chips
    (v5e / v6e); one pair per step elsewhere so dimension_semantics='parallel'
    spreads pairs across TensorCores (v7x)."""
    try:
        kind = jax.devices()[0].device_kind.lower()
    except Exception:
        return 1
    single_tc = ("lite" in kind) or ("v5e" in kind) or ("v6e" in kind)
    return batch if single_tc else 1


def _pool_upsample_mats(H, W, bps):
    """Per-image 2x2 avg-pool / 2x NN-upsample / pooling constants,
    block-diagonal over the `bps` images folded into one grid step (f32 so
    the averaging is exact).

    TODO(synk): the pool/upsample constants are O((H*W)^2) per image; switch
    to separable (H/2,H) x (W,W/2) factors before using H, W >~ 64."""
    Hc, Wc = H // 2, W // 2
    q = jnp.arange(H * W)
    r = jnp.arange(Hc * Wc)
    qi, qj = q // W, q % W
    ri, rj = r // Wc, r % Wc
    mask = ((qi[None, :] // 2) == ri[:, None]) & \
           ((qj[None, :] // 2) == rj[:, None])                  # (Hc*Wc, H*W)
    eye = jnp.eye(bps, dtype=jnp.float32)
    pool = jnp.kron(eye, mask.astype(jnp.float32) * 0.25)       # (bps*HWc, bps*HW)
    up = jnp.kron(eye, mask.T.astype(jnp.float32))              # (bps*HW, bps*HWc)
    gpool = jnp.kron(eye, jnp.full((1, H * W), 1.0 / (H * W), jnp.float32))
    cmean = jnp.kron(eye, jnp.full((1, Hc * Wc), 1.0 / (Hc * Wc), jnp.float32))
    return pool, up, gpool, cmean


def aesfa_test_forward(params, real_A, real_B):
    """real_A, real_B: (B, 3, H, W) NCHW float32 -> trs_AtoB (B, 3, H, W)."""
    B, Cin, H, W = real_A.shape
    nf = params["e_w1"].shape[-1]
    HW = H * W
    assert H % 2 == 0 and W % 2 == 0

    bps = _pairs_per_step(B)
    if B % bps != 0:
        bps = 1
    nsteps = B // bps
    Ms = bps * HW

    # ---- hoisted input im2col: (B, HW, 9*Cin) bf16 patch matrices ----------
    def im2col(x):
        xh = jnp.transpose(x, (0, 2, 3, 1)).astype(jnp.float32)
        xp = jnp.pad(xh, ((0, 0), (1, 1), (1, 1), (0, 0)))
        cols = [xp[:, kh:kh + H, kw:kw + W, :].reshape(B, HW, Cin)
                for kh in range(3) for kw in range(3)]
        return jnp.concatenate(cols, axis=-1).astype(jnp.bfloat16)

    pa = im2col(real_A).reshape(nsteps, bps, HW, 9 * Cin)
    pb = im2col(real_B).reshape(nsteps, bps, HW, 9 * Cin)
    # Stream-major per step: [A images (content) | B images (style)] along M.
    patches = jnp.concatenate([pa, pb], axis=1).reshape(nsteps, 2 * Ms, 9 * Cin)

    # ---- weights: fused content|style encoders, per-tap layouts ------------
    def taps(w):  # (3,3,cin,cout) -> (9, cin, cout) bf16
        return w.reshape(9, w.shape[2], w.shape[3]).astype(jnp.bfloat16)

    def brow(v):  # bias -> (1, cout) f32
        return v.reshape(1, -1).astype(jnp.float32)

    w1f = jnp.concatenate([params["e_w1"], params["s_w1"]], axis=-1)
    w1f = w1f.reshape(9 * Cin, 2 * nf).astype(jnp.bfloat16)        # (27, 2nf)
    b1f = brow(jnp.concatenate([params["e_b1"], params["s_b1"]]))
    w2f = jnp.concatenate([taps(params["e_w2"]), taps(params["s_w2"])],
                          axis=-1)                                 # (9, nf, 4nf)
    b2f = brow(jnp.concatenate([params["e_b2"], params["s_b2"]]))

    st_w, st_b = params["st_w"], params["st_b"]
    stg_w = st_w[:, :2 * nf].astype(jnp.bfloat16)
    stb_w = st_w[:, 2 * nf:].astype(jnp.bfloat16)
    stg_b = brow(st_b[:2 * nf])
    stb_b = brow(st_b[2 * nf:])

    gw1 = taps(params["g_w1"])                                     # (9, 2nf, nf)
    gb1 = brow(params["g_b1"])
    gw2t = jnp.transpose(taps(params["g_w2"]), (0, 2, 1))           # (9, 3, nf)
    gb2 = params["g_b2"].reshape(-1, 1).astype(jnp.float32)         # (3, 1)

    pool_mat, up_mat, gpool, cmean = _pool_upsample_mats(H, W, bps)

    inputs = (patches,
              w1f, b1f, w2f, b2f,
              stg_w, stg_b, stb_w, stb_b,
              gw1, gb1, gw2t, gb2,
              pool_mat, up_mat, gpool, cmean)

    patch_spec = pl.BlockSpec((1, 2 * Ms, 9 * Cin), lambda i: (i, 0, 0))

    def const_spec(x):
        zeros = (0,) * x.ndim
        return pl.BlockSpec(x.shape, lambda i: zeros)

    kernel = functools.partial(_aesfa_fused_kernel, H=H, W=W, nf=nf, bps=bps)
    out = pl.pallas_call(
        kernel,
        out_shape=jax.ShapeDtypeStruct((nsteps, 3, Ms), jnp.float32),
        grid=(nsteps,),
        in_specs=[patch_spec] + [const_spec(x) for x in inputs[1:]],
        out_specs=pl.BlockSpec((1, 3, Ms), lambda i: (i, 0, 0)),
        scratch_shapes=[
            pltpu.VMEM((2 * bps, H + 2, W + 2, nf), jnp.float32),   # nf-ch pad
            pltpu.VMEM((bps, H + 2, W + 2, 2 * nf), jnp.float32),   # 2nf-ch pad
        ],
        compiler_params=pltpu.CompilerParams(
            dimension_semantics=("parallel",)),
    )(*inputs)

    # (nsteps, 3, bps*HW) is flattened NCHW per step -> (B, 3, H, W).
    out = out.reshape(nsteps, 3, bps, HW).transpose(0, 2, 1, 3)
    return out.reshape(B, 3, H, W)


# ----------------------------------------------------------------------------
# Parameters
# ----------------------------------------------------------------------------
def _conv_init(key, kh, kw, cin, cout):
    k1, k2 = jax.random.split(key)
    scale = 1.0 / jnp.sqrt(kh * kw * cin)
    w = jax.random.uniform(k1, (kh, kw, cin, cout), jnp.float32, -scale, scale)
    b = jax.random.uniform(k2, (cout,), jnp.float32, -scale, scale)
    return w, b


def init_params(key, nf=16):
    ks = jax.random.split(key, 8)
    p = {}
    # netE (content encoder)
    p["e_w1"], p["e_b1"] = _conv_init(ks[0], 3, 3, 3, nf)
    p["e_w2"], p["e_b2"] = _conv_init(ks[1], 3, 3, nf, 2 * nf)
    # netS (style encoder)
    p["s_w1"], p["s_b1"] = _conv_init(ks[2], 3, 3, 3, nf)
    p["s_w2"], p["s_b2"] = _conv_init(ks[3], 3, 3, nf, 2 * nf)
    # style -> (gamma, beta) linear
    k1, k2 = jax.random.split(ks[4])
    scale = 1.0 / jnp.sqrt(2 * nf)
    p["st_w"] = jax.random.uniform(k1, (2 * nf, 4 * nf), jnp.float32,
                                   -scale, scale)
    p["st_b"] = jax.random.uniform(k2, (4 * nf,), jnp.float32, -scale, scale)
    # netG (generator / decoder)
    p["g_w1"], p["g_b1"] = _conv_init(ks[5], 3, 3, 2 * nf, nf)
    p["g_w2"], p["g_b2"] = _conv_init(ks[6], 3, 3, nf, 3)
    return p


# ----------------------------------------------------------------------------
if __name__ == "__main__":
    key = jax.random.PRNGKey(0)
    k_param, k_a, k_b = jax.random.split(key, 3)

    params = init_params(k_param, nf=16)

    B, C, H, W = 2, 3, 16, 16
    real_A = jax.random.uniform(k_a, (B, C, H, W), jnp.float32, -1.0, 1.0)
    real_B = jax.random.uniform(k_b, (B, C, H, W), jnp.float32, -1.0, 1.0)

    trs_AtoB = jax.jit(aesfa_test_forward)(params, real_A, real_B)
    jax.block_until_ready(trs_AtoB)

    assert trs_AtoB.shape == (B, 3, H, W)
    assert bool(jnp.all(jnp.isfinite(trs_AtoB)))
    print("KERNEL_OK")
</pallas_src>

<mosaic_0001>
module attributes {stable_mosaic.version = 11 : i64} {
  func.func @_aesfa_fused_kernel(%arg0: i32, %arg1: memref<1x512x27xbf16, #tpu.memory_space<vmem>>, %arg2: memref<27x32xbf16, #tpu.memory_space<vmem>>, %arg3: memref<1x32xf32, #tpu.memory_space<vmem>>, %arg4: memref<9x16x64xbf16, #tpu.memory_space<vmem>>, %arg5: memref<1x64xf32, #tpu.memory_space<vmem>>, %arg6: memref<32x32xbf16, #tpu.memory_space<vmem>>, %arg7: memref<1x32xf32, #tpu.memory_space<vmem>>, %arg8: memref<32x32xbf16, #tpu.memory_space<vmem>>, %arg9: memref<1x32xf32, #tpu.memory_space<vmem>>, %arg10: memref<9x32x16xbf16, #tpu.memory_space<vmem>>, %arg11: memref<1x16xf32, #tpu.memory_space<vmem>>, %arg12: memref<9x3x16xbf16, #tpu.memory_space<vmem>>, %arg13: memref<3x1xf32, #tpu.memory_space<vmem>>, %arg14: memref<64x256xf32, #tpu.memory_space<vmem>>, %arg15: memref<256x64xf32, #tpu.memory_space<vmem>>, %arg16: memref<1x256xf32, #tpu.memory_space<vmem>>, %arg17: memref<1x64xf32, #tpu.memory_space<vmem>>, %arg18: memref<1x3x256xf32, #tpu.memory_space<vmem>>, %arg19: memref<2x18x18x16xf32, #tpu.memory_space<vmem>>, %arg20: memref<1x18x18x32xf32, #tpu.memory_space<vmem>>) attributes {dimension_semantics = [#tpu.dimension_semantics<parallel>], iteration_bounds = array<i64: 2>, scalar_prefetch = 0 : i64, scratch_operands = 2 : i64, tpu.core_type = #tpu.core_type<tc>, window_params = [{transform_indices = @transform_0, window_bounds = array<i64: 1, 512, 27>}, {pipeline_mode = #tpu.pipeline_mode<synchronous>, transform_indices = @transform_1, window_bounds = array<i64: 27, 32>}, {pipeline_mode = #tpu.pipeline_mode<synchronous>, transform_indices = @transform_2, window_bounds = array<i64: 1, 32>}, {pipeline_mode = #tpu.pipeline_mode<synchronous>, transform_indices = @transform_3, window_bounds = array<i64: 9, 16, 64>}, {pipeline_mode = #tpu.pipeline_mode<synchronous>, transform_indices = @transform_4, window_bounds = array<i64: 1, 64>}, {pipeline_mode = #tpu.pipeline_mode<synchronous>, transform_indices = @transform_5, window_bounds = array<i64: 32, 32>}, {pipeline_mode = #tpu.pipeline_mode<synchronous>, transform_indices = @transform_6, window_bounds = array<i64: 1, 32>}, {pipeline_mode = #tpu.pipeline_mode<synchronous>, transform_indices = @transform_7, window_bounds = array<i64: 32, 32>}, {pipeline_mode = #tpu.pipeline_mode<synchronous>, transform_indices = @transform_8, window_bounds = array<i64: 1, 32>}, {pipeline_mode = #tpu.pipeline_mode<synchronous>, transform_indices = @transform_9, window_bounds = array<i64: 9, 32, 16>}, {pipeline_mode = #tpu.pipeline_mode<synchronous>, transform_indices = @transform_10, window_bounds = array<i64: 1, 16>}, {pipeline_mode = #tpu.pipeline_mode<synchronous>, transform_indices = @transform_11, window_bounds = array<i64: 9, 3, 16>}, {pipeline_mode = #tpu.pipeline_mode<synchronous>, transform_indices = @transform_12, window_bounds = array<i64: 3, 1>}, {pipeline_mode = #tpu.pipeline_mode<synchronous>, transform_indices = @transform_13, window_bounds = array<i64: 64, 256>}, {pipeline_mode = #tpu.pipeline_mode<synchronous>, transform_indices = @transform_14, window_bounds = array<i64: 256, 64>}, {pipeline_mode = #tpu.pipeline_mode<synchronous>, transform_indices = @transform_15, window_bounds = array<i64: 1, 256>}, {pipeline_mode = #tpu.pipeline_mode<synchronous>, transform_indices = @transform_16, window_bounds = array<i64: 1, 64>}, {transform_indices = @transform_17, window_bounds = array<i64: 1, 3, 256>}]} {
    %cst = arith.constant 0.000000e+00 : f32
    %0 = vector.broadcast %cst : f32 to vector<2x1x18x16xf32>
    %cst_0 = arith.constant 0.000000e+00 : f32
    %1 = vector.broadcast %cst_0 : f32 to vector<2x18x1x16xf32>
    %c0 = arith.constant 0 : index
    %c0_1 = arith.constant 0 : index
    %c0_2 = arith.constant 0 : index
    %c0_3 = arith.constant 0 : index
    %2 = vector.load %arg19[%c0, %c0_1, %c0_2, %c0_3] : memref<2x18x18x16xf32, #tpu.memory_space<vmem>>, vector<2x1x18x16xf32>
    tpu.vector_store %arg19[%c0, %c0_1, %c0_2, %c0_3], %0 {strides = array<i32>} : memref<2x18x18x16xf32, #tpu.memory_space<vmem>>, vector<2x1x18x16xf32>,
    %c0_4 = arith.constant 0 : index
    %c17 = arith.constant 17 : index
    %c0_5 = arith.constant 0 : index
    %c0_6 = arith.constant 0 : index
    %3 = vector.load %arg19[%c0_4, %c17, %c0_5, %c0_6] : memref<2x18x18x16xf32, #tpu.memory_space<vmem>>, vector<2x1x18x16xf32>
    tpu.vector_store %arg19[%c0_4, %c17, %c0_5, %c0_6], %0 {strides = array<i32>} : memref<2x18x18x16xf32, #tpu.memory_space<vmem>>, vector<2x1x18x16xf32>,
    %c0_7 = arith.constant 0 : index
    %c0_8 = arith.constant 0 : index
    %c0_9 = arith.constant 0 : index
    %c0_10 = arith.constant 0 : index
    %4 = vector.load %arg19[%c0_7, %c0_8, %c0_9, %c0_10] : memref<2x18x18x16xf32, #tpu.memory_space<vmem>>, vector<2x18x1x16xf32>
    tpu.vector_store %arg19[%c0_7, %c0_8, %c0_9, %c0_10], %1 {strides = array<i32>} : memref<2x18x18x16xf32, #tpu.memory_space<vmem>>, vector<2x18x1x16xf32>,
    %c0_11 = arith.constant 0 : index
    %c0_12 = arith.constant 0 : index
    %c17_13 = arith.constant 17 : index
    %c0_14 = arith.constant 0 : index
    %5 = vector.load %arg19[%c0_11, %c0_12, %c17_13, %c0_14] : memref<2x18x18x16xf32, #tpu.memory_space<vmem>>, vector<2x18x1x16xf32>
    tpu.vector_store %arg19[%c0_11, %c0_12, %c17_13, %c0_14], %1 {strides = array<i32>} : memref<2x18x18x16xf32, #tpu.memory_space<vmem>>, vector<2x18x1x16xf32>,
    %cst_15 = arith.constant 0.000000e+00 : f32
    %6 = vector.broadcast %cst_15 : f32 to vector<1x1x18x32xf32>
    %cst_16 = arith.constant 0.000000e+00 : f32
    %7 = vector.broadcast %cst_16 : f32 to vector<1x18x1x32xf32>
    %c0_17 = arith.constant 0 : index
    %c0_18 = arith.constant 0 : index
    %c0_19 = arith.constant 0 : index
    %c0_20 = arith.constant 0 : index
    %8 = vector.load %arg20[%c0_17, %c0_18, %c0_19, %c0_20] : memref<1x18x18x32xf32, #tpu.memory_space<vmem>>, vector<1x1x18x32xf32>
    tpu.vector_store %arg20[%c0_17, %c0_18, %c0_19, %c0_20], %6 {strides = array<i32>} : memref<1x18x18x32xf32, #tpu.memory_space<vmem>>, vector<1x1x18x32xf32>,
    %c0_21 = arith.constant 0 : index
    %c17_22 = arith.constant 17 : index
    %c0_23 = arith.constant 0 : index
    %c0_24 = arith.constant 0 : index
    %9 = vector.load %arg20[%c0_21, %c17_22, %c0_23, %c0_24] : memref<1x18x18x32xf32, #tpu.memory_space<vmem>>, vector<1x1x18x32xf32>
    tpu.vector_store %arg20[%c0_21, %c17_22, %c0_23, %c0_24], %6 {strides = array<i32>} : memref<1x18x18x32xf32, #tpu.memory_space<vmem>>, vector<1x1x18x32xf32>,
    %c0_25 = arith.constant 0 : index
    %c0_26 = arith.constant 0 : index
    %c0_27 = arith.constant 0 : index
    %c0_28 = arith.constant 0 : index
    %10 = vector.load %arg20[%c0_25, %c0_26, %c0_27, %c0_28] : memref<1x18x18x32xf32, #tpu.memory_space<vmem>>, vector<1x18x1x32xf32>
    tpu.vector_store %arg20[%c0_25, %c0_26, %c0_27, %c0_28], %7 {strides = array<i32>} : memref<1x18x18x32xf32, #tpu.memory_space<vmem>>, vector<1x18x1x32xf32>,
    %c0_29 = arith.constant 0 : index
    %c0_30 = arith.constant 0 : index
    %c17_31 = arith.constant 17 : index
    %c0_32 = arith.constant 0 : index
    %11 = vector.load %arg20[%c0_29, %c0_30, %c17_31, %c0_32] : memref<1x18x18x32xf32, #tpu.memory_space<vmem>>, vector<1x18x1x32xf32>
    tpu.vector_store %arg20[%c0_29, %c0_30, %c17_31, %c0_32], %7 {strides = array<i32>} : memref<1x18x18x32xf32, #tpu.memory_space<vmem>>, vector<1x18x1x32xf32>,
    %c0_33 = arith.constant 0 : index
    %c0_34 = arith.constant 0 : index
    %c0_35 = arith.constant 0 : index
    %12 = vector.load %arg1[%c0_33, %c0_34, %c0_35] : memref<1x512x27xbf16, #tpu.memory_space<vmem>>, vector<1x512x27xbf16>
    %13 = vector.shape_cast %12 : vector<1x512x27xbf16> to vector<512x27xbf16>
    %c0_36 = arith.constant 0 : index
    %c0_37 = arith.constant 0 : index
    %14 = vector.load %arg2[%c0_36, %c0_37] : memref<27x32xbf16, #tpu.memory_space<vmem>>, vector<27x32xbf16>
    %cst_38 = arith.constant dense<0.000000e+00> : vector<512x32xf32>
    %15 = tpu.matmul %13, %14, %cst_38 {dimension_numbers = #tpu.dot_dimension_numbers<[1], [0], [0], [1], [0, 0, 1, 1], [], []>} : vector<512x27xbf16>, vector<27x32xbf16>, vector<512x32xf32> -> vector<512x32xf32>
    %c0_39 = arith.constant 0 : index
    %c0_40 = arith.constant 0 : index
    %16 = vector.load %arg3[%c0_39, %c0_40] : memref<1x32xf32, #tpu.memory_space<vmem>>, vector<1x32xf32>
    %17 = vector.broadcast %16 : vector<1x32xf32> to vector<512x32xf32>
    %18 = arith.addf %15, %17 : vector<512x32xf32>
    %cst_41 = arith.constant 0.000000e+00 : f32
    %19 = vector.broadcast %cst_41 : f32 to vector<512x32xf32>
    %20 = arith.maximumf %18, %19 : vector<512x32xf32>
    %21 = vector.extract_strided_slice %20 {offsets = [0, 0], sizes = [256, 16], strides = [1, 1]} : vector<512x32xf32> to vector<256x16xf32>
    %22 = vector.shape_cast %21 : vector<256x16xf32> to vector<1x16x16x16xf32>
    %c0_42 = arith.constant 0 : index
    %c1 = arith.constant 1 : index
    %c1_43 = arith.constant 1 : index
    %c0_44 = arith.constant 0 : index
    %23 = vector.load %arg19[%c0_42, %c1, %c1_43, %c0_44] : memref<2x18x18x16xf32, #tpu.memory_space<vmem>>, vector<1x16x16x16xf32>
    tpu.vector_store %arg19[%c0_42, %c1, %c1_43, %c0_44], %22 {strides = array<i32>} : memref<2x18x18x16xf32, #tpu.memory_space<vmem>>, vector<1x16x16x16xf32>,
    %24 = vector.extract_strided_slice %20 {offsets = [256, 16], sizes = [256, 16], strides = [1, 1]} : vector<512x32xf32> to vector<256x16xf32>
    %25 = vector.shape_cast %24 : vector<256x16xf32> to vector<1x16x16x16xf32>
    %c1_45 = arith.constant 1 : index
    %c1_46 = arith.constant 1 : index
    %c1_47 = arith.constant 1 : index
    %c0_48 = arith.constant 0 : index
    %26 = vector.load %arg19[%c1_45, %c1_46, %c1_47, %c0_48] : memref<2x18x18x16xf32, #tpu.memory_space<vmem>>, vector<1x16x16x16xf32>
    tpu.vector_store %arg19[%c1_45, %c1_46, %c1_47, %c0_48], %25 {strides = array<i32>} : memref<2x18x18x16xf32, #tpu.memory_space<vmem>>, vector<1x16x16x16xf32>,
    %cst_49 = arith.constant 0.000000e+00 : f32
    %27 = vector.broadcast %cst_49 : f32 to vector<512x64xf32>
    %c0_50 = arith.constant 0 : index
    %c0_51 = arith.constant 0 : index
    %c0_52 = arith.constant 0 : index
    %c0_53 = arith.constant 0 : index
    %28 = vector.load %arg19[%c0_50, %c0_51, %c0_52, %c0_53] : memref<2x18x18x16xf32, #tpu.memory_space<vmem>>, vector<2x16x16x16xf32>
    %29 = vector.shape_cast %28 : vector<2x16x16x16xf32> to vector<512x16xf32>
    %30 = arith.truncf %29 : vector<512x16xf32> to vector<512x16xbf16>
    %c0_54 = arith.constant 0 : index
    %c0_55 = arith.constant 0 : index
    %c0_56 = arith.constant 0 : index
    %31 = vector.load %arg4[%c0_54, %c0_55, %c0_56] : memref<9x16x64xbf16, #tpu.memory_space<vmem>>, vector<1x16x64xbf16>
    %32 = vector.shape_cast %31 : vector<1x16x64xbf16> to vector<16x64xbf16>
    %cst_57 = arith.constant dense<0.000000e+00> : vector<512x64xf32>
    %33 = tpu.matmul %30, %32, %cst_57 {dimension_numbers = #tpu.dot_dimension_numbers<[1], [0], [0], [1], [0, 0, 1, 1], [], []>} : vector<512x16xbf16>, vector<16x64xbf16>, vector<512x64xf32> -> vector<512x64xf32>
    %34 = arith.addf %27, %33 : vector<512x64xf32>
    %c0_58 = arith.constant 0 : index
    %c0_59 = arith.constant 0 : index
    %c1_60 = arith.constant 1 : index
    %c0_61 = arith.constant 0 : index
    %35 = vector.load %arg19[%c0_58, %c0_59, %c1_60, %c0_61] : memref<2x18x18x16xf32, #tpu.memory_space<vmem>>, vector<2x16x16x16xf32>
    %36 = vector.shape_cast %35 : vector<2x16x16x16xf32> to vector<512x16xf32>
    %37 = arith.truncf %36 : vector<512x16xf32> to vector<512x16xbf16>
    %c1_62 = arith.constant 1 : index
    %c0_63 = arith.constant 0 : index
    %c0_64 = arith.constant 0 : index
    %38 = vector.load %arg4[%c1_62, %c0_63, %c0_64] : memref<9x16x64xbf16, #tpu.memory_space<vmem>>, vector<1x16x64xbf16>
    %39 = vector.shape_cast %38 : vector<1x16x64xbf16> to vector<16x64xbf16>
    %cst_65 = arith.constant dense<0.000000e+00> : vector<512x64xf32>
    %40 = tpu.matmul %37, %39, %cst_65 {dimension_numbers = #tpu.dot_dimension_numbers<[1], [0], [0], [1], [0, 0, 1, 1], [], []>} : vector<512x16xbf16>, vector<16x64xbf16>, vector<512x64xf32> -> vector<512x64xf32>
    %41 = arith.addf %34, %40 : vector<512x64xf32>
    %c0_66 = arith.constant 0 : index
    %c0_67 = arith.constant 0 : index
    %c2 = arith.constant 2 : index
    %c0_68 = arith.constant 0 : index
    %42 = vector.load %arg19[%c0_66, %c0_67, %c2, %c0_68] : memref<2x18x18x16xf32, #tpu.memory_space<vmem>>, vector<2x16x16x16xf32>
    %43 = vector.shape_cast %42 : vector<2x16x16x16xf32> to vector<512x16xf32>
    %44 = arith.truncf %43 : vector<512x16xf32> to vector<512x16xbf16>
    %c2_69 = arith.constant 2 : index
    %c0_70 = arith.constant 0 : index
    %c0_71 = arith.constant 0 : index
    %45 = vector.load %arg4[%c2_69, %c0_70, %c0_71] : memref<9x16x64xbf16, #tpu.memory_space<vmem>>, vector<1x16x64xbf16>
    %46 = vector.shape_cast %45 : vector<1x16x64xbf16> to vector<16x64xbf16>
    %cst_72 = arith.constant dense<0.000000e+00> : vector<512x64xf32>
    %47 = tpu.matmul %44, %46, %cst_72 {dimension_numbers = #tpu.dot_dimension_numbers<[1], [0], [0], [1], [0, 0, 1, 1], [], []>} : vector<512x16xbf16>, vector<16x64xbf16>, vector<512x64xf32> -> vector<512x64xf32>
    %48 = arith.addf %41, %47 : vector<512x64xf32>
    %c0_73 = arith.constant 0 : index
    %c1_74 = arith.constant 1 : index
    %c0_75 = arith.constant 0 : index
    %c0_76 = arith.constant 0 : index
    %49 = vector.load %arg19[%c0_73, %c1_74, %c0_75, %c0_76] : memref<2x18x18x16xf32, #tpu.memory_space<vmem>>, vector<2x16x16x16xf32>
    %50 = vector.shape_cast %49 : vector<2x16x16x16xf32> to vector<512x16xf32>
    %51 = arith.truncf %50 : vector<512x16xf32> to vector<512x16xbf16>
    %c3 = arith.constant 3 : index
    %c0_77 = arith.constant 0 : index
    %c0_78 = arith.constant 0 : index
    %52 = vector.load %arg4[%c3, %c0_77, %c0_78] : memref<9x16x64xbf16, #tpu.memory_space<vmem>>, vector<1x16x64xbf16>
    %53 = vector.shape_cast %52 : vector<1x16x64xbf16> to vector<16x64xbf16>
    %cst_79 = arith.constant dense<0.000000e+00> : vector<512x64xf32>
    %54 = tpu.matmul %51, %53, %cst_79 {dimension_numbers = #tpu.dot_dimension_numbers<[1], [0], [0], [1], [0, 0, 1, 1], [], []>} : vector<512x16xbf16>, vector<16x64xbf16>, vector<512x64xf32> -> vector<512x64xf32>
    %55 = arith.addf %48, %54 : vector<512x64xf32>
    %c0_80 = arith.constant 0 : index
    %c1_81 = arith.constant 1 : index
    %c1_82 = arith.constant 1 : index
    %c0_83 = arith.constant 0 : index
    %56 = vector.load %arg19[%c0_80, %c1_81, %c1_82, %c0_83] : memref<2x18x18x16xf32, #tpu.memory_space<vmem>>, vector<2x16x16x16xf32>
    %57 = vector.shape_cast %56 : vector<2x16x16x16xf32> to vector<512x16xf32>
    %58 = arith.truncf %57 : vector<512x16xf32> to vector<512x16xbf16>
    %c4 = arith.constant 4 : index
    %c0_84 = arith.constant 0 : index
    %c0_85 = arith.constant 0 : index
    %59 = vector.load %arg4[%c4, %c0_84, %c0_85] : memref<9x16x64xbf16, #tpu.memory_space<vmem>>, vector<1x16x64xbf16>
    %60 = vector.shape_cast %59 : vector<1x16x64xbf16> to vector<16x64xbf16>
    %cst_86 = arith.constant dense<0.000000e+00> : vector<512x64xf32>
    %61 = tpu.matmul %58, %60, %cst_86 {dimension_numbers = #tpu.dot_dimension_numbers<[1], [0], [0], [1], [0, 0, 1, 1], [], []>} : vector<512x16xbf16>, vector<16x64xbf16>, vector<512x64xf32> -> vector<512x64xf32>
    %62 = arith.addf %55, %61 : vector<512x64xf32>
    %c0_87 = arith.constant 0 : index
    %c1_88 = arith.constant 1 : index
    %c2_89 = arith.constant 2 : index
    %c0_90 = arith.constant 0 : index
    %63 = vector.load %arg19[%c0_87, %c1_88, %c2_89, %c0_90] : memref<2x18x18x16xf32, #tpu.memory_space<vmem>>, vector<2x16x16x16xf32>
    %64 = vector.shape_cast %63 : vector<2x16x16x16xf32> to vector<512x16xf32>
    %65 = arith.truncf %64 : vector<512x16xf32> to vector<512x16xbf16>
    %c5 = arith.constant 5 : index
    %c0_91 = arith.constant 0 : index
    %c0_92 = arith.constant 0 : index
    %66 = vector.load %arg4[%c5, %c0_91, %c0_92] : memref<9x16x64xbf16, #tpu.memory_space<vmem>>, vector<1x16x64xbf16>
    %67 = vector.shape_cast %66 : vector<1x16x64xbf16> to vector<16x64xbf16>
    %cst_93 = arith.constant dense<0.000000e+00> : vector<512x64xf32>
    %68 = tpu.matmul %65, %67, %cst_93 {dimension_numbers = #tpu.dot_dimension_numbers<[1], [0], [0], [1], [0, 0, 1, 1], [], []>} : vector<512x16xbf16>, vector<16x64xbf16>, vector<512x64xf32> -> vector<512x64xf32>
    %69 = arith.addf %62, %68 : vector<512x64xf32>
    %c0_94 = arith.constant 0 : index
    %c2_95 = arith.constant 2 : index
    %c0_96 = arith.constant 0 : index
    %c0_97 = arith.constant 0 : index
    %70 = vector.load %arg19[%c0_94, %c2_95, %c0_96, %c0_97] : memref<2x18x18x16xf32, #tpu.memory_space<vmem>>, vector<2x16x16x16xf32>
    %71 = vector.shape_cast %70 : vector<2x16x16x16xf32> to vector<512x16xf32>
    %72 = arith.truncf %71 : vector<512x16xf32> to vector<512x16xbf16>
    %c6 = arith.constant 6 : index
    %c0_98 = arith.constant 0 : index
    %c0_99 = arith.constant 0 : index
    %73 = vector.load %arg4[%c6, %c0_98, %c0_99] : memref<9x16x64xbf16, #tpu.memory_space<vmem>>, vector<1x16x64xbf16>
    %74 = vector.shape_cast %73 : vector<1x16x64xbf16> to vector<16x64xbf16>
    %cst_100 = arith.constant dense<0.000000e+00> : vector<512x64xf32>
    %75 = tpu.matmul %72, %74, %cst_100 {dimension_numbers = #tpu.dot_dimension_numbers<[1], [0], [0], [1], [0, 0, 1, 1], [], []>} : vector<512x16xbf16>, vector<16x64xbf16>, vector<512x64xf32> -> vector<512x64xf32>
    %76 = arith.addf %69, %75 : vector<512x64xf32>
    %c0_101 = arith.constant 0 : index
    %c2_102 = arith.constant 2 : index
    %c1_103 = arith.constant 1 : index
    %c0_104 = arith.constant 0 : index
    %77 = vector.load %arg19[%c0_101, %c2_102, %c1_103, %c0_104] : memref<2x18x18x16xf32, #tpu.memory_space<vmem>>, vector<2x16x16x16xf32>
    %78 = vector.shape_cast %77 : vector<2x16x16x16xf32> to vector<512x16xf32>
    %79 = arith.truncf %78 : vector<512x16xf32> to vector<512x16xbf16>
    %c7 = arith.constant 7 : index
    %c0_105 = arith.constant 0 : index
    %c0_106 = arith.constant 0 : index
    %80 = vector.load %arg4[%c7, %c0_105, %c0_106] : memref<9x16x64xbf16, #tpu.memory_space<vmem>>, vector<1x16x64xbf16>
    %81 = vector.shape_cast %80 : vector<1x16x64xbf16> to vector<16x64xbf16>
    %cst_107 = arith.constant dense<0.000000e+00> : vector<512x64xf32>
    %82 = tpu.matmul %79, %81, %cst_107 {dimension_numbers = #tpu.dot_dimension_numbers<[1], [0], [0], [1], [0, 0, 1, 1], [], []>} : vector<512x16xbf16>, vector<16x64xbf16>, vector<512x64xf32> -> vector<512x64xf32>
    %83 = arith.addf %76, %82 : vector<512x64xf32>
    %c0_108 = arith.constant 0 : index
    %c2_109 = arith.constant 2 : index
    %c2_110 = arith.constant 2 : index
    %c0_111 = arith.constant 0 : index
    %84 = vector.load %arg19[%c0_108, %c2_109, %c2_110, %c0_111] : memref<2x18x18x16xf32, #tpu.memory_space<vmem>>, vector<2x16x16x16xf32>
    %85 = vector.shape_cast %84 : vector<2x16x16x16xf32> to vector<512x16xf32>
    %86 = arith.truncf %85 : vector<512x16xf32> to vector<512x16xbf16>
    %c8 = arith.constant 8 : index
    %c0_112 = arith.constant 0 : index
    %c0_113 = arith.constant 0 : index
    %87 = vector.load %arg4[%c8, %c0_112, %c0_113] : memref<9x16x64xbf16, #tpu.memory_space<vmem>>, vector<1x16x64xbf16>
    %88 = vector.shape_cast %87 : vector<1x16x64xbf16> to vector<16x64xbf16>
    %cst_114 = arith.constant dense<0.000000e+00> : vector<512x64xf32>
    %89 = tpu.matmul %86, %88, %cst_114 {dimension_numbers = #tpu.dot_dimension_numbers<[1], [0], [0], [1], [0, 0, 1, 1], [], []>} : vector<512x16xbf16>, vector<16x64xbf16>, vector<512x64xf32> -> vector<512x64xf32>
    %90 = arith.addf %83, %89 : vector<512x64xf32>
    %c0_115 = arith.constant 0 : index
    %c0_116 = arith.constant 0 : index
    %91 = vector.load %arg5[%c0_115, %c0_116] : memref<1x64xf32, #tpu.memory_space<vmem>>, vector<1x64xf32>
    %92 = vector.broadcast %91 : vector<1x64xf32> to vector<512x64xf32>
    %93 = arith.addf %90, %92 : vector<512x64xf32>
    %cst_117 = arith.constant 0.000000e+00 : f32
    %94 = vector.broadcast %cst_117 : f32 to vector<512x64xf32>
    %95 = arith.maximumf %93, %94 : vector<512x64xf32>
    %96 = vector.extract_strided_slice %95 {offsets = [0, 0], sizes = [256, 32], strides = [1, 1]} : vector<512x64xf32> to vector<256x32xf32>
    %97 = vector.extract_strided_slice %95 {offsets = [256, 32], sizes = [256, 32], strides = [1, 1]} : vector<512x64xf32> to vector<256x32xf32>
    %c0_118 = arith.constant 0 : index
    %c0_119 = arith.constant 0 : index
    %98 = vector.load %arg16[%c0_118, %c0_119] : memref<1x256xf32, #tpu.memory_space<vmem>>, vector<1x256xf32>
    %cst_120 = arith.constant dense<0.000000e+00> : vector<1x32xf32>
    %99 = tpu.matmul %98, %97, %cst_120 {dimension_numbers = #tpu.dot_dimension_numbers<[1], [0], [0], [1], [0, 0, 1, 1], [], []>} : vector<1x256xf32>, vector<256x32xf32>, vector<1x32xf32> -> vector<1x32xf32>
    %100 = arith.truncf %99 : vector<1x32xf32> to vector<1x32xbf16>
    %c0_121 = arith.constant 0 : index
    %c0_122 = arith.constant 0 : index
    %101 = vector.load %arg6[%c0_121, %c0_122] : memref<32x32xbf16, #tpu.memory_space<vmem>>, vector<32x32xbf16>
    %cst_123 = arith.constant dense<0.000000e+00> : vector<1x32xf32>
    %102 = tpu.matmul %100, %101, %cst_123 {dimension_numbers = #tpu.dot_dimension_numbers<[1], [0], [0], [1], [0, 0, 1, 1], [], []>} : vector<1x32xbf16>, vector<32x32xbf16>, vector<1x32xf32> -> vector<1x32xf32>
    %c0_124 = arith.constant 0 : index
    %c0_125 = arith.constant 0 : index
    %103 = vector.load %arg7[%c0_124, %c0_125] : memref<1x32xf32, #tpu.memory_space<vmem>>, vector<1x32xf32>
    %104 = arith.addf %102, %103 : vector<1x32xf32>
    %c0_126 = arith.constant 0 : index
    %c0_127 = arith.constant 0 : index
    %105 = vector.load %arg8[%c0_126, %c0_127] : memref<32x32xbf16, #tpu.memory_space<vmem>>, vector<32x32xbf16>
    %cst_128 = arith.constant dense<0.000000e+00> : vector<1x32xf32>
    %106 = tpu.matmul %100, %105, %cst_128 {dimension_numbers = #tpu.dot_dimension_numbers<[1], [0], [0], [1], [0, 0, 1, 1], [], []>} : vector<1x32xbf16>, vector<32x32xbf16>, vector<1x32xf32> -> vector<1x32xf32>
    %c0_129 = arith.constant 0 : index
    %c0_130 = arith.constant 0 : index
    %107 = vector.load %arg9[%c0_129, %c0_130] : memref<1x32xf32, #tpu.memory_space<vmem>>, vector<1x32xf32>
    %108 = arith.addf %106, %107 : vector<1x32xf32>
    %c0_131 = arith.constant 0 : index
    %c0_132 = arith.constant 0 : index
    %109 = vector.load %arg14[%c0_131, %c0_132] : memref<64x256xf32, #tpu.memory_space<vmem>>, vector<64x256xf32>
    %cst_133 = arith.constant dense<0.000000e+00> : vector<64x32xf32>
    %110 = tpu.matmul %109, %96, %cst_133 {dimension_numbers = #tpu.dot_dimension_numbers<[1], [0], [0], [1], [0, 0, 1, 1], [], []>} : vector<64x256xf32>, vector<256x32xf32>, vector<64x32xf32> -> vector<64x32xf32>
    %c0_134 = arith.constant 0 : index
    %c0_135 = arith.constant 0 : index
    %111 = vector.load %arg17[%c0_134, %c0_135] : memref<1x64xf32, #tpu.memory_space<vmem>>, vector<1x64xf32>
    %cst_136 = arith.constant dense<0.000000e+00> : vector<1x32xf32>
    %112 = tpu.matmul %111, %110, %cst_136 {dimension_numbers = #tpu.dot_dimension_numbers<[1], [0], [0], [1], [0, 0, 1, 1], [], []>} : vector<1x64xf32>, vector<64x32xf32>, vector<1x32xf32> -> vector<1x32xf32>
    %113 = vector.shape_cast %112 : vector<1x32xf32> to vector<1x1x32xf32>
    %114 = vector.shape_cast %113 : vector<1x1x32xf32> to vector<1x1x32xf32>
    %115 = vector.broadcast %114 : vector<1x1x32xf32> to vector<1x64x32xf32>
    %116 = vector.shape_cast %115 : vector<1x64x32xf32> to vector<64x32xf32>
    %117 = arith.subf %110, %116 : vector<64x32xf32>
    %c0_137 = arith.constant 0 : index
    %c0_138 = arith.constant 0 : index
    %118 = vector.load %arg17[%c0_137, %c0_138] : memref<1x64xf32, #tpu.memory_space<vmem>>, vector<1x64xf32>
    %119 = arith.mulf %117, %117 : vector<64x32xf32>
    %cst_139 = arith.constant dense<0.000000e+00> : vector<1x32xf32>
    %120 = tpu.matmul %118, %119, %cst_139 {dimension_numbers = #tpu.dot_dimension_numbers<[1], [0], [0], [1], [0, 0, 1, 1], [], []>} : vector<1x64xf32>, vector<64x32xf32>, vector<1x32xf32> -> vector<1x32xf32>
    %cst_140 = arith.constant 9.99999974E-6 : f32
    %121 = vector.broadcast %cst_140 : f32 to vector<1x32xf32>
    %122 = arith.addf %120, %121 : vector<1x32xf32>
    %123 = math.rsqrt %122 : vector<1x32xf32>
    %cst_141 = arith.constant 1.000000e+00 : f32
    %124 = vector.broadcast %cst_141 : f32 to vector<1x32xf32>
    %125 = arith.addf %124, %104 : vector<1x32xf32>
    %126 = arith.mulf %123, %125 : vector<1x32xf32>
    %127 = vector.shape_cast %126 : vector<1x32xf32> to vector<1x1x32xf32>
    %128 = vector.shape_cast %127 : vector<1x1x32xf32> to vector<1x1x32xf32>
    %129 = vector.broadcast %128 : vector<1x1x32xf32> to vector<1x64x32xf32>
    %130 = vector.shape_cast %129 : vector<1x64x32xf32> to vector<64x32xf32>
    %131 = arith.mulf %117, %130 : vector<64x32xf32>
    %132 = vector.shape_cast %108 : vector<1x32xf32> to vector<1x1x32xf32>
    %133 = vector.shape_cast %132 : vector<1x1x32xf32> to vector<1x1x32xf32>
    %134 = vector.broadcast %133 : vector<1x1x32xf32> to vector<1x64x32xf32>
    %135 = vector.shape_cast %134 : vector<1x64x32xf32> to vector<64x32xf32>
    %136 = arith.addf %131, %135 : vector<64x32xf32>
    %c0_142 = arith.constant 0 : index
    %c0_143 = arith.constant 0 : index
    %137 = vector.load %arg15[%c0_142, %c0_143] : memref<256x64xf32, #tpu.memory_space<vmem>>, vector<256x64xf32>
    %cst_144 = arith.constant dense<0.000000e+00> : vector<256x32xf32>
    %138 = tpu.matmul %137, %136, %cst_144 {dimension_numbers = #tpu.dot_dimension_numbers<[1], [0], [0], [1], [0, 0, 1, 1], [], []>} : vector<256x64xf32>, vector<64x32xf32>, vector<256x32xf32> -> vector<256x32xf32>
    %139 = vector.shape_cast %138 : vector<256x32xf32> to vector<1x16x16x32xf32>
    %c0_145 = arith.constant 0 : index
    %c1_146 = arith.constant 1 : index
    %c1_147 = arith.constant 1 : index
    %c0_148 = arith.constant 0 : index
    %140 = vector.load %arg20[%c0_145, %c1_146, %c1_147, %c0_148] : memref<1x18x18x32xf32, #tpu.memory_space<vmem>>, vector<1x16x16x32xf32>
    tpu.vector_store %arg20[%c0_145, %c1_146, %c1_147, %c0_148], %139 {strides = array<i32>} : memref<1x18x18x32xf32, #tpu.memory_space<vmem>>, vector<1x16x16x32xf32>,
    %cst_149 = arith.constant 0.000000e+00 : f32
    %141 = vector.broadcast %cst_149 : f32 to vector<256x16xf32>
    %c0_150 = arith.constant 0 : index
    %c0_151 = arith.constant 0 : index
    %c0_152 = arith.constant 0 : index
    %c0_153 = arith.constant 0 : index
    %142 = vector.load %arg20[%c0_150, %c0_151, %c0_152, %c0_153] : memref<1x18x18x32xf32, #tpu.memory_space<vmem>>, vector<1x16x16x32xf32>
    %143 = vector.shape_cast %142 : vector<1x16x16x32xf32> to vector<256x32xf32>
    %144 = arith.truncf %143 : vector<256x32xf32> to vector<256x32xbf16>
    %c0_154 = arith.constant 0 : index
    %c0_155 = arith.constant 0 : index
    %c0_156 = arith.constant 0 : index
    %145 = vector.load %arg10[%c0_154, %c0_155, %c0_156] : memref<9x32x16xbf16, #tpu.memory_space<vmem>>, vector<1x32x16xbf16>
    %146 = vector.shape_cast %145 : vector<1x32x16xbf16> to vector<32x16xbf16>
    %cst_157 = arith.constant dense<0.000000e+00> : vector<256x16xf32>
    %147 = tpu.matmul %144, %146, %cst_157 {dimension_numbers = #tpu.dot_dimension_numbers<[1], [0], [0], [1], [0, 0, 1, 1], [], []>} : vector<256x32xbf16>, vector<32x16xbf16>, vector<256x16xf32> -> vector<256x16xf32>
    %148 = arith.addf %141, %147 : vector<256x16xf32>
    %c0_158 = arith.constant 0 : index
    %c0_159 = arith.constant 0 : index
    %c1_160 = arith.constant 1 : index
    %c0_161 = arith.constant 0 : index
    %149 = vector.load %arg20[%c0_158, %c0_159, %c1_160, %c0_161] : memref<1x18x18x32xf32, #tpu.memory_space<vmem>>, vector<1x16x16x32xf32>
    %150 = vector.shape_cast %149 : vector<1x16x16x32xf32> to vector<256x32xf32>
    %151 = arith.truncf %150 : vector<256x32xf32> to vector<256x32xbf16>
    %c1_162 = arith.constant 1 : index
    %c0_163 = arith.constant 0 : index
    %c0_164 = arith.constant 0 : index
    %152 = vector.load %arg10[%c1_162, %c0_163, %c0_164] : memref<9x32x16xbf16, #tpu.memory_space<vmem>>, vector<1x32x16xbf16>
    %153 = vector.shape_cast %152 : vector<1x32x16xbf16> to vector<32x16xbf16>
    %cst_165 = arith.constant dense<0.000000e+00> : vector<256x16xf32>
    %154 = tpu.matmul %151, %153, %cst_165 {dimension_numbers = #tpu.dot_dimension_numbers<[1], [0], [0], [1], [0, 0, 1, 1], [], []>} : vector<256x32xbf16>, vector<32x16xbf16>, vector<256x16xf32> -> vector<256x16xf32>
    %155 = arith.addf %148, %154 : vector<256x16xf32>
    %c0_166 = arith.constant 0 : index
    %c0_167 = arith.constant 0 : index
    %c2_168 = arith.constant 2 : index
    %c0_169 = arith.constant 0 : index
    %156 = vector.load %arg20[%c0_166, %c0_167, %c2_168, %c0_169] : memref<1x18x18x32xf32, #tpu.memory_space<vmem>>, vector<1x16x16x32xf32>
    %157 = vector.shape_cast %156 : vector<1x16x16x32xf32> to vector<256x32xf32>
    %158 = arith.truncf %157 : vector<256x32xf32> to vector<256x32xbf16>
    %c2_170 = arith.constant 2 : index
    %c0_171 = arith.constant 0 : index
    %c0_172 = arith.constant 0 : index
    %159 = vector.load %arg10[%c2_170, %c0_171, %c0_172] : memref<9x32x16xbf16, #tpu.memory_space<vmem>>, vector<1x32x16xbf16>
    %160 = vector.shape_cast %159 : vector<1x32x16xbf16> to vector<32x16xbf16>
    %cst_173 = arith.constant dense<0.000000e+00> : vector<256x16xf32>
    %161 = tpu.matmul %158, %160, %cst_173 {dimension_numbers = #tpu.dot_dimension_numbers<[1], [0], [0], [1], [0, 0, 1, 1], [], []>} : vector<256x32xbf16>, vector<32x16xbf16>, vector<256x16xf32> -> vector<256x16xf32>
    %162 = arith.addf %155, %161 : vector<256x16xf32>
    %c0_174 = arith.constant 0 : index
    %c1_175 = arith.constant 1 : index
    %c0_176 = arith.constant 0 : index
    %c0_177 = arith.constant 0 : index
    %163 = vector.load %arg20[%c0_174, %c1_175, %c0_176, %c0_177] : memref<1x18x18x32xf32, #tpu.memory_space<vmem>>, vector<1x16x16x32xf32>
    %164 = vector.shape_cast %163 : vector<1x16x16x32xf32> to vector<256x32xf32>
    %165 = arith.truncf %164 : vector<256x32xf32> to vector<256x32xbf16>
    %c3_178 = arith.constant 3 : index
    %c0_179 = arith.constant 0 : index
    %c0_180 = arith.constant 0 : index
    %166 = vector.load %arg10[%c3_178, %c0_179, %c0_180] : memref<9x32x16xbf16, #tpu.memory_space<vmem>>, vector<1x32x16xbf16>
    %167 = vector.shape_cast %166 : vector<1x32x16xbf16> to vector<32x16xbf16>
    %cst_181 = arith.constant dense<0.000000e+00> : vector<256x16xf32>
    %168 = tpu.matmul %165, %167, %cst_181 {dimension_numbers = #tpu.dot_dimension_numbers<[1], [0], [0], [1], [0, 0, 1, 1], [], []>} : vector<256x32xbf16>, vector<32x16xbf16>, vector<256x16xf32> -> vector<256x16xf32>
    %169 = arith.addf %162, %168 : vector<256x16xf32>
    %c0_182 = arith.constant 0 : index
    %c1_183 = arith.constant 1 : index
    %c1_184 = arith.constant 1 : index
    %c0_185 = arith.constant 0 : index
    %170 = vector.load %arg20[%c0_182, %c1_183, %c1_184, %c0_185] : memref<1x18x18x32xf32, #tpu.memory_space<vmem>>, vector<1x16x16x32xf32>
    %171 = vector.shape_cast %170 : vector<1x16x16x32xf32> to vector<256x32xf32>
    %172 = arith.truncf %171 : vector<256x32xf32> to vector<256x32xbf16>
    %c4_186 = arith.constant 4 : index
    %c0_187 = arith.constant 0 : index
    %c0_188 = arith.constant 0 : index
    %173 = vector.load %arg10[%c4_186, %c0_187, %c0_188] : memref<9x32x16xbf16, #tpu.memory_space<vmem>>, vector<1x32x16xbf16>
    %174 = vector.shape_cast %173 : vector<1x32x16xbf16> to vector<32x16xbf16>
    %cst_189 = arith.constant dense<0.000000e+00> : vector<256x16xf32>
    %175 = tpu.matmul %172, %174, %cst_189 {dimension_numbers = #tpu.dot_dimension_numbers<[1], [0], [0], [1], [0, 0, 1, 1], [], []>} : vector<256x32xbf16>, vector<32x16xbf16>, vector<256x16xf32> -> vector<256x16xf32>
    %176 = arith.addf %169, %175 : vector<256x16xf32>
    %c0_190 = arith.constant 0 : index
    %c1_191 = arith.constant 1 : index
    %c2_192 = arith.constant 2 : index
    %c0_193 = arith.constant 0 : index
    %177 = vector.load %arg20[%c0_190, %c1_191, %c2_192, %c0_193] : memref<1x18x18x32xf32, #tpu.memory_space<vmem>>, vector<1x16x16x32xf32>
    %178 = vector.shape_cast %177 : vector<1x16x16x32xf32> to vector<256x32xf32>
    %179 = arith.truncf %178 : vector<256x32xf32> to vector<256x32xbf16>
    %c5_194 = arith.constant 5 : index
    %c0_195 = arith.constant 0 : index
    %c0_196 = arith.constant 0 : index
    %180 = vector.load %arg10[%c5_194, %c0_195, %c0_196] : memref<9x32x16xbf16, #tpu.memory_space<vmem>>, vector<1x32x16xbf16>
    %181 = vector.shape_cast %180 : vector<1x32x16xbf16> to vector<32x16xbf16>
    %cst_197 = arith.constant dense<0.000000e+00> : vector<256x16xf32>
    %182 = tpu.matmul %179, %181, %cst_197 {dimension_numbers = #tpu.dot_dimension_numbers<[1], [0], [0], [1], [0, 0, 1, 1], [], []>} : vector<256x32xbf16>, vector<32x16xbf16>, vector<256x16xf32> -> vector<256x16xf32>
    %183 = arith.addf %176, %182 : vector<256x16xf32>
    %c0_198 = arith.constant 0 : index
    %c2_199 = arith.constant 2 : index
    %c0_200 = arith.constant 0 : index
    %c0_201 = arith.constant 0 : index
    %184 = vector.load %arg20[%c0_198, %c2_199, %c0_200, %c0_201] : memref<1x18x18x32xf32, #tpu.memory_space<vmem>>, vector<1x16x16x32xf32>
    %185 = vector.shape_cast %184 : vector<1x16x16x32xf32> to vector<256x32xf32>
    %186 = arith.truncf %185 : vector<256x32xf32> to vector<256x32xbf16>
    %c6_202 = arith.constant 6 : index
    %c0_203 = arith.constant 0 : index
    %c0_204 = arith.constant 0 : index
    %187 = vector.load %arg10[%c6_202, %c0_203, %c0_204] : memref<9x32x16xbf16, #tpu.memory_space<vmem>>, vector<1x32x16xbf16>
    %188 = vector.shape_cast %187 : vector<1x32x16xbf16> to vector<32x16xbf16>
    %cst_205 = arith.constant dense<0.000000e+00> : vector<256x16xf32>
    %189 = tpu.matmul %186, %188, %cst_205 {dimension_numbers = #tpu.dot_dimension_numbers<[1], [0], [0], [1], [0, 0, 1, 1], [], []>} : vector<256x32xbf16>, vector<32x16xbf16>, vector<256x16xf32> -> vector<256x16xf32>
    %190 = arith.addf %183, %189 : vector<256x16xf32>
    %c0_206 = arith.constant 0 : index
    %c2_207 = arith.constant 2 : index
    %c1_208 = arith.constant 1 : index
    %c0_209 = arith.constant 0 : index
    %191 = vector.load %arg20[%c0_206, %c2_207, %c1_208, %c0_209] : memref<1x18x18x32xf32, #tpu.memory_space<vmem>>, vector<1x16x16x32xf32>
    %192 = vector.shape_cast %191 : vector<1x16x16x32xf32> to vector<256x32xf32>
    %193 = arith.truncf %192 : vector<256x32xf32> to vector<256x32xbf16>
    %c7_210 = arith.constant 7 : index
    %c0_211 = arith.constant 0 : index
    %c0_212 = arith.constant 0 : index
    %194 = vector.load %arg10[%c7_210, %c0_211, %c0_212] : memref<9x32x16xbf16, #tpu.memory_space<vmem>>, vector<1x32x16xbf16>
    %195 = vector.shape_cast %194 : vector<1x32x16xbf16> to vector<32x16xbf16>
    %cst_213 = arith.constant dense<0.000000e+00> : vector<256x16xf32>
    %196 = tpu.matmul %193, %195, %cst_213 {dimension_numbers = #tpu.dot_dimension_numbers<[1], [0], [0], [1], [0, 0, 1, 1], [], []>} : vector<256x32xbf16>, vector<32x16xbf16>, vector<256x16xf32> -> vector<256x16xf32>
    %197 = arith.addf %190, %196 : vector<256x16xf32>
    %c0_214 = arith.constant 0 : index
    %c2_215 = arith.constant 2 : index
    %c2_216 = arith.constant 2 : index
    %c0_217 = arith.constant 0 : index
    %198 = vector.load %arg20[%c0_214, %c2_215, %c2_216, %c0_217] : memref<1x18x18x32xf32, #tpu.memory_space<vmem>>, vector<1x16x16x32xf32>
    %199 = vector.shape_cast %198 : vector<1x16x16x32xf32> to vector<256x32xf32>
    %200 = arith.truncf %199 : vector<256x32xf32> to vector<256x32xbf16>
    %c8_218 = arith.constant 8 : index
    %c0_219 = arith.constant 0 : index
    %c0_220 = arith.constant 0 : index
    %201 = vector.load %arg10[%c8_218, %c0_219, %c0_220] : memref<9x32x16xbf16, #tpu.memory_space<vmem>>, vector<1x32x16xbf16>
    %202 = vector.shape_cast %201 : vector<1x32x16xbf16> to vector<32x16xbf16>
    %cst_221 = arith.constant dense<0.000000e+00> : vector<256x16xf32>
    %203 = tpu.matmul %200, %202, %cst_221 {dimension_numbers = #tpu.dot_dimension_numbers<[1], [0], [0], [1], [0, 0, 1, 1], [], []>} : vector<256x32xbf16>, vector<32x16xbf16>, vector<256x16xf32> -> vector<256x16xf32>
    %204 = arith.addf %197, %203 : vector<256x16xf32>
    %c0_222 = arith.constant 0 : index
    %c0_223 = arith.constant 0 : index
    %205 = vector.load %arg11[%c0_222, %c0_223] : memref<1x16xf32, #tpu.memory_space<vmem>>, vector<1x16xf32>
    %206 = vector.broadcast %205 : vector<1x16xf32> to vector<256x16xf32>
    %207 = arith.addf %204, %206 : vector<256x16xf32>
    %cst_224 = arith.constant 0.000000e+00 : f32
    %208 = vector.broadcast %cst_224 : f32 to vector<256x16xf32>
    %209 = arith.maximumf %207, %208 : vector<256x16xf32>
    %210 = vector.shape_cast %209 : vector<256x16xf32> to vector<1x16x16x16xf32>
    %c0_225 = arith.constant 0 : index
    %c1_226 = arith.constant 1 : index
    %c1_227 = arith.constant 1 : index
    %c0_228 = arith.constant 0 : index
    %211 = vector.load %arg19[%c0_225, %c1_226, %c1_227, %c0_228] : memref<2x18x18x16xf32, #tpu.memory_space<vmem>>, vector<1x16x16x16xf32>
    tpu.vector_store %arg19[%c0_225, %c1_226, %c1_227, %c0_228], %210 {strides = array<i32>} : memref<2x18x18x16xf32, #tpu.memory_space<vmem>>, vector<1x16x16x16xf32>,
    %cst_229 = arith.constant 0.000000e+00 : f32
    %212 = vector.broadcast %cst_229 : f32 to vector<3x256xf32>
    %c0_230 = arith.constant 0 : index
    %c0_231 = arith.constant 0 : index
    %c0_232 = arith.constant 0 : index
    %c0_233 = arith.constant 0 : index
    %213 = vector.load %arg19[%c0_230, %c0_231, %c0_232, %c0_233] : memref<2x18x18x16xf32, #tpu.memory_space<vmem>>, vector<1x16x16x16xf32>
    %214 = vector.shape_cast %213 : vector<1x16x16x16xf32> to vector<256x16xf32>
    %215 = arith.truncf %214 : vector<256x16xf32> to vector<256x16xbf16>
    %c0_234 = arith.constant 0 : index
    %c0_235 = arith.constant 0 : index
    %c0_236 = arith.constant 0 : index
    %216 = vector.load %arg12[%c0_234, %c0_235, %c0_236] : memref<9x3x16xbf16, #tpu.memory_space<vmem>>, vector<1x3x16xbf16>
    %217 = vector.shape_cast %216 : vector<1x3x16xbf16> to vector<3x16xbf16>
    %cst_237 = arith.constant dense<0.000000e+00> : vector<3x256xf32>
    %218 = tpu.matmul %217, %215, %cst_237 {dimension_numbers = #tpu.dot_dimension_numbers<[1], [1], [0], [0], [0, 0, 1, 0], [], []>} : vector<3x16xbf16>, vector<256x16xbf16>, vector<3x256xf32> -> vector<3x256xf32>
    %219 = arith.addf %212, %218 : vector<3x256xf32>
    %c0_238 = arith.constant 0 : index
    %c0_239 = arith.constant 0 : index
    %c1_240 = arith.constant 1 : index
    %c0_241 = arith.constant 0 : index
    %220 = vector.load %arg19[%c0_238, %c0_239, %c1_240, %c0_241] : memref<2x18x18x16xf32, #tpu.memory_space<vmem>>, vector<1x16x16x16xf32>
    %221 = vector.shape_cast %220 : vector<1x16x16x16xf32> to vector<256x16xf32>
    %222 = arith.truncf %221 : vector<256x16xf32> to vector<256x16xbf16>
    %c1_242 = arith.constant 1 : index
    %c0_243 = arith.constant 0 : index
    %c0_244 = arith.constant 0 : index
    %223 = vector.load %arg12[%c1_242, %c0_243, %c0_244] : memref<9x3x16xbf16, #tpu.memory_space<vmem>>, vector<1x3x16xbf16>
    %224 = vector.shape_cast %223 : vector<1x3x16xbf16> to vector<3x16xbf16>
    %cst_245 = arith.constant dense<0.000000e+00> : vector<3x256xf32>
    %225 = tpu.matmul %224, %222, %cst_245 {dimension_numbers = #tpu.dot_dimension_numbers<[1], [1], [0], [0], [0, 0, 1, 0], [], []>} : vector<3x16xbf16>, vector<256x16xbf16>, vector<3x256xf32> -> vector<3x256xf32>
    %226 = arith.addf %219, %225 : vector<3x256xf32>
    %c0_246 = arith.constant 0 : index
    %c0_247 = arith.constant 0 : index
    %c2_248 = arith.constant 2 : index
    %c0_249 = arith.constant 0 : index
    %227 = vector.load %arg19[%c0_246, %c0_247, %c2_248, %c0_249] : memref<2x18x18x16xf32, #tpu.memory_space<vmem>>, vector<1x16x16x16xf32>
    %228 = vector.shape_cast %227 : vector<1x16x16x16xf32> to vector<256x16xf32>
    %229 = arith.truncf %228 : vector<256x16xf32> to vector<256x16xbf16>
    %c2_250 = arith.constant 2 : index
    %c0_251 = arith.constant 0 : index
    %c0_252 = arith.constant 0 : index
    %230 = vector.load %arg12[%c2_250, %c0_251, %c0_252] : memref<9x3x16xbf16, #tpu.memory_space<vmem>>, vector<1x3x16xbf16>
    %231 = vector.shape_cast %230 : vector<1x3x16xbf16> to vector<3x16xbf16>
    %cst_253 = arith.constant dense<0.000000e+00> : vector<3x256xf32>
    %232 = tpu.matmul %231, %229, %cst_253 {dimension_numbers = #tpu.dot_dimension_numbers<[1], [1], [0], [0], [0, 0, 1, 0], [], []>} : vector<3x16xbf16>, vector<256x16xbf16>, vector<3x256xf32> -> vector<3x256xf32>
    %233 = arith.addf %226, %232 : vector<3x256xf32>
    %c0_254 = arith.constant 0 : index
    %c1_255 = arith.constant 1 : index
    %c0_256 = arith.constant 0 : index
    %c0_257 = arith.constant 0 : index
    %234 = vector.load %arg19[%c0_254, %c1_255, %c0_256, %c0_257] : memref<2x18x18x16xf32, #tpu.memory_space<vmem>>, vector<1x16x16x16xf32>
    %235 = vector.shape_cast %234 : vector<1x16x16x16xf32> to vector<256x16xf32>
    %236 = arith.truncf %235 : vector<256x16xf32> to vector<256x16xbf16>
    %c3_258 = arith.constant 3 : index
    %c0_259 = arith.constant 0 : index
    %c0_260 = arith.constant 0 : index
    %237 = vector.load %arg12[%c3_258, %c0_259, %c0_260] : memref<9x3x16xbf16, #tpu.memory_space<vmem>>, vector<1x3x16xbf16>
    %238 = vector.shape_cast %237 : vector<1x3x16xbf16> to vector<3x16xbf16>
    %cst_261 = arith.constant dense<0.000000e+00> : vector<3x256xf32>
    %239 = tpu.matmul %238, %236, %cst_261 {dimension_numbers = #tpu.dot_dimension_numbers<[1], [1], [0], [0], [0, 0, 1, 0], [], []>} : vector<3x16xbf16>, vector<256x16xbf16>, vector<3x256xf32> -> vector<3x256xf32>
    %240 = arith.addf %233, %239 : vector<3x256xf32>
    %c0_262 = arith.constant 0 : index
    %c1_263 = arith.constant 1 : index
    %c1_264 = arith.constant 1 : index
    %c0_265 = arith.constant 0 : index
    %241 = vector.load %arg19[%c0_262, %c1_263, %c1_264, %c0_265] : memref<2x18x18x16xf32, #tpu.memory_space<vmem>>, vector<1x16x16x16xf32>
    %242 = vector.shape_cast %241 : vector<1x16x16x16xf32> to vector<256x16xf32>
    %243 = arith.truncf %242 : vector<256x16xf32> to vector<256x16xbf16>
    %c4_266 = arith.constant 4 : index
    %c0_267 = arith.constant 0 : index
    %c0_268 = arith.constant 0 : index
    %244 = vector.load %arg12[%c4_266, %c0_267, %c0_268] : memref<9x3x16xbf16, #tpu.memory_space<vmem>>, vector<1x3x16xbf16>
    %245 = vector.shape_cast %244 : vector<1x3x16xbf16> to vector<3x16xbf16>
    %cst_269 = arith.constant dense<0.000000e+00> : vector<3x256xf32>
    %246 = tpu.matmul %245, %243, %cst_269 {dimension_numbers = #tpu.dot_dimension_numbers<[1], [1], [0], [0], [0, 0, 1, 0], [], []>} : vector<3x16xbf16>, vector<256x16xbf16>, vector<3x256xf32> -> vector<3x256xf32>
    %247 = arith.addf %240, %246 : vector<3x256xf32>
    %c0_270 = arith.constant 0 : index
    %c1_271 = arith.constant 1 : index
    %c2_272 = arith.constant 2 : index
    %c0_273 = arith.constant 0 : index
    %248 = vector.load %arg19[%c0_270, %c1_271, %c2_272, %c0_273] : memref<2x18x18x16xf32, #tpu.memory_space<vmem>>, vector<1x16x16x16xf32>
    %249 = vector.shape_cast %248 : vector<1x16x16x16xf32> to vector<256x16xf32>
    %250 = arith.truncf %249 : vector<256x16xf32> to vector<256x16xbf16>
    %c5_274 = arith.constant 5 : index
    %c0_275 = arith.constant 0 : index
    %c0_276 = arith.constant 0 : index
    %251 = vector.load %arg12[%c5_274, %c0_275, %c0_276] : memref<9x3x16xbf16, #tpu.memory_space<vmem>>, vector<1x3x16xbf16>
    %252 = vector.shape_cast %251 : vector<1x3x16xbf16> to vector<3x16xbf16>
    %cst_277 = arith.constant dense<0.000000e+00> : vector<3x256xf32>
    %253 = tpu.matmul %252, %250, %cst_277 {dimension_numbers = #tpu.dot_dimension_numbers<[1], [1], [0], [0], [0, 0, 1, 0], [], []>} : vector<3x16xbf16>, vector<256x16xbf16>, vector<3x256xf32> -> vector<3x256xf32>
    %254 = arith.addf %247, %253 : vector<3x256xf32>
    %c0_278 = arith.constant 0 : index
    %c2_279 = arith.constant 2 : index
    %c0_280 = arith.constant 0 : index
    %c0_281 = arith.constant 0 : index
    %255 = vector.load %arg19[%c0_278, %c2_279, %c0_280, %c0_281] : memref<2x18x18x16xf32, #tpu.memory_space<vmem>>, vector<1x16x16x16xf32>
    %256 = vector.shape_cast %255 : vector<1x16x16x16xf32> to vector<256x16xf32>
    %257 = arith.truncf %256 : vector<256x16xf32> to vector<256x16xbf16>
    %c6_282 = arith.constant 6 : index
    %c0_283 = arith.constant 0 : index
    %c0_284 = arith.constant 0 : index
    %258 = vector.load %arg12[%c6_282, %c0_283, %c0_284] : memref<9x3x16xbf16, #tpu.memory_space<vmem>>, vector<1x3x16xbf16>
    %259 = vector.shape_cast %258 : vector<1x3x16xbf16> to vector<3x16xbf16>
    %cst_285 = arith.constant dense<0.000000e+00> : vector<3x256xf32>
    %260 = tpu.matmul %259, %257, %cst_285 {dimension_numbers = #tpu.dot_dimension_numbers<[1], [1], [0], [0], [0, 0, 1, 0], [], []>} : vector<3x16xbf16>, vector<256x16xbf16>, vector<3x256xf32> -> vector<3x256xf32>
    %261 = arith.addf %254, %260 : vector<3x256xf32>
    %c0_286 = arith.constant 0 : index
    %c2_287 = arith.constant 2 : index
    %c1_288 = arith.constant 1 : index
    %c0_289 = arith.constant 0 : index
    %262 = vector.load %arg19[%c0_286, %c2_287, %c1_288, %c0_289] : memref<2x18x18x16xf32, #tpu.memory_space<vmem>>, vector<1x16x16x16xf32>
    %263 = vector.shape_cast %262 : vector<1x16x16x16xf32> to vector<256x16xf32>
    %264 = arith.truncf %263 : vector<256x16xf32> to vector<256x16xbf16>
    %c7_290 = arith.constant 7 : index
    %c0_291 = arith.constant 0 : index
    %c0_292 = arith.constant 0 : index
    %265 = vector.load %arg12[%c7_290, %c0_291, %c0_292] : memref<9x3x16xbf16, #tpu.memory_space<vmem>>, vector<1x3x16xbf16>
    %266 = vector.shape_cast %265 : vector<1x3x16xbf16> to vector<3x16xbf16>
    %cst_293 = arith.constant dense<0.000000e+00> : vector<3x256xf32>
    %267 = tpu.matmul %266, %264, %cst_293 {dimension_numbers = #tpu.dot_dimension_numbers<[1], [1], [0], [0], [0, 0, 1, 0], [], []>} : vector<3x16xbf16>, vector<256x16xbf16>, vector<3x256xf32> -> vector<3x256xf32>
    %268 = arith.addf %261, %267 : vector<3x256xf32>
    %c0_294 = arith.constant 0 : index
    %c2_295 = arith.constant 2 : index
    %c2_296 = arith.constant 2 : index
    %c0_297 = arith.constant 0 : index
    %269 = vector.load %arg19[%c0_294, %c2_295, %c2_296, %c0_297] : memref<2x18x18x16xf32, #tpu.memory_space<vmem>>, vector<1x16x16x16xf32>
    %270 = vector.shape_cast %269 : vector<1x16x16x16xf32> to vector<256x16xf32>
    %271 = arith.truncf %270 : vector<256x16xf32> to vector<256x16xbf16>
    %c8_298 = arith.constant 8 : index
    %c0_299 = arith.constant 0 : index
    %c0_300 = arith.constant 0 : index
    %272 = vector.load %arg12[%c8_298, %c0_299, %c0_300] : memref<9x3x16xbf16, #tpu.memory_space<vmem>>, vector<1x3x16xbf16>
    %273 = vector.shape_cast %272 : vector<1x3x16xbf16> to vector<3x16xbf16>
    %cst_301 = arith.constant dense<0.000000e+00> : vector<3x256xf32>
    %274 = tpu.matmul %273, %271, %cst_301 {dimension_numbers = #tpu.dot_dimension_numbers<[1], [1], [0], [0], [0, 0, 1, 0], [], []>} : vector<3x16xbf16>, vector<256x16xbf16>, vector<3x256xf32> -> vector<3x256xf32>
    %275 = arith.addf %268, %274 : vector<3x256xf32>
    %c0_302 = arith.constant 0 : index
    %c0_303 = arith.constant 0 : index
    %276 = vector.load %arg13[%c0_302, %c0_303] : memref<3x1xf32, #tpu.memory_space<vmem>>, vector<3x1xf32>
    %277 = vector.broadcast %276 : vector<3x1xf32> to vector<3x256xf32>
    %278 = arith.addf %275, %277 : vector<3x256xf32>
    %279 = math.tanh %278 : vector<3x256xf32>
    %c0_304 = arith.constant 0 : index
    %c0_305 = arith.constant 0 : index
    %c0_306 = arith.constant 0 : index
    %280 = vector.load %arg18[%c0_304, %c0_305, %c0_306] : memref<1x3x256xf32, #tpu.memory_space<vmem>>, vector<1x3x256xf32>
    %281 = vector.shape_cast %280 : vector<1x3x256xf32> to vector<3x256xf32>
    %282 = vector.shape_cast %279 : vector<3x256xf32> to vector<1x3x256xf32>
    tpu.vector_store %arg18[%c0_304, %c0_305, %c0_306], %282 {strides = array<i32>} : memref<1x3x256xf32, #tpu.memory_space<vmem>>, vector<1x3x256xf32>,
    return
  }
  func.func @transform_0(%arg0: i32) -> (i32, i32, i32) {
    %c0_i32 = arith.constant 0 : i32
    %c0_i32_0 = arith.constant 0 : i32
    %c0_i32_1 = arith.constant 0 : i32
    return %arg0, %c0_i32, %c0_i32_0 : i32, i32, i32
  }
  func.func @transform_1(%arg0: i32) -> (i32, i32) {
    %c0_i32 = arith.constant 0 : i32
    %c0_i32_0 = arith.constant 0 : i32
    %c0_i32_1 = arith.constant 0 : i32
    return %c0_i32, %c0_i32_0 : i32, i32
  }
  func.func @transform_2(%arg0: i32) -> (i32, i32) {
    %c0_i32 = arith.constant 0 : i32
    %c0_i32_0 = arith.constant 0 : i32
    %c0_i32_1 = arith.constant 0 : i32
    return %c0_i32, %c0_i32_0 : i32, i32
  }
  func.func @transform_3(%arg0: i32) -> (i32, i32, i32) {
    %c0_i32 = arith.constant 0 : i32
    %c0_i32_0 = arith.constant 0 : i32
    %c0_i32_1 = arith.constant 0 : i32
    %c0_i32_2 = arith.constant 0 : i32
    return %c0_i32, %c0_i32_0, %c0_i32_1 : i32, i32, i32
  }
  func.func @transform_4(%arg0: i32) -> (i32, i32) {
    %c0_i32 = arith.constant 0 : i32
    %c0_i32_0 = arith.constant 0 : i32
    %c0_i32_1 = arith.constant 0 : i32
    return %c0_i32, %c0_i32_0 : i32, i32
  }
  func.func @transform_5(%arg0: i32) -> (i32, i32) {
    %c0_i32 = arith.constant 0 : i32
    %c0_i32_0 = arith.constant 0 : i32
    %c0_i32_1 = arith.constant 0 : i32
    return %c0_i32, %c0_i32_0 : i32, i32
  }
  func.func @transform_6(%arg0: i32) -> (i32, i32) {
    %c0_i32 = arith.constant 0 : i32
    %c0_i32_0 = arith.constant 0 : i32
    %c0_i32_1 = arith.constant 0 : i32
    return %c0_i32, %c0_i32_0 : i32, i32
  }
  func.func @transform_7(%arg0: i32) -> (i32, i32) {
    %c0_i32 = arith.constant 0 : i32
    %c0_i32_0 = arith.constant 0 : i32
    %c0_i32_1 = arith.constant 0 : i32
    return %c0_i32, %c0_i32_0 : i32, i32
  }
  func.func @transform_8(%arg0: i32) -> (i32, i32) {
    %c0_i32 = arith.constant 0 : i32
    %c0_i32_0 = arith.constant 0 : i32
    %c0_i32_1 = arith.constant 0 : i32
    return %c0_i32, %c0_i32_0 : i32, i32
  }
  func.func @transform_9(%arg0: i32) -> (i32, i32, i32) {
    %c0_i32 = arith.constant 0 : i32
    %c0_i32_0 = arith.constant 0 : i32
    %c0_i32_1 = arith.constant 0 : i32
    %c0_i32_2 = arith.constant 0 : i32
    return %c0_i32, %c0_i32_0, %c0_i32_1 : i32, i32, i32
  }
  func.func @transform_10(%arg0: i32) -> (i32, i32) {
    %c0_i32 = arith.constant 0 : i32
    %c0_i32_0 = arith.constant 0 : i32
    %c0_i32_1 = arith.constant 0 : i32
    return %c0_i32, %c0_i32_0 : i32, i32
  }
  func.func @transform_11(%arg0: i32) -> (i32, i32, i32) {
    %c0_i32 = arith.constant 0 : i32
    %c0_i32_0 = arith.constant 0 : i32
    %c0_i32_1 = arith.constant 0 : i32
    %c0_i32_2 = arith.constant 0 : i32
    return %c0_i32, %c0_i32_0, %c0_i32_1 : i32, i32, i32
  }
  func.func @transform_12(%arg0: i32) -> (i32, i32) {
    %c0_i32 = arith.constant 0 : i32
    %c0_i32_0 = arith.constant 0 : i32
    %c0_i32_1 = arith.constant 0 : i32
    return %c0_i32, %c0_i32_0 : i32, i32
  }
  func.func @transform_13(%arg0: i32) -> (i32, i32) {
    %c0_i32 = arith.constant 0 : i32
    %c0_i32_0 = arith.constant 0 : i32
    %c0_i32_1 = arith.constant 0 : i32
    return %c0_i32, %c0_i32_0 : i32, i32
  }
  func.func @transform_14(%arg0: i32) -> (i32, i32) {
    %c0_i32 = arith.constant 0 : i32
    %c0_i32_0 = arith.constant 0 : i32
    %c0_i32_1 = arith.constant 0 : i32
    return %c0_i32, %c0_i32_0 : i32, i32
  }
  func.func @transform_15(%arg0: i32) -> (i32, i32) {
    %c0_i32 = arith.constant 0 : i32
    %c0_i32_0 = arith.constant 0 : i32
    %c0_i32_1 = arith.constant 0 : i32
    return %c0_i32, %c0_i32_0 : i32, i32
  }
  func.func @transform_16(%arg0: i32) -> (i32, i32) {
    %c0_i32 = arith.constant 0 : i32
    %c0_i32_0 = arith.constant 0 : i32
    %c0_i32_1 = arith.constant 0 : i32
    return %c0_i32, %c0_i32_0 : i32, i32
  }
  func.func @transform_17(%arg0: i32) -> (i32, i32, i32) {
    %c0_i32 = arith.constant 0 : i32
    %c0_i32_0 = arith.constant 0 : i32
    %c0_i32_1 = arith.constant 0 : i32
    return %arg0, %c0_i32, %c0_i32_0 : i32, i32, i32
  }
}

</mosaic_0001>

<bundles_post_ra>
// kernel: aesfa_test_forward.1
= control target key start
LH: loop header
LB: loop body
LE: loop exit
PB: predicated region body
PF: predicated region fallthrough
CT: control target
= control target key end

     0   :  { %s15535_s24 = smov 0   ;;  %s18061_s0 = inlined_call_operand.vmem [shape: bf16[2,512,27], index: 0, kind: input, shape index: {}]   ;;  %s18062_s1 = inlined_call_operand.vmem [shape: bf16[27,32], index: 1, kind: input, shape index: {}]   ;;  %s18063_s2 = inlined_call_operand.vmem [shape: f32[1,32], index: 2, kind: input, shape index: {}]   ;;  %s18064_s3 = inlined_call_operand.vmem [shape: bf16[9,16,64], index: 3, kind: input, shape index: {}]   ;;  %s18065_s4 = inlined_call_operand.vmem [shape: f32[1,64], index: 4, kind: input, shape index: {}]   ;;  %s18066_s5 = inlined_call_operand.vmem [shape: bf16[32,32], index: 5, kind: input, shape index: {}]   ;;  %s18067_s6 = inlined_call_operand.vmem [shape: f32[1,32], index: 6, kind: input, shape index: {}]   ;;  %s18068_s7 = inlined_call_operand.vmem [shape: bf16[32,32], index: 7, kind: input, shape index: {}]   ;;  %s18069_s8 = inlined_call_operand.vmem [shape: f32[1,32], index: 8, kind: input, shape index: {}]   ;;  %s18070_s9 = inlined_call_operand.vmem [shape: bf16[9,32,16], index: 9, kind: input, shape index: {}]   ;;  %s18071_s10 = inlined_call_operand.vmem [shape: f32[1,16], index: 10, kind: input, shape index: {}]   ;;  %s18072_s11 = inlined_call_operand.vmem [shape: bf16[9,3,16], index: 11, kind: input, shape index: {}]   ;;  %s18073_s12 = inlined_call_operand.vmem [shape: f32[3,1], index: 12, kind: input, shape index: {}]   ;;  %s18074_s13 = inlined_call_operand.vmem [shape: f32[64,256], index: 13, kind: input, shape index: {}]   ;;  %s18075_s14 = inlined_call_operand.vmem [shape: f32[256,64], index: 14, kind: input, shape index: {}]   ;;  %s18076_s15 = inlined_call_operand.vmem [shape: f32[1,256], index: 15, kind: input, shape index: {}]   ;;  %s18077_s16 = inlined_call_operand.vmem [shape: f32[1,64], index: 16, kind: input, shape index: {}]   ;;  %s18078_s17 = inlined_call_operand.vmem [shape: f32[2,3,256], index: 17, kind: output, shape index: {}]  }
   0x1   :  { %18088 = sst [smem:[#allocation10_spill]] %s18061_s0 }
   0x2   :  { %18089 = sst [smem:[#allocation11_spill]] %s18062_s1 }
   0x3 LB: > { %s11755_s25 = sadd.s32 4294967295, %s15436_s24   ;;  %p11759_p0 = scmp.ge.s32.totalorder %s15436_s24, 1  ;;  %s15436_s24 = sphi %s15535_s24, %s27_s24  }
   0x4   : > { %p487_p1 = scmp.lt.s32.totalorder %s15436_s24, 3 }
   0x6   : > { %p488_p2 = pnand %p11759_p0, %p487_p1 }
   0x8   : > { %491 = sbr.rel (%p488_p2) target bundleno = 4527 (0x11af), region = 88 }
   0xf   : > { %s18090_s28 = sld [smem:[#allocation11_spill]]  ;;  %vm1027_vm0 = vcmask 1044480   ;;  %vm1028_vm1 = vcmask 1045504   ;;  %p539_p3 = scmp.lt.s32.totalorder %s11755_s25, 1  ;;  %v15438_v2 = vmov 65535   ;;  %vm930_vm2 = vcmask 220160  }
  0x10   : > { %v1029_v3 = vsel %vm1027_vm0, 4294967295, %v15438_v2  ;;  %s18091_s1 = sld [smem:[#allocation10_spill]]  ;;  %vm550_vm3 = vcmask 130048   ;;  %vm565_vm4 = vcmask 122880   ;;  %v18080_v37 = vmov 0.0   ;;  %v15393_v39 = vld [vmem:[%s18064_s3 + $0x8] sm:$0xff]  }
  0x11   : > { %v1030_v4 = vsel %vm1028_vm1, %v1029_v3, 0  ;;  %s18106_s25 = smov (!%p539_p3, %s11755_s25), 1  ;;  %551 = vst.msk [vmem:[#allocation2] sm:$0xff] %vm550_vm3, %v18080_v37  ;;  %552 = vst.msk [vmem:[#allocation2 + $0x8] sm:$0xff] %vm550_vm3, %v18080_v37  ;;  %vm553_vm5 = vcmask 123904   ;;  %s15440_s27 = smov 112  }
  0x12   : > { %s12399_s30 = sshll.u32 %s18106_s25, 8  ;;  %555 = vst.msk [vmem:[#allocation2 + $0x1b0] sm:$0xff] %vm550_vm3, %v18080_v37  ;;  %556 = vst.msk [vmem:[#allocation2 + $0x1b8] sm:$0xff] %vm550_vm3, %v18080_v37  ;;  %v15795_v43 = vld [vmem:[%s18063_s2] ss:$0 sm:$0xff]  ;;  %vm638_vm6 = vcmask 261120  }
  0x13   : > { %559 = vst.msk [vmem:[#allocation2 + $0x198] sm:$0xff] %vm550_vm3, %v18080_v37  ;;  %560 = vst.msk [vmem:[#allocation2 + $0x1a0] sm:$0xff] %vm550_vm3, %v18080_v37  ;;  %vm15442_vm7 = vmmov 0   ;;  %vm7024_vm8 = vcmask 523264   ;;  %vm641_vm9 = vcmask 254976   ;;  %vm647_vm10 = vcmask 253952  }
  0x14   : > { %562 = vst.msk [vmem:[#allocation2 + $0x348] sm:$0xff] %vm550_vm3, %v18080_v37  ;;  %563 = vst.msk [vmem:[#allocation2 + $0x350] sm:$0xff] %vm550_vm3, %v18080_v37  ;;  %s12400_s23 = sshll.u32 %s18106_s25, 3 }
  0x15   : > { %v15359_v0 = vld [vmem:[%s18090_s28] sm:$0xff]   ;;  %v15360_v1 = vld [vmem:[%s18090_s28 + $0x8] sm:$0x3f]   ;;  %567 = vst.msk [vmem:[#allocation2 + $0x18] sm:$0x1] %vm565_vm4, %v18080_v37  ;;  %s548_s29 = scalar_lea.vmem %s18078_s17, %s12400_s23 }
  0x16   : > { %13211 = vmatprep.subr.bf16.mxu0 %v15359_v0  ;;  %14419 = vmatprep.subr.bf16.mxu1 %v15359_v0  ;;  %v1032_v5 = vand.u32 %v15360_v1, %v1030_v4  ;;  %s15555_s20 = scalar_lea.vmem %s18091_s1, %s12399_s30  ;;  %568 = vst.msk [vmem:[#allocation2 + $0x30] sm:$0x1] %vm565_vm4, %v18080_v37  ;;  %569 = vst.msk [vmem:[#allocation2 + $0x48] sm:$0x1] %vm565_vm4, %v18080_v37 }
  0x17   : > { %13212 = vmatpush3.bf16.msra.mxu0 %v15359_v0  ;;  %14421 = vmatpush3.bf16.msra.mxu1 %v15359_v0  ;;  %v15361_v6 = vld [vmem:[%s15555_s20] sm:$0xff]   ;;  %v15362_v7 = vld [vmem:[%s15555_s20 + $0x8] sm:$0xff]   ;;  %v15363_v8 = vld [vmem:[%s15555_s20 + $0x10] sm:$0xff]   ;;  %570 = vst.msk [vmem:[#allocation2 + $0x60] sm:$0x1] %vm565_vm4, %v18080_v37 }
  0x18   : > { %13213 = vmatprep.subr.bf16.mxu0 %v1032_v5  ;;  %14420 = vmatprep.subr.bf16.mxu1 %v1032_v5  ;;  %v15364_v9 = vld [vmem:[%s15555_s20 + $0x18] sm:$0xff]   ;;  %v15365_v10 = vld [vmem:[%s15555_s20 + $0x20] sm:$0xff]   ;;  %v15366_v11 = vld [vmem:[%s15555_s20 + $0x28] sm:$0xff]   ;;  %571 = vst.msk [vmem:[#allocation2 + $0x78] sm:$0x1] %vm565_vm4, %v18080_v37 }
  0x19   : > { %13215 = vmatprep.mubr.msk.bf16.mxu0 %vm930_vm2, %v15361_v6  ;;  %v15367_v12 = vld [vmem:[%s15555_s20 + $0x30] sm:$0xff]   ;;  %v15368_v13 = vld [vmem:[%s15555_s20 + $0x38] sm:$0xff]   ;;  %v15369_v14 = vld [vmem:[%s15555_s20 + $0x40] sm:$0xff]   ;;  %572 = vst.msk [vmem:[#allocation2 + $0x90] sm:$0x1] %vm565_vm4, %v18080_v37 }
  0x1a   : > { %v15387_v15 = vld [vmem:[%s15555_s20 + $0xd0] sm:$0xff]   ;;  %v15388_v16 = vld [vmem:[%s15555_s20 + $0xd8] sm:$0xff]   ;;  %v15389_v17 = vld [vmem:[%s15555_s20 + $0xe0] sm:$0xff]   ;;  %573 = vst.msk [vmem:[#allocation2 + $0xa8] sm:$0x1] %vm565_vm4, %v18080_v37 }
  0x1b   : > { %13214 = vmatpush3.bf16.msra.mxu0 %v1032_v5  ;;  %14422 = vmatpush3.bf16.msra.mxu1 %v1032_v5  ;;  %v15370_v18 = vld [vmem:[%s15555_s20 + $0x48] sm:$0xff]   ;;  %v15371_v19 = vld [vmem:[%s15555_s20 + $0x50] sm:$0xff]   ;;  %v15372_v22 = vld [vmem:[%s15555_s20 + $0x58] sm:$0xff]   ;;  %574 = vst.msk [vmem:[#allocation2 + $0xc0] sm:$0x1] %vm565_vm4, %v18080_v37 }
  0x1c   : > { %13267 = vmatprep.mubr.msk.bf16.mxu1 %vm930_vm2, %v15387_v15  ;;  %v15390_v20 = vld [vmem:[%s15555_s20 + $0xe8] sm:$0xff]   ;;  %v15391_v21 = vld [vmem:[%s15555_s20 + $0xf0] sm:$0xff]   ;;  %v15373_v23 = vld [vmem:[%s15555_s20 + $0x60] sm:$0xff]   ;;  %575 = vst.msk [vmem:[#allocation2 + $0xd8] sm:$0x1] %vm565_vm4, %v18080_v37  ;;  %13279 = vmatprep.subr.bf16.mxu1 %v15393_v39 }
  0x1d   : > { %v15392_v24 = vld [vmem:[%s15555_s20 + $0xf8] sm:$0xff]   ;;  %v15374_v25 = vld [vmem:[%s15555_s20 + $0x68] sm:$0xff]   ;;  %v15375_v26 = vld [vmem:[%s15555_s20 + $0x70] sm:$0xff]   ;;  %576 = vst.msk [vmem:[#allocation2 + $0xf0] sm:$0x1] %vm565_vm4, %v18080_v37 }
  0x1e   : > { %13216 = vmatmul.mubr.msk.bf16.vlgmr.msra.gmra.mrb[0].mxu0 %vm930_vm2, %v15362_v7  ;;  %13268 = vmatmul.mubr.msk.bf16.vlgmr.msra.gmra.mrb[0].mxu1 %vm930_vm2, %v15388_v16  ;;  %v15376_v27 = vld [vmem:[%s15555_s20 + $0x78] sm:$0xff]   ;;  %v15377_v28 = vld [vmem:[%s15555_s20 + $0x80] sm:$0xff]   ;;  %v15378_v29 = vld [vmem:[%s15555_s20 + $0x88] sm:$0xff]   ;;  %577 = vst.msk [vmem:[#allocation2 + $0x108] sm:$0x1] %vm565_vm4, %v18080_v37 }
  0x1f   : > { %13219 = vmatprep.mubr.msk.bf16.mxu0 %vm930_vm2, %v15363_v8  ;;  %13271 = vmatprep.mubr.msk.bf16.mxu1 %vm930_vm2, %v15389_v17  ;;  %v15379_v30 = vld [vmem:[%s15555_s20 + $0x90] sm:$0xff]   ;;  %v15380_v31 = vld [vmem:[%s15555_s20 + $0x98] sm:$0xff]   ;;  %v15381_v32 = vld [vmem:[%s15555_s20 + $0xa0] sm:$0xff]   ;;  %578 = vst.msk [vmem:[#allocation2 + $0x120] sm:$0x1] %vm565_vm4, %v18080_v37 }
  0x20   : > { %v15382_v33 = vld [vmem:[%s15555_s20 + $0xa8] sm:$0xff]   ;;  %v15383_v34 = vld [vmem:[%s15555_s20 + $0xb0] sm:$0xff]   ;;  %v15384_v35 = vld [vmem:[%s15555_s20 + $0xb8] sm:$0xff]   ;;  %579 = vst.msk [vmem:[#allocation2 + $0x138] sm:$0x1] %vm565_vm4, %v18080_v37  ;;  %13280 = vmatpush3.bf16.msra.mxu1 %v15393_v39 }
  0x21   : > { %v15617_v36 = vld [vmem:[%s15555_s20 + $0xc0] sm:$0xff]   ;;  %580 = vst.msk [vmem:[#allocation2 + $0x150] sm:$0x1] %vm565_vm4, %v18080_v37  ;;  %581 = vst.msk [vmem:[#allocation2 + $0x168] sm:$0x1] %vm565_vm4, %v18080_v37  ;;  %v15386_v38 = vld [vmem:[%s15555_s20 + $0xc8] sm:$0xff]  }
  0x22   : > { %582 = vst.msk [vmem:[#allocation2 + $0x180] sm:$0x1] %vm565_vm4, %v18080_v37  ;;  %585 = vst.msk [vmem:[#allocation2 + $0x1c8] sm:$0x1] %vm565_vm4, %v18080_v37  ;;  %v1679_v40 = vld [vmem:[#allocation2 + $0x1] sm:$0xff]  ;;  %s15441_s20 = smov 96  }
  0x23   : > { %586 = vst.msk [vmem:[#allocation2 + $0x1e0] sm:$0x1] %vm565_vm4, %v18080_v37  ;;  %587 = vst.msk [vmem:[#allocation2 + $0x1f8] sm:$0x1] %vm565_vm4, %v18080_v37 }
  0x24   : > { %588 = vst.msk [vmem:[#allocation2 + $0x210] sm:$0x1] %vm565_vm4, %v18080_v37  ;;  %589 = vst.msk [vmem:[#allocation2 + $0x228] sm:$0x1] %vm565_vm4, %v18080_v37 }
  0x25   : > { %590 = vst.msk [vmem:[#allocation2 + $0x240] sm:$0x1] %vm565_vm4, %v18080_v37  ;;  %591 = vst.msk [vmem:[#allocation2 + $0x258] sm:$0x1] %vm565_vm4, %v18080_v37 }
  0x26   : > { %13220 = vmatmul.mubr.msk.bf16.gmra.mrb[4].mxu0 %vm930_vm2, %v15364_v9  ;;  %13272 = vmatmul.mubr.msk.bf16.gmra.mrb[4].mxu1 %vm930_vm2, %v15390_v20  ;;  %592 = vst.msk [vmem:[#allocation2 + $0x270] sm:$0x1] %vm565_vm4, %v18080_v37  ;;  %593 = vst.msk [vmem:[#allocation2 + $0x288] sm:$0x1] %vm565_vm4, %v18080_v37 }
  0x27   : > { %13223 = vmatprep.mubr.msk.bf16.mxu0 %vm930_vm2, %v15365_v10  ;;  %13275 = vmatprep.mubr.msk.bf16.mxu1 %vm930_vm2, %v15391_v21  ;;  %594 = vst.msk [vmem:[#allocation2 + $0x2a0] sm:$0x1] %vm565_vm4, %v18080_v37  ;;  %595 = vst.msk [vmem:[#allocation2 + $0x2b8] sm:$0x1] %vm565_vm4, %v18080_v37 }
  0x28   : > { %596 = vst.msk [vmem:[#allocation2 + $0x2d0] sm:$0x1] %vm565_vm4, %v18080_v37  ;;  %597 = vst.msk [vmem:[#allocation2 + $0x2e8] sm:$0x1] %vm565_vm4, %v18080_v37 }
  0x29   : > { %598 = vst.msk [vmem:[#allocation2 + $0x300] sm:$0x1] %vm565_vm4, %v18080_v37  ;;  %599 = vst.msk [vmem:[#allocation2 + $0x318] sm:$0x1] %vm565_vm4, %v18080_v37 }
  0x2a   : > { %600 = vst.msk [vmem:[#allocation2 + $0x330] sm:$0x1] %vm565_vm4, %v18080_v37  ;;  %603 = vst.msk [vmem:[#allocation2 + $0x29] sm:$0x1] %vm565_vm4, %v18080_v37 }
  0x2b   : > { %604 = vst.msk [vmem:[#allocation2 + $0x41] sm:$0x1] %vm565_vm4, %v18080_v37  ;;  %605 = vst.msk [vmem:[#allocation2 + $0x59] sm:$0x1] %vm565_vm4, %v18080_v37 }
  0x2c   : > { %606 = vst.msk [vmem:[#allocation2 + $0x71] sm:$0x1] %vm565_vm4, %v18080_v37  ;;  %607 = vst.msk [vmem:[#allocation2 + $0x89] sm:$0x1] %vm565_vm4, %v18080_v37 }
  0x2d   : > { %608 = vst.msk [vmem:[#allocation2 + $0xa1] sm:$0x1] %vm565_vm4, %v18080_v37  ;;  %609 = vst.msk [vmem:[#allocation2 + $0xb9] sm:$0x1] %vm565_vm4, %v18080_v37 }
  0x2e   : > { %13224 = vmatmul.mubr.msk.bf16.gmra.mrb[8].mxu0 %vm930_vm2, %v15366_v11  ;;  %13276 = vmatmul.mubr.msk.bf16.gmra.mrb[8].mxu1 %vm930_vm2, %v15392_v24  ;;  %610 = vst.msk [vmem:[#allocation2 + $0xd1] sm:$0x1] %vm565_vm4, %v18080_v37  ;;  %611 = vst.msk [vmem:[#allocation2 + $0xe9] sm:$0x1] %vm565_vm4, %v18080_v37 }
  0x2f   : > { %13227 = vmatprep.mubr.msk.bf16.mxu0 %vm930_vm2, %v15367_v12  ;;  %612 = vst.msk [vmem:[#allocation2 + $0x101] sm:$0x1] %vm565_vm4, %v18080_v37  ;;  %613 = vst.msk [vmem:[#allocation2 + $0x119] sm:$0x1] %vm565_vm4, %v18080_v37 }
  0x30   : > { %614 = vst.msk [vmem:[#allocation2 + $0x131] sm:$0x1] %vm565_vm4, %v18080_v37  ;;  %615 = vst.msk [vmem:[#allocation2 + $0x149] sm:$0x1] %vm565_vm4, %v18080_v37 }
  0x31   : > { %616 = vst.msk [vmem:[#allocation2 + $0x161] sm:$0x1] %vm565_vm4, %v18080_v37  ;;  %617 = vst.msk [vmem:[#allocation2 + $0x179] sm:$0x1] %vm565_vm4, %v18080_v37 }
  0x32   : > { %618 = vst.msk [vmem:[#allocation2 + $0x191] sm:$0x1] %vm565_vm4, %v18080_v37  ;;  %621 = vst.msk [vmem:[#allocation2 + $0x1d9] sm:$0x1] %vm565_vm4, %v18080_v37 }
  0x33   : > { %622 = vst.msk [vmem:[#allocation2 + $0x1f1] sm:$0x1] %vm565_vm4, %v18080_v37  ;;  %623 = vst.msk [vmem:[#allocation2 + $0x209] sm:$0x1] %vm565_vm4, %v18080_v37 }
  0x34   : > { %624 = vst.msk [vmem:[#allocation2 + $0x221] sm:$0x1] %vm565_vm4, %v18080_v37  ;;  %625 = vst.msk [vmem:[#allocation2 + $0x239] sm:$0x1] %vm565_vm4, %v18080_v37 }
  0x35   : > { %626 = vst.msk [vmem:[#allocation2 + $0x251] sm:$0x1] %vm565_vm4, %v18080_v37  ;;  %627 = vst.msk [vmem:[#allocation2 + $0x269] sm:$0x1] %vm565_vm4, %v18080_v37 }
  0x36   : > { %13228 = vmatmul.mubr.msk.bf16.gmra.mrb[12].mxu0 %vm930_vm2, %v15368_v13  ;;  %628 = vst.msk [vmem:[#allocation2 + $0x281] sm:$0x1] %vm565_vm4, %v18080_v37  ;;  %629 = vst.msk [vmem:[#allocation2 + $0x299] sm:$0x1] %vm565_vm4, %v18080_v37 }
  0x37   : > { %13231 = vmatprep.mubr.msk.bf16.mxu0 %vm930_vm2, %v15369_v14  ;;  %630 = vst.msk [vmem:[#allocation2 + $0x2b1] sm:$0x1] %vm565_vm4, %v18080_v37  ;;  %631 = vst.msk [vmem:[#allocation2 + $0x2c9] sm:$0x1] %vm565_vm4, %v18080_v37 }
  0x38   : > { %632 = vst.msk [vmem:[#allocation2 + $0x2e1] sm:$0x1] %vm565_vm4, %v18080_v37  ;;  %633 = vst.msk [vmem:[#allocation2 + $0x2f9] sm:$0x1] %vm565_vm4, %v18080_v37 }
  0x39   : > { %634 = vst.msk [vmem:[#allocation2 + $0x311] sm:$0x1] %vm565_vm4, %v18080_v37  ;;  %635 = vst.msk [vmem:[#allocation2 + $0x329] sm:$0x1] %vm565_vm4, %v18080_v37 }
  0x3a   : > { %636 = vst.msk [vmem:[#allocation2 + $0x341] sm:$0x1] %vm565_vm4, %v18080_v37  ;;  %566 = vst.msk [vmem:[#allocation2] sm:$0x1] %vm565_vm4, %v18080_v37 }
  0x3b   : > { %583 = vst.msk [vmem:[#allocation2 + $0x198] sm:$0x1] %vm565_vm4, %v18080_v37  ;;  %584 = vst.msk [vmem:[#allocation2 + $0x1b0] sm:$0x1] %vm565_vm4, %v18080_v37 }
  0x3c   : > { %601 = vst.msk [vmem:[#allocation2 + $0x348] sm:$0x1] %vm565_vm4, %v18080_v37 }
  0x3d   : > { %554 = vst.msk [vmem:[#allocation2 + $0x10] sm:$0x3] %vm553_vm5, %v18080_v37  ;;  %557 = vst.msk [vmem:[#allocation2 + $0x1c0] sm:$0x3] %vm553_vm5, %v18080_v37 }
  0x3e   : > { %13232 = vmatmul.mubr.msk.bf16.gmra.mrb[16].mxu0 %vm930_vm2, %v15370_v18  ;;  %561 = vst.msk [vmem:[#allocation2 + $0x1a8] sm:$0x3] %vm553_vm5, %v18080_v37  ;;  %564 = vst.msk [vmem:[#allocation2 + $0x358] sm:$0x3] %vm553_vm5, %v18080_v37 }
  0x3f   : > { %13235 = vmatprep.mubr.msk.bf16.mxu0 %vm930_vm2, %v15371_v19  ;;  %602 = vst.msk [vmem:[#allocation2 + $0x11] sm:$0x1] %vm565_vm4, %v18080_v37  ;;  %619 = vst.msk [vmem:[#allocation2 + $0x1a9] sm:$0x1] %vm565_vm4, %v18080_v37 }
  0x40   : > { %620 = vst.msk [vmem:[#allocation2 + $0x1c1] sm:$0x1] %vm565_vm4, %v18080_v37  ;;  %637 = vst.msk [vmem:[#allocation2 + $0x359] sm:$0x1] %vm565_vm4, %v18080_v37 }
  0x44   : > { %v1680_v41 = vld [vmem:[#allocation2 + $0x9] sm:$0xff] }
  0x45   : > { %v1743_v42 = vpack.c.bf16 %v1680_v41, %v1679_v40 }
  0x46   : > { %13236 = vmatmul.mubr.msk.bf16.gmra.mrb[20].mxu0 %vm930_vm2, %v15372_v22 }
  0x47   : > { %13239 = vmatprep.mubr.msk.bf16.mxu0 %vm930_vm2, %v15373_v23  ;;  %13281 = vmatprep.mubr.msk.bf16.mxu1 %vm550_vm3, %v1743_v42 }
  0x4e   : > { %13240 = vmatmul.mubr.msk.bf16.gmra.mrb[24].mxu0 %vm930_vm2, %v15374_v25 }
  0x4f   : > { %13243 = vmatprep.mubr.msk.bf16.mxu0 %vm930_vm2, %v15375_v26 }
  0x56   : > { %13244 = vmatmul.mubr.msk.bf16.gmra.mrb[28].mxu0 %vm930_vm2, %v15376_v27 }
  0x57   : > { %13247 = vmatprep.mubr.msk.bf16.mxu0 %vm930_vm2, %v15377_v28 }
  0x5e   : > { %13248 = vmatmul.mubr.msk.bf16.gmra.mrb[32].mxu0 %vm930_vm2, %v15378_v29 }
  0x5f   : > { %13251 = vmatprep.mubr.msk.bf16.mxu0 %vm930_vm2, %v15379_v30 }
  0x66   : > { %13252 = vmatmul.mubr.msk.bf16.gmra.mrb[36].mxu0 %vm930_vm2, %v15380_v31 }
  0x67   : > { %13255 = vmatprep.mubr.msk.bf16.mxu0 %vm930_vm2, %v15381_v32 }
  0x6e   : > { %13256 = vmatmul.mubr.msk.bf16.gmra.mrb[40].mxu0 %vm930_vm2, %v15382_v33 }
  0x6f   : > { %13259 = vmatprep.mubr.msk.bf16.mxu0 %vm930_vm2, %v15383_v34 }
  0x76   : > { %13260 = vmatmul.mubr.msk.bf16.gmra.mrb[44].mxu0 %vm930_vm2, %v15384_v35 }
  0x77   : > { %13263 = vmatprep.mubr.msk.bf16.mxu0 %vm930_vm2, %v15617_v36 }
  0x7e   : > { %13264 = vmatmul.mubr.msk.bf16.gmra.mrb[48].mxu0 %vm930_vm2, %v15386_v38 }
  0xf1   : > { %v13217_v44 = vpop.f32.mrb[0].mxu0  ;;  %v15826_v33 = vpop.f32.mrb[0].mxu1 }
  0xf2   : > { %v1077_v45 = vadd.f32 %v13217_v44, %v15795_v43  ;;  %v1068_v46 = vpop.f32.mrb[1].mxu0  ;;  %v15830_v38 = vpop.f32.mrb[1].mxu1 }
  0xf3   : > { %v1069_v47 = vadd.f32 %v15795_v43, %v1068_v46  ;;  %v13218_v48 = vpop.f32.mrb[2].mxu0  ;;  %v15833_v41 = vpop.f32.mrb[2].mxu1 }
  0xf4   : > { %v1325_v49 = vmax.f32 %v1077_v45, 0.0  ;;  %v1080_v50 = vadd.f32 %v13218_v48, %v15795_v43  ;;  %v1071_v51 = vpop.f32.mrb[3].mxu0  ;;  %v15836_v44 = vpop.f32.mrb[3].mxu1 }
  0xf5   : > { %v1323_v52 = vmax.f32 %v1069_v47, 0.0  ;;  %v1072_v53 = vadd.f32 %v15795_v43, %v1071_v51 }
  0xf6   : > { %1390 = vst.msk [vmem:[#allocation2 + $0x31] sm:$0xff] %vm550_vm3, %v1325_v49  ;;  %v1326_v54 = vmax.f32 %v1080_v50, 0.0 }
  0xf7   : > { %1388 = vst.msk [vmem:[#allocation2 + $0x19] sm:$0xff] %vm550_vm3, %v1323_v52  ;;  %v1324_v55 = vmax.f32 %v1072_v53, 0.0 }
  0xf8   : > { %1391 = vst.msk [vmem:[#allocation2 + $0x39] sm:$0xff] %vm550_vm3, %v1326_v54 }
  0xf9   : > { %1389 = vst.msk [vmem:[#allocation2 + $0x21] sm:$0xff] %vm550_vm3, %v1324_v55  ;;  %v13221_v56 = vpop.f32.mrb[4].mxu0 }
  0xfa   : > { %v1093_v57 = vadd.f32 %v13221_v56, %v15795_v43  ;;  %v1084_v58 = vpop.f32.mrb[5].mxu0 }
  0xfb   : > { %v1085_v59 = vadd.f32 %v15795_v43, %v1084_v58  ;;  %v13222_v60 = vpop.f32.mrb[6].mxu0 }
  0xfc   : > { %v1329_v61 = vmax.f32 %v1093_v57, 0.0  ;;  %v1096_v62 = vadd.f32 %v13222_v60, %v15795_v43  ;;  %v1087_v63 = vpop.f32.mrb[7].mxu0  ;;  %v15844_v57 = vpop.f32.mrb[4].mxu1 }
  0xfd   : > { %v1327_v0 = vmax.f32 %v1085_v59, 0.0  ;;  %v1088_v1 = vadd.f32 %v15795_v43, %v1087_v63  ;;  %v1683_v9 = vld [vmem:[#allocation2 + $0x31] sm:$0xff] }
  0xfe   : > { %1394 = vst.msk [vmem:[#allocation2 + $0x61] sm:$0xff] %vm550_vm3, %v1329_v61  ;;  %v1330_v2 = vmax.f32 %v1096_v62, 0.0  ;;  %v1681_v5 = vld [vmem:[#allocation2 + $0x19] sm:$0xff]  ;;  %v15848_v61 = vpop.f32.mrb[5].mxu1 }
  0xff   : > { %1392 = vst.msk [vmem:[#allocation2 + $0x49] sm:$0xff] %vm550_vm3, %v1327_v0  ;;  %v1328_v3 = vmax.f32 %v1088_v1, 0.0  ;;  %v1684_v4 = vld [vmem:[#allocation2 + $0x39] sm:$0xff]  ;;  %v15851_v0 = vpop.f32.mrb[6].mxu1 }
 0x100   : > { %1395 = vst.msk [vmem:[#allocation2 + $0x69] sm:$0xff] %vm550_vm3, %v1330_v2  ;;  %v1682_v6 = vld [vmem:[#allocation2 + $0x21] sm:$0xff]  ;;  %v1745_v12 = vpack.c.bf16 %v1684_v4, %v1683_v9  ;;  %v15854_v2 = vpop.f32.mrb[7].mxu1 }
 0x101   : > { %1393 = vst.msk [vmem:[#allocation2 + $0x51] sm:$0xff] %vm550_vm3, %v1328_v3  ;;  %v13225_v7 = vpop.f32.mrb[8].mxu0  ;;  %v1744_v8 = vpack.c.bf16 %v1682_v6, %v1681_v5 }
 0x102   : > { %v1109_v10 = vadd.f32 %v13225_v7, %v15795_v43  ;;  %v1100_v11 = vpop.f32.mrb[9].mxu0 }
 0x103   : > { %v1101_v13 = vadd.f32 %v15795_v43, %v1100_v11  ;;  %v13226_v14 = vpop.f32.mrb[10].mxu0  ;;  %13282 = vmatmul.mubr.msk.bf16.vlgmr.msra.gmra.mrb[12].mxu1 %vm550_vm3, %v1744_v8 }
 0x104   : > { %v1333_v15 = vmax.f32 %v1109_v10, 0.0  ;;  %v1112_v16 = vadd.f32 %v13226_v14, %v15795_v43  ;;  %v1103_v17 = vpop.f32.mrb[11].mxu0  ;;  %13285 = vmatprep.mubr.msk.bf16.mxu1 %vm550_vm3, %v1745_v12 }
 0x105   : > { %v1331_v18 = vmax.f32 %v1101_v13, 0.0  ;;  %v1104_v19 = vadd.f32 %v15795_v43, %v1103_v17  ;;  %v1687_v27 = vld [vmem:[#allocation2 + $0x61] sm:$0xff] }
 0x106   : > { %1398 = vst.msk [vmem:[#allocation2 + $0x91] sm:$0xff] %vm550_vm3, %v1333_v15  ;;  %v1334_v20 = vmax.f32 %v1112_v16, 0.0  ;;  %v1685_v23 = vld [vmem:[#allocation2 + $0x49] sm:$0xff]  ;;  %v15862_v15 = vpop.f32.mrb[8].mxu1 }
 0x107   : > { %1396 = vst.msk [vmem:[#allocation2 + $0x79] sm:$0xff] %vm550_vm3, %v1331_v18  ;;  %v1332_v21 = vmax.f32 %v1104_v19, 0.0  ;;  %v1688_v22 = vld [vmem:[#allocation2 + $0x69] sm:$0xff]  ;;  %v15866_v19 = vpop.f32.mrb[9].mxu1 }
 0x108   : > { %1399 = vst.msk [vmem:[#allocation2 + $0x99] sm:$0xff] %vm550_vm3, %v1334_v20  ;;  %v1686_v24 = vld [vmem:[#allocation2 + $0x51] sm:$0xff]  ;;  %v1747_v30 = vpack.c.bf16 %v1688_v22, %v1687_v27  ;;  %v15869_v22 = vpop.f32.mrb[10].mxu1 }
 0x109   : > { %1397 = vst.msk [vmem:[#allocation2 + $0x81] sm:$0xff] %vm550_vm3, %v1332_v21  ;;  %v13229_v25 = vpop.f32.mrb[12].mxu0  ;;  %v1746_v26 = vpack.c.bf16 %v1686_v24, %v1685_v23  ;;  %v15872_v24 = vpop.f32.mrb[11].mxu1 }
 0x10a   : > { %v1125_v28 = vadd.f32 %v13229_v25, %v15795_v43  ;;  %v1116_v29 = vpop.f32.mrb[13].mxu0 }
 0x10b   : > { %v1117_v31 = vadd.f32 %v15795_v43, %v1116_v29  ;;  %v13230_v32 = vpop.f32.mrb[14].mxu0  ;;  %13286 = vmatmul.mubr.msk.bf16.gmra.mrb[16].mxu1 %vm550_vm3, %v1746_v26 }
 0x10c   : > { %v1337_v34 = vmax.f32 %v1125_v28, 0.0  ;;  %v1128_v35 = vadd.f32 %v13230_v32, %v15795_v43  ;;  %v1119_v36 = vpop.f32.mrb[15].mxu0  ;;  %13289 = vmatprep.mubr.msk.bf16.mxu1 %vm550_vm3, %v1747_v30 }
 0x10d   : > { %v1335_v39 = vmax.f32 %v1117_v31, 0.0  ;;  %v1120_v40 = vadd.f32 %v15795_v43, %v1119_v36  ;;  %v1691_v51 = vld [vmem:[#allocation2 + $0x91] sm:$0xff] }
 0x10e   : > { %1402 = vst.msk [vmem:[#allocation2 + $0xc1] sm:$0xff] %vm550_vm3, %v1337_v34  ;;  %v1338_v42 = vmax.f32 %v1128_v35, 0.0  ;;  %v1689_v47 = vld [vmem:[#allocation2 + $0x79] sm:$0xff] }
 0x10f   : > { %1400 = vst.msk [vmem:[#allocation2 + $0xa9] sm:$0xff] %vm550_vm3, %v1335_v39  ;;  %v1336_v45 = vmax.f32 %v1120_v40, 0.0  ;;  %v1692_v46 = vld [vmem:[#allocation2 + $0x99] sm:$0xff] }
 0x110   : > { %1403 = vst.msk [vmem:[#allocation2 + $0xc9] sm:$0xff] %vm550_vm3, %v1338_v42  ;;  %v1690_v48 = vld [vmem:[#allocation2 + $0x81] sm:$0xff]  ;;  %v1749_v54 = vpack.c.bf16 %v1692_v46, %v1691_v51 }
 0x111   : > { %1401 = vst.msk [vmem:[#allocation2 + $0xb1] sm:$0xff] %vm550_vm3, %v1336_v45  ;;  %v13233_v49 = vpop.f32.mrb[16].mxu0  ;;  %v1748_v50 = vpack.c.bf16 %v1690_v48, %v1689_v47 }
 0x112   : > { %v1141_v52 = vadd.f32 %v13233_v49, %v15795_v43  ;;  %v1132_v53 = vpop.f32.mrb[17].mxu0 }
 0x113   : > { %v1133_v55 = vadd.f32 %v15795_v43, %v1132_v53  ;;  %v13234_v56 = vpop.f32.mrb[18].mxu0  ;;  %13290 = vmatmul.mubr.msk.bf16.gmra.mrb[20].mxu1 %vm550_vm3, %v1748_v50 }
 0x114   : > { %v1341_v58 = vmax.f32 %v1141_v52, 0.0  ;;  %v1144_v59 = vadd.f32 %v13234_v56, %v15795_v43  ;;  %v1135_v60 = vpop.f32.mrb[19].mxu0  ;;  %13293 = vmatprep.mubr.msk.bf16.mxu1 %vm550_vm3, %v1749_v54 }
 0x115   : > { %v1339_v62 = vmax.f32 %v1133_v55, 0.0  ;;  %v1136_v63 = vadd.f32 %v15795_v43, %v1135_v60  ;;  %v1695_v9 = vld [vmem:[#allocation2 + $0xc1] sm:$0xff] }
 0x116   : > { %1406 = vst.msk [vmem:[#allocation2 + $0xf1] sm:$0xff] %vm550_vm3, %v1341_v58  ;;  %v1342_v1 = vmax.f32 %v1144_v59, 0.0  ;;  %v1693_v5 = vld [vmem:[#allocation2 + $0xa9] sm:$0xff] }
 0x117   : > { %1404 = vst.msk [vmem:[#allocation2 + $0xd9] sm:$0xff] %vm550_vm3, %v1339_v62  ;;  %v1340_v3 = vmax.f32 %v1136_v63, 0.0  ;;  %v1696_v4 = vld [vmem:[#allocation2 + $0xc9] sm:$0xff] }
 0x118   : > { %1407 = vst.msk [vmem:[#allocation2 + $0xf9] sm:$0xff] %vm550_vm3, %v1342_v1  ;;  %v1694_v6 = vld [vmem:[#allocation2 + $0xb1] sm:$0xff]  ;;  %v1751_v12 = vpack.c.bf16 %v1696_v4, %v1695_v9 }
 0x119   : > { %1405 = vst.msk [vmem:[#allocation2 + $0xe1] sm:$0xff] %vm550_vm3, %v1340_v3  ;;  %v13237_v7 = vpop.f32.mrb[20].mxu0  ;;  %v1750_v8 = vpack.c.bf16 %v1694_v6, %v1693_v5 }
 0x11a   : > { %v1157_v10 = vadd.f32 %v13237_v7, %v15795_v43  ;;  %v1148_v11 = vpop.f32.mrb[21].mxu0 }
 0x11b   : > { %v1149_v13 = vadd.f32 %v15795_v43, %v1148_v11  ;;  %v13238_v14 = vpop.f32.mrb[22].mxu0  ;;  %13294 = vmatmul.mubr.msk.bf16.gmra.mrb[24].mxu1 %vm550_vm3, %v1750_v8 }
 0x11c   : > { %v1345_v16 = vmax.f32 %v1157_v10, 0.0  ;;  %v1160_v17 = vadd.f32 %v13238_v14, %v15795_v43  ;;  %v1151_v18 = vpop.f32.mrb[23].mxu0  ;;  %13297 = vmatprep.mubr.msk.bf16.mxu1 %vm550_vm3, %v1751_v12 }
 0x11d   : > { %v1343_v20 = vmax.f32 %v1149_v13, 0.0  ;;  %v1152_v21 = vadd.f32 %v15795_v43, %v1151_v18  ;;  %v1699_v31 = vld [vmem:[#allocation2 + $0xf1] sm:$0xff] }
 0x11e   : > { %1410 = vst.msk [vmem:[#allocation2 + $0x121] sm:$0xff] %vm550_vm3, %v1345_v16  ;;  %v1346_v23 = vmax.f32 %v1160_v17, 0.0  ;;  %v1697_v27 = vld [vmem:[#allocation2 + $0xd9] sm:$0xff] }
 0x11f   : > { %1408 = vst.msk [vmem:[#allocation2 + $0x109] sm:$0xff] %vm550_vm3, %v1343_v20  ;;  %v1344_v25 = vmax.f32 %v1152_v21, 0.0  ;;  %v1700_v26 = vld [vmem:[#allocation2 + $0xf9] sm:$0xff] }
 0x120   : > { %1411 = vst.msk [vmem:[#allocation2 + $0x129] sm:$0xff] %vm550_vm3, %v1346_v23  ;;  %v1698_v28 = vld [vmem:[#allocation2 + $0xe1] sm:$0xff]  ;;  %v1753_v35 = vpack.c.bf16 %v1700_v26, %v1699_v31 }
 0x121   : > { %1409 = vst.msk [vmem:[#allocation2 + $0x111] sm:$0xff] %vm550_vm3, %v1344_v25  ;;  %v13241_v29 = vpop.f32.mrb[24].mxu0  ;;  %v1752_v30 = vpack.c.bf16 %v1698_v28, %v1697_v27  ;;  %v1711_v28 = vld [vmem:[#allocation2 + $0x1b1] sm:$0xff] }
 0x122   : > { %v1173_v32 = vadd.f32 %v13241_v29, %v15795_v43  ;;  %v1164_v34 = vpop.f32.mrb[25].mxu0  ;;  %v1712_v29 = vld [vmem:[#allocation2 + $0x1b9] sm:$0xff] }
 0x123   : > { %v1165_v36 = vadd.f32 %v15795_v43, %v1164_v34  ;;  %v13242_v39 = vpop.f32.mrb[26].mxu0  ;;  %13298 = vmatmul.mubr.msk.bf16.gmra.mrb[28].mxu1 %vm550_vm3, %v1752_v30  ;;  %v1759_v34 = vpack.c.bf16 %v1712_v29, %v1711_v28 }
 0x124   : > { %v1349_v40 = vmax.f32 %v1173_v32, 0.0  ;;  %v1176_v42 = vadd.f32 %v13242_v39, %v15795_v43  ;;  %v1167_v45 = vpop.f32.mrb[27].mxu0  ;;  %13301 = vmatprep.mubr.msk.bf16.mxu1 %vm550_vm3, %v1753_v35 }
 0x125   : > { %v1347_v46 = vmax.f32 %v1165_v36, 0.0  ;;  %v1168_v47 = vadd.f32 %v15795_v43, %v1167_v45  ;;  %v1703_v55 = vld [vmem:[#allocation2 + $0x121] sm:$0xff] }
 0x126   : > { %1414 = vst.msk [vmem:[#allocation2 + $0x151] sm:$0xff] %vm550_vm3, %v1349_v40  ;;  %v1350_v48 = vmax.f32 %v1176_v42, 0.0  ;;  %v1701_v51 = vld [vmem:[#allocation2 + $0x109] sm:$0xff] }
 0x127   : > { %1412 = vst.msk [vmem:[#allocation2 + $0x139] sm:$0xff] %vm550_vm3, %v1347_v46  ;;  %v1348_v49 = vmax.f32 %v1168_v47, 0.0  ;;  %v1704_v50 = vld [vmem:[#allocation2 + $0x129] sm:$0xff] }
 0x128   : > { %1415 = vst.msk [vmem:[#allocation2 + $0x159] sm:$0xff] %vm550_vm3, %v1350_v48  ;;  %v1702_v52 = vld [vmem:[#allocation2 + $0x111] sm:$0xff]  ;;  %v1755_v59 = vpack.c.bf16 %v1704_v50, %v1703_v55 }
 0x129   : > { %1413 = vst.msk [vmem:[#allocation2 + $0x141] sm:$0xff] %vm550_vm3, %v1348_v49  ;;  %v13245_v53 = vpop.f32.mrb[28].mxu0  ;;  %v1754_v54 = vpack.c.bf16 %v1702_v52, %v1701_v51  ;;  %v15394_v52 = vld [vmem:[%s18064_s3] sm:$0xff]  }
 0x12a   : > { %v1189_v56 = vadd.f32 %v13245_v53, %v15795_v43  ;;  %v1180_v58 = vpop.f32.mrb[29].mxu0  ;;  %13345 = vmatprep.subr.bf16.mxu1 %v15394_v52 }
 0x12b   : > { %v1181_v60 = vadd.f32 %v15795_v43, %v1180_v58  ;;  %v13246_v62 = vpop.f32.mrb[30].mxu0  ;;  %13302 = vmatmul.mubr.msk.bf16.gmra.mrb[32].mxu1 %vm550_vm3, %v1754_v54 }
 0x12c   : > { %v1353_v63 = vmax.f32 %v1189_v56, 0.0  ;;  %v1192_v1 = vadd.f32 %v13246_v62, %v15795_v43  ;;  %v1183_v3 = vpop.f32.mrb[31].mxu0  ;;  %13305 = vmatprep.mubr.msk.bf16.mxu1 %vm550_vm3, %v1755_v59  ;;  %13346 = vmatpush3.bf16.msra.mxu1 %v15394_v52 }
 0x12d   : > { %v1351_v4 = vmax.f32 %v1181_v60, 0.0  ;;  %v1184_v5 = vadd.f32 %v15795_v43, %v1183_v3  ;;  %v1707_v13 = vld [vmem:[#allocation2 + $0x151] sm:$0xff] }
 0x12e   : > { %1418 = vst.msk [vmem:[#allocation2 + $0x181] sm:$0xff] %vm550_vm3, %v1353_v63  ;;  %v1354_v6 = vmax.f32 %v1192_v1, 0.0  ;;  %v1705_v9 = vld [vmem:[#allocation2 + $0x139] sm:$0xff] }
 0x12f   : > { %1416 = vst.msk [vmem:[#allocation2 + $0x169] sm:$0xff] %vm550_vm3, %v1351_v4  ;;  %v1352_v7 = vmax.f32 %v1184_v5, 0.0  ;;  %v1708_v8 = vld [vmem:[#allocation2 + $0x159] sm:$0xff] }
 0x130   : > { %1419 = vst.msk [vmem:[#allocation2 + $0x189] sm:$0xff] %vm550_vm3, %v1354_v6  ;;  %v1706_v10 = vld [vmem:[#allocation2 + $0x141] sm:$0xff]  ;;  %v1757_v17 = vpack.c.bf16 %v1708_v8, %v1707_v13 }
 0x131   : > { %1417 = vst.msk [vmem:[#allocation2 + $0x171] sm:$0xff] %vm550_vm3, %v1352_v7  ;;  %v13249_v11 = vpop.f32.mrb[32].mxu0  ;;  %v1756_v12 = vpack.c.bf16 %v1706_v10, %v1705_v9 }
 0x132   : > { %v1205_v14 = vadd.f32 %v13249_v11, %v15795_v43  ;;  %v1196_v16 = vpop.f32.mrb[33].mxu0 }
 0x133   : > { %v1197_v18 = vadd.f32 %v15795_v43, %v1196_v16  ;;  %v13250_v20 = vpop.f32.mrb[34].mxu0  ;;  %13306 = vmatmul.mubr.msk.bf16.gmra.mrb[36].mxu1 %vm550_vm3, %v1756_v12 }
 0x134   : > { %v1357_v21 = vmax.f32 %v1205_v14, 0.0  ;;  %v1208_v23 = vadd.f32 %v13250_v20, %v15795_v43  ;;  %v1199_v25 = vpop.f32.mrb[35].mxu0  ;;  %13309 = vmatprep.mubr.msk.bf16.mxu1 %vm550_vm3, %v1757_v17 }
 0x135   : > { %v1355_v26 = vmax.f32 %v1197_v18, 0.0  ;;  %v1200_v27 = vadd.f32 %v15795_v43, %v1199_v25 }
 0x136   : > { %1456 = vrot.lane.b32.xlu1 %v1357_v21, %s15440_s27  ;;  %v1358_v30 = vmax.f32 %v1208_v23, 0.0  ;;  %v1709_v31 = vld [vmem:[#allocation2 + $0x169] sm:$0xff] }
 0x137   : > { %1452 = vrot.lane.b32.xlu0 %v1355_v26, %s15440_s27  ;;  %v1356_v35 = vmax.f32 %v1200_v27, 0.0 }
 0x138   : > { %v1710_v32 = vld [vmem:[#allocation2 + $0x171] sm:$0xff] }
 0x139   : > { %v13253_v36 = vpop.f32.mrb[36].mxu0  ;;  %v1758_v39 = vpack.c.bf16 %v1710_v32, %v1709_v31 }
 0x13a   : > { %1458 = vrot.lane.b32.xlu1 %v1358_v30, %s15440_s27  ;;  %v1212_v40 = vpop.f32.mrb[37].mxu0  ;;  %v1221_v47 = vadd.f32 %v13253_v36, %v15795_v43  ;;  %v1280_v36 = vadd.f32 %v15795_v43, %v15836_v44  ;;  %v1296_v44 = vadd.f32 %v15795_v43, %v15854_v2  ;;  %v1312_v2 = vadd.f32 %v15795_v43, %v15872_v24 }
 0x13b   : > { %v1213_v42 = vadd.f32 %v15795_v43, %v1212_v40  ;;  %v13254_v45 = vpop.f32.mrb[38].mxu0  ;;  %1454 = vrot.lane.b32.xlu0 %v1356_v35, %s15440_s27  ;;  %13310 = vmatmul.mubr.msk.bf16.gmra.mrb[40].mxu1 %vm550_vm3, %v1758_v39 }
 0x13c   : > { %v1215_v46 = vpop.f32.mrb[39].mxu0  ;;  %13313 = vmatprep.mubr.msk.bf16.mxu1 %vm550_vm3, %v1759_v34  ;;  %v1224_v50 = vadd.f32 %v13254_v45, %v15795_v43  ;;  %v1361_v53 = vmax.f32 %v1221_v47, 0.0  ;;  %v1277_v34 = vadd.f32 %v15795_v43, %v15830_v38  ;;  %v1376_v45 = vmax.f32 %v1280_v36, 0.0 }
 0x13d   : > { %v1359_v48 = vmax.f32 %v1213_v42, 0.0  ;;  %v1216_v49 = vadd.f32 %v15795_v43, %v1215_v46  ;;  %v1285_v42 = vadd.f32 %v15826_v33, %v15795_v43  ;;  %v1288_v46 = vadd.f32 %v15833_v41, %v15795_v43 }
 0x13e   : > { %v1362_v56 = vmax.f32 %v1224_v50, 0.0  ;;  %v1375_v40 = vmax.f32 %v1277_v34, 0.0  ;;  %v1293_v38 = vadd.f32 %v15795_v43, %v15848_v61  ;;  %v1301_v33 = vadd.f32 %v15844_v57, %v15795_v43 }
 0x13f   : > { %v1360_v51 = vmax.f32 %v1216_v49, 0.0  ;;  %1460 = vrot.lane.b32.xlu0 %v1359_v48, %s15440_s27  ;;  %v1377_v47 = vmax.f32 %v1285_v42, 0.0  ;;  %v1378_v48 = vmax.f32 %v1288_v46, 0.0  ;;  %v1380_v50 = vmax.f32 %v1296_v44, 0.0 }
 0x140   : > { %v1379_v49 = vmax.f32 %v1293_v38, 0.0  ;;  %v1304_v41 = vadd.f32 %v15851_v0, %v15795_v43  ;;  %v1309_v61 = vadd.f32 %v15795_v43, %v15866_v19  ;;  %v1317_v57 = vadd.f32 %v15862_v15, %v15795_v43 }
 0x141   : > { %v13257_v54 = vpop.f32.mrb[40].mxu0  ;;  %1462 = vrot.lane.b32.xlu1 %v1360_v51, %s15440_s27  ;;  %v1381_v51 = vmax.f32 %v1301_v33, 0.0  ;;  %v1320_v0 = vadd.f32 %v15869_v22, %v15795_v43 }
 0x142   : > { %v1228_v55 = vpop.f32.mrb[41].mxu0  ;;  %v1237_v62 = vadd.f32 %v13257_v54, %v15795_v43  ;;  %v1382_v52 = vmax.f32 %v1304_v41, 0.0  ;;  %v1384_v54 = vmax.f32 %v1312_v2, 0.0  ;;  %v1385_v19 = vmax.f32 %v1317_v57, 0.0 }
 0x143   : > { %v1229_v58 = vadd.f32 %v15795_v43, %v1228_v55  ;;  %v13258_v59 = vpop.f32.mrb[42].mxu0  ;;  %1464 = vrot.lane.b32.xlu0 %v1361_v53, %s15440_s27  ;;  %v1383_v53 = vmax.f32 %v1309_v61, 0.0  ;;  %v1386_v55 = vmax.f32 %v1320_v0, 0.0 }
 0x144   : > { %v1231_v60 = vpop.f32.mrb[43].mxu0  ;;  %v1240_v3 = vadd.f32 %v13258_v59, %v15795_v43  ;;  %v1365_v5 = vmax.f32 %v1237_v62, 0.0 }
 0x145   : > { %v1363_v63 = vmax.f32 %v1229_v58, 0.0  ;;  %v1232_v1 = vadd.f32 %v15795_v43, %v1231_v60  ;;  %1466 = vrot.lane.b32.xlu1 %v1362_v56, %s15440_s27 }
 0x146   : > { %v1366_v8 = vmax.f32 %v1240_v3, 0.0 }
 0x147   : > { %v1364_v4 = vmax.f32 %v1232_v1, 0.0  ;;  %1468 = vrot.lane.b32.xlu0 %v1363_v63, %s15440_s27 }
 0x149   : > { %v13261_v6 = vpop.f32.mrb[44].mxu0  ;;  %1470 = vrot.lane.b32.xlu1 %v1364_v4, %s15440_s27 }
 0x14a   : > { %v1244_v7 = vpop.f32.mrb[45].mxu0  ;;  %v1253_v12 = vadd.f32 %v13261_v6, %v15795_v43 }
 0x14b   : > { %v1245_v9 = vadd.f32 %v15795_v43, %v1244_v7  ;;  %v13262_v10 = vpop.f32.mrb[46].mxu0  ;;  %1472 = vrot.lane.b32.xlu0 %v1365_v5, %s15440_s27 }
 0x14c   : > { %v1247_v11 = vpop.f32.mrb[47].mxu0  ;;  %v1256_v16 = vadd.f32 %v13262_v10, %v15795_v43  ;;  %v1369_v18 = vmax.f32 %v1253_v12, 0.0 }
 0x14d   : > { %v1367_v13 = vmax.f32 %v1245_v9, 0.0  ;;  %v1248_v14 = vadd.f32 %v15795_v43, %v1247_v11  ;;  %1474 = vrot.lane.b32.xlu1 %v1366_v8, %s15440_s27 }
 0x14e   : > { %v1370_v23 = vmax.f32 %v1256_v16, 0.0 }
 0x14f   : > { %v1368_v17 = vmax.f32 %v1248_v14, 0.0  ;;  %1476 = vrot.lane.b32.xlu0 %v1367_v13, %s15440_s27 }
 0x151   : > { %v13265_v20 = vpop.f32.mrb[48].mxu0  ;;  %1478 = vrot.lane.b32.xlu1 %v1368_v17, %s15440_s27  ;;  %v15998_v17 = vld [vmem:[%s18064_s3 + $0x10] sm:$0xff]  }
 0x152   : > { %v1260_v21 = vpop.f32.mrb[49].mxu0  ;;  %v1269_v28 = vadd.f32 %v13265_v20, %v15795_v43  ;;  %13411 = vmatprep.subr.bf16.mxu1 %v15998_v17 }
 0x153   : > { %v1261_v25 = vadd.f32 %v15795_v43, %v1260_v21  ;;  %v13266_v26 = vpop.f32.mrb[50].mxu0  ;;  %1480 = vrot.lane.b32.xlu0 %v1369_v18, %s15440_s27 }
 0x154   : > { %v1263_v27 = vpop.f32.mrb[51].mxu0  ;;  %v1272_v31 = vadd.f32 %v13266_v26, %v15795_v43  ;;  %v1373_v35 = vmax.f32 %v1269_v28, 0.0 }
 0x155   : > { %v1371_v29 = vmax.f32 %v1261_v25, 0.0  ;;  %v1264_v30 = vadd.f32 %v15795_v43, %v1263_v27  ;;  %1482 = vrot.lane.b32.xlu1 %v1370_v23, %s15440_s27 }
 0x156   : > { %v1374_v39 = vmax.f32 %v1272_v31, 0.0 }
 0x157   : > { %v1372_v32 = vmax.f32 %v1264_v30, 0.0  ;;  %1484 = vrot.lane.b32.xlu0 %v1371_v29, %s15440_s27 }
 0x159   : > { %1486 = vrot.lane.b32.xlu1 %v1372_v32, %s15440_s27 }
 0x15b   : > { %1488 = vrot.lane.b32.xlu0 %v1373_v35, %s15440_s27 }
 0x15d   : > { %1490 = vrot.lane.b32.xlu1 %v1374_v39, %s15440_s27 }
 0x15f   : > { %1492 = vrot.lane.b32.xlu0 %v1375_v40, %s15440_s27 }
 0x161   : > { %1494 = vrot.lane.b32.xlu1 %v1376_v45, %s15440_s27 }
 0x163   : > { %1496 = vrot.lane.b32.xlu0 %v1377_v47, %s15440_s27 }
 0x165   : > { %1498 = vrot.lane.b32.xlu1 %v1378_v48, %s15440_s27 }
 0x167   : > { %1500 = vrot.lane.b32.xlu0 %v1379_v49, %s15440_s27 }
 0x169   : > { %1502 = vrot.lane.b32.xlu1 %v1380_v50, %s15440_s27 }
 0x16b   : > { %1504 = vrot.lane.b32.xlu0 %v1381_v51, %s15440_s27 }
 0x16d   : > { %1506 = vrot.lane.b32.xlu1 %v1382_v52, %s15440_s27 }
 0x16f   : > { %1508 = vrot.lane.b32.xlu0 %v1383_v53, %s15440_s27 }
 0x171   : > { %1510 = vrot.lane.b32.xlu1 %v1384_v54, %s15440_s27 }
 0x173   : > { %1512 = vrot.lane.b32.xlu0 %v1385_v19, %s15440_s27 }
 0x175   : > { %1514 = vrot.lane.b32.xlu1 %v1386_v55, %s15440_s27 }
 0x1a8   : > { %v1457_v24 = vpop.permute.xlu1 %1456 }
 0x1a9   : > { %1551 = vst.msk [vmem:[#allocation2 + $0x1e1] sm:$0xff] %vm550_vm3, %v1457_v24  ;;  %v1453_v15 = vpop.permute.xlu0 %1452 }
 0x1aa   : > { %1549 = vst.msk [vmem:[#allocation2 + $0x1c9] sm:$0xff] %vm550_vm3, %v1453_v15 }
 0x1ac   : > { %v1459_v56 = vpop.permute.xlu1 %1458 }
 0x1ad   : > { %1552 = vst.msk [vmem:[#allocation2 + $0x1e9] sm:$0xff] %vm550_vm3, %v1459_v56  ;;  %v1455_v43 = vpop.permute.xlu0 %1454 }
 0x1ae   : > { %1550 = vst.msk [vmem:[#allocation2 + $0x1d1] sm:$0xff] %vm550_vm3, %v1455_v43 }
 0x1b0   : > { %v1715_v3 = vld [vmem:[#allocation2 + $0x1e1] sm:$0xff] }
 0x1b1   : > { %v1461_v22 = vpop.permute.xlu0 %1460  ;;  %v1713_v62 = vld [vmem:[#allocation2 + $0x1c9] sm:$0xff] }
 0x1b2   : > { %1553 = vst.msk [vmem:[#allocation2 + $0x1f9] sm:$0xff] %vm550_vm3, %v1461_v22 }
 0x1b3   : > { %v1463_v58 = vpop.permute.xlu1 %1462 }
 0x1b4   : > { %1554 = vst.msk [vmem:[#allocation2 + $0x201] sm:$0xff] %vm550_vm3, %v1463_v58  ;;  %v1716_v59 = vld [vmem:[#allocation2 + $0x1e9] sm:$0xff] }
 0x1b5   : > { %v1465_v60 = vpop.permute.xlu0 %1464  ;;  %v1714_v63 = vld [vmem:[#allocation2 + $0x1d1] sm:$0xff]  ;;  %v1761_v5 = vpack.c.bf16 %v1716_v59, %v1715_v3 }
 0x1b6   : > { %1555 = vst.msk [vmem:[#allocation2 + $0x211] sm:$0xff] %vm550_vm3, %v1465_v60  ;;  %v1760_v1 = vpack.c.bf16 %v1714_v63, %v1713_v62 }
 0x1b7   : > { %v1467_v4 = vpop.permute.xlu1 %1466 }
 0x1b8   : > { %1556 = vst.msk [vmem:[#allocation2 + $0x219] sm:$0xff] %vm550_vm3, %v1467_v4  ;;  %13314 = vmatmul.mubr.msk.bf16.gmra.mrb[44].mxu1 %vm550_vm3, %v1760_v1  ;;  %v1581_v4 = vld [vmem:[#allocation2] sm:$0xff] }
 0x1b9   : > { %v1469_v6 = vpop.permute.xlu0 %1468  ;;  %13317 = vmatprep.mubr.msk.bf16.mxu1 %vm550_vm3, %v1761_v5  ;;  %v1717_v8 = vld [vmem:[#allocation2 + $0x1f9] sm:$0xff]  ;;  %v1582_v5 = vld [vmem:[#allocation2 + $0x8] sm:$0xff] }
 0x1ba   : > { %1557 = vst.msk [vmem:[#allocation2 + $0x229] sm:$0xff] %vm550_vm3, %v1469_v6 }
 0x1bb   : > { %v1471_v7 = vpop.permute.xlu1 %1470  ;;  %v1718_v9 = vld [vmem:[#allocation2 + $0x201] sm:$0xff] }
 0x1bc   : > { %1558 = vst.msk [vmem:[#allocation2 + $0x231] sm:$0xff] %vm550_vm3, %v1471_v7  ;;  %v1762_v11 = vpack.c.bf16 %v1718_v9, %v1717_v8  ;;  %v1645_v8 = vpack.c.bf16 %v1582_v5, %v1581_v4 }
 0x1bd   : > { %v1473_v10 = vpop.permute.xlu0 %1472  ;;  %v1719_v13 = vld [vmem:[#allocation2 + $0x211] sm:$0xff] }
 0x1be   : > { %1559 = vst.msk [vmem:[#allocation2 + $0x241] sm:$0xff] %vm550_vm3, %v1473_v10  ;;  %v1584_v10 = vld [vmem:[#allocation2 + $0x20] sm:$0xff]  ;;  %v1621_v5 = vld [vmem:[#allocation2 + $0x210] sm:$0xff] }
 0x1bf   : > { %v1475_v12 = vpop.permute.xlu1 %1474  ;;  %v1720_v14 = vld [vmem:[#allocation2 + $0x219] sm:$0xff] }
 0x1c0   : > { %1560 = vst.msk [vmem:[#allocation2 + $0x249] sm:$0xff] %vm550_vm3, %v1475_v12  ;;  %13318 = vmatmul.mubr.msk.bf16.gmra.mrb[48].mxu1 %vm550_vm3, %v1762_v11  ;;  %v1763_v16 = vpack.c.bf16 %v1720_v14, %v1719_v13  ;;  %v1586_v11 = vld [vmem:[#allocation2 + $0x38] sm:$0xff]  ;;  %v1585_v14 = vld [vmem:[#allocation2 + $0x30] sm:$0xff] }
 0x1c1   : > { %v1477_v18 = vpop.permute.xlu0 %1476  ;;  %v1721_v21 = vld [vmem:[#allocation2 + $0x229] sm:$0xff]  ;;  %v1583_v12 = vld [vmem:[#allocation2 + $0x18] sm:$0xff] }
 0x1c2   : > { %1561 = vst.msk [vmem:[#allocation2 + $0x259] sm:$0xff] %vm550_vm3, %v1477_v18  ;;  %13321 = vmatprep.mubr.msk.bf16.mxu1 %vm550_vm3, %v1763_v16  ;;  %v16034_v13 = vpack.c.bf16 %v1584_v10, %v1583_v12  ;;  %v16036_v16 = vpack.c.bf16 %v1586_v11, %v1585_v14  ;;  %v1588_v18 = vld [vmem:[#allocation2 + $0x50] sm:$0xff] }
 0x1c3   : > { %v1479_v20 = vpop.permute.xlu1 %1478  ;;  %v1722_v23 = vld [vmem:[#allocation2 + $0x231] sm:$0xff] }
 0x1c4   : > { %1562 = vst.msk [vmem:[#allocation2 + $0x261] sm:$0xff] %vm550_vm3, %v1479_v20  ;;  %v1764_v26 = vpack.c.bf16 %v1722_v23, %v1721_v21  ;;  %v1590_v20 = vld [vmem:[#allocation2 + $0x68] sm:$0xff] }
 0x1c5   : > { %v1481_v25 = vpop.permute.xlu0 %1480  ;;  %v1723_v28 = vld [vmem:[#allocation2 + $0x241] sm:$0xff] }
 0x1c6   : > { %1563 = vst.msk [vmem:[#allocation2 + $0x271] sm:$0xff] %vm550_vm3, %v1481_v25  ;;  %v1587_v21 = vld [vmem:[#allocation2 + $0x48] sm:$0xff]  ;;  %v1589_v25 = vld [vmem:[#allocation2 + $0x60] sm:$0xff] }
 0x1c7   : > { %v1483_v27 = vpop.permute.xlu1 %1482  ;;  %v1724_v29 = vld [vmem:[#allocation2 + $0x249] sm:$0xff]  ;;  %v16043_v23 = vpack.c.bf16 %v1588_v18, %v1587_v21  ;;  %v1625_v12 = vld [vmem:[#allocation2 + $0x240] sm:$0xff] }
 0x1c8   : > { %1564 = vst.msk [vmem:[#allocation2 + $0x279] sm:$0xff] %vm550_vm3, %v1483_v27  ;;  %13322 = vmatmul.mubr.msk.bf16.gmra.mrb[52].mxu1 %vm550_vm3, %v1764_v26  ;;  %v1765_v30 = vpack.c.bf16 %v1724_v29, %v1723_v28  ;;  %v16045_v26 = vpack.c.bf16 %v1590_v20, %v1589_v25  ;;  %v1592_v27 = vld [vmem:[#allocation2 + $0x80] sm:$0xff]  ;;  %v1594_v28 = vld [vmem:[#allocation2 + $0x98] sm:$0xff]  ;;  %v1626_v10 = vld [vmem:[#allocation2 + $0x248] sm:$0xff] }
 0x1c9   : > { %v1485_v31 = vpop.permute.xlu0 %1484  ;;  %v1725_v34 = vld [vmem:[#allocation2 + $0x259] sm:$0xff]  ;;  %v16117_v14 = vpack.c.bf16 %v1626_v10, %v1625_v12  ;;  %v2569_v10 = vld [vmem:[#allocation2 + $0x6a] sm:$0xff] }
 0x1ca   : > { %1565 = vst.msk [vmem:[#allocation2 + $0x289] sm:$0xff] %vm550_vm3, %v1485_v31  ;;  %13325 = vmatprep.mubr.msk.bf16.mxu1 %vm550_vm3, %v1765_v30  ;;  %v1591_v29 = vld [vmem:[#allocation2 + $0x78] sm:$0xff] }
 0x1cb   : > { %v1487_v32 = vpop.permute.xlu1 %1486  ;;  %v1726_v35 = vld [vmem:[#allocation2 + $0x261] sm:$0xff]  ;;  %v16051_v30 = vpack.c.bf16 %v1592_v27, %v1591_v29  ;;  %v1627_v18 = vld [vmem:[#allocation2 + $0x258] sm:$0xff] }
 0x1cc   : > { %1566 = vst.msk [vmem:[#allocation2 + $0x291] sm:$0xff] %vm550_vm3, %v1487_v32  ;;  %v1766_v39 = vpack.c.bf16 %v1726_v35, %v1725_v34  ;;  %v1596_v32 = vld [vmem:[#allocation2 + $0xb0] sm:$0xff]  ;;  %v1598_v34 = vld [vmem:[#allocation2 + $0xc8] sm:$0xff]  ;;  %v1628_v20 = vld [vmem:[#allocation2 + $0x260] sm:$0xff] }
 0x1cd   : > { %v1489_v36 = vpop.permute.xlu0 %1488  ;;  %v1727_v42 = vld [vmem:[#allocation2 + $0x271] sm:$0xff]  ;;  %v1595_v35 = vld [vmem:[#allocation2 + $0xa8] sm:$0xff]  ;;  %v16123_v25 = vpack.c.bf16 %v1628_v20, %v1627_v18  ;;  %v2570_v20 = vld [vmem:[#allocation2 + $0x7a] sm:$0xff] }
 0x1ce   : > { %1567 = vst.msk [vmem:[#allocation2 + $0x2a1] sm:$0xff] %vm550_vm3, %v1489_v36  ;;  %v16059_v36 = vpack.c.bf16 %v1596_v32, %v1595_v35  ;;  %v1629_v27 = vld [vmem:[#allocation2 + $0x270] sm:$0xff] }
 0x1cf   : > { %v1491_v40 = vpop.permute.xlu1 %1490  ;;  %v1728_v45 = vld [vmem:[#allocation2 + $0x279] sm:$0xff] }
 0x1d0   : > { %1568 = vst.msk [vmem:[#allocation2 + $0x2a9] sm:$0xff] %vm550_vm3, %v1491_v40  ;;  %13326 = vmatmul.mubr.msk.bf16.gmra.mrb[56].mxu1 %vm550_vm3, %v1766_v39  ;;  %v1767_v46 = vpack.c.bf16 %v1728_v45, %v1727_v42  ;;  %v1597_v39 = vld [vmem:[#allocation2 + $0xc0] sm:$0xff]  ;;  %v1602_v45 = vld [vmem:[#allocation2 + $0xf8] sm:$0xff] }
 0x1d1   : > { %v1493_v38 = vpop.permute.xlu0 %1492  ;;  %v1729_v44 = vld [vmem:[#allocation2 + $0x289] sm:$0xff]  ;;  %v16061_v40 = vpack.c.bf16 %v1598_v34, %v1597_v39  ;;  %v1600_v42 = vld [vmem:[#allocation2 + $0xe0] sm:$0xff]  ;;  %v1630_v21 = vld [vmem:[#allocation2 + $0x278] sm:$0xff] }
 0x1d2   : > { %1569 = vst.msk [vmem:[#allocation2 + $0x2b9] sm:$0xff] %vm550_vm3, %v1493_v38  ;;  %13329 = vmatprep.mubr.msk.bf16.mxu1 %vm550_vm3, %v1767_v46  ;;  %v1599_v46 = vld [vmem:[#allocation2 + $0xd8] sm:$0xff]  ;;  %v1631_v29 = vld [vmem:[#allocation2 + $0x288] sm:$0xff] }
 0x1d3   : > { %v1495_v47 = vpop.permute.xlu1 %1494  ;;  %v1730_v48 = vld [vmem:[#allocation2 + $0x291] sm:$0xff]  ;;  %v16067_v38 = vpack.c.bf16 %v1600_v42, %v1599_v46 }
 0x1d4   : > { %1570 = vst.msk [vmem:[#allocation2 + $0x2c1] sm:$0xff] %vm550_vm3, %v1495_v47  ;;  %v1768_v33 = vpack.c.bf16 %v1730_v48, %v1729_v44  ;;  %v1601_v47 = vld [vmem:[#allocation2 + $0xf0] sm:$0xff] }
 0x1d5   : > { %v1497_v49 = vpop.permute.xlu0 %1496  ;;  %v1731_v41 = vld [vmem:[#allocation2 + $0x2a1] sm:$0xff]  ;;  %v16069_v44 = vpack.c.bf16 %v1602_v45, %v1601_v47  ;;  %v1604_v48 = vld [vmem:[#allocation2 + $0x110] sm:$0xff] }
 0x1d6   : > { %1571 = vst.msk [vmem:[#allocation2 + $0x2d1] sm:$0xff] %vm550_vm3, %v1497_v49  ;;  %v1606_v49 = vld [vmem:[#allocation2 + $0x128] sm:$0xff]  ;;  %v1633_v35 = vld [vmem:[#allocation2 + $0x2a0] sm:$0xff] }
 0x1d7   : > { %v1499_v50 = vpop.permute.xlu1 %1498  ;;  %v1732_v61 = vld [vmem:[#allocation2 + $0x2a9] sm:$0xff] }
 0x1d8   : > { %1572 = vst.msk [vmem:[#allocation2 + $0x2d9] sm:$0xff] %vm550_vm3, %v1499_v50  ;;  %13330 = vmatmul.mubr.msk.bf16.gmra.mrb[60].mxu1 %vm550_vm3, %v1768_v33  ;;  %v1769_v51 = vpack.c.bf16 %v1732_v61, %v1731_v41  ;;  %v1603_v33 = vld [vmem:[#allocation2 + $0x108] sm:$0xff]  ;;  %v1605_v41 = vld [vmem:[#allocation2 + $0x120] sm:$0xff] }
 0x1d9   : > { %v1501_v2 = vpop.permute.xlu0 %1500  ;;  %v1733_v53 = vld [vmem:[#allocation2 + $0x2b9] sm:$0xff]  ;;  %v16075_v50 = vpack.c.bf16 %v1604_v48, %v1603_v33  ;;  %v16077_v61 = vpack.c.bf16 %v1606_v49, %v1605_v41  ;;  %v1634_v32 = vld [vmem:[#allocation2 + $0x2a8] sm:$0xff] }
 0x1da   : > { %1573 = vst.msk [vmem:[#allocation2 + $0x2e9] sm:$0xff] %vm550_vm3, %v1501_v2  ;;  %13333 = vmatprep.mubr.msk.bf16.mxu1 %vm550_vm3, %v1769_v51  ;;  %v1608_v51 = vld [vmem:[#allocation2 + $0x140] sm:$0xff]  ;;  %v1610_v2 = vld [vmem:[#allocation2 + $0x158] sm:$0xff]  ;;  %v16133_v39 = vpack.c.bf16 %v1634_v32, %v1633_v35  ;;  %v2574_v32 = vld [vmem:[#allocation2 + $0xaa] sm:$0xff] }
 0x1db   : > { %v1503_v52 = vpop.permute.xlu1 %1502  ;;  %v1734_v57 = vld [vmem:[#allocation2 + $0x2c1] sm:$0xff]  ;;  %v1635_v42 = vld [vmem:[#allocation2 + $0x2b8] sm:$0xff] }
 0x1dc   : > { %1574 = vst.msk [vmem:[#allocation2 + $0x2f1] sm:$0xff] %vm550_vm3, %v1503_v52  ;;  %v1770_v0 = vpack.c.bf16 %v1734_v57, %v1733_v53  ;;  %v1607_v52 = vld [vmem:[#allocation2 + $0x138] sm:$0xff]  ;;  %v1609_v57 = vld [vmem:[#allocation2 + $0x150] sm:$0xff]  ;;  %v1636_v45 = vld [vmem:[#allocation2 + $0x2c0] sm:$0xff] }
 0x1dd   : > { %v1505_v54 = vpop.permute.xlu0 %1504  ;;  %v1735_v55 = vld [vmem:[#allocation2 + $0x2d1] sm:$0xff]  ;;  %v16083_v53 = vpack.c.bf16 %v1608_v51, %v1607_v52  ;;  %v16139_v47 = vpack.c.bf16 %v1636_v45, %v1635_v42  ;;  %v2576_v42 = vld [vmem:[#allocation2 + $0xc2] sm:$0xff] }
 0x1de   : > { %1575 = vst.msk [vmem:[#allocation2 + $0x301] sm:$0xff] %vm550_vm3, %v1505_v54  ;;  %v16085_v54 = vpack.c.bf16 %v1610_v2, %v1609_v57  ;;  %v1637_v48 = vld [vmem:[#allocation2 + $0x2d0] sm:$0xff] }
 0x1df   : > { %v1507_v19 = vpop.permute.xlu1 %1506  ;;  %v1736_v24 = vld [vmem:[#allocation2 + $0x2d9] sm:$0xff]  ;;  %v2577_v45 = vld [vmem:[#allocation2 + $0xca] sm:$0xff] }
 0x1e0   : > { %1576 = vst.msk [vmem:[#allocation2 + $0x309] sm:$0xff] %vm550_vm3, %v1507_v19  ;;  %13334 = vmatmul.mubr.msk.bf16.gmra.mrb[64].mxu1 %vm550_vm3, %v1770_v0  ;;  %v1771_v15 = vpack.c.bf16 %v1736_v24, %v1735_v55  ;;  %v1613_v0 = vld [vmem:[#allocation2 + $0x1b0] sm:$0xff]  ;;  %v1614_v19 = vld [vmem:[#allocation2 + $0x1b8] sm:$0xff]  ;;  %v1611_v24 = vld [vmem:[#allocation2 + $0x168] sm:$0xff] }
 0x1e1   : > { %v1509_v56 = vpop.permute.xlu0 %1508  ;;  %v1737_v22 = vld [vmem:[#allocation2 + $0x2e9] sm:$0xff]  ;;  %v1638_v46 = vld [vmem:[#allocation2 + $0x2d8] sm:$0xff] }
 0x1e2   : > { %1577 = vst.msk [vmem:[#allocation2 + $0x319] sm:$0xff] %vm550_vm3, %v1509_v56  ;;  %13337 = vmatprep.mubr.msk.bf16.mxu1 %vm550_vm3, %v1771_v15  ;;  %v1612_v55 = vld [vmem:[#allocation2 + $0x170] sm:$0xff]  ;;  %v1661_v15 = vpack.c.bf16 %v1614_v19, %v1613_v0  ;;  %v16141_v49 = vpack.c.bf16 %v1638_v46, %v1637_v48  ;;  %v1639_v33 = vld [vmem:[#allocation2 + $0x2e8] sm:$0xff]  ;;  %v16186_v48 = vpack.c.bf16 %v2577_v45, %v2576_v42 }
 0x1e3   : > { %v1511_v43 = vpop.permute.xlu1 %1510  ;;  %v1738_v58 = vld [vmem:[#allocation2 + $0x2f1] sm:$0xff]  ;;  %v16091_v56 = vpack.c.bf16 %v1612_v55, %v1611_v24  ;;  %v2560_v0 = vld [vmem:[#allocation2 + $0x2] sm:$0xff] }
 0x1e4   : > { %1578 = vst.msk [vmem:[#allocation2 + $0x321] sm:$0xff] %vm550_vm3, %v1511_v43  ;;  %v1772_v60 = vpack.c.bf16 %v1738_v58, %v1737_v22  ;;  %v1616_v43 = vld [vmem:[#allocation2 + $0x1d0] sm:$0xff]  ;;  %v1618_v22 = vld [vmem:[#allocation2 + $0x1e8] sm:$0xff] }
 0x1e5   : > { %v1513_v59 = vpop.permute.xlu0 %1512  ;;  %v1739_v63 = vld [vmem:[#allocation2 + $0x301] sm:$0xff]  ;;  %v1640_v41 = vld [vmem:[#allocation2 + $0x2f0] sm:$0xff] }
 0x1e6   : > { %1579 = vst.msk [vmem:[#allocation2 + $0x331] sm:$0xff] %vm550_vm3, %v1513_v59  ;;  %v1615_v58 = vld [vmem:[#allocation2 + $0x1c8] sm:$0xff]  ;;  %v16147_v2 = vpack.c.bf16 %v1640_v41, %v1639_v33  ;;  %v1641_v52 = vld [vmem:[#allocation2 + $0x300] sm:$0xff]  ;;  %v2575_v35 = vld [vmem:[#allocation2 + $0xb2] sm:$0xff] }
 0x1e7   : > { %v1515_v62 = vpop.permute.xlu1 %1514  ;;  %v1740_v1 = vld [vmem:[#allocation2 + $0x309] sm:$0xff]  ;;  %v16096_v59 = vpack.c.bf16 %v1616_v43, %v1615_v58  ;;  %v16184_v46 = vpack.c.bf16 %v2575_v35, %v2574_v32  ;;  %v2578_v33 = vld [vmem:[#allocation2 + $0xda] sm:$0xff]  ;;  %v2591_v32 = vld [vmem:[#allocation2 + $0x172] sm:$0xff] }
 0x1e8   : > { %1580 = vst.msk [vmem:[#allocation2 + $0x339] sm:$0xff] %vm550_vm3, %v1515_v62  ;;  %13338 = vmatmul.mubr.msk.bf16.gmra.mrb[68].mxu1 %vm550_vm3, %v1772_v60  ;;  %v1773_v3 = vpack.c.bf16 %v1740_v1, %v1739_v63  ;;  %v1617_v60 = vld [vmem:[#allocation2 + $0x1e0] sm:$0xff]  ;;  %v1619_v63 = vld [vmem:[#allocation2 + $0x1f8] sm:$0xff]  ;;  %v1642_v51 = vld [vmem:[#allocation2 + $0x308] sm:$0xff] }
 0x1e9   : > { %v1741_v6 = vld [vmem:[#allocation2 + $0x319] sm:$0xff]  ;;  %v16098_v62 = vpack.c.bf16 %v1618_v22, %v1617_v60  ;;  %v16149_v57 = vpack.c.bf16 %v1642_v51, %v1641_v52  ;;  %v2561_v19 = vld [vmem:[#allocation2 + $0xa] sm:$0xff]  ;;  %v2563_v58 = vld [vmem:[#allocation2 + $0x22] sm:$0xff] }
 0x1ea   : > { %13341 = vmatprep.mubr.msk.bf16.mxu1 %vm550_vm3, %v1773_v3  ;;  %v1620_v1 = vld [vmem:[#allocation2 + $0x200] sm:$0xff]  ;;  %v1622_v3 = vld [vmem:[#allocation2 + $0x218] sm:$0xff]  ;;  %v2594_v45 = vld [vmem:[#allocation2 + $0x1ca] sm:$0xff] }
 0x1eb   : > { %v1742_v7 = vld [vmem:[#allocation2 + $0x321] sm:$0xff]  ;;  %v16104_v4 = vpack.c.bf16 %v1620_v1, %v1619_v63  ;;  %v1643_v55 = vld [vmem:[#allocation2 + $0x318] sm:$0xff] }
 0x1ec   : > { %v1774_v9 = vpack.c.bf16 %v1742_v7, %v1741_v6  ;;  %v16106_v6 = vpack.c.bf16 %v1622_v3, %v1621_v5  ;;  %v15396_v7 = vld [vmem:[%s18064_s3 + $0x18] sm:$0xff]   ;;  %v1644_v24 = vld [vmem:[#allocation2 + $0x320] sm:$0xff]  ;;  %v2566_v5 = vld [vmem:[#allocation2 + $0x4a] sm:$0xff] }
 0x1ed   : > { %v16155_v43 = vpack.c.bf16 %v1644_v24, %v1643_v55  ;;  %v2562_v22 = vld [vmem:[#allocation2 + $0x1a] sm:$0xff]  ;;  %v2564_v60 = vld [vmem:[#allocation2 + $0x32] sm:$0xff]  ;;  %v2579_v41 = vld [vmem:[#allocation2 + $0xe2] sm:$0xff] }
 0x1ee   : > { %v2565_v63 = vld [vmem:[#allocation2 + $0x3a] sm:$0xff]  ;;  %v16160_v1 = vpack.c.bf16 %v2563_v58, %v2562_v22  ;;  %v2580_v51 = vld [vmem:[#allocation2 + $0xf2] sm:$0xff]  ;;  %v2582_v55 = vld [vmem:[#allocation2 + $0x10a] sm:$0xff] }
 0x1ef   : > { %v16162_v3 = vpack.c.bf16 %v2565_v63, %v2564_v60  ;;  %v2581_v52 = vld [vmem:[#allocation2 + $0xfa] sm:$0xff]  ;;  %v2583_v24 = vld [vmem:[#allocation2 + $0x112] sm:$0xff]  ;;  %v2585_v22 = vld [vmem:[#allocation2 + $0x12a] sm:$0xff] }
 0x1f0   : > { %13342 = vmatmul.mubr.msk.bf16.gmra.mrb[72].mxu1 %vm550_vm3, %v1774_v9  ;;  %v1624_v9 = vld [vmem:[#allocation2 + $0x230] sm:$0xff]  ;;  %v16200_v58 = vpack.c.bf16 %v2583_v24, %v2582_v55  ;;  %v2586_v63 = vld [vmem:[#allocation2 + $0x13a] sm:$0xff] }
 0x1f1   : > { %13347 = vmatprep.mubr.msk.bf16.mxu1 %vm550_vm3, %v1645_v8  ;;  %v1623_v8 = vld [vmem:[#allocation2 + $0x228] sm:$0xff]  ;;  %v2598_v24 = vld [vmem:[#allocation2 + $0x1fa] sm:$0xff] }
 0x1f2   : > { %v16115_v11 = vpack.c.bf16 %v1624_v9, %v1623_v8  ;;  %v2567_v8 = vld [vmem:[#allocation2 + $0x52] sm:$0xff]  ;;  %v2568_v9 = vld [vmem:[#allocation2 + $0x62] sm:$0xff] }
 0x1f3   : > { %v16168_v12 = vpack.c.bf16 %v2567_v8, %v2566_v5  ;;  %v16170_v18 = vpack.c.bf16 %v2569_v10, %v2568_v9  ;;  %v2587_v5 = vld [vmem:[#allocation2 + $0x142] sm:$0xff]  ;;  %v2588_v8 = vld [vmem:[#allocation2 + $0x152] sm:$0xff]  ;;  %v2589_v9 = vld [vmem:[#allocation2 + $0x15a] sm:$0xff] }
 0x1f4   : > { %v16208_v10 = vpack.c.bf16 %v2587_v5, %v2586_v63  ;;  %v2601_v63 = vld [vmem:[#allocation2 + $0x21a] sm:$0xff] }
 0x1f8   : > { %13348 = vmatmul.mubr.msk.bf16.vlgmr.msra.gmra.mrb[12].mxu1 %vm550_vm3, %v16034_v13 }
 0x1f9   : > { %13351 = vmatprep.mubr.msk.bf16.mxu1 %vm550_vm3, %v16036_v16  ;;  %13412 = vmatpush3.bf16.msra.mxu1 %v15998_v17  ;;  %v1593_v17 = vld [vmem:[#allocation2 + $0x90] sm:$0xff] }
 0x1fa   : > { %v16053_v31 = vpack.c.bf16 %v1594_v28, %v1593_v17  ;;  %13477 = vmatprep.subr.bf16.mxu1 %v15396_v7  ;;  %v16125_v28 = vpack.c.bf16 %v1630_v21, %v1629_v27  ;;  %v1632_v17 = vld [vmem:[#allocation2 + $0x290] sm:$0xff]  ;;  %v2571_v21 = vld [vmem:[#allocation2 + $0x82] sm:$0xff] }
 0x1fb   : > { %v16131_v34 = vpack.c.bf16 %v1632_v17, %v1631_v29  ;;  %v2572_v27 = vld [vmem:[#allocation2 + $0x92] sm:$0xff]  ;;  %v2573_v29 = vld [vmem:[#allocation2 + $0x9a] sm:$0xff]  ;;  %v16176_v17 = vpack.c.bf16 %v2571_v21, %v2570_v20  ;;  %v16210_v20 = vpack.c.bf16 %v2589_v9, %v2588_v8 }
 0x1fc   : > { %v2592_v21 = vld [vmem:[#allocation2 + $0x1b2] sm:$0xff]  ;;  %v15397_v9 = vld [vmem:[%s18064_s3 + $0x20] sm:$0xff]  }
 0x200   : > { %13352 = vmatmul.mubr.msk.bf16.gmra.mrb[16].mxu1 %vm550_vm3, %v16043_v23 }
 0x201   : > { %13355 = vmatprep.mubr.msk.bf16.mxu1 %vm550_vm3, %v16045_v26 }
 0x208   : > { %13356 = vmatmul.mubr.msk.bf16.gmra.mrb[20].mxu1 %vm550_vm3, %v16051_v30 }
 0x209   : > { %13359 = vmatprep.mubr.msk.bf16.mxu1 %vm550_vm3, %v16053_v31 }
 0x210   : > { %13360 = vmatmul.mubr.msk.bf16.gmra.mrb[24].mxu1 %vm550_vm3, %v16059_v36 }
 0x211   : > { %13363 = vmatprep.mubr.msk.bf16.mxu1 %vm550_vm3, %v16061_v40 }
 0x218   : > { %13364 = vmatmul.mubr.msk.bf16.gmra.mrb[28].mxu1 %vm550_vm3, %v16067_v38 }
 0x219   : > { %13367 = vmatprep.mubr.msk.bf16.mxu1 %vm550_vm3, %v16069_v44 }
 0x220   : > { %13368 = vmatmul.mubr.msk.bf16.gmra.mrb[32].mxu1 %vm550_vm3, %v16075_v50 }
 0x221   : > { %13371 = vmatprep.mubr.msk.bf16.mxu1 %vm550_vm3, %v16077_v61 }
 0x228   : > { %13372 = vmatmul.mubr.msk.bf16.gmra.mrb[36].mxu1 %vm550_vm3, %v16083_v53 }
 0x229   : > { %13375 = vmatprep.mubr.msk.bf16.mxu1 %vm550_vm3, %v16085_v54 }
 0x230   : > { %13376 = vmatmul.mubr.msk.bf16.gmra.mrb[40].mxu1 %vm550_vm3, %v16091_v56 }
 0x231   : > { %13379 = vmatprep.mubr.msk.bf16.mxu1 %vm550_vm3, %v1661_v15  ;;  %v2624_v15 = vpack.c.bf16 %v2561_v19, %v2560_v0  ;;  %v16192_v0 = vpack.c.bf16 %v2579_v41, %v2578_v33  ;;  %v16194_v19 = vpack.c.bf16 %v2581_v52, %v2580_v51  ;;  %v2595_v33 = vld [vmem:[#allocation2 + $0x1d2] sm:$0xff]  ;;  %v2596_v41 = vld [vmem:[#allocation2 + $0x1e2] sm:$0xff]  ;;  %v2597_v51 = vld [vmem:[#allocation2 + $0x1ea] sm:$0xff] }
 0x232   : > { %v16221_v52 = vpack.c.bf16 %v2595_v33, %v2594_v45  ;;  %v16223_v55 = vpack.c.bf16 %v2597_v51, %v2596_v41  ;;  %v2606_v33 = vld [vmem:[#allocation2 + $0x25a] sm:$0xff]  ;;  %v2607_v41 = vld [vmem:[#allocation2 + $0x262] sm:$0xff]  ;;  %v2608_v51 = vld [vmem:[#allocation2 + $0x272] sm:$0xff] }
 0x238   : > { %13380 = vmatmul.mubr.msk.bf16.gmra.mrb[44].mxu1 %vm550_vm3, %v16096_v59 }
 0x239   : > { %13383 = vmatprep.mubr.msk.bf16.mxu1 %vm550_vm3, %v16098_v62 }
 0x240   : > { %13384 = vmatmul.mubr.msk.bf16.gmra.mrb[48].mxu1 %vm550_vm3, %v16104_v4 }
 0x241   : > { %13387 = vmatprep.mubr.msk.bf16.mxu1 %vm550_vm3, %v16106_v6 }
 0x248   : > { %13388 = vmatmul.mubr.msk.bf16.gmra.mrb[52].mxu1 %vm550_vm3, %v16115_v11 }
 0x249   : > { %13391 = vmatprep.mubr.msk.bf16.mxu1 %vm550_vm3, %v16117_v14 }
 0x250   : > { %13392 = vmatmul.mubr.msk.bf16.gmra.mrb[56].mxu1 %vm550_vm3, %v16123_v25 }
 0x251   : > { %13395 = vmatprep.mubr.msk.bf16.mxu1 %vm550_vm3, %v16125_v28 }
 0x258   : > { %13396 = vmatmul.mubr.msk.bf16.gmra.mrb[60].mxu1 %vm550_vm3, %v16131_v34 }
 0x259   : > { %13399 = vmatprep.mubr.msk.bf16.mxu1 %vm550_vm3, %v16133_v39 }
 0x260   : > { %13400 = vmatmul.mubr.msk.bf16.gmra.mrb[64].mxu1 %vm550_vm3, %v16139_v47 }
 0x261   : > { %13403 = vmatprep.mubr.msk.bf16.mxu1 %vm550_vm3, %v16141_v49 }
 0x268   : > { %13404 = vmatmul.mubr.msk.bf16.gmra.mrb[68].mxu1 %vm550_vm3, %v16147_v2 }
 0x269   : > { %13407 = vmatprep.mubr.msk.bf16.mxu1 %vm550_vm3, %v16149_v57 }
 0x270   : > { %13408 = vmatmul.mubr.msk.bf16.gmra.mrb[72].mxu1 %vm550_vm3, %v16155_v43 }
 0x271   : > { %13413 = vmatprep.mubr.msk.bf16.mxu1 %vm550_vm3, %v2624_v15  ;;  %v2584_v15 = vld [vmem:[#allocation2 + $0x122] sm:$0xff] }
 0x272   : > { %v16202_v60 = vpack.c.bf16 %v2585_v22, %v2584_v15  ;;  %v2599_v15 = vld [vmem:[#allocation2 + $0x202] sm:$0xff]  ;;  %v2600_v22 = vld [vmem:[#allocation2 + $0x212] sm:$0xff] }
 0x273   : > { %v16229_v5 = vpack.c.bf16 %v2599_v15, %v2598_v24  ;;  %v16231_v8 = vpack.c.bf16 %v2601_v63, %v2600_v22  ;;  %v2609_v24 = vld [vmem:[#allocation2 + $0x27a] sm:$0xff]  ;;  %v16248_v15 = vpack.c.bf16 %v2607_v41, %v2606_v33  ;;  %v2610_v63 = vld [vmem:[#allocation2 + $0x28a] sm:$0xff]  ;;  %v2615_v41 = vld [vmem:[#allocation2 + $0x2c2] sm:$0xff] }
 0x274   : > { %v16250_v22 = vpack.c.bf16 %v2609_v24, %v2608_v51  ;;  %v2614_v33 = vld [vmem:[#allocation2 + $0x2ba] sm:$0xff]  ;;  %v2616_v51 = vld [vmem:[#allocation2 + $0x2d2] sm:$0xff] }
 0x275   : > { %18092 = vst [vmem:[#allocation4_spill] sm:$0xff] %v16248_v15  ;;  %v2617_v24 = vld [vmem:[#allocation2 + $0x2da] sm:$0xff] }
 0x276   : > { %18093 = vst [vmem:[#allocation5_spill] sm:$0xff] %v16250_v22 }
 0x278   : > { %13414 = vmatmul.mubr.msk.bf16.vlgmr.msra.gmra.mrb[12].mxu1 %vm550_vm3, %v16160_v1 }
 0x279   : > { %13417 = vmatprep.mubr.msk.bf16.mxu1 %vm550_vm3, %v16162_v3  ;;  %13478 = vmatpush3.bf16.msra.mxu1 %v15396_v7  ;;  %v16178_v7 = vpack.c.bf16 %v2573_v29, %v2572_v27  ;;  %v2593_v27 = vld [vmem:[#allocation2 + $0x1ba] sm:$0xff]  ;;  %v2590_v29 = vld [vmem:[#allocation2 + $0x16a] sm:$0xff] }
 0x27a   : > { %v2640_v35 = vpack.c.bf16 %v2593_v27, %v2592_v21  ;;  %v16216_v42 = vpack.c.bf16 %v2591_v32, %v2590_v29  ;;  %13543 = vmatprep.subr.bf16.mxu1 %v15397_v9  ;;  %v2602_v21 = vld [vmem:[#allocation2 + $0x22a] sm:$0xff]  ;;  %v2603_v27 = vld [vmem:[#allocation2 + $0x232] sm:$0xff]  ;;  %v2604_v29 = vld [vmem:[#allocation2 + $0x242] sm:$0xff] }
 0x27b   : > { %v2605_v32 = vld [vmem:[#allocation2 + $0x24a] sm:$0xff] }
 0x27c   : > { %v16242_v45 = vpack.c.bf16 %v2605_v32, %v2604_v29  ;;  %v2613_v29 = vld [vmem:[#allocation2 + $0x2aa] sm:$0xff] }
 0x280   : > { %13418 = vmatmul.mubr.msk.bf16.gmra.mrb[16].mxu1 %vm550_vm3, %v16168_v12 }
 0x281   : > { %13421 = vmatprep.mubr.msk.bf16.mxu1 %vm550_vm3, %v16170_v18 }
 0x288   : > { %13422 = vmatmul.mubr.msk.bf16.gmra.mrb[20].mxu1 %vm550_vm3, %v16176_v17 }
 0x289   : > { %13425 = vmatprep.mubr.msk.bf16.mxu1 %vm550_vm3, %v16178_v7 }
 0x290   : > { %13426 = vmatmul.mubr.msk.bf16.gmra.mrb[24].mxu1 %vm550_vm3, %v16184_v46 }
 0x291   : > { %13429 = vmatprep.mubr.msk.bf16.mxu1 %vm550_vm3, %v16186_v48 }
 0x298   : > { %13430 = vmatmul.mubr.msk.bf16.gmra.mrb[28].mxu1 %vm550_vm3, %v16192_v0 }
 0x299   : > { %13433 = vmatprep.mubr.msk.bf16.mxu1 %vm550_vm3, %v16194_v19 }
 0x2a0   : > { %13434 = vmatmul.mubr.msk.bf16.gmra.mrb[32].mxu1 %vm550_vm3, %v16200_v58 }
 0x2a1   : > { %13437 = vmatprep.mubr.msk.bf16.mxu1 %vm550_vm3, %v16202_v60 }
 0x2a8   : > { %13438 = vmatmul.mubr.msk.bf16.gmra.mrb[36].mxu1 %vm550_vm3, %v16208_v10 }
 0x2a9   : > { %13441 = vmatprep.mubr.msk.bf16.mxu1 %vm550_vm3, %v16210_v20 }
 0x2b0   : > { %13442 = vmatmul.mubr.msk.bf16.gmra.mrb[40].mxu1 %vm550_vm3, %v16216_v42 }
 0x2b1   : > { %13445 = vmatprep.mubr.msk.bf16.mxu1 %vm550_vm3, %v2640_v35  ;;  %v16240_v35 = vpack.c.bf16 %v2603_v27, %v2602_v21  ;;  %v2611_v21 = vld [vmem:[#allocation2 + $0x292] sm:$0xff]  ;;  %v2612_v27 = vld [vmem:[#allocation2 + $0x2a2] sm:$0xff] }
 0x2b2   : > { %v16256_v32 = vpack.c.bf16 %v2611_v21, %v2610_v63  ;;  %v16258_v37 = vpack.c.bf16 %v2613_v29, %v2612_v27  ;;  %v2618_v63 = vld [vmem:[#allocation2 + $0x2ea] sm:$0xff]  ;;  %v2619_v21 = vld [vmem:[#allocation2 + $0x2f2] sm:$0xff]  ;;  %v2620_v27 = vld [vmem:[#allocation2 + $0x302] sm:$0xff] }
 0x2b3   : > { %v2621_v29 = vld [vmem:[#allocation2 + $0x30a] sm:$0xff] }
 0x2b4   : > { %18094 = vst [vmem:[#allocation6_spill] sm:$0xff] %v16256_v32  ;;  %18095 = vst [vmem:[#allocation7_spill] sm:$0xff] %v16258_v37 }
 0x2b8   : > { %13446 = vmatmul.mubr.msk.bf16.gmra.mrb[44].mxu1 %vm550_vm3, %v16221_v52 }
 0x2b9   : > { %13449 = vmatprep.mubr.msk.bf16.mxu1 %vm550_vm3, %v16223_v55 }
 0x2c0   : > { %13450 = vmatmul.mubr.msk.bf16.gmra.mrb[48].mxu1 %vm550_vm3, %v16229_v5 }
 0x2c1   : > { %13453 = vmatprep.mubr.msk.bf16.mxu1 %vm550_vm3, %v16231_v8 }
 0x2c8   : > { %13454 = vmatmul.mubr.msk.bf16.gmra.mrb[52].mxu1 %vm550_vm3, %v16240_v35 }
 0x2c9   : > { %13457 = vmatprep.mubr.msk.bf16.mxu1 %vm550_vm3, %v16242_v45 }
 0x2d0   : > { %13458 = vmatmul.mubr.msk.bf16.gmra.mrb[56].mxu1 %vm550_vm3, %v16248_v15  ;;  %v16264_v15 = vpack.c.bf16 %v2615_v41, %v2614_v33  ;;  %v2622_v33 = vld [vmem:[#allocation2 + $0x31a] sm:$0xff]  ;;  %v2623_v41 = vld [vmem:[#allocation2 + $0x322] sm:$0xff] }
 0x2d1   : > { %13461 = vmatprep.mubr.msk.bf16.mxu1 %vm550_vm3, %v16250_v22  ;;  %v16266_v22 = vpack.c.bf16 %v2617_v24, %v2616_v51  ;;  %v16280_v51 = vpack.c.bf16 %v2623_v41, %v2622_v33  ;;  %v3686_v33 = vld [vmem:[#allocation2 + $0xf1] sm:$0xff] }
 0x2d8   : > { %13462 = vmatmul.mubr.msk.bf16.gmra.mrb[60].mxu1 %vm550_vm3, %v16256_v32  ;;  %v16272_v32 = vpack.c.bf16 %v2619_v21, %v2618_v63  ;;  %v3684_v63 = vld [vmem:[#allocation2 + $0xd9] sm:$0xff] }
 0x2d9   : > { %13465 = vmatprep.mubr.msk.bf16.mxu1 %vm550_vm3, %v16258_v37  ;;  %v16274_v37 = vpack.c.bf16 %v2621_v29, %v2620_v27  ;;  %v3687_v27 = vld [vmem:[#allocation2 + $0xf9] sm:$0xff]  ;;  %v3689_v29 = vld [vmem:[#allocation2 + $0x111] sm:$0xff] }
 0x2da   : > { %v16388_v41 = vpack.c.bf16 %v3687_v27, %v3686_v33  ;;  %v3707_v33 = vld [vmem:[#allocation2 + $0x219] sm:$0xff] }
 0x2e0   : > { %13466 = vmatmul.mubr.msk.bf16.gmra.mrb[64].mxu1 %vm550_vm3, %v16264_v15 }
 0x2e1   : > { %13469 = vmatprep.mubr.msk.bf16.mxu1 %vm550_vm3, %v16266_v22 }
 0x2e8   : > { %13470 = vmatmul.mubr.msk.bf16.gmra.mrb[68].mxu1 %vm550_vm3, %v16272_v32 }
 0x2e9   : > { %13473 = vmatprep.mubr.msk.bf16.mxu1 %vm550_vm3, %v16274_v37 }
 0x2f0   : > { %13474 = vmatmul.mubr.msk.bf16.gmra.mrb[72].mxu1 %vm550_vm3, %v16280_v51 }
 0x2f1   : > { %13479 = vmatprep.mubr.msk.bf16.mxu1 %vm550_vm3, %v16034_v13  ;;  %v3145_v13 = vld [vmem:[#allocation2 + $0x188] sm:$0xff] }
 0x2f8   : > { %13480 = vmatmul.mubr.msk.bf16.vlgmr.msra.gmra.mrb[12].mxu1 %vm550_vm3, %v16036_v16  ;;  %v3144_v16 = vld [vmem:[#allocation2 + $0x180] sm:$0xff] }
 0x2f9   : > { %13483 = vmatprep.mubr.msk.bf16.mxu1 %vm550_vm3, %v16043_v23  ;;  %13544 = vmatpush3.bf16.msra.mxu1 %v15397_v9  ;;  %v16314_v23 = vpack.c.bf16 %v3145_v13, %v3144_v16  ;;  %v3682_v9 = vld [vmem:[#allocation2 + $0xc1] sm:$0xff]  ;;  %v3688_v13 = vld [vmem:[#allocation2 + $0x109] sm:$0xff] }
 0x2fa   : > { %v16390_v16 = vpack.c.bf16 %v3689_v29, %v3688_v13  ;;  %v3708_v13 = vld [vmem:[#allocation2 + $0x229] sm:$0xff] }
 0x300   : > { %13484 = vmatmul.mubr.msk.bf16.gmra.mrb[16].mxu1 %vm550_vm3, %v16045_v26  ;;  %v15398_v26 = vld [vmem:[%s18064_s3 + $0x28] sm:$0xff]  }
 0x301   : > { %13487 = vmatprep.mubr.msk.bf16.mxu1 %vm550_vm3, %v16051_v30  ;;  %13609 = vmatprep.subr.bf16.mxu1 %v15398_v26  ;;  %v3177_v30 = vld [vmem:[#allocation2 + $0x338] sm:$0xff] }
 0x308   : > { %13488 = vmatmul.mubr.msk.bf16.gmra.mrb[20].mxu1 %vm550_vm3, %v16053_v31  ;;  %v3669_v31 = vld [vmem:[#allocation2 + $0x21] sm:$0xff] }
 0x309   : > { %13491 = vmatprep.mubr.msk.bf16.mxu1 %vm550_vm3, %v16059_v36  ;;  %v3176_v36 = vld [vmem:[#allocation2 + $0x330] sm:$0xff] }
 0x310   : > { %13492 = vmatmul.mubr.msk.bf16.gmra.mrb[24].mxu1 %vm550_vm3, %v16061_v40  ;;  %v16351_v40 = vpack.c.bf16 %v3177_v30, %v3176_v36  ;;  %v3693_v30 = vld [vmem:[#allocation2 + $0x141] sm:$0xff] }
 0x311   : > { %13495 = vmatprep.mubr.msk.bf16.mxu1 %vm550_vm3, %v16067_v38  ;;  %v3668_v38 = vld [vmem:[#allocation2 + $0x19] sm:$0xff] }
 0x318   : > { %13496 = vmatmul.mubr.msk.bf16.gmra.mrb[28].mxu1 %vm550_vm3, %v16069_v44  ;;  %v3732_v44 = vpack.c.bf16 %v3669_v31, %v3668_v38  ;;  %v3690_v31 = vld [vmem:[#allocation2 + $0x121] sm:$0xff]  ;;  %v3692_v38 = vld [vmem:[#allocation2 + $0x139] sm:$0xff] }
 0x319   : > { %13499 = vmatprep.mubr.msk.bf16.mxu1 %vm550_vm3, %v16075_v50  ;;  %v3671_v50 = vld [vmem:[#allocation2 + $0x39] sm:$0xff] }
 0x320   : > { %13500 = vmatmul.mubr.msk.bf16.gmra.mrb[32].mxu1 %vm550_vm3, %v16077_v61  ;;  %v3673_v61 = vld [vmem:[#allocation2 + $0x51] sm:$0xff] }
 0x321   : > { %13503 = vmatprep.mubr.msk.bf16.mxu1 %vm550_vm3, %v16083_v53  ;;  %v3670_v53 = vld [vmem:[#allocation2 + $0x31] sm:$0xff] }
 0x328   : > { %13504 = vmatmul.mubr.msk.bf16.gmra.mrb[36].mxu1 %vm550_vm3, %v16085_v54  ;;  %v16356_v54 = vpack.c.bf16 %v3671_v50, %v3670_v53  ;;  %v3695_v50 = vld [vmem:[#allocation2 + $0x159] sm:$0xff]  ;;  %v3694_v53 = vld [vmem:[#allocation2 + $0x151] sm:$0xff] }
 0x329   : > { %13507 = vmatprep.mubr.msk.bf16.mxu1 %vm550_vm3, %v16091_v56  ;;  %v3672_v56 = vld [vmem:[#allocation2 + $0x49] sm:$0xff] }
 0x330   : > { %13508 = vmatmul.mubr.msk.bf16.gmra.mrb[40].mxu1 %vm550_vm3, %v16314_v23 }
 0x331   : > { %13511 = vmatprep.mubr.msk.bf16.mxu1 %vm550_vm3, %v16096_v59  ;;  %v16358_v59 = vpack.c.bf16 %v3673_v61, %v3672_v56  ;;  %v3697_v61 = vld [vmem:[#allocation2 + $0x171] sm:$0xff]  ;;  %v16404_v56 = vpack.c.bf16 %v3695_v50, %v3694_v53  ;;  %v3712_v53 = vld [vmem:[#allocation2 + $0x259] sm:$0xff] }
 0x332   : > { %v15399_v50 = vld [vmem:[%s18064_s3 + $0x30] sm:$0xff]  }
 0x338   : > { %13512 = vmatmul.mubr.msk.bf16.gmra.mrb[44].mxu1 %vm550_vm3, %v16098_v62  ;;  %v3675_v62 = vld [vmem:[#allocation2 + $0x69] sm:$0xff] }
 0x339   : > { %13515 = vmatprep.mubr.msk.bf16.mxu1 %vm550_vm3, %v16104_v4  ;;  %v3677_v4 = vld [vmem:[#allocation2 + $0x81] sm:$0xff] }
 0x340   : > { %13516 = vmatmul.mubr.msk.bf16.gmra.mrb[48].mxu1 %vm550_vm3, %v16106_v6  ;;  %v3674_v6 = vld [vmem:[#allocation2 + $0x61] sm:$0xff] }
 0x341   : > { %13519 = vmatprep.mubr.msk.bf16.mxu1 %vm550_vm3, %v16115_v11  ;;  %v16364_v11 = vpack.c.bf16 %v3675_v62, %v3674_v6  ;;  %v3696_v62 = vld [vmem:[#allocation2 + $0x169] sm:$0xff] }
 0x342   : > { %v3699_v6 = vld [vmem:[#allocation2 + $0x189] sm:$0xff] }
 0x348   : > { %13520 = vmatmul.mubr.msk.bf16.gmra.mrb[52].mxu1 %vm550_vm3, %v16117_v14  ;;  %v3676_v14 = vld [vmem:[#allocation2 + $0x79] sm:$0xff] }
 0x349   : > { %13523 = vmatprep.mubr.msk.bf16.mxu1 %vm550_vm3, %v16123_v25  ;;  %v16366_v25 = vpack.c.bf16 %v3677_v4, %v3676_v14  ;;  %v16406_v4 = vpack.c.bf16 %v3697_v61, %v3696_v62  ;;  %v3701_v14 = vld [vmem:[#allocation2 + $0x1d1] sm:$0xff]  ;;  %v3711_v61 = vld [vmem:[#allocation2 + $0x249] sm:$0xff]  ;;  %v3713_v62 = vld [vmem:[#allocation2 + $0x261] sm:$0xff] }
 0x350   : > { %13524 = vmatmul.mubr.msk.bf16.gmra.mrb[56].mxu1 %vm550_vm3, %v16125_v28  ;;  %v3679_v28 = vld [vmem:[#allocation2 + $0x99] sm:$0xff] }
 0x351   : > { %13527 = vmatprep.mubr.msk.bf16.mxu1 %vm550_vm3, %v16131_v34  ;;  %v3681_v34 = vld [vmem:[#allocation2 + $0xb1] sm:$0xff] }
 0x358   : > { %13528 = vmatmul.mubr.msk.bf16.gmra.mrb[60].mxu1 %vm550_vm3, %v16133_v39  ;;  %v3678_v39 = vld [vmem:[#allocation2 + $0x91] sm:$0xff] }
 0x359   : > { %13531 = vmatprep.mubr.msk.bf16.mxu1 %vm550_vm3, %v16139_v47  ;;  %v16372_v47 = vpack.c.bf16 %v3679_v28, %v3678_v39  ;;  %v3698_v28 = vld [vmem:[#allocation2 + $0x181] sm:$0xff]  ;;  %v3700_v39 = vld [vmem:[#allocation2 + $0x1c9] sm:$0xff] }
 0x360   : > { %13532 = vmatmul.mubr.msk.bf16.gmra.mrb[64].mxu1 %vm550_vm3, %v16141_v49  ;;  %v3680_v49 = vld [vmem:[#allocation2 + $0xa9] sm:$0xff] }
 0x361   : > { %13535 = vmatprep.mubr.msk.bf16.mxu1 %vm550_vm3, %v16147_v2  ;;  %v16374_v2 = vpack.c.bf16 %v3681_v34, %v3680_v49  ;;  %v16412_v34 = vpack.c.bf16 %v3699_v6, %v3698_v28  ;;  %v3748_v49 = vpack.c.bf16 %v3701_v14, %v3700_v39  ;;  %v3710_v6 = vld [vmem:[#allocation2 + $0x241] sm:$0xff]  ;;  %v16438_v28 = vpack.c.bf16 %v3713_v62, %v3712_v53  ;;  %v3715_v39 = vld [vmem:[#allocation2 + $0x279] sm:$0xff] }
 0x362   : > { %v16436_v14 = vpack.c.bf16 %v3711_v61, %v3710_v6  ;;  %v3723_v62 = vld [vmem:[#allocation2 + $0x2d9] sm:$0xff]  ;;  %v3724_v6 = vld [vmem:[#allocation2 + $0x2e9] sm:$0xff] }
 0x368   : > { %13536 = vmatmul.mubr.msk.bf16.gmra.mrb[68].mxu1 %vm550_vm3, %v16149_v57  ;;  %v3683_v57 = vld [vmem:[#allocation2 + $0xc9] sm:$0xff] }
 0x369   : > { %13539 = vmatprep.mubr.msk.bf16.mxu1 %vm550_vm3, %v16155_v43  ;;  %v3685_v43 = vld [vmem:[#allocation2 + $0xe1] sm:$0xff]  ;;  %v16380_v24 = vpack.c.bf16 %v3683_v57, %v3682_v9  ;;  %v3703_v57 = vld [vmem:[#allocation2 + $0x1e9] sm:$0xff] }
 0x36a   : > { %v16382_v21 = vpack.c.bf16 %v3685_v43, %v3684_v63  ;;  %v3704_v43 = vld [vmem:[#allocation2 + $0x1f9] sm:$0xff]  ;;  %v3705_v9 = vld [vmem:[#allocation2 + $0x201] sm:$0xff] }
 0x36b   : > { %v3702_v63 = vld [vmem:[#allocation2 + $0x1e1] sm:$0xff]  ;;  %v16419_v29 = vpack.c.bf16 %v3705_v9, %v3704_v43  ;;  %v3714_v43 = vld [vmem:[#allocation2 + $0x271] sm:$0xff] }
 0x36c   : > { %v16417_v27 = vpack.c.bf16 %v3703_v57, %v3702_v63  ;;  %v3717_v57 = vld [vmem:[#allocation2 + $0x291] sm:$0xff]  ;;  %v16444_v9 = vpack.c.bf16 %v3715_v39, %v3714_v43 }
 0x36d   : > { %v3725_v39 = vld [vmem:[#allocation2 + $0x2f1] sm:$0xff] }
 0x36e   : > { %v16462_v43 = vpack.c.bf16 %v3725_v39, %v3724_v6  ;;  %v3730_v6 = vld [vmem:[#allocation2 + $0x331] sm:$0xff] }
 0x370   : > { %13540 = vmatmul.mubr.msk.bf16.gmra.mrb[72].mxu1 %vm550_vm3, %v16351_v40 }
 0x371   : > { %13545 = vmatprep.mubr.msk.bf16.mxu1 %vm550_vm3, %v3732_v44  ;;  %v16398_v44 = vpack.c.bf16 %v3693_v30, %v3692_v38  ;;  %v3706_v30 = vld [vmem:[#allocation2 + $0x211] sm:$0xff] }
 0x378   : > { %13546 = vmatmul.mubr.msk.bf16.vlgmr.msra.gmra.mrb[12].mxu1 %vm550_vm3, %v16356_v54 }
 0x379   : > { %13549 = vmatprep.mubr.msk.bf16.mxu1 %vm550_vm3, %v16358_v59  ;;  %13610 = vmatpush3.bf16.msra.mxu1 %v15398_v26  ;;  %v3691_v26 = vld [vmem:[#allocation2 + $0x129] sm:$0xff] }
 0x37a   : > { %v16396_v36 = vpack.c.bf16 %v3691_v26, %v3690_v31  ;;  %v3709_v26 = vld [vmem:[#allocation2 + $0x231] sm:$0xff]  ;;  %v16425_v31 = vpack.c.bf16 %v3707_v33, %v3706_v30  ;;  %13675 = vmatprep.subr.bf16.mxu1 %v15399_v50  ;;  %v3719_v33 = vld [vmem:[#allocation2 + $0x2a9] sm:$0xff]  ;;  %v3718_v30 = vld [vmem:[#allocation2 + $0x2a1] sm:$0xff] }
 0x37b   : > { %v16427_v38 = vpack.c.bf16 %v3709_v26, %v3708_v13  ;;  %v3720_v13 = vld [vmem:[#allocation2 + $0x2b9] sm:$0xff]  ;;  %v3721_v26 = vld [vmem:[#allocation2 + $0x2c1] sm:$0xff]  ;;  %v16452_v61 = vpack.c.bf16 %v3719_v33, %v3718_v30  ;;  %v3727_v33 = vld [vmem:[#allocation2 + $0x309] sm:$0xff] }
 0x37c   : > { %v16454_v53 = vpack.c.bf16 %v3721_v26, %v3720_v13  ;;  %v3728_v13 = vld [vmem:[#allocation2 + $0x319] sm:$0xff]  ;;  %v3729_v26 = vld [vmem:[#allocation2 + $0x321] sm:$0xff] }
 0x37d   : > { %18096 = vst [vmem:[#allocation8_spill] sm:$0xff] %v16452_v61  ;;  %v3726_v30 = vld [vmem:[#allocation2 + $0x301] sm:$0xff] }
 0x37e   : > { %18097 = vst [vmem:[#allocation9_spill] sm:$0xff] %v16454_v53 }
 0x380   : > { %13550 = vmatmul.mubr.msk.bf16.gmra.mrb[16].mxu1 %vm550_vm3, %v16364_v11 }
 0x381   : > { %13553 = vmatprep.mubr.msk.bf16.mxu1 %vm550_vm3, %v16366_v25 }
 0x388   : > { %13554 = vmatmul.mubr.msk.bf16.gmra.mrb[20].mxu1 %vm550_vm3, %v16372_v47 }
 0x389   : > { %13557 = vmatprep.mubr.msk.bf16.mxu1 %vm550_vm3, %v16374_v2 }
 0x390   : > { %13558 = vmatmul.mubr.msk.bf16.gmra.mrb[24].mxu1 %vm550_vm3, %v16380_v24 }
 0x391   : > { %13561 = vmatprep.mubr.msk.bf16.mxu1 %vm550_vm3, %v16382_v21 }
 0x398   : > { %13562 = vmatmul.mubr.msk.bf16.gmra.mrb[28].mxu1 %vm550_vm3, %v16388_v41 }
 0x399   : > { %13565 = vmatprep.mubr.msk.bf16.mxu1 %vm550_vm3, %v16390_v16 }
 0x3a0   : > { %13566 = vmatmul.mubr.msk.bf16.gmra.mrb[32].mxu1 %vm550_vm3, %v16396_v36 }
 0x3a1   : > { %13569 = vmatprep.mubr.msk.bf16.mxu1 %vm550_vm3, %v16398_v44 }
 0x3a8   : > { %13570 = vmatmul.mubr.msk.bf16.gmra.mrb[36].mxu1 %vm550_vm3, %v16404_v56 }
 0x3a9   : > { %13573 = vmatprep.mubr.msk.bf16.mxu1 %vm550_vm3, %v16406_v4 }
 0x3b0   : > { %13574 = vmatmul.mubr.msk.bf16.gmra.mrb[40].mxu1 %vm550_vm3, %v16412_v34 }
 0x3b1   : > { %13577 = vmatprep.mubr.msk.bf16.mxu1 %vm550_vm3, %v3748_v49  ;;  %v3716_v49 = vld [vmem:[#allocation2 + $0x289] sm:$0xff] }
 0x3b2   : > { %v16446_v63 = vpack.c.bf16 %v3717_v57, %v3716_v49  ;;  %v3722_v49 = vld [vmem:[#allocation2 + $0x2d1] sm:$0xff] }
 0x3b3   : > { %v16460_v57 = vpack.c.bf16 %v3723_v62, %v3722_v49  ;;  %v3731_v62 = vld [vmem:[#allocation2 + $0x339] sm:$0xff]  ;;  %v4790_v49 = vld [vmem:[#allocation2 + $0xc8] sm:$0xff] }
 0x3b4   : > { %v16476_v39 = vpack.c.bf16 %v3731_v62, %v3730_v6  ;;  %v4792_v62 = vld [vmem:[#allocation2 + $0xe0] sm:$0xff]  ;;  %v4794_v6 = vld [vmem:[#allocation2 + $0xf8] sm:$0xff] }
 0x3b8   : > { %13578 = vmatmul.mubr.msk.bf16.gmra.mrb[44].mxu1 %vm550_vm3, %v16417_v27 }
 0x3b9   : > { %13581 = vmatprep.mubr.msk.bf16.mxu1 %vm550_vm3, %v16419_v29 }
 0x3c0   : > { %13582 = vmatmul.mubr.msk.bf16.gmra.mrb[48].mxu1 %vm550_vm3, %v16425_v31 }
 0x3c1   : > { %13585 = vmatprep.mubr.msk.bf16.mxu1 %vm550_vm3, %v16427_v38 }
 0x3c8   : > { %13586 = vmatmul.mubr.msk.bf16.gmra.mrb[52].mxu1 %vm550_vm3, %v16436_v14 }
 0x3c9   : > { %13589 = vmatprep.mubr.msk.bf16.mxu1 %vm550_vm3, %v16438_v28 }
 0x3d0   : > { %13590 = vmatmul.mubr.msk.bf16.gmra.mrb[56].mxu1 %vm550_vm3, %v16444_v9 }
 0x3d1   : > { %13593 = vmatprep.mubr.msk.bf16.mxu1 %vm550_vm3, %v16446_v63 }
 0x3d8   : > { %13594 = vmatmul.mubr.msk.bf16.gmra.mrb[60].mxu1 %vm550_vm3, %v16452_v61  ;;  %v16468_v61 = vpack.c.bf16 %v3727_v33, %v3726_v30  ;;  %v4787_v33 = vld [vmem:[#allocation2 + $0xa8] sm:$0xff] }
 0x3d9   : > { %13597 = vmatprep.mubr.msk.bf16.mxu1 %vm550_vm3, %v16454_v53  ;;  %v16470_v53 = vpack.c.bf16 %v3729_v26, %v3728_v13  ;;  %v4789_v26 = vld [vmem:[#allocation2 + $0xc0] sm:$0xff] }
 0x3da   : > { %v4847_v30 = vpack.c.bf16 %v4790_v49, %v4789_v26  ;;  %v4811_v49 = vld [vmem:[#allocation2 + $0x1f8] sm:$0xff] }
 0x3e0   : > { %13598 = vmatmul.mubr.msk.bf16.gmra.mrb[64].mxu1 %vm550_vm3, %v16460_v57 }
 0x3e1   : > { %13601 = vmatprep.mubr.msk.bf16.mxu1 %vm550_vm3, %v16462_v43 }
 0x3e8   : > { %13602 = vmatmul.mubr.msk.bf16.gmra.mrb[68].mxu1 %vm550_vm3, %v16468_v61 }
 0x3e9   : > { %13605 = vmatprep.mubr.msk.bf16.mxu1 %vm550_vm3, %v16470_v53 }
 0x3f0   : > { %13606 = vmatmul.mubr.msk.bf16.gmra.mrb[72].mxu1 %vm550_vm3, %v16476_v39 }
 0x3f1   : > { %13611 = vmatprep.mubr.msk.bf16.mxu1 %vm550_vm3, %v16160_v1  ;;  %v4252_v1 = vld [vmem:[#allocation2 + $0x182] sm:$0xff] }
 0x3f8   : > { %13612 = vmatmul.mubr.msk.bf16.vlgmr.msra.gmra.mrb[12].mxu1 %vm550_vm3, %v16162_v3  ;;  %v4253_v3 = vld [vmem:[#allocation2 + $0x18a] sm:$0xff] }
 0x3f9   : > { %13615 = vmatprep.mubr.msk.bf16.mxu1 %vm550_vm3, %v16168_v12  ;;  %13676 = vmatpush3.bf16.msra.mxu1 %v15399_v50  ;;  %v16510_v12 = vpack.c.bf16 %v4253_v3, %v4252_v1  ;;  %v4788_v50 = vld [vmem:[#allocation2 + $0xb0] sm:$0xff]  ;;  %v4791_v1 = vld [vmem:[#allocation2 + $0xd8] sm:$0xff] }
 0x3fa   : > { %v4846_v13 = vpack.c.bf16 %v4788_v50, %v4787_v33  ;;  %v4848_v3 = vpack.c.bf16 %v4792_v62, %v4791_v1  ;;  %v4812_v33 = vld [vmem:[#allocation2 + $0x200] sm:$0xff]  ;;  %v4818_v1 = vld [vmem:[#allocation2 + $0x248] sm:$0xff] }
 0x3fb   : > { %v4858_v26 = vpack.c.bf16 %v4812_v33, %v4811_v49  ;;  %v4834_v49 = vld [vmem:[#allocation2 + $0x308] sm:$0xff] }
 0x400   : > { %13616 = vmatmul.mubr.msk.bf16.gmra.mrb[16].mxu1 %vm550_vm3, %v16170_v18  ;;  %v15400_v18 = vld [vmem:[%s18064_s3 + $0x38] sm:$0xff]  }
 0x401   : > { %13619 = vmatprep.mubr.msk.bf16.mxu1 %vm550_vm3, %v16176_v17  ;;  %13741 = vmatprep.subr.bf16.mxu1 %v15400_v18  ;;  %v18098_v17 = vld [vmem:[#allocation4_spill] sm:$0xff] }
 0x408   : > { %13620 = vmatmul.mubr.msk.bf16.gmra.mrb[20].mxu1 %vm550_vm3, %v16178_v7  ;;  %v18099_v7 = vld [vmem:[#allocation5_spill] sm:$0xff] }
 0x409   : > { %13623 = vmatprep.mubr.msk.bf16.mxu1 %vm550_vm3, %v16184_v46  ;;  %v18100_v46 = vld [vmem:[#allocation6_spill] sm:$0xff] }
 0x410   : > { %13624 = vmatmul.mubr.msk.bf16.gmra.mrb[24].mxu1 %vm550_vm3, %v16186_v48  ;;  %v18101_v48 = vld [vmem:[#allocation7_spill] sm:$0xff] }
 0x411   : > { %13627 = vmatprep.mubr.msk.bf16.mxu1 %vm550_vm3, %v16192_v0  ;;  %v4284_v0 = vld [vmem:[#allocation2 + $0x332] sm:$0xff] }
 0x418   : > { %13628 = vmatmul.mubr.msk.bf16.gmra.mrb[28].mxu1 %vm550_vm3, %v16194_v19  ;;  %v4285_v19 = vld [vmem:[#allocation2 + $0x33a] sm:$0xff] }
 0x419   : > { %13631 = vmatprep.mubr.msk.bf16.mxu1 %vm550_vm3, %v16200_v58  ;;  %v4778_v58 = vld [vmem:[#allocation2 + $0x38] sm:$0xff] }
 0x420   : > { %13632 = vmatmul.mubr.msk.bf16.gmra.mrb[32].mxu1 %vm550_vm3, %v16202_v60  ;;  %v16547_v60 = vpack.c.bf16 %v4285_v19, %v4284_v0  ;;  %v4797_v19 = vld [vmem:[#allocation2 + $0x120] sm:$0xff] }
 0x421   : > { %13635 = vmatprep.mubr.msk.bf16.mxu1 %vm550_vm3, %v16208_v10  ;;  %v4777_v10 = vld [vmem:[#allocation2 + $0x30] sm:$0xff] }
 0x428   : > { %13636 = vmatmul.mubr.msk.bf16.gmra.mrb[36].mxu1 %vm550_vm3, %v16210_v20  ;;  %v4841_v20 = vpack.c.bf16 %v4778_v58, %v4777_v10  ;;  %v4800_v10 = vld [vmem:[#allocation2 + $0x140] sm:$0xff] }
 0x429   : > { %13639 = vmatprep.mubr.msk.bf16.mxu1 %vm550_vm3, %v16216_v42  ;;  %v4780_v42 = vld [vmem:[#allocation2 + $0x50] sm:$0xff] }
 0x430   : > { %13640 = vmatmul.mubr.msk.bf16.gmra.mrb[40].mxu1 %vm550_vm3, %v16510_v12 }
 0x431   : > { %13643 = vmatprep.mubr.msk.bf16.mxu1 %vm550_vm3, %v16221_v52  ;;  %v4782_v52 = vld [vmem:[#allocation2 + $0x68] sm:$0xff] }
 0x438   : > { %13644 = vmatmul.mubr.msk.bf16.gmra.mrb[44].mxu1 %vm550_vm3, %v16223_v55  ;;  %v4779_v55 = vld [vmem:[#allocation2 + $0x48] sm:$0xff] }
 0x439   : > { %13647 = vmatprep.mubr.msk.bf16.mxu1 %vm550_vm3, %v16229_v5  ;;  %v4842_v5 = vpack.c.bf16 %v4780_v42, %v4779_v55  ;;  %v4799_v42 = vld [vmem:[#allocation2 + $0x138] sm:$0xff]  ;;  %v4801_v55 = vld [vmem:[#allocation2 + $0x150] sm:$0xff] }
 0x440   : > { %13648 = vmatmul.mubr.msk.bf16.gmra.mrb[48].mxu1 %vm550_vm3, %v16231_v8 }
 0x441   : > { %13651 = vmatprep.mubr.msk.bf16.mxu1 %vm550_vm3, %v16240_v35  ;;  %v4784_v35 = vld [vmem:[#allocation2 + $0x80] sm:$0xff] }
 0x448   : > { %13652 = vmatmul.mubr.msk.bf16.gmra.mrb[52].mxu1 %vm550_vm3, %v16242_v45  ;;  %v4786_v45 = vld [vmem:[#allocation2 + $0x98] sm:$0xff] }
 0x449   : > { %13655 = vmatprep.mubr.msk.bf16.mxu1 %vm550_vm3, %v18098_v17 }
 0x450   : > { %13656 = vmatmul.mubr.msk.bf16.gmra.mrb[56].mxu1 %vm550_vm3, %v18099_v7  ;;  %v4796_v7 = vld [vmem:[#allocation2 + $0x110] sm:$0xff] }
 0x451   : > { %13659 = vmatprep.mubr.msk.bf16.mxu1 %vm550_vm3, %v18100_v46  ;;  %v4798_v46 = vld [vmem:[#allocation2 + $0x128] sm:$0xff] }
 0x452   : > { %v4851_v58 = vpack.c.bf16 %v4798_v46, %v4797_v19  ;;  %v4819_v46 = vld [vmem:[#allocation2 + $0x258] sm:$0xff] }
 0x458   : > { %13660 = vmatmul.mubr.msk.bf16.gmra.mrb[60].mxu1 %vm550_vm3, %v18101_v48  ;;  %v4795_v48 = vld [vmem:[#allocation2 + $0x108] sm:$0xff] }
 0x459   : > { %13663 = vmatprep.mubr.msk.bf16.mxu1 %vm550_vm3, %v16264_v15  ;;  %v4783_v15 = vld [vmem:[#allocation2 + $0x78] sm:$0xff]  ;;  %v4850_v0 = vpack.c.bf16 %v4796_v7, %v4795_v48  ;;  %v15401_v7 = vld [vmem:[%s18064_s3 + $0x40] sm:$0xff]  }
 0x45a   : > { %v4820_v48 = vld [vmem:[#allocation2 + $0x260] sm:$0xff] }
 0x45b   : > { %v4862_v19 = vpack.c.bf16 %v4820_v48, %v4819_v46  ;;  %v5902_v46 = vld [vmem:[#allocation2 + $0xfa] sm:$0xff] }
 0x460   : > { %13664 = vmatmul.mubr.msk.bf16.gmra.mrb[64].mxu1 %vm550_vm3, %v16266_v22  ;;  %v4844_v22 = vpack.c.bf16 %v4784_v35, %v4783_v15  ;;  %v4808_v15 = vld [vmem:[#allocation2 + $0x1a0] sm:$0xff] }
 0x461   : > { %13667 = vmatprep.mubr.msk.bf16.mxu1 %vm550_vm3, %v16272_v32  ;;  %v4785_v32 = vld [vmem:[#allocation2 + $0x90] sm:$0xff] }
 0x468   : > { %13668 = vmatmul.mubr.msk.bf16.gmra.mrb[68].mxu1 %vm550_vm3, %v16274_v37  ;;  %v4781_v37 = vld [vmem:[#allocation2 + $0x60] sm:$0xff] }
 0x469   : > { %13671 = vmatprep.mubr.msk.bf16.mxu1 %vm550_vm3, %v16280_v51  ;;  %v4843_v8 = vpack.c.bf16 %v4782_v52, %v4781_v37  ;;  %v4845_v51 = vpack.c.bf16 %v4786_v45, %v4785_v32  ;;  %v4852_v52 = vpack.c.bf16 %v4800_v10, %v4799_v42  ;;  %v4804_v37 = vld [vmem:[#allocation2 + $0x170] sm:$0xff]  ;;  %v4807_v45 = vld [vmem:[#allocation2 + $0x198] sm:$0xff]  ;;  %v4810_v32 = vld [vmem:[#allocation2 + $0x1e8] sm:$0xff] }
 0x46a   : > { %v4824_v42 = vld [vmem:[#allocation2 + $0x290] sm:$0xff] }
 0x470   : > { %13672 = vmatmul.mubr.msk.bf16.gmra.mrb[72].mxu1 %vm550_vm3, %v16547_v60 }
 0x471   : > { %13677 = vmatprep.mubr.msk.bf16.mxu1 %vm550_vm3, %v4841_v20  ;;  %v4802_v20 = vld [vmem:[#allocation2 + $0x158] sm:$0xff] }
 0x478   : > { %13678 = vmatmul.mubr.msk.bf16.vlgmr.msra.gmra.mrb[12].mxu1 %vm550_vm3, %v4842_v5  ;;  %v4853_v5 = vpack.c.bf16 %v4802_v20, %v4801_v55  ;;  %v4823_v20 = vld [vmem:[#allocation2 + $0x288] sm:$0xff] }
 0x479   : > { %13681 = vmatprep.mubr.msk.bf16.mxu1 %vm550_vm3, %v4843_v8  ;;  %13742 = vmatpush3.bf16.msra.mxu1 %v15400_v18  ;;  %v4793_v18 = vld [vmem:[#allocation2 + $0xf0] sm:$0xff]  ;;  %v4803_v8 = vld [vmem:[#allocation2 + $0x168] sm:$0xff]  ;;  %v4864_v55 = vpack.c.bf16 %v4824_v42, %v4823_v20 }
 0x47a   : > { %v4849_v17 = vpack.c.bf16 %v4794_v6, %v4793_v18  ;;  %v4854_v35 = vpack.c.bf16 %v4804_v37, %v4803_v8  ;;  %v4816_v6 = vld [vmem:[#allocation2 + $0x230] sm:$0xff]  ;;  %v4817_v18 = vld [vmem:[#allocation2 + $0x240] sm:$0xff]  ;;  %13807 = vmatprep.subr.bf16.mxu1 %v15401_v7  ;;  %v4827_v8 = vld [vmem:[#allocation2 + $0x2b8] sm:$0xff] }
 0x47b   : > { %v5906_v20 = vld [vmem:[#allocation2 + $0x12a] sm:$0xff] }
 0x480   : > { %13682 = vmatmul.mubr.msk.bf16.gmra.mrb[16].mxu1 %vm550_vm3, %v4844_v22  ;;  %v4856_v22 = vpack.c.bf16 %v4808_v15, %v4807_v45  ;;  %v4830_v45 = vld [vmem:[#allocation2 + $0x2d8] sm:$0xff] }
 0x481   : > { %13685 = vmatprep.mubr.msk.bf16.mxu1 %vm550_vm3, %v4845_v51  ;;  %v4809_v51 = vld [vmem:[#allocation2 + $0x1e0] sm:$0xff] }
 0x482   : > { %v4857_v50 = vpack.c.bf16 %v4810_v32, %v4809_v51  ;;  %v4831_v51 = vld [vmem:[#allocation2 + $0x2e8] sm:$0xff] }
 0x488   : > { %13686 = vmatmul.mubr.msk.bf16.gmra.mrb[20].mxu1 %vm550_vm3, %v4846_v13  ;;  %v4814_v13 = vld [vmem:[#allocation2 + $0x218] sm:$0xff] }
 0x489   : > { %13689 = vmatprep.mubr.msk.bf16.mxu1 %vm550_vm3, %v4847_v30  ;;  %v4813_v30 = vld [vmem:[#allocation2 + $0x210] sm:$0xff] }
 0x48a   : > { %v4859_v62 = vpack.c.bf16 %v4814_v13, %v4813_v30  ;;  %v4833_v13 = vld [vmem:[#allocation2 + $0x300] sm:$0xff]  ;;  %v4835_v30 = vld [vmem:[#allocation2 + $0x318] sm:$0xff] }
 0x490   : > { %13690 = vmatmul.mubr.msk.bf16.gmra.mrb[24].mxu1 %vm550_vm3, %v4848_v3 }
 0x491   : > { %13693 = vmatprep.mubr.msk.bf16.mxu1 %vm550_vm3, %v4849_v17  ;;  %v4861_v17 = vpack.c.bf16 %v4818_v1, %v4817_v18  ;;  %v4840_v1 = vld [vmem:[#allocation2 + $0x350] sm:$0xff]  ;;  %v5899_v18 = vld [vmem:[#allocation2 + $0xda] sm:$0xff] }
 0x498   : > { %13694 = vmatmul.mubr.msk.bf16.gmra.mrb[28].mxu1 %vm550_vm3, %v4850_v0  ;;  %v4822_v0 = vld [vmem:[#allocation2 + $0x278] sm:$0xff] }
 0x499   : > { %13697 = vmatprep.mubr.msk.bf16.mxu1 %vm550_vm3, %v4851_v58  ;;  %v4821_v58 = vld [vmem:[#allocation2 + $0x270] sm:$0xff] }
 0x49a   : > { %v4863_v10 = vpack.c.bf16 %v4822_v0, %v4821_v58  ;;  %v5904_v58 = vld [vmem:[#allocation2 + $0x112] sm:$0xff] }
 0x4a0   : > { %13698 = vmatmul.mubr.msk.bf16.gmra.mrb[32].mxu1 %vm550_vm3, %v4852_v52  ;;  %v4826_v52 = vld [vmem:[#allocation2 + $0x2a8] sm:$0xff] }
 0x4a1   : > { %13701 = vmatprep.mubr.msk.bf16.mxu1 %vm550_vm3, %v4853_v5  ;;  %v4825_v5 = vld [vmem:[#allocation2 + $0x2a0] sm:$0xff] }
 0x4a2   : > { %v4865_v37 = vpack.c.bf16 %v4826_v52, %v4825_v5  ;;  %v5908_v5 = vld [vmem:[#allocation2 + $0x142] sm:$0xff] }
 0x4a8   : > { %13702 = vmatmul.mubr.msk.bf16.gmra.mrb[36].mxu1 %vm550_vm3, %v4854_v35  ;;  %v4828_v35 = vld [vmem:[#allocation2 + $0x2c0] sm:$0xff] }
 0x4a9   : > { %13705 = vmatprep.mubr.msk.bf16.mxu1 %vm550_vm3, %v16314_v23  ;;  %v4815_v23 = vld [vmem:[#allocation2 + $0x228] sm:$0xff]  ;;  %v4866_v15 = vpack.c.bf16 %v4828_v35, %v4827_v8  ;;  %v5910_v8 = vld [vmem:[#allocation2 + $0x15a] sm:$0xff] }
 0x4aa   : > { %v4860_v3 = vpack.c.bf16 %v4816_v6, %v4815_v23  ;;  %v4839_v6 = vld [vmem:[#allocation2 + $0x348] sm:$0xff] }
 0x4b0   : > { %13706 = vmatmul.mubr.msk.bf16.gmra.mrb[40].mxu1 %vm550_vm3, %v4856_v22  ;;  %v4829_v22 = vld [vmem:[#allocation2 + $0x2d0] sm:$0xff] }
 0x4b1   : > { %13709 = vmatprep.mubr.msk.bf16.mxu1 %vm550_vm3, %v4857_v50  ;;  %v4867_v32 = vpack.c.bf16 %v4830_v45, %v4829_v22  ;;  %v4832_v50 = vld [vmem:[#allocation2 + $0x2f0] sm:$0xff] }
 0x4b2   : > { %v4868_v33 = vpack.c.bf16 %v4832_v50, %v4831_v51  ;;  %v5912_v22 = vld [vmem:[#allocation2 + $0x172] sm:$0xff]  ;;  %v5915_v51 = vld [vmem:[#allocation2 + $0x19a] sm:$0xff]  ;;  %v5916_v50 = vld [vmem:[#allocation2 + $0x1a2] sm:$0xff] }
 0x4b8   : > { %13710 = vmatmul.mubr.msk.bf16.gmra.mrb[44].mxu1 %vm550_vm3, %v4858_v26  ;;  %v4869_v26 = vpack.c.bf16 %v4834_v49, %v4833_v13  ;;  %v5964_v49 = vpack.c.bf16 %v5916_v50, %v5915_v51  ;;  %v5918_v13 = vld [vmem:[#allocation2 + $0x1ea] sm:$0xff] }
 0x4b9   : > { %13713 = vmatprep.mubr.msk.bf16.mxu1 %vm550_vm3, %v4859_v62  ;;  %v4836_v62 = vld [vmem:[#allocation2 + $0x320] sm:$0xff] }
 0x4ba   : > { %v4870_v23 = vpack.c.bf16 %v4836_v62, %v4835_v30  ;;  %v5919_v30 = vld [vmem:[#allocation2 + $0x1fa] sm:$0xff]  ;;  %v5920_v62 = vld [vmem:[#allocation2 + $0x202] sm:$0xff] }
 0x4c0   : > { %13714 = vmatmul.mubr.msk.bf16.gmra.mrb[48].mxu1 %vm550_vm3, %v4860_v3  ;;  %v4872_v3 = vpack.c.bf16 %v4840_v1, %v4839_v6  ;;  %v5922_v6 = vld [vmem:[#allocation2 + $0x21a] sm:$0xff]  ;;  %v5966_v1 = vpack.c.bf16 %v5920_v62, %v5919_v30 }
 0x4c1   : > { %13717 = vmatprep.mubr.msk.bf16.mxu1 %vm550_vm3, %v4861_v17  ;;  %v5900_v17 = vld [vmem:[#allocation2 + $0xe2] sm:$0xff] }
 0x4c2   : > { %v5956_v48 = vpack.c.bf16 %v5900_v17, %v5899_v18  ;;  %v5943_v18 = vld [vmem:[#allocation2 + $0x31a] sm:$0xff]  ;;  %v5944_v17 = vld [vmem:[#allocation2 + $0x322] sm:$0xff] }
 0x4c8   : > { %13718 = vmatmul.mubr.msk.bf16.gmra.mrb[52].mxu1 %vm550_vm3, %v4862_v19  ;;  %v5903_v19 = vld [vmem:[#allocation2 + $0x10a] sm:$0xff] }
 0x4c9   : > { %13721 = vmatprep.mubr.msk.bf16.mxu1 %vm550_vm3, %v4863_v10  ;;  %v5905_v10 = vld [vmem:[#allocation2 + $0x122] sm:$0xff]  ;;  %v5958_v42 = vpack.c.bf16 %v5904_v58, %v5903_v19  ;;  %v16687_v19 = vld [vmem:[%s18065_s4] ss:$0 sm:$0xff] }
 0x4ca   : > { %v5959_v52 = vpack.c.bf16 %v5906_v20, %v5905_v10 }
 0x4d0   : > { %13722 = vmatmul.mubr.msk.bf16.gmra.mrb[56].mxu1 %vm550_vm3, %v4864_v55  ;;  %v5907_v55 = vld [vmem:[#allocation2 + $0x13a] sm:$0xff] }
 0x4d1   : > { %13725 = vmatprep.mubr.msk.bf16.mxu1 %vm550_vm3, %v4865_v37  ;;  %v5909_v37 = vld [vmem:[#allocation2 + $0x152] sm:$0xff]  ;;  %v5960_v35 = vpack.c.bf16 %v5908_v5, %v5907_v55 }
 0x4d2   : > { %v5961_v45 = vpack.c.bf16 %v5910_v8, %v5909_v37 }
 0x4d8   : > { %13726 = vmatmul.mubr.msk.bf16.gmra.mrb[60].mxu1 %vm550_vm3, %v4866_v15  ;;  %v5911_v15 = vld [vmem:[#allocation2 + $0x16a] sm:$0xff] }
 0x4d9   : > { %13729 = vmatprep.mubr.msk.bf16.mxu1 %vm550_vm3, %v4867_v32  ;;  %v5962_v32 = vpack.c.bf16 %v5912_v22, %v5911_v15 }
 0x4e0   : > { %13730 = vmatmul.mubr.msk.bf16.gmra.mrb[64].mxu1 %vm550_vm3, %v4868_v33  ;;  %v5917_v33 = vld [vmem:[#allocation2 + $0x1e2] sm:$0xff] }
 0x4e1   : > { %13733 = vmatprep.mubr.msk.bf16.mxu1 %vm550_vm3, %v4869_v26  ;;  %v5965_v26 = vpack.c.bf16 %v5918_v13, %v5917_v33 }
 0x4e8   : > { %13734 = vmatmul.mubr.msk.bf16.gmra.mrb[68].mxu1 %vm550_vm3, %v4870_v23  ;;  %v5921_v23 = vld [vmem:[#allocation2 + $0x212] sm:$0xff] }
 0x4e9   : > { %13737 = vmatprep.mubr.msk.bf16.mxu1 %vm550_vm3, %v16351_v40  ;;  %v5361_v40 = vld [vmem:[#allocation2 + $0x199] sm:$0xff] }
 0x4f0   : > { %13738 = vmatmul.mubr.msk.bf16.gmra.mrb[72].mxu1 %vm550_vm3, %v4872_v3  ;;  %v5967_v3 = vpack.c.bf16 %v5922_v6, %v5921_v23 }
 0x4f1   : > { %13743 = vmatprep.mubr.msk.bf16.mxu1 %vm550_vm3, %v16356_v54  ;;  %v5362_v54 = vld [vmem:[#allocation2 + $0x1a1] sm:$0xff] }
 0x4f8   : > { %13744 = vmatmul.mubr.msk.bf16.vlgmr.msra.gmra.mrb[12].mxu1 %vm550_vm3, %v16358_v59  ;;  %v5410_v59 = vpack.c.bf16 %v5362_v54, %v5361_v40  ;;  %v5924_v40 = vld [vmem:[#allocation2 + $0x232] sm:$0xff]  ;;  %v5925_v54 = vld [vmem:[#allocation2 + $0x242] sm:$0xff] }
 0x4f9   : > { %13747 = vmatprep.mubr.msk.bf16.mxu1 %vm550_vm3, %v16364_v11  ;;  %13808 = vmatpush3.bf16.msra.mxu1 %v15401_v7  ;;  %v18102_v11 = vld [vmem:[#allocation8_spill] sm:$0xff] }
 0x4fa   : > { %v5901_v7 = vld [vmem:[#allocation2 + $0xf2] sm:$0xff] }
 0x4fb   : > { %v5957_v0 = vpack.c.bf16 %v5902_v46, %v5901_v7  ;;  %v5978_v7 = vpack.c.bf16 %v5944_v17, %v5943_v18  ;;  %v5947_v46 = vld [vmem:[#allocation2 + $0x34a] sm:$0xff] }
 0x500   : > { %13748 = vmatmul.mubr.msk.bf16.gmra.mrb[16].mxu1 %vm550_vm3, %v16366_v25  ;;  %v18103_v25 = vld [vmem:[#allocation9_spill] sm:$0xff] }
 0x501   : > { %13751 = vmatprep.mubr.msk.bf16.mxu1 %vm550_vm3, %v16372_v47  ;;  %v5393_v47 = vld [vmem:[#allocation2 + $0x349] sm:$0xff] }
 0x508   : > { %13752 = vmatmul.mubr.msk.bf16.gmra.mrb[20].mxu1 %vm550_vm3, %v16374_v2  ;;  %v5394_v2 = vld [vmem:[#allocation2 + $0x351] sm:$0xff] }
 0x509   : > { %13755 = vmatprep.mubr.msk.bf16.mxu1 %vm550_vm3, %v16380_v24  ;;  %v5426_v24 = vpack.c.bf16 %v5394_v2, %v5393_v47  ;;  %v5927_v47 = vld [vmem:[#allocation2 + $0x25a] sm:$0xff]  ;;  %v5928_v2 = vld [vmem:[#allocation2 + $0x262] sm:$0xff] }
 0x510   : > { %13756 = vmatmul.mubr.msk.bf16.gmra.mrb[24].mxu1 %vm550_vm3, %v16382_v21  ;;  %v5885_v21 = vld [vmem:[#allocation2 + $0x32] sm:$0xff] }
 0x511   : > { %13759 = vmatprep.mubr.msk.bf16.mxu1 %vm550_vm3, %v16388_v41  ;;  %v5886_v41 = vld [vmem:[#allocation2 + $0x3a] sm:$0xff] }
 0x518   : > { %13760 = vmatmul.mubr.msk.bf16.gmra.mrb[28].mxu1 %vm550_vm3, %v16390_v16  ;;  %v5949_v16 = vpack.c.bf16 %v5886_v41, %v5885_v21  ;;  %v5930_v21 = vld [vmem:[#allocation2 + $0x27a] sm:$0xff]  ;;  %v5970_v41 = vpack.c.bf16 %v5928_v2, %v5927_v47 }
 0x519   : > { %13763 = vmatprep.mubr.msk.bf16.mxu1 %vm550_vm3, %v16396_v36  ;;  %v5887_v36 = vld [vmem:[#allocation2 + $0x4a] sm:$0xff] }
 0x520   : > { %13764 = vmatmul.mubr.msk.bf16.gmra.mrb[32].mxu1 %vm550_vm3, %v16398_v44  ;;  %v5888_v44 = vld [vmem:[#allocation2 + $0x52] sm:$0xff] }
 0x521   : > { %13767 = vmatprep.mubr.msk.bf16.mxu1 %vm550_vm3, %v16404_v56  ;;  %v5889_v56 = vld [vmem:[#allocation2 + $0x62] sm:$0xff] }
 0x528   : > { %13768 = vmatmul.mubr.msk.bf16.gmra.mrb[36].mxu1 %vm550_vm3, %v16406_v4  ;;  %v5890_v4 = vld [vmem:[#allocation2 + $0x6a] sm:$0xff] }
 0x529   : > { %13771 = vmatprep.mubr.msk.bf16.mxu1 %vm550_vm3, %v16412_v34  ;;  %v5950_v34 = vpack.c.bf16 %v5888_v44, %v5887_v36  ;;  %v5931_v36 = vld [vmem:[#allocation2 + $0x28a] sm:$0xff]  ;;  %v5932_v44 = vld [vmem:[#allocation2 + $0x292] sm:$0xff] }
 0x530   : > { %13772 = vmatmul.mubr.msk.bf16.gmra.mrb[40].mxu1 %vm550_vm3, %v5410_v59  ;;  %v5926_v59 = vld [vmem:[#allocation2 + $0x24a] sm:$0xff] }
 0x531   : > { %13775 = vmatprep.mubr.msk.bf16.mxu1 %vm550_vm3, %v16417_v27  ;;  %v5951_v27 = vpack.c.bf16 %v5890_v4, %v5889_v56  ;;  %v5933_v56 = vld [vmem:[#allocation2 + $0x2a2] sm:$0xff]  ;;  %v5934_v4 = vld [vmem:[#allocation2 + $0x2aa] sm:$0xff] }
 0x538   : > { %13776 = vmatmul.mubr.msk.bf16.gmra.mrb[44].mxu1 %vm550_vm3, %v16419_v29  ;;  %v5891_v29 = vld [vmem:[#allocation2 + $0x7a] sm:$0xff] }
 0x539   : > { %13779 = vmatprep.mubr.msk.bf16.mxu1 %vm550_vm3, %v16425_v31  ;;  %v5892_v31 = vld [vmem:[#allocation2 + $0x82] sm:$0xff] }
 0x540   : > { %13780 = vmatmul.mubr.msk.bf16.gmra.mrb[48].mxu1 %vm550_vm3, %v16427_v38  ;;  %v5893_v38 = vld [vmem:[#allocation2 + $0x92] sm:$0xff] }
 0x541   : > { %13783 = vmatprep.mubr.msk.bf16.mxu1 %vm550_vm3, %v16436_v14  ;;  %v5894_v14 = vld [vmem:[#allocation2 + $0x9a] sm:$0xff] }
 0x548   : > { %13784 = vmatmul.mubr.msk.bf16.gmra.mrb[52].mxu1 %vm550_vm3, %v16438_v28  ;;  %v5952_v28 = vpack.c.bf16 %v5892_v31, %v5891_v29  ;;  %v5935_v29 = vld [vmem:[#allocation2 + $0x2ba] sm:$0xff]  ;;  %v5936_v31 = vld [vmem:[#allocation2 + $0x2c2] sm:$0xff] }
 0x549   : > { %13787 = vmatprep.mubr.msk.bf16.mxu1 %vm550_vm3, %v16444_v9  ;;  %v5953_v9 = vpack.c.bf16 %v5894_v14, %v5893_v38  ;;  %v5937_v38 = vld [vmem:[#allocation2 + $0x2d2] sm:$0xff]  ;;  %v5938_v14 = vld [vmem:[#allocation2 + $0x2da] sm:$0xff] }
 0x550   : > { %13788 = vmatmul.mubr.msk.bf16.gmra.mrb[56].mxu1 %vm550_vm3, %v16446_v63  ;;  %v5895_v63 = vld [vmem:[#allocation2 + $0xaa] sm:$0xff] }
 0x551   : > { %13791 = vmatprep.mubr.msk.bf16.mxu1 %vm550_vm3, %v18102_v11 }
 0x558   : > { %13792 = vmatmul.mubr.msk.bf16.gmra.mrb[60].mxu1 %vm550_vm3, %v18103_v25  ;;  %v5969_v25 = vpack.c.bf16 %v5926_v59, %v5925_v54 }
 0x559   : > { %13795 = vmatprep.mubr.msk.bf16.mxu1 %vm550_vm3, %v16460_v57  ;;  %v5898_v57 = vld [vmem:[#allocation2 + $0xca] sm:$0xff] }
 0x560   : > { %13796 = vmatmul.mubr.msk.bf16.gmra.mrb[64].mxu1 %vm550_vm3, %v16462_v43 }
 0x561   : > { %13799 = vmatprep.mubr.msk.bf16.mxu1 %vm550_vm3, %v16468_v61  ;;  %v5896_v61 = vld [vmem:[#allocation2 + $0xb2] sm:$0xff] }
 0x562   : > { %v5954_v43 = vpack.c.bf16 %v5896_v61, %v5895_v63  ;;  %v5939_v63 = vld [vmem:[#allocation2 + $0x2ea] sm:$0xff]  ;;  %v5940_v61 = vld [vmem:[#allocation2 + $0x2f2] sm:$0xff] }
 0x568   : > { %13800 = vmatmul.mubr.msk.bf16.gmra.mrb[68].mxu1 %vm550_vm3, %v16470_v53  ;;  %v5897_v53 = vld [vmem:[#allocation2 + $0xc2] sm:$0xff] }
 0x569   : > { %13803 = vmatprep.mubr.msk.bf16.mxu1 %vm550_vm3, %v16476_v39  ;;  %v5955_v39 = vpack.c.bf16 %v5898_v57, %v5897_v53  ;;  %v5941_v53 = vld [vmem:[#allocation2 + $0x302] sm:$0xff]  ;;  %v5942_v57 = vld [vmem:[#allocation2 + $0x30a] sm:$0xff] }
 0x570   : > { %13804 = vmatmul.mubr.msk.bf16.gmra.mrb[72].mxu1 %vm550_vm3, %v5426_v24  ;;  %v5929_v24 = vld [vmem:[#allocation2 + $0x272] sm:$0xff] }
 0x571   : > { %13809 = vmatprep.mubr.msk.bf16.mxu1 %vm550_vm3, %v5949_v16  ;;  %v5971_v16 = vpack.c.bf16 %v5930_v21, %v5929_v24 }
 0x578   : > { %13810 = vmatmul.mubr.msk.bf16.vlgmr.msra.gmra.mrb[12].mxu1 %vm550_vm3, %v5950_v34  ;;  %v5972_v34 = vpack.c.bf16 %v5932_v44, %v5931_v36 }
 0x579   : > { %13813 = vmatprep.mubr.msk.bf16.mxu1 %vm550_vm3, %v5951_v27  ;;  %v5973_v27 = vpack.c.bf16 %v5934_v4, %v5933_v56 }
 0x580   : > { %13814 = vmatmul.mubr.msk.bf16.gmra.mrb[16].mxu1 %vm550_vm3, %v5952_v28  ;;  %v5974_v28 = vpack.c.bf16 %v5936_v31, %v5935_v29 }
 0x581   : > { %13817 = vmatprep.mubr.msk.bf16.mxu1 %vm550_vm3, %v5953_v9  ;;  %v5975_v9 = vpack.c.bf16 %v5938_v14, %v5937_v38 }
 0x588   : > { %13818 = vmatmul.mubr.msk.bf16.gmra.mrb[20].mxu1 %vm550_vm3, %v5954_v43  ;;  %v5976_v43 = vpack.c.bf16 %v5940_v61, %v5939_v63 }
 0x589   : > { %13821 = vmatprep.mubr.msk.bf16.mxu1 %vm550_vm3, %v5955_v39  ;;  %v5977_v39 = vpack.c.bf16 %v5942_v57, %v5941_v53 }
 0x590   : > { %13822 = vmatmul.mubr.msk.bf16.gmra.mrb[24].mxu1 %vm550_vm3, %v5956_v48  ;;  %v5948_v48 = vld [vmem:[#allocation2 + $0x352] sm:$0xff] }
 0x591   : > { %13825 = vmatprep.mubr.msk.bf16.mxu1 %vm550_vm3, %v5957_v0  ;;  %v5980_v0 = vpack.c.bf16 %v5948_v48, %v5947_v46 }
 0x598   : > { %13826 = vmatmul.mubr.msk.bf16.gmra.mrb[28].mxu1 %vm550_vm3, %v5958_v42 }
 0x599   : > { %13829 = vmatprep.mubr.msk.bf16.mxu1 %vm550_vm3, %v5959_v52 }
 0x5a0   : > { %13830 = vmatmul.mubr.msk.bf16.gmra.mrb[32].mxu1 %vm550_vm3, %v5960_v35 }
 0x5a1   : > { %13833 = vmatprep.mubr.msk.bf16.mxu1 %vm550_vm3, %v5961_v45 }
 0x5a8   : > { %13834 = vmatmul.mubr.msk.bf16.gmra.mrb[36].mxu1 %vm550_vm3, %v5962_v32 }
 0x5a9   : > { %13837 = vmatprep.mubr.msk.bf16.mxu1 %vm550_vm3, %v16510_v12  ;;  %v5923_v12 = vld [vmem:[#allocation2 + $0x22a] sm:$0xff] }
 0x5aa   : > { %v5968_v11 = vpack.c.bf16 %v5924_v40, %v5923_v12 }
 0x5b0   : > { %13838 = vmatmul.mubr.msk.bf16.gmra.mrb[40].mxu1 %vm550_vm3, %v5964_v49 }
 0x5b1   : > { %13841 = vmatprep.mubr.msk.bf16.mxu1 %vm550_vm3, %v5965_v26 }
 0x5b8   : > { %13842 = vmatmul.mubr.msk.bf16.gmra.mrb[44].mxu1 %vm550_vm3, %v5966_v1 }
 0x5b9   : > { %13845 = vmatprep.mubr.msk.bf16.mxu1 %vm550_vm3, %v5967_v3 }
 0x5c0   : > { %13846 = vmatmul.mubr.msk.bf16.gmra.mrb[48].mxu1 %vm550_vm3, %v5968_v11 }
 0x5c1   : > { %13849 = vmatprep.mubr.msk.bf16.mxu1 %vm550_vm3, %v5969_v25 }
 0x5c8   : > { %13850 = vmatmul.mubr.msk.bf16.gmra.mrb[52].mxu1 %vm550_vm3, %v5970_v41 }
 0x5c9   : > { %13853 = vmatprep.mubr.msk.bf16.mxu1 %vm550_vm3, %v5971_v16 }
 0x5d0   : > { %13854 = vmatmul.mubr.msk.bf16.gmra.mrb[56].mxu1 %vm550_vm3, %v5972_v34 }
 0x5d1   : > { %13857 = vmatprep.mubr.msk.bf16.mxu1 %vm550_vm3, %v5973_v27 }
 0x5d8   : > { %13858 = vmatmul.mubr.msk.bf16.gmra.mrb[60].mxu1 %vm550_vm3, %v5974_v28 }
 0x5d9   : > { %13861 = vmatprep.mubr.msk.bf16.mxu1 %vm550_vm3, %v5975_v9 }
 0x5e0   : > { %13862 = vmatmul.mubr.msk.bf16.gmra.mrb[64].mxu1 %vm550_vm3, %v5976_v43 }
 0x5e1   : > { %13865 = vmatprep.mubr.msk.bf16.mxu1 %vm550_vm3, %v5977_v39 }
 0x5e8   : > { %13866 = vmatmul.mubr.msk.bf16.gmra.mrb[68].mxu1 %vm550_vm3, %v5978_v7 }
 0x5e9   : > { %13869 = vmatprep.mubr.msk.bf16.mxu1 %vm550_vm3, %v16547_v60 }
 0x5f0   : > { %13870 = vmatmul.mubr.msk.bf16.gmra.mrb[72].mxu1 %vm550_vm3, %v5980_v0 }
 0x64b   : > { %v13811_v58 = vpop.f32.mrb[12].mxu1 }
 0x64c   : > { %v6448_v10 = vadd.f32 %v13811_v58, %v16687_v19  ;;  %v6120_v20 = vpop.f32.mrb[13].mxu1 }
 0x64d   : > { %v6446_v42 = vadd.f32 %v16687_v19, %v6120_v20  ;;  %v13812_v52 = vpop.f32.mrb[14].mxu1 }
 0x64e   : > { %v6449_v55 = vadd.f32 %v13812_v52, %v16687_v19  ;;  %v6123_v60 = vpop.f32.mrb[15].mxu1  ;;  %v6512_v37 = vmax.f32 %v6448_v10, 0.0 }
 0x64f   : > { %v6447_v5 = vadd.f32 %v16687_v19, %v6123_v60  ;;  %v6510_v35 = vmax.f32 %v6446_v42, 0.0 }
 0x650   : > { %v6513_v8 = vmax.f32 %v6449_v55, 0.0 }
 0x651   : > { %v6511_v45 = vmax.f32 %v6447_v5, 0.0 }
 0x652   : > { %v16693_v15 = vpack.c.bf16 %v6513_v8, %v6512_v37 }
 0x653   : > { %v16695_v22 = vpack.c.bf16 %v6511_v45, %v6510_v35  ;;  %v13815_v32 = vpop.f32.mrb[16].mxu1 }
 0x654   : > { %v6452_v51 = vadd.f32 %v13815_v32, %v16687_v19  ;;  %v6136_v50 = vpop.f32.mrb[17].mxu1 }
 0x655   : > { %v6450_v49 = vadd.f32 %v16687_v19, %v6136_v50  ;;  %v13816_v33 = vpop.f32.mrb[18].mxu1 }
 0x656   : > { %v6453_v13 = vadd.f32 %v13816_v33, %v16687_v19  ;;  %v6139_v26 = vpop.f32.mrb[19].mxu1  ;;  %v6516_v62 = vmax.f32 %v6452_v51, 0.0 }
 0x657   : > { %v6451_v30 = vadd.f32 %v16687_v19, %v6139_v26  ;;  %v6514_v6 = vmax.f32 %v6450_v49, 0.0 }
 0x658   : > { %v6517_v23 = vmax.f32 %v6453_v13, 0.0 }
 0x659   : > { %v6515_v1 = vmax.f32 %v6451_v30, 0.0 }
 0x65a   : > { %v16701_v3 = vpack.c.bf16 %v6517_v23, %v6516_v62 }
 0x65b   : > { %v16703_v12 = vpack.c.bf16 %v6515_v1, %v6514_v6  ;;  %v13819_v40 = vpop.f32.mrb[20].mxu1 }
 0x65c   : > { %v6456_v54 = vadd.f32 %v13819_v40, %v16687_v19  ;;  %v6152_v59 = vpop.f32.mrb[21].mxu1 }
 0x65d   : > { %v6454_v11 = vadd.f32 %v16687_v19, %v6152_v59  ;;  %v13820_v25 = vpop.f32.mrb[22].mxu1 }
 0x65e   : > { %v6457_v47 = vadd.f32 %v13820_v25, %v16687_v19  ;;  %v6155_v2 = vpop.f32.mrb[23].mxu1  ;;  %v6520_v21 = vmax.f32 %v6456_v54, 0.0 }
 0x65f   : > { %v6455_v24 = vadd.f32 %v16687_v19, %v6155_v2  ;;  %v6518_v16 = vmax.f32 %v6454_v11, 0.0 }
 0x660   : > { %v6521_v41 = vmax.f32 %v6457_v47, 0.0 }
 0x661   : > { %v6519_v36 = vmax.f32 %v6455_v24, 0.0 }
 0x662   : > { %v16709_v44 = vpack.c.bf16 %v6521_v41, %v6520_v21 }
 0x663   : > { %v16711_v56 = vpack.c.bf16 %v6519_v36, %v6518_v16  ;;  %v13823_v4 = vpop.f32.mrb[24].mxu1 }
 0x664   : > { %v6460_v34 = vadd.f32 %v13823_v4, %v16687_v19  ;;  %v6168_v27 = vpop.f32.mrb[25].mxu1 }
 0x665   : > { %v6458_v29 = vadd.f32 %v16687_v19, %v6168_v27  ;;  %v13824_v31 = vpop.f32.mrb[26].mxu1 }
 0x666   : > { %v6461_v38 = vadd.f32 %v13824_v31, %v16687_v19  ;;  %v6171_v14 = vpop.f32.mrb[27].mxu1  ;;  %v6524_v9 = vmax.f32 %v6460_v34, 0.0 }
 0x667   : > { %v6459_v28 = vadd.f32 %v16687_v19, %v6171_v14  ;;  %v6522_v61 = vmax.f32 %v6458_v29, 0.0 }
 0x668   : > { %v6525_v63 = vmax.f32 %v6461_v38, 0.0 }
 0x669   : > { %v6523_v53 = vmax.f32 %v6459_v28, 0.0 }
 0x66a   : > { %v16717_v57 = vpack.c.bf16 %v6525_v63, %v6524_v9 }
 0x66b   : > { %v16719_v43 = vpack.c.bf16 %v6523_v53, %v6522_v61  ;;  %v13827_v39 = vpop.f32.mrb[28].mxu1 }
 0x66c   : > { %v6464_v18 = vadd.f32 %v13827_v39, %v16687_v19  ;;  %v6184_v17 = vpop.f32.mrb[29].mxu1 }
 0x66d   : > { %v6462_v7 = vadd.f32 %v16687_v19, %v6184_v17  ;;  %v13828_v46 = vpop.f32.mrb[30].mxu1 }
 0x66e   : > { %v6465_v48 = vadd.f32 %v13828_v46, %v16687_v19  ;;  %v6187_v0 = vpop.f32.mrb[31].mxu1  ;;  %v6528_v10 = vmax.f32 %v6464_v18, 0.0 }
 0x66f   : > { %v6463_v58 = vadd.f32 %v16687_v19, %v6187_v0  ;;  %v6526_v42 = vmax.f32 %v6462_v7, 0.0 }
 0x670   : > { %v6529_v20 = vmax.f32 %v6465_v48, 0.0 }
 0x671   : > { %v6527_v52 = vmax.f32 %v6463_v58, 0.0 }
 0x672   : > { %v16725_v55 = vpack.c.bf16 %v6529_v20, %v6528_v10 }
 0x673   : > { %v16727_v60 = vpack.c.bf16 %v6527_v52, %v6526_v42  ;;  %v13831_v5 = vpop.f32.mrb[32].mxu1 }
 0x674   : > { %v6468_v37 = vadd.f32 %v13831_v5, %v16687_v19  ;;  %v6200_v8 = vpop.f32.mrb[33].mxu1 }
 0x675   : > { %v6466_v35 = vadd.f32 %v16687_v19, %v6200_v8  ;;  %v13832_v45 = vpop.f32.mrb[34].mxu1 }
 0x676   : > { %v6469_v32 = vadd.f32 %v13832_v45, %v16687_v19  ;;  %v6203_v51 = vpop.f32.mrb[35].mxu1  ;;  %v6532_v49 = vmax.f32 %v6468_v37, 0.0 }
 0x677   : > { %v6467_v50 = vadd.f32 %v16687_v19, %v6203_v51  ;;  %v6530_v13 = vmax.f32 %v6466_v35, 0.0 }
 0x678   : > { %v6533_v33 = vmax.f32 %v6469_v32, 0.0 }
 0x679   : > { %v6531_v26 = vmax.f32 %v6467_v50, 0.0 }
 0x67a   : > { %v16733_v30 = vpack.c.bf16 %v6533_v33, %v6532_v49 }
 0x67b   : > { %v16735_v62 = vpack.c.bf16 %v6531_v26, %v6530_v13  ;;  %v13835_v23 = vpop.f32.mrb[36].mxu1 }
 0x67c   : > { %v6472_v6 = vadd.f32 %v13835_v23, %v16687_v19  ;;  %v6216_v1 = vpop.f32.mrb[37].mxu1 }
 0x67d   : > { %v6470_v40 = vadd.f32 %v16687_v19, %v6216_v1  ;;  %v13836_v54 = vpop.f32.mrb[38].mxu1 }
 0x67e   : > { %v6473_v59 = vadd.f32 %v13836_v54, %v16687_v19  ;;  %v6219_v11 = vpop.f32.mrb[39].mxu1  ;;  %v6536_v47 = vmax.f32 %v6472_v6, 0.0 }
 0x67f   : > { %v6471_v25 = vadd.f32 %v16687_v19, %v6219_v11  ;;  %v6534_v24 = vmax.f32 %v6470_v40, 0.0 }
 0x680   : > { %v6537_v2 = vmax.f32 %v6473_v59, 0.0 }
 0x681   : > { %v6535_v21 = vmax.f32 %v6471_v25, 0.0 }
 0x682   : > { %v16741_v41 = vpack.c.bf16 %v6537_v2, %v6536_v47 }
 0x683   : > { %v16743_v16 = vpack.c.bf16 %v6535_v21, %v6534_v24  ;;  %v13839_v36 = vpop.f32.mrb[40].mxu1 }
 0x684   : > { %v6476_v4 = vadd.f32 %v13839_v36, %v16687_v19  ;;  %v6232_v34 = vpop.f32.mrb[41].mxu1 }
 0x685   : > { %v6474_v27 = vadd.f32 %v16687_v19, %v6232_v34  ;;  %v13840_v29 = vpop.f32.mrb[42].mxu1 }
 0x686   : > { %v6477_v31 = vadd.f32 %v13840_v29, %v16687_v19  ;;  %v6235_v38 = vpop.f32.mrb[43].mxu1  ;;  %v6540_v28 = vmax.f32 %v6476_v4, 0.0 }
 0x687   : > { %v6475_v14 = vadd.f32 %v16687_v19, %v6235_v38  ;;  %v6538_v63 = vmax.f32 %v6474_v27, 0.0 }
 0x688   : > { %v6541_v9 = vmax.f32 %v6477_v31, 0.0 }
 0x689   : > { %v6539_v61 = vmax.f32 %v6475_v14, 0.0 }
 0x68a   : > { %v16749_v53 = vpack.c.bf16 %v6541_v9, %v6540_v28 }
 0x68b   : > { %v16751_v39 = vpack.c.bf16 %v6539_v61, %v6538_v63  ;;  %v13843_v18 = vpop.f32.mrb[44].mxu1 }
 0x68c   : > { %v6480_v17 = vadd.f32 %v13843_v18, %v16687_v19  ;;  %v6248_v7 = vpop.f32.mrb[45].mxu1 }
 0x68d   : > { %v6478_v46 = vadd.f32 %v16687_v19, %v6248_v7  ;;  %v13844_v48 = vpop.f32.mrb[46].mxu1 }
 0x68e   : > { %v6481_v0 = vadd.f32 %v13844_v48, %v16687_v19  ;;  %v6251_v58 = vpop.f32.mrb[47].mxu1  ;;  %v6544_v20 = vmax.f32 %v6480_v17, 0.0 }
 0x68f   : > { %v6479_v10 = vadd.f32 %v16687_v19, %v6251_v58  ;;  %v6542_v52 = vmax.f32 %v6478_v46, 0.0 }
 0x690   : > { %v6545_v42 = vmax.f32 %v6481_v0, 0.0 }
 0x691   : > { %v6543_v5 = vmax.f32 %v6479_v10, 0.0 }
 0x692   : > { %v15293_v37 = vpack.i.bf16 %v6545_v42, %v6544_v20 }
 0x693   : > { %v15278_v8 = vpack.i.bf16 %v6543_v5, %v6542_v52  ;;  %v13847_v35 = vpop.f32.mrb[48].mxu1 }
 0x694   : > { %v6484_v45 = vadd.f32 %v13847_v35, %v16687_v19  ;;  %v6264_v32 = vpop.f32.mrb[49].mxu1 }
 0x695   : > { %v6482_v51 = vadd.f32 %v16687_v19, %v6264_v32  ;;  %15279 = vrot.lane.b32.xlu1 %v15278_v8, %s15441_s20  ;;  %v13848_v50 = vpop.f32.mrb[50].mxu1 }
 0x696   : > { %v6485_v49 = vadd.f32 %v13848_v50, %v16687_v19  ;;  %v6267_v33 = vpop.f32.mrb[51].mxu1  ;;  %v6548_v26 = vmax.f32 %v6484_v45, 0.0 }
 0x697   : > { %v6483_v13 = vadd.f32 %v16687_v19, %v6267_v33  ;;  %v6546_v6 = vmax.f32 %v6482_v51, 0.0 }
 0x698   : > { %v6549_v23 = vmax.f32 %v6485_v49, 0.0 }
 0x699   : > { %v6547_v1 = vmax.f32 %v6483_v13, 0.0  ;;  %15294 = vrot.lane.b32.xlu1 %v15293_v37, %s15441_s20 }
 0x69a   : > { %v15313_v40 = vpack.i.bf16 %v6549_v23, %v6548_v26 }
 0x69b   : > { %v15298_v54 = vpack.i.bf16 %v6547_v1, %v6546_v6  ;;  %v13851_v59 = vpop.f32.mrb[52].mxu1 }
 0x69c   : > { %v6488_v11 = vadd.f32 %v13851_v59, %v16687_v19  ;;  %v6280_v25 = vpop.f32.mrb[53].mxu1 }
 0x69d   : > { %v6486_v47 = vadd.f32 %v16687_v19, %v6280_v25  ;;  %15299 = vrot.lane.b32.xlu1 %v15298_v54, %s15441_s20  ;;  %v13852_v2 = vpop.f32.mrb[54].mxu1 }
 0x69e   : > { %v6489_v24 = vadd.f32 %v13852_v2, %v16687_v19  ;;  %v6283_v21 = vpop.f32.mrb[55].mxu1  ;;  %v6552_v4 = vmax.f32 %v6488_v11, 0.0 }
 0x69f   : > { %v6487_v36 = vadd.f32 %v16687_v19, %v6283_v21  ;;  %v6550_v27 = vmax.f32 %v6486_v47, 0.0 }
 0x6a0   : > { %v6553_v34 = vmax.f32 %v6489_v24, 0.0 }
 0x6a1   : > { %v6551_v29 = vmax.f32 %v6487_v36, 0.0  ;;  %15314 = vrot.lane.b32.xlu1 %v15313_v40, %s15441_s20 }
 0x6a2   : > { %v15333_v31 = vpack.i.bf16 %v6553_v34, %v6552_v4 }
 0x6a3   : > { %v15318_v38 = vpack.i.bf16 %v6551_v29, %v6550_v27  ;;  %v13855_v14 = vpop.f32.mrb[56].mxu1 }
 0x6a4   : > { %v6492_v28 = vadd.f32 %v13855_v14, %v16687_v19  ;;  %v6296_v9 = vpop.f32.mrb[57].mxu1 }
 0x6a5   : > { %v6490_v63 = vadd.f32 %v16687_v19, %v6296_v9  ;;  %15319 = vrot.lane.b32.xlu1 %v15318_v38, %s15441_s20  ;;  %v13856_v61 = vpop.f32.mrb[58].mxu1 }
 0x6a6   : > { %v6493_v18 = vadd.f32 %v13856_v61, %v16687_v19  ;;  %v6299_v17 = vpop.f32.mrb[59].mxu1  ;;  %v6556_v46 = vmax.f32 %v6492_v28, 0.0 }
 0x6a7   : > { %v6491_v7 = vadd.f32 %v16687_v19, %v6299_v17  ;;  %v6554_v0 = vmax.f32 %v6490_v63, 0.0 }
 0x6a8   : > { %v6557_v48 = vmax.f32 %v6493_v18, 0.0 }
 0x6a9   : > { %v6555_v58 = vmax.f32 %v6491_v7, 0.0  ;;  %15334 = vrot.lane.b32.xlu1 %v15333_v31, %s15441_s20 }
 0x6aa   : > { %v15353_v10 = vpack.i.bf16 %v6557_v48, %v6556_v46 }
 0x6ab   : > { %v15338_v20 = vpack.i.bf16 %v6555_v58, %v6554_v0  ;;  %v13859_v42 = vpop.f32.mrb[60].mxu1 }
 0x6ac   : > { %v6496_v52 = vadd.f32 %v13859_v42, %v16687_v19  ;;  %v6312_v5 = vpop.f32.mrb[61].mxu1 }
 0x6ad   : > { %v6494_v37 = vadd.f32 %v16687_v19, %v6312_v5  ;;  %15339 = vrot.lane.b32.xlu1 %v15338_v20, %s15441_s20  ;;  %v13860_v8 = vpop.f32.mrb[62].mxu1 }
 0x6ae   : > { %v6497_v35 = vadd.f32 %v13860_v8, %v16687_v19  ;;  %v6315_v45 = vpop.f32.mrb[63].mxu1  ;;  %v6560_v51 = vmax.f32 %v6496_v52, 0.0 }
 0x6af   : > { %v6495_v32 = vadd.f32 %v16687_v19, %v6315_v45  ;;  %v6558_v49 = vmax.f32 %v6494_v37, 0.0 }
 0x6b0   : > { %v6561_v50 = vmax.f32 %v6497_v35, 0.0 }
 0x6b1   : > { %v6559_v33 = vmax.f32 %v6495_v32, 0.0  ;;  %15354 = vrot.lane.b32.xlu1 %v15353_v10, %s15441_s20  ;;  %v6576_v32 = vlaneseq }
 0x6b2   : > { %v15288_v13 = vpack.i.bf16 %v6561_v50, %v6560_v51 }
 0x6b3   : > { %v15283_v26 = vpack.i.bf16 %v6559_v33, %v6558_v49  ;;  %v13863_v23 = vpop.f32.mrb[64].mxu1  ;;  %v16799_v49 = vshrl.u32 %v6576_v32, 7  ;;  %v16804_v33 = vld [vmem:[%s18076_s15] sm:$0x3] }
 0x6b4   : > { %v6500_v6 = vadd.f32 %v13863_v23, %v16687_v19  ;;  %v6328_v1 = vpop.f32.mrb[65].mxu1 }
 0x6b5   : > { %v6498_v40 = vadd.f32 %v16687_v19, %v6328_v1  ;;  %15284 = vrot.lane.b32.xlu0 %v15283_v26, %s15441_s20  ;;  %v13864_v54 = vpop.f32.mrb[66].mxu1 }
 0x6b6   : > { %v6501_v59 = vadd.f32 %v13864_v54, %v16687_v19  ;;  %v6331_v11 = vpop.f32.mrb[67].mxu1  ;;  %v6564_v47 = vmax.f32 %v6500_v6, 0.0 }
 0x6b7   : > { %v6499_v25 = vadd.f32 %v16687_v19, %v6331_v11  ;;  %v6562_v24 = vmax.f32 %v6498_v40, 0.0 }
 0x6b8   : > { %v6565_v2 = vmax.f32 %v6501_v59, 0.0 }
 0x6b9   : > { %v6563_v21 = vmax.f32 %v6499_v25, 0.0  ;;  %15289 = vrot.lane.b32.xlu0 %v15288_v13, %s15441_s20 }
 0x6ba   : > { %v15308_v36 = vpack.i.bf16 %v6565_v2, %v6564_v47 }
 0x6bb   : > { %v15303_v4 = vpack.i.bf16 %v6563_v21, %v6562_v24  ;;  %v13867_v34 = vpop.f32.mrb[68].mxu1 }
 0x6bc   : > { %v6504_v27 = vadd.f32 %v13867_v34, %v16687_v19  ;;  %v6344_v29 = vpop.f32.mrb[69].mxu1 }
 0x6bd   : > { %v6502_v31 = vadd.f32 %v16687_v19, %v6344_v29  ;;  %15304 = vrot.lane.b32.xlu0 %v15303_v4, %s15441_s20  ;;  %v13868_v38 = vpop.f32.mrb[70].mxu1 }
 0x6be   : > { %v6505_v14 = vadd.f32 %v13868_v38, %v16687_v19  ;;  %v6347_v28 = vpop.f32.mrb[71].mxu1  ;;  %v6568_v63 = vmax.f32 %v6504_v27, 0.0 }
 0x6bf   : > { %v6503_v9 = vadd.f32 %v16687_v19, %v6347_v28  ;;  %v6566_v18 = vmax.f32 %v6502_v31, 0.0 }
 0x6c0   : > { %v6569_v61 = vmax.f32 %v6505_v14, 0.0 }
 0x6c1   : > { %v6567_v17 = vmax.f32 %v6503_v9, 0.0  ;;  %15309 = vrot.lane.b32.xlu0 %v15308_v36, %s15441_s20 }
 0x6c2   : > { %v15328_v7 = vpack.i.bf16 %v6569_v61, %v6568_v63 }
 0x6c3   : > { %v15323_v46 = vpack.i.bf16 %v6567_v17, %v6566_v18  ;;  %v13871_v48 = vpop.f32.mrb[72].mxu1 }
 0x6c4   : > { %v6508_v0 = vadd.f32 %v13871_v48, %v16687_v19  ;;  %v6360_v58 = vpop.f32.mrb[73].mxu1 }
 0x6c5   : > { %v6506_v10 = vadd.f32 %v16687_v19, %v6360_v58  ;;  %15324 = vrot.lane.b32.xlu0 %v15323_v46, %s15441_s20  ;;  %v13872_v20 = vpop.f32.mrb[74].mxu1 }
 0x6c6   : > { %v6509_v42 = vadd.f32 %v13872_v20, %v16687_v19  ;;  %v6363_v52 = vpop.f32.mrb[75].mxu1  ;;  %v6572_v37 = vmax.f32 %v6508_v0, 0.0 }
 0x6c7   : > { %v6507_v5 = vadd.f32 %v16687_v19, %v6363_v52  ;;  %v6570_v35 = vmax.f32 %v6506_v10, 0.0  ;;  %v6582_v19 = vsub.s32 1, %v16799_v49 }
 0x6c8   : > { %v6573_v8 = vmax.f32 %v6509_v42, 0.0 }
 0x6c9   : > { %v6571_v45 = vmax.f32 %v6507_v5, 0.0  ;;  %15329 = vrot.lane.b32.xlu0 %v15328_v7, %s15441_s20  ;;  %v6583_v13 = vrot.slane %v16804_v33, %v6582_v19 }
 0x6ca   : > { %v15348_v51 = vpack.i.bf16 %v6573_v8, %v6572_v37 }
 0x6cb   : > { %v15343_v50 = vpack.i.bf16 %v6571_v45, %v6570_v35  ;;  %6778 = vmatprep.mubr.f32.mxu0 %v6583_v13 }
 0x6cd   : > { %15344 = vrot.lane.b32.xlu0 %v15343_v50, %s15441_s20 }
 0x6d1   : > { %15349 = vrot.lane.b32.xlu0 %v15348_v51, %s15441_s20 }
 0x707   : > { %v15280_v26 = vpop.permute.xlu1 %15279 }
 0x708   : > { %v15282_v1 = vunpack.i.h.bf16 %v15280_v26  ;;  %v15281_v40 = vunpack.i.l.bf16 %v15280_v26 }
 0x70a   : > { %v14317_v2 = vpack.c.bf16 %v15282_v1, %v15281_v40 }
 0x70b   : > { %v15295_v23 = vpop.permute.xlu1 %15294 }
 0x70c   : > { %v15297_v24 = vunpack.i.h.bf16 %v15295_v23  ;;  %v15296_v21 = vunpack.i.l.bf16 %v15295_v23 }
 0x70e   : > { %v14321_v31 = vpack.c.bf16 %v15297_v24, %v15296_v21 }
 0x70f   : > { %v15300_v6 = vpop.permute.xlu1 %15299 }
 0x710   : > { %v15302_v38 = vunpack.i.h.bf16 %v15300_v6  ;;  %v15301_v14 = vunpack.i.l.bf16 %v15300_v6 }
 0x712   : > { %v14325_v18 = vpack.c.bf16 %v15302_v38, %v15301_v14  ;;  %v15402_v14 = vld [vmem:[%s18066_s5] sm:$0xff]  }
 0x713   : > { %v15315_v59 = vpop.permute.xlu1 %15314 }
 0x714   : > { %v15317_v17 = vunpack.i.h.bf16 %v15315_v59  ;;  %v15316_v7 = vunpack.i.l.bf16 %v15315_v59 }
 0x716   : > { %v14329_v20 = vpack.c.bf16 %v15317_v17, %v15316_v7  ;;  %v15405_v17 = vld [vmem:[%s18068_s7 + $0x8] sm:$0xff]  }
 0x717   : > { %v15320_v27 = vpop.permute.xlu1 %15319  ;;  %v6903_v7 = vld [vmem:[%s18074_s13 + $0x8] sm:$0xff] }
 0x718   : > { %v15322_v42 = vunpack.i.h.bf16 %v15320_v27  ;;  %v15321_v52 = vunpack.i.l.bf16 %v15320_v27  ;;  %v16811_v27 = vsub.s32 0, %v16799_v49  ;;  %v15403_v49 = vld [vmem:[%s18066_s5 + $0x8] sm:$0xff]  }
 0x71a   : > { %v14333_v32 = vpack.c.bf16 %v15322_v42, %v15321_v52  ;;  %v6579_v38 = vrot.slane %v16804_v33, %v16811_v27 }
 0x71b   : > { %v15335_v48 = vpop.permute.xlu1 %15334 }
 0x71c   : > { %v15337_v51 = vunpack.i.h.bf16 %v15335_v48  ;;  %v15336_v50 = vunpack.i.l.bf16 %v15335_v48 }
 0x71e   : > { %v14337_v6 = vpack.c.bf16 %v15337_v51, %v15336_v50 }
 0x71f   : > { %v15340_v35 = vpop.permute.xlu1 %15339 }
 0x720   : > { %v15342_v1 = vunpack.i.h.bf16 %v15340_v35  ;;  %v15341_v40 = vunpack.i.l.bf16 %v15340_v35 }
 0x723   : > { %v15355_v59 = vpop.permute.xlu1 %15354 }
 0x724   : > { %v15357_v24 = vunpack.i.h.bf16 %v15355_v59  ;;  %v15356_v21 = vunpack.i.l.bf16 %v15355_v59 }
 0x727   : > { %v15285_v54 = vpop.permute.xlu0 %15284 }
 0x728   : > { %v15287_v11 = vunpack.i.h.bf16 %v15285_v54  ;;  %v15286_v25 = vunpack.i.l.bf16 %v15285_v54 }
 0x72a   : > { %v14315_v47 = vpack.c.bf16 %v15287_v11, %v15286_v25 }
 0x72b   : > { %v15290_v36 = vpop.permute.xlu0 %15289 }
 0x72c   : > { %v15292_v4 = vunpack.i.h.bf16 %v15290_v36  ;;  %v15291_v34 = vunpack.i.l.bf16 %v15290_v36  ;;  %14316 = vmatprep.subr.bf16.mxu0 %v14315_v47 }
 0x72d   : > { %14318 = vmatpush3.bf16.msra.mxu0 %v14317_v2  ;;  %v14341_v2 = vpack.c.bf16 %v15342_v1, %v15341_v40 }
 0x72e   : > { %v14319_v29 = vpack.c.bf16 %v15292_v4, %v15291_v34 }
 0x72f   : > { %v15305_v28 = vpop.permute.xlu0 %15304 }
 0x730   : > { %v15307_v9 = vunpack.i.h.bf16 %v15305_v28  ;;  %v15306_v63 = vunpack.i.l.bf16 %v15305_v28  ;;  %14320 = vmatprep.subr.bf16.mxu0 %v14319_v29  ;;  %v18104_v28 = vmov 0.0  }
 0x731   : > { %14322 = vmatpush3.bf16.msra.mxu0 %v14321_v31  ;;  %v14345_v31 = vpack.c.bf16 %v15357_v24, %v15356_v21  ;;  %639 = vst.msk [vmem:[#allocation3] sm:$0xff] %vm638_vm6, %v18104_v28  ;;  %640 = vst.msk [vmem:[#allocation3 + $0x8] sm:$0xff] %vm638_vm6, %v18104_v28 }
 0x732   : > { %v14323_v61 = vpack.c.bf16 %v15307_v9, %v15306_v63  ;;  %644 = vst.msk [vmem:[#allocation3 + $0x198] sm:$0xff] %vm638_vm6, %v18104_v28  ;;  %645 = vst.msk [vmem:[#allocation3 + $0x1a0] sm:$0xff] %vm638_vm6, %v18104_v28 }
 0x733   : > { %v15310_v46 = vpop.permute.xlu0 %15309  ;;  %642 = vst.msk [vmem:[#allocation3 + $0x10] sm:$0x3] %vm641_vm9, %v18104_v28  ;;  %646 = vst.msk [vmem:[#allocation3 + $0x1a8] sm:$0x3] %vm641_vm9, %v18104_v28 }
 0x734   : > { %v15312_v0 = vunpack.i.h.bf16 %v15310_v46  ;;  %v15311_v58 = vunpack.i.l.bf16 %v15310_v46  ;;  %14324 = vmatprep.subr.bf16.mxu0 %v14323_v61  ;;  %v15404_v61 = vld [vmem:[%s18068_s7] sm:$0xff]   ;;  %648 = vst.msk [vmem:[#allocation3] sm:$0x1] %vm647_vm10, %v18104_v28  ;;  %649 = vst.msk [vmem:[#allocation3 + $0x18] sm:$0x1] %vm647_vm10, %v18104_v28 }
 0x735   : > { %14326 = vmatpush3.bf16.msra.mxu0 %v14325_v18  ;;  %650 = vst.msk [vmem:[#allocation3 + $0x30] sm:$0x1] %vm647_vm10, %v18104_v28  ;;  %651 = vst.msk [vmem:[#allocation3 + $0x48] sm:$0x1] %vm647_vm10, %v18104_v28 }
 0x736   : > { %v14327_v10 = vpack.c.bf16 %v15312_v0, %v15311_v58  ;;  %652 = vst.msk [vmem:[#allocation3 + $0x60] sm:$0x1] %vm647_vm10, %v18104_v28  ;;  %653 = vst.msk [vmem:[#allocation3 + $0x78] sm:$0x1] %vm647_vm10, %v18104_v28 }
 0x737   : > { %v15325_v5 = vpop.permute.xlu0 %15324  ;;  %654 = vst.msk [vmem:[#allocation3 + $0x90] sm:$0x1] %vm647_vm10, %v18104_v28  ;;  %655 = vst.msk [vmem:[#allocation3 + $0xa8] sm:$0x1] %vm647_vm10, %v18104_v28 }
 0x738   : > { %v15327_v37 = vunpack.i.h.bf16 %v15325_v5  ;;  %v15326_v8 = vunpack.i.l.bf16 %v15325_v5  ;;  %14328 = vmatprep.subr.bf16.mxu0 %v14327_v10  ;;  %656 = vst.msk [vmem:[#allocation3 + $0xc0] sm:$0x1] %vm647_vm10, %v18104_v28  ;;  %657 = vst.msk [vmem:[#allocation3 + $0xd8] sm:$0x1] %vm647_vm10, %v18104_v28 }
 0x739   : > { %14330 = vmatpush3.bf16.msra.mxu0 %v14329_v20  ;;  %658 = vst.msk [vmem:[#allocation3 + $0xf0] sm:$0x1] %vm647_vm10, %v18104_v28  ;;  %659 = vst.msk [vmem:[#allocation3 + $0x108] sm:$0x1] %vm647_vm10, %v18104_v28 }
 0x73a   : > { %v14331_v45 = vpack.c.bf16 %v15327_v37, %v15326_v8  ;;  %660 = vst.msk [vmem:[#allocation3 + $0x120] sm:$0x1] %vm647_vm10, %v18104_v28  ;;  %661 = vst.msk [vmem:[#allocation3 + $0x138] sm:$0x1] %vm647_vm10, %v18104_v28 }
 0x73b   : > { %v15330_v19 = vpop.permute.xlu0 %15329  ;;  %662 = vst.msk [vmem:[#allocation3 + $0x150] sm:$0x1] %vm647_vm10, %v18104_v28  ;;  %663 = vst.msk [vmem:[#allocation3 + $0x168] sm:$0x1] %vm647_vm10, %v18104_v28 }
 0x73c   : > { %v15332_v13 = vunpack.i.h.bf16 %v15330_v19  ;;  %v15331_v26 = vunpack.i.l.bf16 %v15330_v19  ;;  %14332 = vmatprep.subr.bf16.mxu0 %v14331_v45  ;;  %664 = vst.msk [vmem:[#allocation3 + $0x180] sm:$0x1] %vm647_vm10, %v18104_v28  ;;  %665 = vst.msk [vmem:[#allocation3 + $0x198] sm:$0x1] %vm647_vm10, %v18104_v28 }
 0x73d   : > { %14334 = vmatpush3.bf16.msra.mxu0 %v14333_v32  ;;  %667 = vst.msk [vmem:[#allocation3 + $0x29] sm:$0x1] %vm647_vm10, %v18104_v28  ;;  %668 = vst.msk [vmem:[#allocation3 + $0x41] sm:$0x1] %vm647_vm10, %v18104_v28 }
 0x73e   : > { %v14335_v23 = vpack.c.bf16 %v15332_v13, %v15331_v26  ;;  %669 = vst.msk [vmem:[#allocation3 + $0x59] sm:$0x1] %vm647_vm10, %v18104_v28  ;;  %670 = vst.msk [vmem:[#allocation3 + $0x71] sm:$0x1] %vm647_vm10, %v18104_v28 }
 0x73f   : > { %v15345_v54 = vpop.permute.xlu0 %15344  ;;  %671 = vst.msk [vmem:[#allocation3 + $0x89] sm:$0x1] %vm647_vm10, %v18104_v28  ;;  %672 = vst.msk [vmem:[#allocation3 + $0xa1] sm:$0x1] %vm647_vm10, %v18104_v28 }
 0x740   : > { %v15347_v11 = vunpack.i.h.bf16 %v15345_v54  ;;  %v15346_v25 = vunpack.i.l.bf16 %v15345_v54  ;;  %14336 = vmatprep.subr.bf16.mxu0 %v14335_v23  ;;  %673 = vst.msk [vmem:[#allocation3 + $0xb9] sm:$0x1] %vm647_vm10, %v18104_v28  ;;  %674 = vst.msk [vmem:[#allocation3 + $0xd1] sm:$0x1] %vm647_vm10, %v18104_v28 }
 0x741   : > { %14338 = vmatpush3.bf16.msra.mxu0 %v14337_v6  ;;  %675 = vst.msk [vmem:[#allocation3 + $0xe9] sm:$0x1] %vm647_vm10, %v18104_v28  ;;  %676 = vst.msk [vmem:[#allocation3 + $0x101] sm:$0x1] %vm647_vm10, %v18104_v28 }
 0x742   : > { %v14339_v47 = vpack.c.bf16 %v15347_v11, %v15346_v25  ;;  %677 = vst.msk [vmem:[#allocation3 + $0x119] sm:$0x1] %vm647_vm10, %v18104_v28  ;;  %678 = vst.msk [vmem:[#allocation3 + $0x131] sm:$0x1] %vm647_vm10, %v18104_v28 }
 0x743   : > { %v15350_v36 = vpop.permute.xlu0 %15349  ;;  %679 = vst.msk [vmem:[#allocation3 + $0x149] sm:$0x1] %vm647_vm10, %v18104_v28  ;;  %680 = vst.msk [vmem:[#allocation3 + $0x161] sm:$0x1] %vm647_vm10, %v18104_v28 }
 0x744   : > { %v15352_v4 = vunpack.i.h.bf16 %v15350_v36  ;;  %v15351_v34 = vunpack.i.l.bf16 %v15350_v36  ;;  %14340 = vmatprep.subr.bf16.mxu0 %v14339_v47  ;;  %681 = vst.msk [vmem:[#allocation3 + $0x179] sm:$0x1] %vm647_vm10, %v18104_v28  ;;  %682 = vst.msk [vmem:[#allocation3 + $0x191] sm:$0x1] %vm647_vm10, %v18104_v28 }
 0x745   : > { %14342 = vmatpush3.bf16.msra.mxu0 %v14341_v2  ;;  %666 = vst.msk [vmem:[#allocation3 + $0x11] sm:$0x1] %vm647_vm10, %v18104_v28  ;;  %683 = vst.msk [vmem:[#allocation3 + $0x1a9] sm:$0x1] %vm647_vm10, %v18104_v28 }
 0x746   : > { %v14343_v29 = vpack.c.bf16 %v15352_v4, %v15351_v34 }
 0x748   : > { %14344 = vmatprep.subr.bf16.mxu0 %v14343_v29 }
 0x749   : > { %14346 = vmatpush3.bf16.msra.mxu0 %v14345_v31 }
 0x74a   : > { %13873 = vmatprep.subr.bf16.mxu0 %v18104_v28 }
 0x74c   : > { %6779 = vmatmul.mubr.f32.vlgmr.msra.gmra.mrb[52].mxu0 %v6579_v38  ;;  %v7023_v38 = vld [vmem:[%s18077_s16] sm:$0x1] }
 0x74d   : > { %13874 = vmatpush3.bf16.msra.mxu0 %v15402_v14  ;;  %13877 = vmatprep.mubr.msk.bf16.mxu0 %vm15442_vm7, %v18104_v28 }
 0x74e   : > { %13875 = vmatprep.subr.bf16.mxu0 %v18104_v28 }
 0x751   : > { %13876 = vmatpush3.bf16.msra.mxu0 %v15403_v49 }
 0x752   : > { %13881 = vmatprep.subr.bf16.mxu0 %v18104_v28 }
 0x81f   : > { %v12764_v33 = vpop.f32.mrb[52].mxu0 }
 0x820   : > { %v12765_v9 = vpop.f32.mrb[53].mxu0 }
 0x821   : > { %v12766_v63 = vadd.f32 %v12765_v9, %v12764_v33 }
 0x823   : > { %v6784_v18 = vpack.c.bf16 %v12766_v63, %v12766_v63 }
 0x825   : > { %13878 = vmatmul.mubr.msk.bf16.vlgmr.msra.gmra.mrb[56].mxu0 %vm638_vm6, %v6784_v18 }
 0x826   : > { %13882 = vmatpush3.bf16.msra.mxu0 %v15404_v61  ;;  %13885 = vmatprep.mubr.msk.bf16.mxu0 %vm15442_vm7, %v18104_v28 }
 0x827   : > { %13883 = vmatprep.subr.bf16.mxu0 %v18104_v28 }
 0x82a   : > { %13884 = vmatpush3.bf16.msra.mxu0 %v15405_v17 }
 0x82b   : > { %14348 = vmatprep.subr.bf16.mxu0 %v16727_v60  ;;  %v6913_v60 = vld [vmem:[%s18074_s13 + $0x58] sm:$0xff] }
 0x82d   : > { %13886 = vmatmul.mubr.msk.bf16.vlgmr.msra.gmra.mrb[60].mxu0 %vm638_vm6, %v6784_v18 }
 0x82e   : > { %14350 = vmatpush3.bf16.msra.mxu0 %v16695_v22  ;;  %6982 = vmatprep.mubr.f32.mxu0 %v6903_v7  ;;  %v6905_v22 = vld [vmem:[%s18074_s13 + $0x18] sm:$0xff] }
 0x82f   : > { %14352 = vmatprep.subr.bf16.mxu0 %v16725_v55  ;;  %v6910_v55 = vld [vmem:[%s18074_s13 + $0x40] sm:$0xff] }
 0x832   : > { %14354 = vmatpush3.bf16.msra.mxu0 %v16693_v15  ;;  %v6902_v15 = vld [vmem:[%s18074_s13] sm:$0xff] }
 0x833   : > { %14356 = vmatprep.subr.bf16.mxu0 %v16735_v62  ;;  %v6915_v62 = vld [vmem:[%s18074_s13 + $0x68] sm:$0xff] }
 0x836   : > { %14358 = vmatpush3.bf16.msra.mxu0 %v16703_v12  ;;  %v6907_v12 = vld [vmem:[%s18074_s13 + $0x28] sm:$0xff] }
 0x837   : > { %14360 = vmatprep.subr.bf16.mxu0 %v16733_v30  ;;  %v6912_v30 = vld [vmem:[%s18074_s13 + $0x50] sm:$0xff] }
 0x83a   : > { %14362 = vmatpush3.bf16.msra.mxu0 %v16701_v3  ;;  %v6904_v3 = vld [vmem:[%s18074_s13 + $0x10] sm:$0xff] }
 0x83b   : > { %14364 = vmatprep.subr.bf16.mxu0 %v16743_v16  ;;  %v6917_v16 = vld [vmem:[%s18074_s13 + $0x78] sm:$0xff] }
 0x83e   : > { %14366 = vmatpush3.bf16.msra.mxu0 %v16711_v56  ;;  %v6909_v56 = vld [vmem:[%s18074_s13 + $0x38] sm:$0xff] }
 0x83f   : > { %14368 = vmatprep.subr.bf16.mxu0 %v16741_v41  ;;  %v6914_v41 = vld [vmem:[%s18074_s13 + $0x60] sm:$0xff] }
 0x842   : > { %14370 = vmatpush3.bf16.msra.mxu0 %v16709_v44  ;;  %v6906_v44 = vld [vmem:[%s18074_s13 + $0x20] sm:$0xff] }
 0x843   : > { %14372 = vmatprep.subr.bf16.mxu0 %v16751_v39  ;;  %v15443_v39 = vmov 0.0|0.0  }
 0x846   : > { %14374 = vmatpush3.bf16.msra.mxu0 %v16719_v43  ;;  %v6911_v43 = vld [vmem:[%s18074_s13 + $0x48] sm:$0xff] }
 0x847   : > { %14376 = vmatprep.subr.bf16.mxu0 %v16749_v53  ;;  %v6916_v53 = vld [vmem:[%s18074_s13 + $0x70] sm:$0xff] }
 0x84a   : > { %14378 = vmatpush3.bf16.msra.mxu0 %v16717_v57  ;;  %v6908_v57 = vld [vmem:[%s18074_s13 + $0x30] sm:$0xff] }
 0x84b   : > { %14379 = vmatprep.subr.bf16.mxu0 %v15443_v39 }
 0x84d   : > { %6983 = vmatmul.mubr.f32.vlgmr.msra.gmra.mrb[54].mxu0 %v6902_v15 }
 0x84e   : > { %6987 = vmatprep.mubr.f32.mxu0 %v6905_v22 }
 0x851   : > { %6988 = vmatmul.mubr.f32.gmra.mrb[64].mxu0 %v6904_v3 }
 0x852   : > { %6992 = vmatprep.mubr.f32.mxu0 %v6907_v12 }
 0x855   : > { %6993 = vmatmul.mubr.f32.gmra.mrb[66].mxu0 %v6906_v44 }
 0x856   : > { %6997 = vmatprep.mubr.f32.mxu0 %v6909_v56 }
 0x859   : > { %6998 = vmatmul.mubr.f32.gmra.mrb[68].mxu0 %v6908_v57 }
 0x85a   : > { %7002 = vmatprep.mubr.f32.mxu0 %v6911_v43 }
 0x85d   : > { %7003 = vmatmul.mubr.f32.gmra.mrb[70].mxu0 %v6910_v55 }
 0x85e   : > { %7007 = vmatprep.mubr.f32.mxu0 %v6913_v60 }
 0x861   : > { %7008 = vmatmul.mubr.f32.gmra.mrb[72].mxu0 %v6912_v30 }
 0x862   : > { %7012 = vmatprep.mubr.f32.mxu0 %v6915_v62 }
 0x865   : > { %7013 = vmatmul.mubr.f32.gmra.mrb[74].mxu0 %v6914_v41 }
 0x866   : > { %7017 = vmatprep.mubr.f32.mxu0 %v6917_v16 }
 0x869   : > { %7018 = vmatmul.mubr.f32.gmra.mrb[76].mxu0 %v6916_v53  ;;  %v7215_v53 = vld [vmem:[%s18075_s14] sm:$0xff] }
 0x86a   : > { %13905 = vmatprep.mubr.msk.f32.mxu0 %vm15442_vm7, %v18104_v28 }
 0x8f8   : > { %v16912_v46 = vpop.f32.mrb[56].mxu0 }
 0x8f9   : > { %v13879_v48 = vpop.f32.mrb[57].mxu0 }
 0x8fa   : > { %v6842_v0 = vpop.f32.mrb[58].mxu0 }
 0x8fb   : > { %v13880_v58 = vpop.f32.mrb[59].mxu0 }
 0x900   : > { %v16914_v10 = vpop.f32.mrb[60].mxu0 }
 0x901   : > { %v13887_v20 = vpop.f32.mrb[61].mxu0 }
 0x902   : > { %v6899_v42 = vpop.f32.mrb[62].mxu0  ;;  %v6789_v20 = vld [vmem:[%s18067_s6] sm:$0x1] }
 0x903   : > { %v13888_v52 = vpop.f32.mrb[63].mxu0  ;;  %v6849_v42 = vld [vmem:[%s18069_s8] sm:$0x1] }
 0x920   : > { %v12805_v5 = vpop.f32.mrb[54].mxu0 }
 0x921   : > { %v12806_v37 = vpop.f32.mrb[55].mxu0 }
 0x922   : > { %v12807_v8 = vadd.f32 %v12806_v37, %v12805_v5  ;;  %v6897_v37 = vadd.f32 %v16914_v10, %v6849_v42  ;;  %v15408_v42 = vld [vmem:[%s18070_s9] sm:$0xff]  }
 0x924   : > { %v12808_v35 = vpop.f32.mrb[64].mxu0 }
 0x925   : > { %v12809_v45 = vpop.f32.mrb[65].mxu0 }
 0x926   : > { %v12810_v32 = vadd.f32 %v12809_v45, %v12808_v35  ;;  %v7206_v45 = vrot.slane %v6897_v37, %v16811_v27 }
 0x928   : > { %v14380_v51 = vpack.c.bf16 %v12810_v32, %v12807_v8  ;;  %v12811_v50 = vpop.f32.mrb[66].mxu0 }
 0x929   : > { %v12812_v19 = vpop.f32.mrb[67].mxu0 }
 0x92a   : > { %v12813_v13 = vadd.f32 %v12812_v19, %v12811_v50  ;;  %14381 = vmatpush3.bf16.msra.mxu0 %v14380_v51 }
 0x92b   : > { %14382 = vmatprep.subr.bf16.mxu0 %v15443_v39 }
 0x92c   : > { %v12814_v26 = vpop.f32.mrb[68].mxu0 }
 0x92d   : > { %v12815_v23 = vpop.f32.mrb[69].mxu0 }
 0x92e   : > { %v12816_v6 = vadd.f32 %v12815_v23, %v12814_v26 }
 0x930   : > { %v14383_v1 = vpack.c.bf16 %v12816_v6, %v12813_v13  ;;  %v12817_v40 = vpop.f32.mrb[70].mxu0 }
 0x931   : > { %v12818_v54 = vpop.f32.mrb[71].mxu0 }
 0x932   : > { %v12819_v59 = vadd.f32 %v12818_v54, %v12817_v40  ;;  %14384 = vmatpush3.bf16.msra.mxu0 %v14383_v1 }
 0x933   : > { %14385 = vmatprep.subr.bf16.mxu0 %v15443_v39 }
 0x934   : > { %v12820_v11 = vpop.f32.mrb[72].mxu0 }
 0x935   : > { %v12821_v25 = vpop.f32.mrb[73].mxu0 }
 0x936   : > { %v12822_v47 = vadd.f32 %v12821_v25, %v12820_v11 }
 0x938   : > { %v14386_v2 = vpack.c.bf16 %v12822_v47, %v12819_v59  ;;  %v12823_v24 = vpop.f32.mrb[74].mxu0 }
 0x939   : > { %v12824_v21 = vpop.f32.mrb[75].mxu0 }
 0x93a   : > { %v12825_v36 = vadd.f32 %v12824_v21, %v12823_v24  ;;  %14387 = vmatpush3.bf16.msra.mxu0 %v14386_v2  ;;  %v7216_v21 = vld [vmem:[%s18075_s14 + $0x8] sm:$0xff] }
 0x93b   : > { %14388 = vmatprep.subr.bf16.mxu0 %v15443_v39 }
 0x93c   : > { %v12826_v4 = vpop.f32.mrb[76].mxu0 }
 0x93d   : > { %v12827_v34 = vpop.f32.mrb[77].mxu0 }
 0x93e   : > { %v12828_v29 = vadd.f32 %v12827_v34, %v12826_v4  ;;  %v7218_v4 = vld [vmem:[%s18075_s14 + $0x18] sm:$0xff]  ;;  %v7219_v34 = vld [vmem:[%s18075_s14 + $0x20] sm:$0xff] }
 0x940   : > { %v14389_v31 = vpack.c.bf16 %v12828_v29, %v12825_v36 }
 0x942   : > { %14390 = vmatpush3.bf16.msra.mxu0 %v14389_v31  ;;  %v7221_v31 = vld [vmem:[%s18075_s14 + $0x30] sm:$0xff] }
 0x943   : > { %14391 = vmatprep.subr.bf16.mxu0 %v15443_v39 }
 0x945   : > { %13906 = vmatmul.mubr.msk.f32.vlgmr.msra.gmra.mrb[78].mxu0 %vm7024_vm8, %v7023_v38 }
 0x946   : > { %13924 = vmatprep.mubr.msk.f32.mxu0 %vm15442_vm7, %v18104_v28 }
 0xa18   : > { %v7094_v14 = vpop.f32.mrb[78].mxu0 }
 0xa19   : > { %v7101_v49 = vrot.slane %v7094_v14, %v16811_v27  ;;  %v13907_v33 = vpop.f32.mrb[79].mxu0  ;;  %v7223_v14 = vld [vmem:[%s18075_s14 + $0x40] sm:$0xff] }
 0xa1a   : > { %v7225_v33 = vld [vmem:[%s18075_s14 + $0x50] sm:$0xff] }
 0xa1b   : > { %v7102_v9 = vsub.f32 %v12807_v8, %v7101_v49  ;;  %v7103_v63 = vsub.f32 %v12810_v32, %v7101_v49  ;;  %v7104_v61 = vsub.f32 %v12813_v13, %v7101_v49  ;;  %v7105_v18 = vsub.f32 %v12816_v6, %v7101_v49 }
 0xa1c   : > { %v7106_v15 = vsub.f32 %v12819_v59, %v7101_v49  ;;  %v7107_v44 = vsub.f32 %v12822_v47, %v7101_v49  ;;  %v7108_v56 = vsub.f32 %v12825_v36, %v7101_v49  ;;  %v7109_v60 = vsub.f32 %v12828_v29, %v7101_v49  ;;  %v7217_v36 = vld [vmem:[%s18075_s14 + $0x10] sm:$0xff]  ;;  %v7220_v29 = vld [vmem:[%s18075_s14 + $0x28] sm:$0xff] }
 0xa1d   : > { %v7110_v17 = vmul.f32 %v7102_v9, %v7102_v9  ;;  %v7111_v7 = vmul.f32 %v7103_v63, %v7103_v63  ;;  %v7112_v3 = vmul.f32 %v7104_v61, %v7104_v61  ;;  %v7113_v12 = vmul.f32 %v7105_v18, %v7105_v18  ;;  %v7224_v49 = vld [vmem:[%s18075_s14 + $0x48] sm:$0xff] }
 0xa1e   : > { %v7114_v43 = vmul.f32 %v7106_v15, %v7106_v15  ;;  %v7115_v55 = vmul.f32 %v7107_v44, %v7107_v44  ;;  %v7116_v62 = vmul.f32 %v7108_v56, %v7108_v56  ;;  %v7117_v41 = vmul.f32 %v7109_v60, %v7109_v60 }
 0xa1f   : > { %v14392_v22 = vpack.c.bf16 %v7111_v7, %v7110_v17  ;;  %v14395_v57 = vpack.c.bf16 %v7113_v12, %v7112_v3  ;;  %v7230_v17 = vld [vmem:[%s18075_s14 + $0x78] sm:$0xff]  ;;  %v7231_v7 = vld [vmem:[%s18075_s14 + $0x80] sm:$0xff] }
 0xa20   : > { %v14398_v30 = vpack.c.bf16 %v7115_v55, %v7114_v43  ;;  %v14401_v16 = vpack.c.bf16 %v7117_v41, %v7116_v62  ;;  %v7234_v3 = vld [vmem:[%s18075_s14 + $0x98] sm:$0xff]  ;;  %v7235_v12 = vld [vmem:[%s18075_s14 + $0xa0] sm:$0xff]  ;;  %v7240_v55 = vld [vmem:[%s18075_s14 + $0xc8] sm:$0xff] }
 0xa21   : > { %14393 = vmatpush3.bf16.msra.mxu0 %v14392_v22  ;;  %v7233_v22 = vld [vmem:[%s18075_s14 + $0x90] sm:$0xff]  ;;  %v7239_v43 = vld [vmem:[%s18075_s14 + $0xc0] sm:$0xff]  ;;  %v7244_v41 = vld [vmem:[%s18075_s14 + $0xe8] sm:$0xff] }
 0xa22   : > { %14394 = vmatprep.subr.bf16.mxu0 %v15443_v39  ;;  %v7243_v62 = vld [vmem:[%s18075_s14 + $0xe0] sm:$0xff] }
 0xa25   : > { %14396 = vmatpush3.bf16.msra.mxu0 %v14395_v57  ;;  %v7238_v57 = vld [vmem:[%s18075_s14 + $0xb8] sm:$0xff] }
 0xa26   : > { %14397 = vmatprep.subr.bf16.mxu0 %v15443_v39 }
 0xa29   : > { %14399 = vmatpush3.bf16.msra.mxu0 %v14398_v30  ;;  %v7242_v30 = vld [vmem:[%s18075_s14 + $0xd8] sm:$0xff] }
 0xa2a   : > { %14400 = vmatprep.subr.bf16.mxu0 %v15443_v39  ;;  %v6840_v39 = vadd.f32 %v16912_v46, %v6789_v20  ;;  %v7654_v20 = vld [vmem:[#allocation3 + $0x9] sm:$0xff] }
 0xa2c   : > { %v7189_v52 = vadd.f32 1.0, %v6840_v39 }
 0xa2d   : > { %14402 = vmatpush3.bf16.msra.mxu0 %v14401_v16  ;;  %v15406_v16 = vld [vmem:[%s18070_s9 + $0x10] sm:$0xff]  }
 0xa30   : > { %13925 = vmatmul.mubr.msk.f32.vlgmr.msra.gmra.mrb[80].mxu0 %vm7024_vm8, %v7023_v38  ;;  %v7222_v38 = vld [vmem:[%s18075_s14 + $0x38] sm:$0xff] }
 0xa31   : > { %13943 = vmatprep.mubr.msk.f32.mxu0 %vm7024_vm8, %v7215_v53  ;;  %v7245_v53 = vld [vmem:[%s18075_s14 + $0xf0] sm:$0xff] }
 0xb03   : > { %v7184_v48 = vpop.f32.mrb[80].mxu0 }
 0xb04   : > { %v7185_v0 = vadd.f32 1e-05, %v7184_v48  ;;  %v13926_v58 = vpop.f32.mrb[81].mxu0  ;;  %v7246_v48 = vld [vmem:[%s18075_s14 + $0xf8] sm:$0xff] }
 0xb05   : > { %v7653_v58 = vld [vmem:[#allocation3 + $0x1] sm:$0xff] }
 0xb06   : > { %15424 = vrsqrt.f32 %v7185_v0  ;;  %v15407_v0 = vld [vmem:[%s18070_s9 + $0x18] sm:$0xff]   ;;  %v7685_v39 = vpack.c.bf16 %v7654_v20, %v7653_v58 }
 0xb10   : > { %v15425_v5 = vpop.eup %15424 }
 0xb11   : > { %v7190_v8 = vmul.f32 %v15425_v5, %v7189_v52 }
 0xb13   : > { %v7194_v35 = vrot.slane %v7190_v8, %v16811_v27 }
 0xb15   : > { %v7195_v32 = vmul.f32 %v7194_v35, %v7102_v9  ;;  %v7196_v51 = vmul.f32 %v7194_v35, %v7103_v63  ;;  %v7197_v50 = vmul.f32 %v7194_v35, %v7104_v61  ;;  %v7198_v19 = vmul.f32 %v7194_v35, %v7105_v18  ;;  %v7226_v9 = vld [vmem:[%s18075_s14 + $0x58] sm:$0xff]  ;;  %v7227_v63 = vld [vmem:[%s18075_s14 + $0x60] sm:$0xff]  ;;  %v7228_v61 = vld [vmem:[%s18075_s14 + $0x68] sm:$0xff] }
 0xb16   : > { %v7199_v13 = vmul.f32 %v7194_v35, %v7106_v15  ;;  %v7200_v26 = vmul.f32 %v7194_v35, %v7107_v44  ;;  %v7201_v46 = vmul.f32 %v7194_v35, %v7108_v56  ;;  %v7202_v23 = vmul.f32 %v7194_v35, %v7109_v60  ;;  %v7229_v18 = vld [vmem:[%s18075_s14 + $0x70] sm:$0xff]  ;;  %v7232_v15 = vld [vmem:[%s18075_s14 + $0x88] sm:$0xff] }
 0xb17   : > { %v7207_v6 = vadd.f32 %v7206_v45, %v7195_v32  ;;  %v7208_v1 = vadd.f32 %v7206_v45, %v7196_v51  ;;  %v7209_v40 = vadd.f32 %v7206_v45, %v7197_v50  ;;  %v7210_v54 = vadd.f32 %v7206_v45, %v7198_v19  ;;  %v7236_v44 = vld [vmem:[%s18075_s14 + $0xa8] sm:$0xff]  ;;  %v7237_v56 = vld [vmem:[%s18075_s14 + $0xb0] sm:$0xff] }
 0xb18   : > { %v7211_v59 = vadd.f32 %v7206_v45, %v7199_v13  ;;  %v7212_v11 = vadd.f32 %v7206_v45, %v7200_v26  ;;  %v7213_v10 = vadd.f32 %v7206_v45, %v7201_v46  ;;  %v7214_v25 = vadd.f32 %v7206_v45, %v7202_v23  ;;  %v7241_v60 = vld [vmem:[%s18075_s14 + $0xd0] sm:$0xff]  ;;  %v15409_v50 = vld [vmem:[%s18070_s9 + $0x8] sm:$0xff]  }
 0xb19   : > { %v14403_v47 = vpack.c.bf16 %v7208_v1, %v7207_v6  ;;  %v14407_v2 = vpack.c.bf16 %v7210_v54, %v7209_v40  ;;  %v17173_v6 = vld [vmem:[%s18070_s9 + $0x20] sm:$0xff]  }
 0xb1a   : > { %v14411_v24 = vpack.c.bf16 %v7212_v11, %v7211_v59  ;;  %v14415_v27 = vpack.c.bf16 %v7214_v25, %v7213_v10 }
 0xb1b   : > { %14404 = vmatprep.subr.bf16.mxu0 %v14403_v47 }
 0xb1c   : > { %14406 = vmatpush3.bf16.msra.mxu0 %v14403_v47 }
 0xb1d   : > { %14408 = vmatprep.subr.bf16.mxu0 %v14407_v2 }
 0xb20   : > { %14410 = vmatpush3.bf16.msra.mxu0 %v14407_v2 }
 0xb21   : > { %14412 = vmatprep.subr.bf16.mxu0 %v14411_v24 }
 0xb24   : > { %14414 = vmatpush3.bf16.msra.mxu0 %v14411_v24 }
 0xb25   : > { %14416 = vmatprep.subr.bf16.mxu0 %v14415_v27 }
 0xb28   : > { %14418 = vmatpush3.bf16.msra.mxu0 %v14415_v27 }
 0xb29   : > { %13991 = vmatprep.subr.bf16.mxu0 %v15406_v16 }
 0xb2b   : > { %13944 = vmatmul.mubr.msk.f32.vlgmr.msra.gmra.mrb[82].mxu0 %vm7024_vm8, %v7216_v21 }
 0xb2c   : > { %13946 = vmatprep.mubr.msk.f32.mxu0 %vm7024_vm8, %v7217_v36  ;;  %13992 = vmatpush3.bf16.msra.mxu0 %v15406_v16 }
 0xb2d   : > { %13993 = vmatprep.subr.bf16.mxu0 %v15407_v0 }
 0xb2f   : > { %13947 = vmatmul.mubr.msk.f32.gmra.mrb[84].mxu0 %vm7024_vm8, %v7218_v4 }
 0xb30   : > { %13949 = vmatprep.mubr.msk.f32.mxu0 %vm7024_vm8, %v7219_v34  ;;  %13994 = vmatpush3.bf16.msra.mxu0 %v15407_v0 }
 0xb31   : > { %14027 = vmatprep.subr.bf16.mxu0 %v15408_v42 }
 0xb33   : > { %13950 = vmatmul.mubr.msk.f32.gmra.mrb[86].mxu0 %vm7024_vm8, %v7220_v29 }
 0xb34   : > { %13952 = vmatprep.mubr.msk.f32.mxu0 %vm7024_vm8, %v7221_v31 }
 0xb37   : > { %13953 = vmatmul.mubr.msk.f32.gmra.mrb[88].mxu0 %vm7024_vm8, %v7222_v38 }
 0xb38   : > { %13955 = vmatprep.mubr.msk.f32.mxu0 %vm7024_vm8, %v7223_v14 }
 0xb3b   : > { %13956 = vmatmul.mubr.msk.f32.gmra.mrb[90].mxu0 %vm7024_vm8, %v7224_v49 }
 0xb3c   : > { %13958 = vmatprep.mubr.msk.f32.mxu0 %vm7024_vm8, %v7225_v33 }
 0xb3f   : > { %13959 = vmatmul.mubr.msk.f32.gmra.mrb[92].mxu0 %vm7024_vm8, %v7226_v9 }
 0xb40   : > { %13961 = vmatprep.mubr.msk.f32.mxu0 %vm7024_vm8, %v7227_v63 }
 0xb43   : > { %13962 = vmatmul.mubr.msk.f32.gmra.mrb[94].mxu0 %vm7024_vm8, %v7228_v61 }
 0xb44   : > { %13964 = vmatprep.mubr.msk.f32.mxu0 %vm7024_vm8, %v7229_v18 }
 0xb47   : > { %13965 = vmatmul.mubr.msk.f32.gmra.mrb[96].mxu0 %vm7024_vm8, %v7230_v17 }
 0xb48   : > { %13967 = vmatprep.mubr.msk.f32.mxu0 %vm7024_vm8, %v7231_v7 }
 0xb4b   : > { %13968 = vmatmul.mubr.msk.f32.gmra.mrb[98].mxu0 %vm7024_vm8, %v7232_v15 }
 0xb4c   : > { %13970 = vmatprep.mubr.msk.f32.mxu0 %vm7024_vm8, %v7233_v22 }
 0xb4f   : > { %13971 = vmatmul.mubr.msk.f32.gmra.mrb[100].mxu0 %vm7024_vm8, %v7234_v3 }
 0xb50   : > { %13973 = vmatprep.mubr.msk.f32.mxu0 %vm7024_vm8, %v7235_v12 }
 0xb53   : > { %13974 = vmatmul.mubr.msk.f32.gmra.mrb[102].mxu0 %vm7024_vm8, %v7236_v44 }
 0xb54   : > { %13976 = vmatprep.mubr.msk.f32.mxu0 %vm7024_vm8, %v7237_v56 }
 0xb57   : > { %13977 = vmatmul.mubr.msk.f32.gmra.mrb[104].mxu0 %vm7024_vm8, %v7238_v57 }
 0xb58   : > { %13979 = vmatprep.mubr.msk.f32.mxu0 %vm7024_vm8, %v7239_v43 }
 0xb5b   : > { %13980 = vmatmul.mubr.msk.f32.gmra.mrb[106].mxu0 %vm7024_vm8, %v7240_v55 }
 0xb5c   : > { %13982 = vmatprep.mubr.msk.f32.mxu0 %vm7024_vm8, %v7241_v60 }
 0xb5f   : > { %13983 = vmatmul.mubr.msk.f32.gmra.mrb[108].mxu0 %vm7024_vm8, %v7242_v30 }
 0xb60   : > { %13985 = vmatprep.mubr.msk.f32.mxu0 %vm7024_vm8, %v7243_v62 }
 0xb63   : > { %13986 = vmatmul.mubr.msk.f32.gmra.mrb[110].mxu0 %vm7024_vm8, %v7244_v41 }
 0xb64   : > { %13988 = vmatprep.mubr.msk.f32.mxu0 %vm7024_vm8, %v7245_v53 }
 0xb67   : > { %13989 = vmatmul.mubr.msk.f32.gmra.mrb[112].mxu0 %vm7024_vm8, %v7246_v48 }
 0xb68   : > { %13995 = vmatprep.mubr.msk.bf16.mxu0 %vm638_vm6, %v7685_v39 }
 0xbfe   : > { %v13945_v52 = vpop.f32.mrb[82].mxu0 }
 0xbff   : > { %7570 = vst.msk [vmem:[#allocation3 + $0x21] sm:$0xff] %vm638_vm6, %v13945_v52  ;;  %v7409_v5 = vpop.f32.mrb[83].mxu0 }
 0xc00   : > { %7569 = vst.msk [vmem:[#allocation3 + $0x19] sm:$0xff] %vm638_vm6, %v7409_v5 }
 0xc02   : > { %v13948_v37 = vpop.f32.mrb[84].mxu0 }
 0xc03   : > { %7572 = vst.msk [vmem:[#allocation3 + $0x39] sm:$0xff] %vm638_vm6, %v13948_v37  ;;  %v7419_v28 = vpop.f32.mrb[85].mxu0 }
 0xc04   : > { %7571 = vst.msk [vmem:[#allocation3 + $0x31] sm:$0xff] %vm638_vm6, %v7419_v28 }
 0xc06   : > { %v13951_v8 = vpop.f32.mrb[86].mxu0  ;;  %v7656_v35 = vld [vmem:[#allocation3 + $0x21] sm:$0xff] }
 0xc07   : > { %7574 = vst.msk [vmem:[#allocation3 + $0x51] sm:$0xff] %vm638_vm6, %v13951_v8  ;;  %v7429_v45 = vpop.f32.mrb[87].mxu0  ;;  %v7655_v32 = vld [vmem:[#allocation3 + $0x19] sm:$0xff] }
 0xc08   : > { %7573 = vst.msk [vmem:[#allocation3 + $0x49] sm:$0xff] %vm638_vm6, %v7429_v45  ;;  %v17159_v51 = vpack.c.bf16 %v7656_v35, %v7655_v32 }
 0xc0a   : > { %13996 = vmatmul.mubr.msk.bf16.vlgmr.msra.gmra.mrb[116].mxu0 %vm638_vm6, %v17159_v51  ;;  %v13954_v19 = vpop.f32.mrb[88].mxu0  ;;  %v7658_v13 = vld [vmem:[#allocation3 + $0x39] sm:$0xff] }
 0xc0b   : > { %7576 = vst.msk [vmem:[#allocation3 + $0x69] sm:$0xff] %vm638_vm6, %v13954_v19  ;;  %v7439_v26 = vpop.f32.mrb[89].mxu0  ;;  %v7657_v46 = vld [vmem:[#allocation3 + $0x31] sm:$0xff]  ;;  %14028 = vmatpush3.bf16.msra.mxu0 %v15408_v42 }
 0xc0c   : > { %7575 = vst.msk [vmem:[#allocation3 + $0x61] sm:$0xff] %vm638_vm6, %v7439_v26  ;;  %v17168_v23 = vpack.c.bf16 %v7658_v13, %v7657_v46  ;;  %14029 = vmatprep.subr.bf16.mxu0 %v15409_v50  ;;  %v7601_v13 = vld [vmem:[#allocation3] sm:$0xff]  ;;  %v7602_v26 = vld [vmem:[#allocation3 + $0x8] sm:$0xff] }
 0xc0e   : > { %v13957_v1 = vpop.f32.mrb[90].mxu0  ;;  %13999 = vmatprep.mubr.msk.bf16.mxu0 %vm638_vm6, %v17168_v23  ;;  %v7660_v40 = vld [vmem:[#allocation3 + $0x51] sm:$0xff] }
 0xc0f   : > { %7578 = vst.msk [vmem:[#allocation3 + $0x81] sm:$0xff] %vm638_vm6, %v13957_v1  ;;  %v7449_v54 = vpop.f32.mrb[91].mxu0  ;;  %v7659_v59 = vld [vmem:[#allocation3 + $0x49] sm:$0xff]  ;;  %14030 = vmatpush3.bf16.msra.mxu0 %v15409_v50 }
 0xc10   : > { %7577 = vst.msk [vmem:[#allocation3 + $0x79] sm:$0xff] %vm638_vm6, %v7449_v54  ;;  %v17179_v11 = vpack.c.bf16 %v7660_v40, %v7659_v59  ;;  %14063 = vmatprep.subr.bf16.mxu0 %v17173_v6  ;;  %v7633_v40 = vpack.c.bf16 %v7602_v26, %v7601_v13  ;;  %v7603_v59 = vld [vmem:[#allocation3 + $0x18] sm:$0xff] }
 0xc12   : > { %14000 = vmatmul.mubr.msk.bf16.gmra.mrb[120].mxu0 %vm638_vm6, %v17179_v11  ;;  %v13960_v10 = vpop.f32.mrb[92].mxu0  ;;  %v7662_v25 = vld [vmem:[#allocation3 + $0x69] sm:$0xff] }
 0xc13   : > { %7580 = vst.msk [vmem:[#allocation3 + $0x99] sm:$0xff] %vm638_vm6, %v13960_v10  ;;  %v7459_v47 = vpop.f32.mrb[93].mxu0  ;;  %v7661_v2 = vld [vmem:[#allocation3 + $0x61] sm:$0xff] }
 0xc14   : > { %7579 = vst.msk [vmem:[#allocation3 + $0x91] sm:$0xff] %vm638_vm6, %v7459_v47  ;;  %v17186_v24 = vpack.c.bf16 %v7662_v25, %v7661_v2  ;;  %v7604_v10 = vld [vmem:[#allocation3 + $0x20] sm:$0xff]  ;;  %v7605_v25 = vld [vmem:[#allocation3 + $0x30] sm:$0xff]  ;;  %v7606_v47 = vld [vmem:[#allocation3 + $0x38] sm:$0xff] }
 0xc15   : > { %v17253_v2 = vpack.c.bf16 %v7604_v10, %v7603_v59 }
 0xc16   : > { %v13963_v27 = vpop.f32.mrb[94].mxu0  ;;  %14003 = vmatprep.mubr.msk.bf16.mxu0 %vm638_vm6, %v17186_v24  ;;  %v7664_v21 = vld [vmem:[#allocation3 + $0x81] sm:$0xff] }
 0xc17   : > { %7582 = vst.msk [vmem:[#allocation3 + $0xb1] sm:$0xff] %vm638_vm6, %v13963_v27  ;;  %v7469_v36 = vpop.f32.mrb[95].mxu0  ;;  %v7663_v4 = vld [vmem:[#allocation3 + $0x79] sm:$0xff]  ;;  %v15411_v27 = vld [vmem:[%s18070_s9 + $0x28] sm:$0xff]  }
 0xc18   : > { %7581 = vst.msk [vmem:[#allocation3 + $0xa9] sm:$0xff] %vm638_vm6, %v7469_v36  ;;  %v17192_v34 = vpack.c.bf16 %v7664_v21, %v7663_v4  ;;  %v17258_v21 = vpack.c.bf16 %v7606_v47, %v7605_v25  ;;  %v17268_v36 = vld [vmem:[%s18070_s9 + $0x30] sm:$0xff]   ;;  %v7607_v4 = vld [vmem:[#allocation3 + $0x48] sm:$0xff]  ;;  %v8150_v47 = vld [vmem:[#allocation3 + $0x1a] sm:$0xff] }
 0xc1a   : > { %14004 = vmatmul.mubr.msk.bf16.gmra.mrb[124].mxu0 %vm638_vm6, %v17192_v34  ;;  %v13966_v29 = vpop.f32.mrb[96].mxu0  ;;  %v7666_v31 = vld [vmem:[#allocation3 + $0x99] sm:$0xff] }
 0xc1b   : > { %7584 = vst.msk [vmem:[#allocation3 + $0xc9] sm:$0xff] %vm638_vm6, %v13966_v29  ;;  %v7479_v38 = vpop.f32.mrb[97].mxu0  ;;  %v7665_v14 = vld [vmem:[#allocation3 + $0x91] sm:$0xff] }
 0xc1c   : > { %7583 = vst.msk [vmem:[#allocation3 + $0xc1] sm:$0xff] %vm638_vm6, %v7479_v38  ;;  %v17198_v49 = vpack.c.bf16 %v7666_v31, %v7665_v14  ;;  %v7608_v29 = vld [vmem:[#allocation3 + $0x50] sm:$0xff]  ;;  %v7609_v31 = vld [vmem:[#allocation3 + $0x60] sm:$0xff]  ;;  %v7610_v38 = vld [vmem:[#allocation3 + $0x68] sm:$0xff] }
 0xc1d   : > { %v17270_v14 = vpack.c.bf16 %v7608_v29, %v7607_v4  ;;  %v8152_v4 = vld [vmem:[#allocation3 + $0x32] sm:$0xff]  ;;  %v8153_v29 = vld [vmem:[#allocation3 + $0x3a] sm:$0xff] }
 0xc1e   : > { %v13969_v33 = vpop.f32.mrb[98].mxu0  ;;  %14007 = vmatprep.mubr.msk.bf16.mxu0 %vm638_vm6, %v17198_v49  ;;  %v7668_v9 = vld [vmem:[#allocation3 + $0xb1] sm:$0xff] }
 0xc1f   : > { %7586 = vst.msk [vmem:[#allocation3 + $0xe1] sm:$0xff] %vm638_vm6, %v13969_v33  ;;  %v7489_v63 = vpop.f32.mrb[99].mxu0  ;;  %v7667_v61 = vld [vmem:[#allocation3 + $0xa9] sm:$0xff]  ;;  %v17273_v33 = vpack.c.bf16 %v7610_v38, %v7609_v31  ;;  %v15413_v38 = vld [vmem:[%s18070_s9 + $0x38] sm:$0xff]  }
 0xc20   : > { %7585 = vst.msk [vmem:[#allocation3 + $0xd9] sm:$0xff] %vm638_vm6, %v7489_v63  ;;  %v17204_v18 = vpack.c.bf16 %v7668_v9, %v7667_v61  ;;  %v7612_v9 = vld [vmem:[#allocation3 + $0x80] sm:$0xff]  ;;  %v7613_v63 = vld [vmem:[#allocation3 + $0x90] sm:$0xff]  ;;  %v7614_v61 = vld [vmem:[#allocation3 + $0x98] sm:$0xff] }
 0xc22   : > { %14008 = vmatmul.mubr.msk.bf16.gmra.mrb[128].mxu0 %vm638_vm6, %v17204_v18  ;;  %v13972_v17 = vpop.f32.mrb[100].mxu0  ;;  %v7670_v7 = vld [vmem:[#allocation3 + $0xc9] sm:$0xff] }
 0xc23   : > { %7588 = vst.msk [vmem:[#allocation3 + $0xf9] sm:$0xff] %vm638_vm6, %v13972_v17  ;;  %v7499_v15 = vpop.f32.mrb[101].mxu0  ;;  %v7669_v22 = vld [vmem:[#allocation3 + $0xc1] sm:$0xff] }
 0xc24   : > { %7587 = vst.msk [vmem:[#allocation3 + $0xf1] sm:$0xff] %vm638_vm6, %v7499_v15  ;;  %v17210_v3 = vpack.c.bf16 %v7670_v7, %v7669_v22  ;;  %v17281_v7 = vpack.c.bf16 %v7614_v61, %v7613_v63  ;;  %v7615_v15 = vld [vmem:[#allocation3 + $0xa8] sm:$0xff]  ;;  %v7616_v22 = vld [vmem:[#allocation3 + $0xb0] sm:$0xff] }
 0xc25   : > { %v8154_v63 = vld [vmem:[#allocation3 + $0x4a] sm:$0xff]  ;;  %v8155_v61 = vld [vmem:[#allocation3 + $0x52] sm:$0xff] }
 0xc26   : > { %v13975_v12 = vpop.f32.mrb[102].mxu0  ;;  %14011 = vmatprep.mubr.msk.bf16.mxu0 %vm638_vm6, %v17210_v3  ;;  %v7672_v44 = vld [vmem:[#allocation3 + $0xe1] sm:$0xff] }
 0xc27   : > { %7590 = vst.msk [vmem:[#allocation3 + $0x111] sm:$0xff] %vm638_vm6, %v13975_v12  ;;  %v7509_v56 = vpop.f32.mrb[103].mxu0  ;;  %v7671_v57 = vld [vmem:[#allocation3 + $0xd9] sm:$0xff] }
 0xc28   : > { %7589 = vst.msk [vmem:[#allocation3 + $0x109] sm:$0xff] %vm638_vm6, %v7509_v56  ;;  %v17216_v43 = vpack.c.bf16 %v7672_v44, %v7671_v57  ;;  %v7617_v12 = vld [vmem:[#allocation3 + $0xc0] sm:$0xff]  ;;  %v7618_v44 = vld [vmem:[#allocation3 + $0xc8] sm:$0xff]  ;;  %v17287_v56 = vpack.c.bf16 %v7616_v22, %v7615_v15 }
 0xc29   : > { %v17289_v57 = vpack.c.bf16 %v7618_v44, %v7617_v12  ;;  %v8156_v15 = vld [vmem:[#allocation3 + $0x62] sm:$0xff]  ;;  %v8157_v22 = vld [vmem:[#allocation3 + $0x6a] sm:$0xff]  ;;  %v17341_v12 = vpack.c.bf16 %v8155_v61, %v8154_v63 }
 0xc2a   : > { %14012 = vmatmul.mubr.msk.bf16.gmra.mrb[132].mxu0 %vm638_vm6, %v17216_v43  ;;  %v13978_v55 = vpop.f32.mrb[104].mxu0  ;;  %v7674_v60 = vld [vmem:[#allocation3 + $0xf9] sm:$0xff]  ;;  %v17343_v44 = vpack.c.bf16 %v8157_v22, %v8156_v15 }
 0xc2b   : > { %7592 = vst.msk [vmem:[#allocation3 + $0x129] sm:$0xff] %vm638_vm6, %v13978_v55  ;;  %v7519_v30 = vpop.f32.mrb[105].mxu0  ;;  %v7673_v62 = vld [vmem:[#allocation3 + $0xf1] sm:$0xff] }
 0xc2c   : > { %7591 = vst.msk [vmem:[#allocation3 + $0x121] sm:$0xff] %vm638_vm6, %v7519_v30  ;;  %v17222_v41 = vpack.c.bf16 %v7674_v60, %v7673_v62  ;;  %v7619_v30 = vld [vmem:[#allocation3 + $0xd8] sm:$0xff]  ;;  %v7620_v62 = vld [vmem:[#allocation3 + $0xe0] sm:$0xff] }
 0xc2e   : > { %v13981_v16 = vpop.f32.mrb[106].mxu0  ;;  %14015 = vmatprep.mubr.msk.bf16.mxu0 %vm638_vm6, %v17222_v41  ;;  %v7676_v53 = vld [vmem:[#allocation3 + $0x111] sm:$0xff] }
 0xc2f   : > { %7594 = vst.msk [vmem:[#allocation3 + $0x141] sm:$0xff] %vm638_vm6, %v13981_v16  ;;  %v7529_v48 = vpop.f32.mrb[107].mxu0  ;;  %v7675_v0 = vld [vmem:[#allocation3 + $0x109] sm:$0xff] }
 0xc30   : > { %7593 = vst.msk [vmem:[#allocation3 + $0x139] sm:$0xff] %vm638_vm6, %v7529_v48  ;;  %v17228_v58 = vpack.c.bf16 %v7676_v53, %v7675_v0  ;;  %v7621_v16 = vld [vmem:[#allocation3 + $0xf0] sm:$0xff]  ;;  %v7622_v53 = vld [vmem:[#allocation3 + $0xf8] sm:$0xff]  ;;  %v17297_v48 = vpack.c.bf16 %v7620_v62, %v7619_v30 }
 0xc31   : > { %v17299_v0 = vpack.c.bf16 %v7622_v53, %v7621_v16  ;;  %v8161_v30 = vld [vmem:[#allocation3 + $0x9a] sm:$0xff]  ;;  %v8162_v53 = vld [vmem:[#allocation3 + $0xaa] sm:$0xff] }
 0xc32   : > { %14016 = vmatmul.mubr.msk.bf16.gmra.mrb[136].mxu0 %vm638_vm6, %v17228_v58  ;;  %v13984_v20 = vpop.f32.mrb[108].mxu0  ;;  %v7678_v39 = vld [vmem:[#allocation3 + $0x129] sm:$0xff] }
 0xc33   : > { %7596 = vst.msk [vmem:[#allocation3 + $0x159] sm:$0xff] %vm638_vm6, %v13984_v20  ;;  %v7539_v42 = vpop.f32.mrb[109].mxu0  ;;  %v7677_v52 = vld [vmem:[#allocation3 + $0x121] sm:$0xff] }
 0xc34   : > { %7595 = vst.msk [vmem:[#allocation3 + $0x151] sm:$0xff] %vm638_vm6, %v7539_v42  ;;  %v17234_v5 = vpack.c.bf16 %v7678_v39, %v7677_v52  ;;  %v7623_v20 = vld [vmem:[#allocation3 + $0x108] sm:$0xff]  ;;  %v7624_v39 = vld [vmem:[#allocation3 + $0x110] sm:$0xff]  ;;  %v7625_v42 = vld [vmem:[#allocation3 + $0x120] sm:$0xff] }
 0xc35   : > { %v7626_v52 = vld [vmem:[#allocation3 + $0x128] sm:$0xff] }
 0xc36   : > { %v13987_v37 = vpop.f32.mrb[110].mxu0  ;;  %14019 = vmatprep.mubr.msk.bf16.mxu0 %vm638_vm6, %v17234_v5  ;;  %v7680_v28 = vld [vmem:[#allocation3 + $0x141] sm:$0xff] }
 0xc37   : > { %7598 = vst.msk [vmem:[#allocation3 + $0x171] sm:$0xff] %vm638_vm6, %v13987_v37  ;;  %v7549_v8 = vpop.f32.mrb[111].mxu0  ;;  %v7679_v35 = vld [vmem:[#allocation3 + $0x139] sm:$0xff]  ;;  %v17305_v37 = vpack.c.bf16 %v7624_v39, %v7623_v20  ;;  %v8164_v39 = vld [vmem:[#allocation3 + $0xc2] sm:$0xff] }
 0xc38   : > { %7597 = vst.msk [vmem:[#allocation3 + $0x169] sm:$0xff] %vm638_vm6, %v7549_v8  ;;  %v17240_v45 = vpack.c.bf16 %v7680_v28, %v7679_v35  ;;  %v17307_v28 = vpack.c.bf16 %v7626_v52, %v7625_v42  ;;  %v7627_v8 = vld [vmem:[#allocation3 + $0x138] sm:$0xff]  ;;  %v7628_v35 = vld [vmem:[#allocation3 + $0x140] sm:$0xff]  ;;  %v8165_v42 = vld [vmem:[#allocation3 + $0xca] sm:$0xff] }
 0xc39   : > { %v17313_v13 = vpack.c.bf16 %v7628_v35, %v7627_v8  ;;  %v8163_v20 = vld [vmem:[#allocation3 + $0xb2] sm:$0xff]  ;;  %v17359_v8 = vpack.c.bf16 %v8165_v42, %v8164_v39  ;;  %v8166_v35 = vld [vmem:[#allocation3 + $0xda] sm:$0xff]  ;;  %v8175_v63 = vld [vmem:[#allocation3 + $0x142] sm:$0xff] }
 0xc3a   : > { %14020 = vmatmul.mubr.msk.bf16.gmra.mrb[140].mxu0 %vm638_vm6, %v17240_v45  ;;  %v7682_v32 = vld [vmem:[#allocation3 + $0x159] sm:$0xff]  ;;  %v13990_v55 = vpop.f32.mrb[112].mxu0  ;;  %v17357_v52 = vpack.c.bf16 %v8163_v20, %v8162_v53  ;;  %v15415_v53 = vld [vmem:[%s18070_s9 + $0x48] sm:$0xff]   ;;  %v15416_v20 = vld [vmem:[%s18070_s9 + $0x50] sm:$0xff]  }
 0xc3b   : > { %v7681_v50 = vld [vmem:[#allocation3 + $0x151] sm:$0xff]  ;;  %7600 = vst.msk [vmem:[#allocation3 + $0x189] sm:$0xff] %vm638_vm6, %v13990_v55  ;;  %v7559_v60 = vpop.f32.mrb[113].mxu0  ;;  %v8159_v55 = vld [vmem:[#allocation3 + $0x82] sm:$0xff]  ;;  %v8177_v15 = vld [vmem:[#allocation3 + $0x15a] sm:$0xff] }
 0xc3c   : > { %v17244_v19 = vpack.c.bf16 %v7682_v32, %v7681_v50  ;;  %7599 = vst.msk [vmem:[#allocation3 + $0x181] sm:$0xff] %vm638_vm6, %v7559_v60  ;;  %v7629_v32 = vld [vmem:[#allocation3 + $0x150] sm:$0xff]  ;;  %v7630_v50 = vld [vmem:[#allocation3 + $0x158] sm:$0xff] }
 0xc3d   : > { %v17315_v26 = vpack.c.bf16 %v7630_v50, %v7629_v32  ;;  %v8160_v60 = vld [vmem:[#allocation3 + $0x92] sm:$0xff]  ;;  %v8167_v32 = vld [vmem:[#allocation3 + $0xe2] sm:$0xff] }
 0xc3e   : > { %14023 = vmatprep.mubr.msk.bf16.mxu0 %vm638_vm6, %v17244_v19  ;;  %v7684_v46 = vld [vmem:[#allocation3 + $0x171] sm:$0xff]  ;;  %v17351_v16 = vpack.c.bf16 %v8161_v30, %v8160_v60 }
 0xc3f   : > { %v7683_v1 = vld [vmem:[#allocation3 + $0x169] sm:$0xff]  ;;  %v8168_v50 = vld [vmem:[#allocation3 + $0xf2] sm:$0xff] }
 0xc40   : > { %v17248_v54 = vpack.c.bf16 %v7684_v46, %v7683_v1  ;;  %v8148_v46 = vld [vmem:[#allocation3 + $0x2] sm:$0xff]  ;;  %v8149_v1 = vld [vmem:[#allocation3 + $0xa] sm:$0xff]  ;;  %v8176_v61 = vld [vmem:[#allocation3 + $0x152] sm:$0xff] }
 0xc41   : > { %v7632_v59 = vld [vmem:[#allocation3 + $0x170] sm:$0xff]  ;;  %v8180_v10 = vpack.c.bf16 %v8149_v1, %v8148_v46  ;;  %v8169_v46 = vld [vmem:[#allocation3 + $0xfa] sm:$0xff]  ;;  %v17365_v1 = vpack.c.bf16 %v8167_v32, %v8166_v35 }
 0xc42   : > { %14024 = vmatmul.mubr.msk.bf16.gmra.mrb[144].mxu0 %vm638_vm6, %v17248_v54  ;;  %v8179_v60 = vld [vmem:[#allocation3 + $0x172] sm:$0xff]  ;;  %v15418_v35 = vld [vmem:[%s18070_s9 + $0x60] sm:$0xff]  }
 0xc43   : > { %14031 = vmatprep.mubr.msk.bf16.mxu0 %vm638_vm6, %v7633_v40  ;;  %v7631_v40 = vld [vmem:[#allocation3 + $0x168] sm:$0xff]  ;;  %v15417_v42 = vld [vmem:[%s18070_s9 + $0x58] sm:$0xff]  }
 0xc44   : > { %v17321_v25 = vpack.c.bf16 %v7632_v59, %v7631_v40  ;;  %v17367_v40 = vpack.c.bf16 %v8169_v46, %v8168_v50  ;;  %v8170_v59 = vld [vmem:[#allocation3 + $0x10a] sm:$0xff]  ;;  %v9691_v50 = vld [vmem:[#allocation3 + $0xc1] sm:$0xff] }
 0xc45   : > { %v9690_v32 = vld [vmem:[#allocation3 + $0xb1] sm:$0xff]  ;;  %v9692_v46 = vld [vmem:[#allocation3 + $0xc9] sm:$0xff] }
 0xc4a   : > { %14032 = vmatmul.mubr.msk.bf16.vlgmr.msra.gmra.mrb[116].mxu0 %vm638_vm6, %v17253_v2 }
 0xc4b   : > { %14035 = vmatprep.mubr.msk.bf16.mxu0 %vm638_vm6, %v17258_v21  ;;  %14064 = vmatpush3.bf16.msra.mxu0 %v17173_v6  ;;  %v7611_v6 = vld [vmem:[#allocation3 + $0x78] sm:$0xff] }
 0xc4c   : > { %14065 = vmatprep.subr.bf16.mxu0 %v15411_v27  ;;  %v17279_v17 = vpack.c.bf16 %v7612_v9, %v7611_v6  ;;  %v17331_v6 = vpack.c.bf16 %v8153_v29, %v8152_v4  ;;  %v15414_v9 = vld [vmem:[%s18070_s9 + $0x40] sm:$0xff]  }
 0xc4f   : > { %14066 = vmatpush3.bf16.msra.mxu0 %v15411_v27  ;;  %v8151_v27 = vld [vmem:[#allocation3 + $0x22] sm:$0xff] }
 0xc50   : > { %14099 = vmatprep.subr.bf16.mxu0 %v17268_v36  ;;  %v17326_v31 = vpack.c.bf16 %v8151_v27, %v8150_v47  ;;  %v8172_v47 = vld [vmem:[#allocation3 + $0x122] sm:$0xff]  ;;  %v8173_v27 = vld [vmem:[#allocation3 + $0x12a] sm:$0xff] }
 0xc51   : > { %v17375_v29 = vpack.c.bf16 %v8173_v27, %v8172_v47  ;;  %v9693_v47 = vld [vmem:[#allocation3 + $0xd9] sm:$0xff]  ;;  %v9694_v27 = vld [vmem:[#allocation3 + $0xe1] sm:$0xff] }
 0xc52   : > { %14036 = vmatmul.mubr.msk.bf16.gmra.mrb[120].mxu0 %vm638_vm6, %v17270_v14 }
 0xc53   : > { %14039 = vmatprep.mubr.msk.bf16.mxu0 %vm638_vm6, %v17273_v33 }
 0xc5a   : > { %14040 = vmatmul.mubr.msk.bf16.gmra.mrb[124].mxu0 %vm638_vm6, %v17279_v17 }
 0xc5b   : > { %14043 = vmatprep.mubr.msk.bf16.mxu0 %vm638_vm6, %v17281_v7 }
 0xc62   : > { %14044 = vmatmul.mubr.msk.bf16.gmra.mrb[128].mxu0 %vm638_vm6, %v17287_v56 }
 0xc63   : > { %14047 = vmatprep.mubr.msk.bf16.mxu0 %vm638_vm6, %v17289_v57 }
 0xc6a   : > { %14048 = vmatmul.mubr.msk.bf16.gmra.mrb[132].mxu0 %vm638_vm6, %v17297_v48 }
 0xc6b   : > { %14051 = vmatprep.mubr.msk.bf16.mxu0 %vm638_vm6, %v17299_v0 }
 0xc72   : > { %14052 = vmatmul.mubr.msk.bf16.gmra.mrb[136].mxu0 %vm638_vm6, %v17305_v37 }
 0xc73   : > { %14055 = vmatprep.mubr.msk.bf16.mxu0 %vm638_vm6, %v17307_v28 }
 0xc7a   : > { %14056 = vmatmul.mubr.msk.bf16.gmra.mrb[140].mxu0 %vm638_vm6, %v17313_v13 }
 0xc7b   : > { %14059 = vmatprep.mubr.msk.bf16.mxu0 %vm638_vm6, %v17315_v26 }
 0xc82   : > { %14060 = vmatmul.mubr.msk.bf16.gmra.mrb[144].mxu0 %vm638_vm6, %v17321_v25 }
 0xc83   : > { %14067 = vmatprep.mubr.msk.bf16.mxu0 %vm638_vm6, %v8180_v10  ;;  %v8171_v10 = vld [vmem:[#allocation3 + $0x112] sm:$0xff] }
 0xc84   : > { %v17373_v4 = vpack.c.bf16 %v8171_v10, %v8170_v59  ;;  %v9717_v10 = vpack.c.bf16 %v9692_v46, %v9691_v50 }
 0xc8a   : > { %14068 = vmatmul.mubr.msk.bf16.vlgmr.msra.gmra.mrb[116].mxu0 %vm638_vm6, %v17326_v31 }
 0xc8b   : > { %14071 = vmatprep.mubr.msk.bf16.mxu0 %vm638_vm6, %v17331_v6  ;;  %14100 = vmatpush3.bf16.msra.mxu0 %v17268_v36  ;;  %v8158_v36 = vld [vmem:[#allocation3 + $0x7a] sm:$0xff] }
 0xc8c   : > { %14101 = vmatprep.subr.bf16.mxu0 %v15413_v38  ;;  %v17349_v62 = vpack.c.bf16 %v8159_v55, %v8158_v36  ;;  %v17383_v36 = vpack.c.bf16 %v8177_v15, %v8176_v61  ;;  %v8178_v55 = vld [vmem:[#allocation3 + $0x16a] sm:$0xff]  ;;  %v9718_v61 = vpack.c.bf16 %v9694_v27, %v9693_v47 }
 0xc8d   : > { %v17389_v30 = vpack.c.bf16 %v8179_v60, %v8178_v55  ;;  %v9697_v55 = vld [vmem:[#allocation3 + $0x109] sm:$0xff]  ;;  %v9698_v60 = vld [vmem:[#allocation3 + $0x111] sm:$0xff] }
 0xc8f   : > { %14102 = vmatpush3.bf16.msra.mxu0 %v15413_v38  ;;  %v8174_v38 = vld [vmem:[#allocation3 + $0x13a] sm:$0xff] }
 0xc90   : > { %14135 = vmatprep.subr.bf16.mxu0 %v15414_v9  ;;  %v17381_v22 = vpack.c.bf16 %v8175_v63, %v8174_v38  ;;  %v9695_v38 = vld [vmem:[#allocation3 + $0xf1] sm:$0xff]  ;;  %v9696_v63 = vld [vmem:[#allocation3 + $0xf9] sm:$0xff] }
 0xc91   : > { %v9719_v15 = vpack.c.bf16 %v9696_v63, %v9695_v38 }
 0xc92   : > { %14072 = vmatmul.mubr.msk.bf16.gmra.mrb[120].mxu0 %vm638_vm6, %v17341_v12 }
 0xc93   : > { %14075 = vmatprep.mubr.msk.bf16.mxu0 %vm638_vm6, %v17343_v44 }
 0xc9a   : > { %14076 = vmatmul.mubr.msk.bf16.gmra.mrb[124].mxu0 %vm638_vm6, %v17349_v62 }
 0xc9b   : > { %14079 = vmatprep.mubr.msk.bf16.mxu0 %vm638_vm6, %v17351_v16 }
 0xca2   : > { %14080 = vmatmul.mubr.msk.bf16.gmra.mrb[128].mxu0 %vm638_vm6, %v17357_v52 }
 0xca3   : > { %14083 = vmatprep.mubr.msk.bf16.mxu0 %vm638_vm6, %v17359_v8 }
 0xcaa   : > { %14084 = vmatmul.mubr.msk.bf16.gmra.mrb[132].mxu0 %vm638_vm6, %v17365_v1 }
 0xcab   : > { %14087 = vmatprep.mubr.msk.bf16.mxu0 %vm638_vm6, %v17367_v40 }
 0xcb2   : > { %14088 = vmatmul.mubr.msk.bf16.gmra.mrb[136].mxu0 %vm638_vm6, %v17373_v4 }
 0xcb3   : > { %14091 = vmatprep.mubr.msk.bf16.mxu0 %vm638_vm6, %v17375_v29 }
 0xcba   : > { %14092 = vmatmul.mubr.msk.bf16.gmra.mrb[140].mxu0 %vm638_vm6, %v17381_v22 }
 0xcbb   : > { %14095 = vmatprep.mubr.msk.bf16.mxu0 %vm638_vm6, %v17383_v36 }
 0xcc2   : > { %14096 = vmatmul.mubr.msk.bf16.gmra.mrb[144].mxu0 %vm638_vm6, %v17389_v30 }
 0xcc3   : > { %14103 = vmatprep.mubr.msk.bf16.mxu0 %vm638_vm6, %v17253_v2  ;;  %v8484_v2 = vld [vmem:[#allocation3 + $0x180] sm:$0xff] }
 0xcca   : > { %14104 = vmatmul.mubr.msk.bf16.vlgmr.msra.gmra.mrb[116].mxu0 %vm638_vm6, %v17258_v21 }
 0xccb   : > { %14107 = vmatprep.mubr.msk.bf16.mxu0 %vm638_vm6, %v17270_v14  ;;  %14136 = vmatpush3.bf16.msra.mxu0 %v15414_v9  ;;  %v8485_v9 = vld [vmem:[#allocation3 + $0x188] sm:$0xff] }
 0xccc   : > { %14137 = vmatprep.subr.bf16.mxu0 %v15415_v53  ;;  %v17429_v39 = vpack.c.bf16 %v8485_v9, %v8484_v2  ;;  %v9720_v2 = vpack.c.bf16 %v9698_v60, %v9697_v55 }
 0xccf   : > { %14138 = vmatpush3.bf16.msra.mxu0 %v15415_v53  ;;  %v9699_v53 = vld [vmem:[#allocation3 + $0x121] sm:$0xff] }
 0xcd0   : > { %14171 = vmatprep.subr.bf16.mxu0 %v15416_v20 }
 0xcd2   : > { %14108 = vmatmul.mubr.msk.bf16.gmra.mrb[120].mxu0 %vm638_vm6, %v17273_v33 }
 0xcd3   : > { %14111 = vmatprep.mubr.msk.bf16.mxu0 %vm638_vm6, %v17279_v17 }
 0xcda   : > { %14112 = vmatmul.mubr.msk.bf16.gmra.mrb[124].mxu0 %vm638_vm6, %v17281_v7 }
 0xcdb   : > { %14115 = vmatprep.mubr.msk.bf16.mxu0 %vm638_vm6, %v17287_v56 }
 0xce2   : > { %14116 = vmatmul.mubr.msk.bf16.gmra.mrb[128].mxu0 %vm638_vm6, %v17289_v57 }
 0xce3   : > { %14119 = vmatprep.mubr.msk.bf16.mxu0 %vm638_vm6, %v17297_v48 }
 0xcea   : > { %14120 = vmatmul.mubr.msk.bf16.gmra.mrb[132].mxu0 %vm638_vm6, %v17299_v0 }
 0xceb   : > { %14123 = vmatprep.mubr.msk.bf16.mxu0 %vm638_vm6, %v17305_v37 }
 0xcf2   : > { %14124 = vmatmul.mubr.msk.bf16.gmra.mrb[136].mxu0 %vm638_vm6, %v17307_v28 }
 0xcf3   : > { %14127 = vmatprep.mubr.msk.bf16.mxu0 %vm638_vm6, %v17313_v13 }
 0xcfa   : > { %14128 = vmatmul.mubr.msk.bf16.gmra.mrb[140].mxu0 %vm638_vm6, %v17315_v26 }
 0xcfb   : > { %14131 = vmatprep.mubr.msk.bf16.mxu0 %vm638_vm6, %v17321_v25 }
 0xd02   : > { %14132 = vmatmul.mubr.msk.bf16.gmra.mrb[144].mxu0 %vm638_vm6, %v17429_v39 }
 0xd03   : > { %14139 = vmatprep.mubr.msk.bf16.mxu0 %vm638_vm6, %v17159_v51  ;;  %v8790_v51 = vld [vmem:[#allocation3 + $0x181] sm:$0xff] }
 0xd0a   : > { %14140 = vmatmul.mubr.msk.bf16.vlgmr.msra.gmra.mrb[116].mxu0 %vm638_vm6, %v17168_v23  ;;  %v8791_v23 = vld [vmem:[#allocation3 + $0x189] sm:$0xff] }
 0xd0b   : > { %14143 = vmatprep.mubr.msk.bf16.mxu0 %vm638_vm6, %v17179_v11  ;;  %14172 = vmatpush3.bf16.msra.mxu0 %v15416_v20  ;;  %v17469_v11 = vpack.c.bf16 %v8791_v23, %v8790_v51  ;;  %v9700_v20 = vld [vmem:[#allocation3 + $0x129] sm:$0xff]  ;;  %v9704_v51 = vld [vmem:[#allocation3 + $0x159] sm:$0xff] }
 0xd0c   : > { %14173 = vmatprep.subr.bf16.mxu0 %v15417_v42  ;;  %v9721_v9 = vpack.c.bf16 %v9700_v20, %v9699_v53 }
 0xd0f   : > { %14174 = vmatpush3.bf16.msra.mxu0 %v15417_v42  ;;  %v9702_v42 = vld [vmem:[#allocation3 + $0x141] sm:$0xff] }
 0xd10   : > { %14207 = vmatprep.subr.bf16.mxu0 %v15418_v35 }
 0xd12   : > { %14144 = vmatmul.mubr.msk.bf16.gmra.mrb[120].mxu0 %vm638_vm6, %v17186_v24  ;;  %v15419_v24 = vld [vmem:[%s18070_s9 + $0x68] sm:$0xff]  }
 0xd13   : > { %14147 = vmatprep.mubr.msk.bf16.mxu0 %vm638_vm6, %v17192_v34  ;;  %v15420_v34 = vld [vmem:[%s18070_s9 + $0x70] sm:$0xff]  }
 0xd1a   : > { %14148 = vmatmul.mubr.msk.bf16.gmra.mrb[124].mxu0 %vm638_vm6, %v17198_v49  ;;  %v9096_v49 = vld [vmem:[#allocation3 + $0x182] sm:$0xff] }
 0xd1b   : > { %14151 = vmatprep.mubr.msk.bf16.mxu0 %vm638_vm6, %v17204_v18  ;;  %v9097_v18 = vld [vmem:[#allocation3 + $0x18a] sm:$0xff] }
 0xd22   : > { %14152 = vmatmul.mubr.msk.bf16.gmra.mrb[128].mxu0 %vm638_vm6, %v17210_v3  ;;  %v17509_v3 = vpack.c.bf16 %v9097_v18, %v9096_v49  ;;  %v9706_v49 = vld [vmem:[#allocation3 + $0x171] sm:$0xff] }
 0xd23   : > { %14155 = vmatprep.mubr.msk.bf16.mxu0 %vm638_vm6, %v17216_v43  ;;  %v15421_v43 = vld [vmem:[%s18070_s9 + $0x78] sm:$0xff]  }
 0xd2a   : > { %14156 = vmatmul.mubr.msk.bf16.gmra.mrb[132].mxu0 %vm638_vm6, %v17222_v41  ;;  %v15422_v41 = vld [vmem:[%s18070_s9 + $0x80] sm:$0xff]  }
 0xd2b   : > { %14159 = vmatprep.mubr.msk.bf16.mxu0 %vm638_vm6, %v17228_v58  ;;  %v9403_v58 = vld [vmem:[#allocation3 + $0x198] sm:$0xff] }
 0xd32   : > { %14160 = vmatmul.mubr.msk.bf16.gmra.mrb[136].mxu0 %vm638_vm6, %v17234_v5  ;;  %v9404_v5 = vld [vmem:[#allocation3 + $0x1a0] sm:$0xff] }
 0xd33   : > { %14163 = vmatprep.mubr.msk.bf16.mxu0 %vm638_vm6, %v17240_v45  ;;  %v9420_v45 = vpack.c.bf16 %v9404_v5, %v9403_v58 }
 0xd3a   : > { %14164 = vmatmul.mubr.msk.bf16.gmra.mrb[140].mxu0 %vm638_vm6, %v17244_v19  ;;  %v9679_v19 = vld [vmem:[#allocation3 + $0x31] sm:$0xff] }
 0xd3b   : > { %14167 = vmatprep.mubr.msk.bf16.mxu0 %vm638_vm6, %v17248_v54  ;;  %v9680_v54 = vld [vmem:[#allocation3 + $0x39] sm:$0xff] }
 0xd42   : > { %14168 = vmatmul.mubr.msk.bf16.gmra.mrb[144].mxu0 %vm638_vm6, %v17469_v11 }
 0xd43   : > { %14175 = vmatprep.mubr.msk.bf16.mxu0 %vm638_vm6, %v17326_v31  ;;  %v9689_v31 = vld [vmem:[#allocation3 + $0xa9] sm:$0xff] }
 0xd44   : > { %v9716_v59 = vpack.c.bf16 %v9690_v32, %v9689_v31 }
 0xd4a   : > { %14176 = vmatmul.mubr.msk.bf16.vlgmr.msra.gmra.mrb[116].mxu0 %vm638_vm6, %v17331_v6 }
 0xd4b   : > { %14179 = vmatprep.mubr.msk.bf16.mxu0 %vm638_vm6, %v17341_v12  ;;  %14208 = vmatpush3.bf16.msra.mxu0 %v15418_v35  ;;  %v9703_v35 = vld [vmem:[#allocation3 + $0x151] sm:$0xff] }
 0xd4c   : > { %14209 = vmatprep.subr.bf16.mxu0 %v15419_v24 }
 0xd4f   : > { %14210 = vmatpush3.bf16.msra.mxu0 %v15419_v24  ;;  %v9723_v24 = vpack.c.bf16 %v9704_v51, %v9703_v35  ;;  %v10443_v51 = vld [vmem:[#allocation2 + $0x1] sm:$0xff] }
 0xd50   : > { %14243 = vmatprep.subr.bf16.mxu0 %v15420_v34 }
 0xd52   : > { %14180 = vmatmul.mubr.msk.bf16.gmra.mrb[120].mxu0 %vm638_vm6, %v17343_v44 }
 0xd53   : > { %14183 = vmatprep.mubr.msk.bf16.mxu0 %vm638_vm6, %v17349_v62 }
 0xd5a   : > { %14184 = vmatmul.mubr.msk.bf16.gmra.mrb[124].mxu0 %vm638_vm6, %v17351_v16 }
 0xd5b   : > { %14187 = vmatprep.mubr.msk.bf16.mxu0 %vm638_vm6, %v17357_v52 }
 0xd62   : > { %14188 = vmatmul.mubr.msk.bf16.gmra.mrb[128].mxu0 %vm638_vm6, %v17359_v8 }
 0xd63   : > { %14191 = vmatprep.mubr.msk.bf16.mxu0 %vm638_vm6, %v17365_v1 }
 0xd6a   : > { %14192 = vmatmul.mubr.msk.bf16.gmra.mrb[132].mxu0 %vm638_vm6, %v17367_v40 }
 0xd6b   : > { %14195 = vmatprep.mubr.msk.bf16.mxu0 %vm638_vm6, %v17373_v4 }
 0xd72   : > { %14196 = vmatmul.mubr.msk.bf16.gmra.mrb[136].mxu0 %vm638_vm6, %v17375_v29 }
 0xd73   : > { %14199 = vmatprep.mubr.msk.bf16.mxu0 %vm638_vm6, %v17381_v22 }
 0xd7a   : > { %14200 = vmatmul.mubr.msk.bf16.gmra.mrb[140].mxu0 %vm638_vm6, %v17383_v36 }
 0xd7b   : > { %14203 = vmatprep.mubr.msk.bf16.mxu0 %vm638_vm6, %v17389_v30 }
 0xd82   : > { %14204 = vmatmul.mubr.msk.bf16.gmra.mrb[144].mxu0 %vm638_vm6, %v17509_v3 }
 0xd83   : > { %14211 = vmatprep.mubr.msk.bf16.mxu0 %vm638_vm6, %v17258_v21  ;;  %v9711_v21 = vpack.c.bf16 %v9680_v54, %v9679_v19 }
 0xd8a   : > { %14212 = vmatmul.mubr.msk.bf16.vlgmr.msra.gmra.mrb[116].mxu0 %vm638_vm6, %v17270_v14  ;;  %v9681_v14 = vld [vmem:[#allocation3 + $0x49] sm:$0xff] }
 0xd8b   : > { %14215 = vmatprep.mubr.msk.bf16.mxu0 %vm638_vm6, %v17273_v33  ;;  %14244 = vmatpush3.bf16.msra.mxu0 %v15420_v34  ;;  %v9682_v33 = vld [vmem:[#allocation3 + $0x51] sm:$0xff]  ;;  %v9705_v34 = vld [vmem:[#allocation3 + $0x169] sm:$0xff] }
 0xd8c   : > { %14245 = vmatprep.subr.bf16.mxu0 %v15421_v43  ;;  %v9724_v18 = vpack.c.bf16 %v9706_v49, %v9705_v34 }
 0xd8f   : > { %14246 = vmatpush3.bf16.msra.mxu0 %v15421_v43  ;;  %v9709_v43 = vld [vmem:[#allocation3 + $0x199] sm:$0xff] }
 0xd90   : > { %14279 = vmatprep.subr.bf16.mxu0 %v15422_v41 }
 0xd92   : > { %14216 = vmatmul.mubr.msk.bf16.gmra.mrb[120].mxu0 %vm638_vm6, %v17279_v17  ;;  %v9683_v17 = vld [vmem:[#allocation3 + $0x61] sm:$0xff] }
 0xd93   : > { %14219 = vmatprep.mubr.msk.bf16.mxu0 %vm638_vm6, %v17281_v7  ;;  %v9684_v7 = vld [vmem:[#allocation3 + $0x69] sm:$0xff] }
 0xd9a   : > { %14220 = vmatmul.mubr.msk.bf16.gmra.mrb[124].mxu0 %vm638_vm6, %v17287_v56  ;;  %v9712_v56 = vpack.c.bf16 %v9682_v33, %v9681_v14 }
 0xd9b   : > { %14223 = vmatprep.mubr.msk.bf16.mxu0 %vm638_vm6, %v17289_v57  ;;  %v15423_v57 = vld [vmem:[%s18070_s9 + $0x88] sm:$0xff]  }
 0xda2   : > { %14224 = vmatmul.mubr.msk.bf16.gmra.mrb[128].mxu0 %vm638_vm6, %v17297_v48  ;;  %v9713_v48 = vpack.c.bf16 %v9684_v7, %v9683_v17 }
 0xda3   : > { %14227 = vmatprep.mubr.msk.bf16.mxu0 %vm638_vm6, %v17299_v0  ;;  %v9685_v0 = vld [vmem:[#allocation3 + $0x79] sm:$0xff] }
 0xdaa   : > { %14228 = vmatmul.mubr.msk.bf16.gmra.mrb[132].mxu0 %vm638_vm6, %v17305_v37  ;;  %v9686_v37 = vld [vmem:[#allocation3 + $0x81] sm:$0xff] }
 0xdab   : > { %14231 = vmatprep.mubr.msk.bf16.mxu0 %vm638_vm6, %v17307_v28  ;;  %v9687_v28 = vld [vmem:[#allocation3 + $0x91] sm:$0xff] }
 0xdb2   : > { %14232 = vmatmul.mubr.msk.bf16.gmra.mrb[136].mxu0 %vm638_vm6, %v17313_v13  ;;  %v9688_v13 = vld [vmem:[#allocation3 + $0x99] sm:$0xff] }
 0xdb3   : > { %14235 = vmatprep.mubr.msk.bf16.mxu0 %vm638_vm6, %v17315_v26  ;;  %v9714_v26 = vpack.c.bf16 %v9686_v37, %v9685_v0 }
 0xdba   : > { %14236 = vmatmul.mubr.msk.bf16.gmra.mrb[140].mxu0 %vm638_vm6, %v17321_v25  ;;  %v9715_v25 = vpack.c.bf16 %v9688_v13, %v9687_v28 }
 0xdbb   : > { %14239 = vmatprep.mubr.msk.bf16.mxu0 %vm638_vm6, %v17429_v39  ;;  %v9701_v39 = vld [vmem:[#allocation3 + $0x139] sm:$0xff] }
 0xdbc   : > { %v9722_v23 = vpack.c.bf16 %v9702_v42, %v9701_v39 }
 0xdc2   : > { %14240 = vmatmul.mubr.msk.bf16.gmra.mrb[144].mxu0 %vm638_vm6, %v9420_v45 }
 0xdc3   : > { %14247 = vmatprep.mubr.msk.bf16.mxu0 %vm638_vm6, %v9711_v21 }
 0xdca   : > { %14248 = vmatmul.mubr.msk.bf16.vlgmr.msra.gmra.mrb[116].mxu0 %vm638_vm6, %v9712_v56 }
 0xdcb   : > { %14251 = vmatprep.mubr.msk.bf16.mxu0 %vm638_vm6, %v9713_v48  ;;  %14280 = vmatpush3.bf16.msra.mxu0 %v15422_v41  ;;  %v9710_v41 = vld [vmem:[#allocation3 + $0x1a1] sm:$0xff] }
 0xdcc   : > { %14281 = vmatprep.subr.bf16.mxu0 %v15423_v57  ;;  %v9726_v58 = vpack.c.bf16 %v9710_v41, %v9709_v43 }
 0xdcf   : > { %14282 = vmatpush3.bf16.msra.mxu0 %v15423_v57 }
 0xdd2   : > { %14252 = vmatmul.mubr.msk.bf16.gmra.mrb[120].mxu0 %vm638_vm6, %v9714_v26 }
 0xdd3   : > { %14255 = vmatprep.mubr.msk.bf16.mxu0 %vm638_vm6, %v9715_v25 }
 0xdda   : > { %14256 = vmatmul.mubr.msk.bf16.gmra.mrb[124].mxu0 %vm638_vm6, %v9716_v59 }
 0xddb   : > { %14259 = vmatprep.mubr.msk.bf16.mxu0 %vm638_vm6, %v9717_v10 }
 0xde2   : > { %14260 = vmatmul.mubr.msk.bf16.gmra.mrb[128].mxu0 %vm638_vm6, %v9718_v61 }
 0xde3   : > { %14263 = vmatprep.mubr.msk.bf16.mxu0 %vm638_vm6, %v9719_v15 }
 0xdea   : > { %14264 = vmatmul.mubr.msk.bf16.gmra.mrb[132].mxu0 %vm638_vm6, %v9720_v2 }
 0xdeb   : > { %14267 = vmatprep.mubr.msk.bf16.mxu0 %vm638_vm6, %v9721_v9 }
 0xdf2   : > { %14268 = vmatmul.mubr.msk.bf16.gmra.mrb[136].mxu0 %vm638_vm6, %v9722_v23  ;;  %v10444_v23 = vld [vmem:[#allocation2 + $0x9] sm:$0xff] }
 0xdf3   : > { %14271 = vmatprep.mubr.msk.bf16.mxu0 %vm638_vm6, %v9723_v24 }
 0xdfa   : > { %14272 = vmatmul.mubr.msk.bf16.gmra.mrb[140].mxu0 %vm638_vm6, %v9724_v18 }
 0xdfb   : > { %14275 = vmatprep.mubr.msk.bf16.mxu0 %vm638_vm6, %v17469_v11 }
 0xe02   : > { %14276 = vmatmul.mubr.msk.bf16.gmra.mrb[144].mxu0 %vm638_vm6, %v9726_v58 }
 0xe03   : > { %14283 = vmatprep.mubr.msk.bf16.mxu0 %vm638_vm6, %v17331_v6  ;;  %v10015_v6 = vld [vmem:[#allocation3 + $0x19a] sm:$0xff] }
 0xe0a   : > { %14284 = vmatmul.mubr.msk.bf16.vlgmr.msra.gmra.mrb[116].mxu0 %vm638_vm6, %v17341_v12  ;;  %v10016_v12 = vld [vmem:[#allocation3 + $0x1a2] sm:$0xff] }
 0xe0b   : > { %14287 = vmatprep.mubr.msk.bf16.mxu0 %vm638_vm6, %v17343_v44  ;;  %v10032_v44 = vpack.c.bf16 %v10016_v12, %v10015_v6  ;;  %v10475_v6 = vpack.c.bf16 %v10444_v23, %v10443_v51 }
 0xe12   : > { %14288 = vmatmul.mubr.msk.bf16.gmra.mrb[120].mxu0 %vm638_vm6, %v17349_v62  ;;  %v17604_v62 = vld [vmem:[%s18072_s11 + $0x2] sm:$0x3] }
 0xe13   : > { %14291 = vmatprep.mubr.msk.bf16.mxu0 %vm638_vm6, %v17351_v16  ;;  %v17611_v16 = vld [vmem:[%s18072_s11 + $0xa] sm:$0x3] }
 0xe14   : > { %13155 = vmatprep.mubr.msk.bf16.mxu1 %vm550_vm3, %v17611_v16 }
 0xe1a   : > { %14292 = vmatmul.mubr.msk.bf16.gmra.mrb[124].mxu0 %vm638_vm6, %v17357_v52  ;;  %v17618_v52 = vld [vmem:[%s18071_s10] ss:$0 sm:$0xff] }
 0xe1b   : > { %14295 = vmatprep.mubr.msk.bf16.mxu0 %vm638_vm6, %v17359_v8 }
 0xe22   : > { %14296 = vmatmul.mubr.msk.bf16.gmra.mrb[128].mxu0 %vm638_vm6, %v17365_v1 }
 0xe23   : > { %14299 = vmatprep.mubr.msk.bf16.mxu0 %vm638_vm6, %v17367_v40 }
 0xe2a   : > { %14300 = vmatmul.mubr.msk.bf16.gmra.mrb[132].mxu0 %vm638_vm6, %v17373_v4 }
 0xe2b   : > { %14303 = vmatprep.mubr.msk.bf16.mxu0 %vm638_vm6, %v17375_v29 }
 0xe32   : > { %14304 = vmatmul.mubr.msk.bf16.gmra.mrb[136].mxu0 %vm638_vm6, %v17381_v22 }
 0xe33   : > { %14307 = vmatprep.mubr.msk.bf16.mxu0 %vm638_vm6, %v17383_v36 }
 0xe3a   : > { %14308 = vmatmul.mubr.msk.bf16.gmra.mrb[140].mxu0 %vm638_vm6, %v17389_v30 }
 0xe3b   : > { %14311 = vmatprep.mubr.msk.bf16.mxu0 %vm638_vm6, %v17509_v3 }
 0xe42   : > { %14312 = vmatmul.mubr.msk.bf16.gmra.mrb[144].mxu0 %vm638_vm6, %v10032_v44 }
 0xe43   : > { %13065 = vmatprep.mubr.msk.bf16.mxu0 %vm550_vm3, %v17604_v62 }
 0xedd   : > { %v14285_v8 = vpop.f32.mrb[116].mxu0 }
 0xede   : > { %v10300_v1 = vadd.f32 %v14285_v8, %v17618_v52  ;;  %v10132_v40 = vpop.f32.mrb[117].mxu0 }
 0xedf   : > { %v10298_v4 = vadd.f32 %v17618_v52, %v10132_v40  ;;  %v14286_v29 = vpop.f32.mrb[118].mxu0 }
 0xee0   : > { %v10332_v22 = vmax.f32 %v10300_v1, 0.0  ;;  %v10301_v36 = vadd.f32 %v14286_v29, %v17618_v52  ;;  %v10135_v30 = vpop.f32.mrb[119].mxu0 }
 0xee1   : > { %v10330_v11 = vmax.f32 %v10298_v4, 0.0  ;;  %v10299_v3 = vadd.f32 %v17618_v52, %v10135_v30 }
 0xee2   : > { %10364 = vst.msk [vmem:[#allocation2 + $0x31] sm:$0xff] %vm550_vm3, %v10332_v22  ;;  %v10333_v5 = vmax.f32 %v10301_v36, 0.0  ;;  %v10497_v22 = vsel %vm550_vm3, %v10475_v6, 0 }
 0xee3   : > { %10362 = vst.msk [vmem:[#allocation2 + $0x19] sm:$0xff] %vm550_vm3, %v10330_v11  ;;  %v10331_v45 = vmax.f32 %v10299_v3, 0.0 }
 0xee4   : > { %10365 = vst.msk [vmem:[#allocation2 + $0x39] sm:$0xff] %vm550_vm3, %v10333_v5 }
 0xee5   : > { %10363 = vst.msk [vmem:[#allocation2 + $0x21] sm:$0xff] %vm550_vm3, %v10331_v45  ;;  %v14289_v19 = vpop.f32.mrb[120].mxu0 }
 0xee6   : > { %v10304_v54 = vadd.f32 %v14289_v19, %v17618_v52  ;;  %v10148_v21 = vpop.f32.mrb[121].mxu0 }
 0xee7   : > { %v10302_v14 = vadd.f32 %v17618_v52, %v10148_v21  ;;  %v14290_v33 = vpop.f32.mrb[122].mxu0 }
 0xee8   : > { %v10336_v17 = vmax.f32 %v10304_v54, 0.0  ;;  %v10305_v7 = vadd.f32 %v14290_v33, %v17618_v52  ;;  %v10151_v56 = vpop.f32.mrb[123].mxu0 }
 0xee9   : > { %v10334_v57 = vmax.f32 %v10302_v14, 0.0  ;;  %v10303_v48 = vadd.f32 %v17618_v52, %v10151_v56 }
 0xeea   : > { %10368 = vst.msk [vmem:[#allocation2 + $0x61] sm:$0xff] %vm550_vm3, %v10336_v17  ;;  %v10337_v0 = vmax.f32 %v10305_v7, 0.0  ;;  %v10445_v56 = vld [vmem:[#allocation2 + $0x19] sm:$0xff] }
 0xeeb   : > { %10366 = vst.msk [vmem:[#allocation2 + $0x49] sm:$0xff] %vm550_vm3, %v10334_v57  ;;  %v10335_v37 = vmax.f32 %v10303_v48, 0.0 }
 0xeec   : > { %10369 = vst.msk [vmem:[#allocation2 + $0x69] sm:$0xff] %vm550_vm3, %v10337_v0  ;;  %v10446_v45 = vld [vmem:[#allocation2 + $0x21] sm:$0xff] }
 0xeed   : > { %10367 = vst.msk [vmem:[#allocation2 + $0x51] sm:$0xff] %vm550_vm3, %v10335_v37  ;;  %v14293_v28 = vpop.f32.mrb[124].mxu0  ;;  %v11109_v14 = vld [vmem:[#allocation2 + $0x1a] sm:$0xff]  ;;  %v11110_v33 = vld [vmem:[#allocation2 + $0x22] sm:$0xff]  ;;  %v10476_v0 = vpack.c.bf16 %v10446_v45, %v10445_v56 }
 0xeee   : > { %v10308_v13 = vadd.f32 %v14293_v28, %v17618_v52  ;;  %v10164_v26 = vpop.f32.mrb[125].mxu0  ;;  %v11141_v28 = vpack.c.bf16 %v11110_v33, %v11109_v14 }
 0xeef   : > { %v10306_v25 = vadd.f32 %v17618_v52, %v10164_v26  ;;  %v14294_v31 = vpop.f32.mrb[126].mxu0 }
 0xef0   : > { %v10340_v32 = vmax.f32 %v10308_v13, 0.0  ;;  %v10309_v50 = vadd.f32 %v14294_v31, %v17618_v52  ;;  %v10167_v46 = vpop.f32.mrb[127].mxu0 }
 0xef1   : > { %v10338_v59 = vmax.f32 %v10306_v25, 0.0  ;;  %v10307_v10 = vadd.f32 %v17618_v52, %v10167_v46 }
 0xef2   : > { %10372 = vst.msk [vmem:[#allocation2 + $0x91] sm:$0xff] %vm550_vm3, %v10340_v32  ;;  %v10341_v47 = vmax.f32 %v10309_v50, 0.0 }
 0xef3   : > { %10370 = vst.msk [vmem:[#allocation2 + $0x79] sm:$0xff] %vm550_vm3, %v10338_v59  ;;  %v10339_v27 = vmax.f32 %v10307_v10, 0.0 }
 0xef4   : > { %10373 = vst.msk [vmem:[#allocation2 + $0x99] sm:$0xff] %vm550_vm3, %v10341_v47 }
 0xef5   : > { %10371 = vst.msk [vmem:[#allocation2 + $0x81] sm:$0xff] %vm550_vm3, %v10339_v27  ;;  %v14297_v38 = vpop.f32.mrb[128].mxu0 }
 0xef6   : > { %v10312_v63 = vadd.f32 %v14297_v38, %v17618_v52  ;;  %v10180_v61 = vpop.f32.mrb[129].mxu0  ;;  %v17679_v38 = vsel %vm550_vm3, %v10476_v0, 0 }
 0xef7   : > { %v10310_v15 = vadd.f32 %v17618_v52, %v10180_v61  ;;  %v14298_v55 = vpop.f32.mrb[130].mxu0 }
 0xef8   : > { %v10344_v60 = vmax.f32 %v10312_v63, 0.0  ;;  %v10313_v53 = vadd.f32 %v14298_v55, %v17618_v52  ;;  %v10183_v20 = vpop.f32.mrb[131].mxu0  ;;  %v17687_v55 = vsel %vm550_vm3, %v11141_v28, 0 }
 0xef9   : > { %v10342_v2 = vmax.f32 %v10310_v15, 0.0  ;;  %v10311_v9 = vadd.f32 %v17618_v52, %v10183_v20  ;;  %v10448_v20 = vld [vmem:[#allocation2 + $0x39] sm:$0xff] }
 0xefa   : > { %10376 = vst.msk [vmem:[#allocation2 + $0xc1] sm:$0xff] %vm550_vm3, %v10344_v60  ;;  %v10345_v39 = vmax.f32 %v10313_v53, 0.0 }
 0xefb   : > { %10374 = vst.msk [vmem:[#allocation2 + $0xa9] sm:$0xff] %vm550_vm3, %v10342_v2  ;;  %v10343_v42 = vmax.f32 %v10311_v9, 0.0 }
 0xefc   : > { %10377 = vst.msk [vmem:[#allocation2 + $0xc9] sm:$0xff] %vm550_vm3, %v10345_v39 }
 0xefd   : > { %10375 = vst.msk [vmem:[#allocation2 + $0xb1] sm:$0xff] %vm550_vm3, %v10343_v42  ;;  %v14301_v35 = vpop.f32.mrb[132].mxu0  ;;  %v11111_v42 = vld [vmem:[#allocation2 + $0x32] sm:$0xff] }
 0xefe   : > { %v10316_v24 = vadd.f32 %v14301_v35, %v17618_v52  ;;  %v10196_v34 = vpop.f32.mrb[133].mxu0  ;;  %v11112_v35 = vld [vmem:[#allocation2 + $0x3a] sm:$0xff] }
 0xeff   : > { %v10314_v49 = vadd.f32 %v17618_v52, %v10196_v34  ;;  %v14302_v18 = vpop.f32.mrb[134].mxu0 }
 0xf00   : > { %v10348_v43 = vmax.f32 %v10316_v24, 0.0  ;;  %v10317_v41 = vadd.f32 %v14302_v18, %v17618_v52  ;;  %v10199_v58 = vpop.f32.mrb[135].mxu0  ;;  %v10447_v24 = vld [vmem:[#allocation2 + $0x31] sm:$0xff] }
 0xf01   : > { %v10346_v12 = vmax.f32 %v10314_v49, 0.0  ;;  %v10315_v44 = vadd.f32 %v17618_v52, %v10199_v58  ;;  %v10459_v40 = vld [vmem:[#allocation2 + $0xc1] sm:$0xff]  ;;  %v10477_v49 = vpack.c.bf16 %v10448_v20, %v10447_v24 }
 0xf02   : > { %10380 = vst.msk [vmem:[#allocation2 + $0xf1] sm:$0xff] %vm550_vm3, %v10348_v43  ;;  %v10349_v8 = vmax.f32 %v10317_v41, 0.0  ;;  %v11142_v43 = vpack.c.bf16 %v11112_v35, %v11111_v42  ;;  %v11118_v24 = vld [vmem:[#allocation2 + $0x82] sm:$0xff] }
 0xf03   : > { %10378 = vst.msk [vmem:[#allocation2 + $0xd9] sm:$0xff] %vm550_vm3, %v10346_v12  ;;  %v10347_v1 = vmax.f32 %v10315_v44, 0.0  ;;  %v10460_v4 = vld [vmem:[#allocation2 + $0xc9] sm:$0xff] }
 0xf04   : > { %10381 = vst.msk [vmem:[#allocation2 + $0xf9] sm:$0xff] %vm550_vm3, %v10349_v8  ;;  %v17659_v29 = vpack.c.bf16 %v10460_v4, %v10459_v40 }
 0xf05   : > { %10379 = vst.msk [vmem:[#allocation2 + $0xe1] sm:$0xff] %vm550_vm3, %v10347_v1  ;;  %v14305_v36 = vpop.f32.mrb[136].mxu0  ;;  %v17707_v1 = vsel %vm550_vm3, %v10477_v49, 0 }
 0xf06   : > { %v10320_v30 = vadd.f32 %v14305_v36, %v17618_v52  ;;  %v10212_v11 = vpop.f32.mrb[137].mxu0  ;;  %15191 = vmatprep.subr.msk.bf16.mxu0 %vm550_vm3, %v17659_v29  ;;  %v17711_v36 = vsel %vm550_vm3, %v11142_v43, 0 }
 0xf07   : > { %v10318_v3 = vadd.f32 %v17618_v52, %v10212_v11  ;;  %v14306_v5 = vpop.f32.mrb[138].mxu0  ;;  %13050 = vmatpush3.bf16.xpose.msra.mxu0 %v10497_v22 }
 0xf08   : > { %v10352_v19 = vmax.f32 %v10320_v30, 0.0  ;;  %v10321_v54 = vadd.f32 %v14306_v5, %v17618_v52  ;;  %v10215_v21 = vpop.f32.mrb[139].mxu0 }
 0xf09   : > { %v10350_v17 = vmax.f32 %v10318_v3, 0.0  ;;  %v10319_v7 = vadd.f32 %v17618_v52, %v10215_v21  ;;  %v10463_v63 = vld [vmem:[#allocation2 + $0xf1] sm:$0xff] }
 0xf0a   : > { %10384 = vst.msk [vmem:[#allocation2 + $0x121] sm:$0xff] %vm550_vm3, %v10352_v19  ;;  %v10353_v57 = vmax.f32 %v10321_v54, 0.0  ;;  %v10461_v48 = vld [vmem:[#allocation2 + $0xd9] sm:$0xff]  ;;  %v10450_v19 = vld [vmem:[#allocation2 + $0x51] sm:$0xff] }
 0xf0b   : > { %10382 = vst.msk [vmem:[#allocation2 + $0x109] sm:$0xff] %vm550_vm3, %v10350_v17  ;;  %v10351_v37 = vmax.f32 %v10319_v7, 0.0  ;;  %v10464_v13 = vld [vmem:[#allocation2 + $0xf9] sm:$0xff]  ;;  %v11113_v54 = vld [vmem:[#allocation2 + $0x4a] sm:$0xff] }
 0xf0c   : > { %v11127_v26 = vld [vmem:[#allocation2 + $0xf2] sm:$0xff]  ;;  %v11128_v25 = vld [vmem:[#allocation2 + $0xfa] sm:$0xff]  ;;  %10385 = vst.msk [vmem:[#allocation2 + $0x129] sm:$0xff] %vm550_vm3, %v10353_v57  ;;  %v11126_v50 = vld [vmem:[#allocation2 + $0xe2] sm:$0xff]  ;;  %v17689_v60 = vpack.c.bf16 %v10464_v13, %v10463_v63 }
 0xf0d   : > { %v10462_v31 = vld [vmem:[#allocation2 + $0xe1] sm:$0xff]  ;;  %10383 = vst.msk [vmem:[#allocation2 + $0x111] sm:$0xff] %vm550_vm3, %v10351_v37  ;;  %v14309_v46 = vpop.f32.mrb[140].mxu0  ;;  %v17691_v53 = vpack.c.bf16 %v11128_v25, %v11127_v26  ;;  %v11114_v21 = vld [vmem:[#allocation2 + $0x52] sm:$0xff]  ;;  %v10449_v7 = vld [vmem:[#allocation2 + $0x49] sm:$0xff] }
 0xf0e   : > { %v11125_v32 = vld [vmem:[#allocation2 + $0xda] sm:$0xff]  ;;  %v17673_v59 = vpack.c.bf16 %v10462_v31, %v10461_v48  ;;  %v10324_v47 = vadd.f32 %v14309_v46, %v17618_v52  ;;  %v10228_v27 = vpop.f32.mrb[141].mxu0  ;;  %v10478_v57 = vpack.c.bf16 %v10450_v19, %v10449_v7  ;;  %v11143_v48 = vpack.c.bf16 %v11114_v21, %v11113_v54  ;;  %v11116_v46 = vld [vmem:[#allocation2 + $0x6a] sm:$0xff] }
 0xf0f   : > { %v17675_v10 = vpack.c.bf16 %v11126_v50, %v11125_v32  ;;  %v10322_v61 = vadd.f32 %v17618_v52, %v10228_v27  ;;  %v14310_v15 = vpop.f32.mrb[142].mxu0  ;;  %v10452_v32 = vld [vmem:[#allocation2 + $0x69] sm:$0xff] }
 0xf10   : > { %15192 = vmatprep.subr.msk.bf16.mxu0 %vm550_vm3, %v17673_v59  ;;  %v10356_v2 = vmax.f32 %v10324_v47, 0.0  ;;  %v10325_v9 = vadd.f32 %v14310_v15, %v17618_v52  ;;  %v10231_v39 = vpop.f32.mrb[143].mxu0  ;;  %v17730_v13 = vsel %vm550_vm3, %v10478_v57, 0  ;;  %v17733_v26 = vsel %vm550_vm3, %v11143_v48, 0  ;;  %v11115_v50 = vld [vmem:[#allocation2 + $0x62] sm:$0xff]  ;;  %v10458_v48 = vld [vmem:[#allocation2 + $0xb1] sm:$0xff] }
 0xf11   : > { %15231 = vmatprep.subr.msk.bf16.mxu1 %vm550_vm3, %v17675_v10  ;;  %13052 = vmatpush3.bf16.xpose.msra.mxu0 %v17679_v38  ;;  %v10354_v51 = vmax.f32 %v10322_v61, 0.0  ;;  %v10323_v23 = vadd.f32 %v17618_v52, %v10231_v39  ;;  %v10467_v28 = vld [vmem:[#allocation2 + $0x121] sm:$0xff]  ;;  %v11144_v63 = vpack.c.bf16 %v11116_v46, %v11115_v50 }
 0xf12   : > { %13140 = vmatpush3.bf16.xpose.msra.mxu1 %v17687_v55  ;;  %15193 = vmatprep.subr.msk.bf16.mxu0 %vm550_vm3, %v17689_v60  ;;  %10388 = vst.msk [vmem:[#allocation2 + $0x151] sm:$0xff] %vm550_vm3, %v10356_v2  ;;  %v10357_v34 = vmax.f32 %v10325_v9, 0.0  ;;  %v10465_v40 = vld [vmem:[#allocation2 + $0x109] sm:$0xff]  ;;  %v10451_v47 = vld [vmem:[#allocation2 + $0x61] sm:$0xff] }
 0xf13   : > { %15232 = vmatprep.subr.msk.bf16.mxu1 %vm550_vm3, %v17691_v53  ;;  %10386 = vst.msk [vmem:[#allocation2 + $0x139] sm:$0xff] %vm550_vm3, %v10354_v51  ;;  %v10355_v18 = vmax.f32 %v10323_v23, 0.0  ;;  %v10468_v0 = vld [vmem:[#allocation2 + $0x129] sm:$0xff]  ;;  %v10479_v27 = vpack.c.bf16 %v10452_v32, %v10451_v47  ;;  %v17749_v39 = vsel %vm550_vm3, %v11144_v63, 0  ;;  %v10454_v51 = vld [vmem:[#allocation2 + $0x81] sm:$0xff] }
 0xf14   : > { %10389 = vst.msk [vmem:[#allocation2 + $0x159] sm:$0xff] %vm550_vm3, %v10357_v34  ;;  %v10466_v41 = vld [vmem:[#allocation2 + $0x111] sm:$0xff]  ;;  %v11131_v37 = vld [vmem:[#allocation2 + $0x122] sm:$0xff]  ;;  %v17735_v25 = vpack.c.bf16 %v10468_v0, %v10467_v28  ;;  %v11117_v23 = vld [vmem:[#allocation2 + $0x7a] sm:$0xff] }
 0xf15   : > { %v11129_v58 = vld [vmem:[#allocation2 + $0x10a] sm:$0xff]  ;;  %v11130_v6 = vld [vmem:[#allocation2 + $0x112] sm:$0xff]  ;;  %10387 = vst.msk [vmem:[#allocation2 + $0x141] sm:$0xff] %vm550_vm3, %v10355_v18  ;;  %v14313_v12 = vpop.f32.mrb[144].mxu0  ;;  %v17713_v30 = vpack.c.bf16 %v10466_v41, %v10465_v40  ;;  %v17746_v9 = vsel %vm550_vm3, %v10479_v27, 0  ;;  %v11145_v18 = vpack.c.bf16 %v11118_v24, %v11117_v23  ;;  %v10410_v27 = vld [vmem:[#allocation2 + $0xc0] sm:$0xff] }
 0xf16   : > { %v10328_v44 = vadd.f32 %v14313_v12, %v17618_v52  ;;  %v10244_v8 = vpop.f32.mrb[145].mxu0  ;;  %v17715_v11 = vpack.c.bf16 %v11130_v6, %v11129_v58  ;;  %v10453_v34 = vld [vmem:[#allocation2 + $0x79] sm:$0xff]  ;;  %v11121_v0 = vld [vmem:[#allocation2 + $0xaa] sm:$0xff]  ;;  %v11123_v23 = vld [vmem:[#allocation2 + $0xc2] sm:$0xff] }
 0xf17   : > { %v10326_v4 = vadd.f32 %v17618_v52, %v10244_v8  ;;  %v14314_v22 = vpop.f32.mrb[146].mxu0  ;;  %v10480_v49 = vpack.c.bf16 %v10454_v51, %v10453_v34  ;;  %v10411_v50 = vld [vmem:[#allocation2 + $0xc8] sm:$0xff]  ;;  %v10394_v63 = vld [vmem:[#allocation2] sm:$0xff] }
 0xf18   : > { %v10360_v3 = vmax.f32 %v10328_v44, 0.0  ;;  %v10329_v5 = vadd.f32 %v14314_v22, %v17618_v52  ;;  %v10247_v45 = vpop.f32.mrb[147].mxu0  ;;  %v17765_v44 = vsel %vm550_vm3, %v11145_v18, 0  ;;  %v11119_v22 = vld [vmem:[#allocation2 + $0x92] sm:$0xff]  ;;  %v11124_v24 = vld [vmem:[#allocation2 + $0xca] sm:$0xff]  ;;  %v10413_v18 = vld [vmem:[#allocation2 + $0xe0] sm:$0xff] }
 0xf19   : > { %13054 = vmatpush3.bf16.xpose.msra.mxu0 %v17707_v1  ;;  %v10358_v14 = vmax.f32 %v10326_v4, 0.0  ;;  %v10327_v33 = vadd.f32 %v17618_v52, %v10247_v45  ;;  %v11132_v52 = vld [vmem:[#allocation2 + $0x12a] sm:$0xff]  ;;  %v17762_v12 = vsel %vm550_vm3, %v10480_v49, 0  ;;  %v10456_v4 = vld [vmem:[#allocation2 + $0x99] sm:$0xff]  ;;  %v17806_v49 = vpack.c.bf16 %v11124_v24, %v11123_v23 }
 0xf1a   : > { %13142 = vmatpush3.bf16.xpose.msra.mxu1 %v17711_v36  ;;  %15194 = vmatprep.subr.msk.bf16.mxu0 %vm550_vm3, %v17713_v30  ;;  %10392 = vst.msk [vmem:[#allocation2 + $0x181] sm:$0xff] %vm550_vm3, %v10360_v3  ;;  %v10361_v17 = vmax.f32 %v10329_v5, 0.0  ;;  %v17737_v31 = vpack.c.bf16 %v11132_v52, %v11131_v37  ;;  %v10469_v2 = vld [vmem:[#allocation2 + $0x139] sm:$0xff]  ;;  %v10471_v6 = vld [vmem:[#allocation2 + $0x151] sm:$0xff]  ;;  %v10457_v52 = vld [vmem:[#allocation2 + $0xa9] sm:$0xff] }
 0xf1b   : > { %15233 = vmatprep.subr.msk.bf16.mxu1 %vm550_vm3, %v17715_v11  ;;  %10390 = vst.msk [vmem:[#allocation2 + $0x169] sm:$0xff] %vm550_vm3, %v10358_v14  ;;  %v10359_v56 = vmax.f32 %v10327_v33, 0.0  ;;  %v10472_v43 = vld [vmem:[#allocation2 + $0x159] sm:$0xff]  ;;  %v10455_v5 = vld [vmem:[#allocation2 + $0x91] sm:$0xff]  ;;  %v10482_v28 = vpack.c.bf16 %v10458_v48, %v10457_v52 }
 0xf1c   : > { %10393 = vst.msk [vmem:[#allocation2 + $0x189] sm:$0xff] %vm550_vm3, %v10361_v17  ;;  %v10470_v61 = vld [vmem:[#allocation2 + $0x141] sm:$0xff]  ;;  %v11135_v41 = vld [vmem:[#allocation2 + $0x152] sm:$0xff]  ;;  %v17767_v8 = vpack.c.bf16 %v10472_v43, %v10471_v6  ;;  %v10481_v45 = vpack.c.bf16 %v10456_v4, %v10455_v5 }
 0xf1d   : > { %10391 = vst.msk [vmem:[#allocation2 + $0x171] sm:$0xff] %vm550_vm3, %v10359_v56  ;;  %v11133_v15 = vld [vmem:[#allocation2 + $0x13a] sm:$0xff]  ;;  %v11134_v20 = vld [vmem:[#allocation2 + $0x142] sm:$0xff]  ;;  %v17751_v42 = vpack.c.bf16 %v10470_v61, %v10469_v2  ;;  %v11122_v37 = vld [vmem:[#allocation2 + $0xb2] sm:$0xff]  ;;  %v17799_v2 = vpack.c.bf16 %v10411_v50, %v10410_v27 }
 0xf1e   : > { %v17753_v35 = vpack.c.bf16 %v11134_v20, %v11133_v15  ;;  %v11136_v58 = vld [vmem:[#allocation2 + $0x15a] sm:$0xff]  ;;  %v17778_v17 = vsel %vm550_vm3, %v10481_v45, 0  ;;  %v11147_v32 = vpack.c.bf16 %v11122_v37, %v11121_v0  ;;  %v10395_v61 = vld [vmem:[#allocation2 + $0x8] sm:$0xff]  ;;  %v17794_v15 = vsel %vm550_vm3, %v10482_v28, 0  ;;  %v10414_v45 = vld [vmem:[#allocation2 + $0xf0] sm:$0xff] }
 0xf1f   : > { %v17769_v40 = vpack.c.bf16 %v11136_v58, %v11135_v41  ;;  %v11120_v3 = vld [vmem:[#allocation2 + $0x9a] sm:$0xff]  ;;  %v10426_v34 = vpack.c.bf16 %v10395_v61, %v10394_v63  ;;  %v11184_v58 = vsel %vm550_vm3, %v17806_v49, 0  ;;  %v10417_v48 = vld [vmem:[#allocation2 + $0x110] sm:$0xff]  ;;  %v10416_v0 = vld [vmem:[#allocation2 + $0x108] sm:$0xff] }
 0xf20   : > { %v11146_v19 = vpack.c.bf16 %v11120_v3, %v11119_v22  ;;  %v17797_v20 = vsel %vm550_vm3, %v11147_v32, 0  ;;  %v10412_v41 = vld [vmem:[#allocation2 + $0xd8] sm:$0xff]  ;;  %v17818_v4 = vld [vmem:[%s18072_s11] sm:$0x3]  ;;  %v10401_v52 = vld [vmem:[#allocation2 + $0x50] sm:$0xff] }
 0xf21   : > { %13056 = vmatpush3.bf16.xpose.msra.mxu0 %v17730_v13  ;;  %v10589_v43 = vsel %vm550_vm3, %v10426_v34, 0  ;;  %v17813_v6 = vpack.c.bf16 %v10413_v18, %v10412_v41  ;;  %v10397_v22 = vld [vmem:[#allocation2 + $0x20] sm:$0xff]  ;;  %v10415_v5 = vld [vmem:[#allocation2 + $0xf8] sm:$0xff]  ;;  %v10400_v28 = vld [vmem:[#allocation2 + $0x48] sm:$0xff] }
 0xf22   : > { %13144 = vmatpush3.bf16.xpose.msra.mxu1 %v17733_v26  ;;  %15195 = vmatprep.subr.msk.bf16.mxu0 %vm550_vm3, %v17735_v25  ;;  %v10473_v33 = vld [vmem:[#allocation2 + $0x169] sm:$0xff]  ;;  %v17781_v7 = vsel %vm550_vm3, %v11146_v19, 0  ;;  %v10429_v32 = vpack.c.bf16 %v10401_v52, %v10400_v28  ;;  %v10402_v61 = vld [vmem:[#allocation2 + $0x60] sm:$0xff]  ;;  %v10420_v24 = vld [vmem:[#allocation2 + $0x138] sm:$0xff] }
 0xf23   : > { %15234 = vmatprep.subr.msk.bf16.mxu1 %vm550_vm3, %v17737_v31  ;;  %v11139_v46 = vld [vmem:[#allocation2 + $0x182] sm:$0xff]  ;;  %v11140_v47 = vld [vmem:[#allocation2 + $0x18a] sm:$0xff]  ;;  %v10404_v41 = vld [vmem:[#allocation2 + $0x78] sm:$0xff] }
 0xf24   : > { %v10474_v54 = vld [vmem:[#allocation2 + $0x171] sm:$0xff]  ;;  %v11156_v51 = vpack.c.bf16 %v11140_v47, %v11139_v46  ;;  %v10419_v50 = vld [vmem:[#allocation2 + $0x128] sm:$0xff]  ;;  %v10418_v46 = vld [vmem:[#allocation2 + $0x120] sm:$0xff]  ;;  %v17851_v47 = vsel %vm550_vm3, %v10429_v32, 0 }
 0xf25   : > { %v11137_v21 = vld [vmem:[#allocation2 + $0x16a] sm:$0xff]  ;;  %v11138_v14 = vld [vmem:[#allocation2 + $0x172] sm:$0xff]  ;;  %v17783_v56 = vpack.c.bf16 %v10474_v54, %v10473_v33  ;;  %v17831_v54 = vpack.c.bf16 %v10415_v5, %v10414_v45  ;;  %v17853_v27 = vpack.c.bf16 %v10419_v50, %v10418_v46  ;;  %v10421_v23 = vld [vmem:[#allocation2 + $0x140] sm:$0xff] }
 0xf26   : > { %v17785_v57 = vpack.c.bf16 %v11138_v14, %v11137_v21  ;;  %v10399_v21 = vld [vmem:[#allocation2 + $0x38] sm:$0xff]  ;;  %v10398_v14 = vld [vmem:[#allocation2 + $0x30] sm:$0xff]  ;;  %v10403_v63 = vld [vmem:[#allocation2 + $0x68] sm:$0xff]  ;;  %v17864_v18 = vpack.c.bf16 %v10421_v23, %v10420_v24 }
 0xf27   : > { %v10428_v33 = vpack.c.bf16 %v10399_v21, %v10398_v14  ;;  %v10407_v45 = vld [vmem:[#allocation2 + $0x98] sm:$0xff]  ;;  %v10406_v21 = vld [vmem:[#allocation2 + $0x90] sm:$0xff]  ;;  %v11425_v52 = vld [vmem:[#allocation2 + $0x181] sm:$0xff] }
 0xf28   : > { %v10432_v14 = vpack.c.bf16 %v10407_v45, %v10406_v21  ;;  %v10409_v46 = vld [vmem:[#allocation2 + $0xb0] sm:$0xff]  ;;  %v12383_v21 = vld [vmem:[%s18072_s11 + $0x4] sm:$0x3] }
 0xf29   : > { %13058 = vmatpush3.bf16.xpose.msra.mxu0 %v17746_v9  ;;  %v17840_v37 = vsel %vm550_vm3, %v10428_v33, 0  ;;  %v10425_v33 = vld [vmem:[#allocation2 + $0x170] sm:$0xff] }
 0xf2a   : > { %13146 = vmatpush3.bf16.xpose.msra.mxu1 %v17749_v39  ;;  %15196 = vmatprep.subr.msk.bf16.mxu0 %vm550_vm3, %v17751_v42  ;;  %v17884_v28 = vsel %vm550_vm3, %v10432_v14, 0 }
 0xf2b   : > { %15235 = vmatprep.subr.msk.bf16.mxu1 %vm550_vm3, %v17753_v35 }
 0xf31   : > { %13060 = vmatpush3.bf16.xpose.msra.mxu0 %v17762_v12 }
 0xf32   : > { %13148 = vmatpush3.bf16.xpose.msra.mxu1 %v17765_v44  ;;  %15197 = vmatprep.subr.msk.bf16.mxu0 %vm550_vm3, %v17767_v8 }
 0xf33   : > { %15236 = vmatprep.subr.msk.bf16.mxu1 %vm550_vm3, %v17769_v40 }
 0xf39   : > { %13062 = vmatpush3.bf16.xpose.msra.mxu0 %v17778_v17 }
 0xf3a   : > { %13150 = vmatpush3.bf16.xpose.msra.mxu1 %v17781_v7  ;;  %15198 = vmatprep.subr.msk.bf16.mxu0 %vm550_vm3, %v17783_v56 }
 0xf3b   : > { %15237 = vmatprep.subr.msk.bf16.mxu1 %vm550_vm3, %v17785_v57 }
 0xf41   : > { %13064 = vmatpush3.bf16.xpose.msra.mxu0 %v17794_v15 }
 0xf42   : > { %13152 = vmatpush3.bf16.xpose.msra.mxu1 %v17797_v20  ;;  %15199 = vmatprep.subr.msk.bf16.mxu0 %vm550_vm3, %v17799_v2 }
 0xf43   : > { %15238 = vmatprep.subr.msk.bf16.mxu1 %vm550_vm3, %v11156_v51  ;;  %v10430_v51 = vpack.c.bf16 %v10403_v63, %v10402_v61  ;;  %v10408_v63 = vld [vmem:[#allocation2 + $0xa8] sm:$0xff]  ;;  %v11427_v61 = vld [vmem:[#allocation2 + $0x199] sm:$0xff] }
 0xf44   : > { %v10433_v23 = vpack.c.bf16 %v10409_v46, %v10408_v63  ;;  %v11547_v63 = vld [vmem:[#allocation2 + $0x7a] sm:$0xff] }
 0xf45   : > { %v17862_v34 = vsel %vm550_vm3, %v10430_v51, 0  ;;  %v11428_v51 = vld [vmem:[#allocation2 + $0x1a1] sm:$0xff] }
 0xf46   : > { %v11444_v24 = vpack.c.bf16 %v11428_v51, %v11427_v61  ;;  %v11548_v61 = vld [vmem:[#allocation2 + $0x82] sm:$0xff] }
 0xf48   : > { %13066 = vmatmul.mubr.msk.bf16.vlgmr.msra.gmra.mrb[148].mxu0 %vm550_vm3, %v17604_v62  ;;  %v10396_v62 = vld [vmem:[#allocation2 + $0x18] sm:$0xff] }
 0xf49   : > { %13068 = vmatpush3.bf16.xpose.msra.mxu0 %v10589_v43  ;;  %13083 = vmatprep.mubr.msk.bf16.mxu0 %vm550_vm3, %v17818_v4  ;;  %v10427_v3 = vpack.c.bf16 %v10397_v22, %v10396_v62  ;;  %v10405_v43 = vld [vmem:[#allocation2 + $0x80] sm:$0xff]  ;;  %v10423_v22 = vld [vmem:[#allocation2 + $0x158] sm:$0xff]  ;;  %v10422_v62 = vld [vmem:[#allocation2 + $0x150] sm:$0xff] }
 0xf4a   : > { %13154 = vmatpush3.bf16.xpose.msra.mxu1 %v11184_v58  ;;  %15200 = vmatprep.subr.msk.bf16.mxu0 %vm550_vm3, %v17813_v6  ;;  %v10431_v58 = vpack.c.bf16 %v10405_v43, %v10404_v41  ;;  %v17875_v5 = vpack.c.bf16 %v10423_v22, %v10422_v62  ;;  %v10677_v43 = vld [vmem:[#allocation2 + $0x2] sm:$0xff]  ;;  %v10678_v41 = vld [vmem:[#allocation2 + $0xa] sm:$0xff]  ;;  %v11469_v22 = vsel %vm550_vm3, %v17659_v29, 0  ;;  %v11472_v29 = vsel %vm550_vm3, %v17673_v59, 0 }
 0xf4b   : > { %15247 = vmatprep.subr.msk.bf16.mxu1 %vm550_vm3, %v17689_v60  ;;  %v17827_v19 = vsel %vm550_vm3, %v10427_v3, 0  ;;  %v10709_v62 = vpack.c.bf16 %v10678_v41, %v10677_v43  ;;  %v11576_v43 = vpack.c.bf16 %v11548_v61, %v11547_v63 }
 0xf4c   : > { %v17873_v3 = vsel %vm550_vm3, %v10431_v58, 0  ;;  %v17897_v58 = vsel %vm550_vm3, %v10433_v23, 0 }
 0xf4d   : > { %v10731_v45 = vsel %vm550_vm3, %v10709_v62, 0 }
 0xf51   : > { %13156 = vmatmul.mubr.msk.bf16.vlgmr.msra.gmra.mrb[76].mxu1 %vm550_vm3, %v17611_v16  ;;  %13070 = vmatpush3.bf16.xpose.msra.mxu0 %v17827_v19  ;;  %v17842_v16 = vpack.c.bf16 %v10417_v48, %v10416_v0  ;;  %v11426_v48 = vld [vmem:[#allocation2 + $0x189] sm:$0xff] }
 0xf52   : > { %13176 = vmatpush3.bf16.xpose.msra.mxu1 %v17707_v1  ;;  %15201 = vmatprep.subr.msk.bf16.mxu0 %vm550_vm3, %v17831_v54  ;;  %v10424_v0 = vld [vmem:[#allocation2 + $0x168] sm:$0xff]  ;;  %v17888_v50 = vpack.c.bf16 %v11426_v48, %v11425_v52 }
 0xf53   : > { %15248 = vmatprep.subr.msk.bf16.mxu1 %vm550_vm3, %v17713_v30  ;;  %v17886_v32 = vpack.c.bf16 %v10425_v33, %v10424_v0  ;;  %v11545_v48 = vld [vmem:[#allocation2 + $0x62] sm:$0xff]  ;;  %v11546_v0 = vld [vmem:[#allocation2 + $0x6a] sm:$0xff] }
 0xf54   : > { %v11575_v52 = vpack.c.bf16 %v11546_v0, %v11545_v48 }
 0xf59   : > { %13072 = vmatpush3.bf16.xpose.msra.mxu0 %v17840_v37 }
 0xf5a   : > { %13178 = vmatpush3.bf16.xpose.msra.mxu1 %v17730_v13  ;;  %15202 = vmatprep.subr.msk.bf16.mxu0 %vm550_vm3, %v17842_v16 }
 0xf5b   : > { %15249 = vmatprep.subr.msk.bf16.mxu1 %vm550_vm3, %v17735_v25 }
 0xf61   : > { %13074 = vmatpush3.bf16.xpose.msra.mxu0 %v17851_v47 }
 0xf62   : > { %13180 = vmatpush3.bf16.xpose.msra.mxu1 %v17746_v9  ;;  %15203 = vmatprep.subr.msk.bf16.mxu0 %vm550_vm3, %v17853_v27 }
 0xf63   : > { %15250 = vmatprep.subr.msk.bf16.mxu1 %vm550_vm3, %v17751_v42 }
 0xf69   : > { %13076 = vmatpush3.bf16.xpose.msra.mxu0 %v17862_v34 }
 0xf6a   : > { %13182 = vmatpush3.bf16.xpose.msra.mxu1 %v17762_v12  ;;  %15204 = vmatprep.subr.msk.bf16.mxu0 %vm550_vm3, %v17864_v18 }
 0xf6b   : > { %15251 = vmatprep.subr.msk.bf16.mxu1 %vm550_vm3, %v17767_v8 }
 0xf71   : > { %13078 = vmatpush3.bf16.xpose.msra.mxu0 %v17873_v3 }
 0xf72   : > { %13184 = vmatpush3.bf16.xpose.msra.mxu1 %v17778_v17  ;;  %15205 = vmatprep.subr.msk.bf16.mxu0 %vm550_vm3, %v17875_v5 }
 0xf73   : > { %15252 = vmatprep.subr.msk.bf16.mxu1 %vm550_vm3, %v17783_v56 }
 0xf79   : > { %13080 = vmatpush3.bf16.xpose.msra.mxu0 %v17884_v28 }
 0xf7a   : > { %13186 = vmatpush3.bf16.xpose.msra.mxu1 %v17794_v15  ;;  %15206 = vmatprep.subr.msk.bf16.mxu0 %vm550_vm3, %v17886_v32 }
 0xf7b   : > { %15253 = vmatprep.subr.msk.bf16.mxu1 %vm550_vm3, %v17888_v50 }
 0xf81   : > { %13082 = vmatpush3.bf16.xpose.msra.mxu0 %v17897_v58 }
 0xf82   : > { %13188 = vmatpush3.bf16.xpose.msra.mxu1 %v11469_v22  ;;  %15207 = vmatprep.subr.msk.bf16.mxu0 %vm550_vm3, %v17806_v49  ;;  %v11541_v49 = vld [vmem:[#allocation2 + $0x32] sm:$0xff]  ;;  %v11566_v22 = vld [vmem:[#allocation2 + $0x15a] sm:$0xff] }
 0xf83   : > { %15254 = vmatprep.subr.msk.bf16.mxu1 %vm550_vm3, %v11444_v24 }
 0xf88   : > { %13084 = vmatmul.mubr.msk.bf16.vlgmr.msra.gmra.mrb[152].mxu0 %vm550_vm3, %v17818_v4  ;;  %v11542_v4 = vld [vmem:[#allocation2 + $0x3a] sm:$0xff] }
 0xf89   : > { %13086 = vmatpush3.bf16.xpose.msra.mxu0 %v10731_v45  ;;  %13101 = vmatprep.mubr.msk.bf16.mxu0 %vm550_vm3, %v12383_v21 }
 0xf8a   : > { %13190 = vmatpush3.bf16.xpose.msra.mxu1 %v11472_v29  ;;  %15208 = vmatprep.subr.msk.bf16.mxu0 %vm550_vm3, %v17675_v10  ;;  %v12385_v10 = vld [vmem:[%s18072_s11 + $0x6] sm:$0x3]  ;;  %v15444_v29 = vmov 0  }
 0xf8b   : > { %15358 = vset.pattern.permute.xlu0 %v15444_v29 }
 0xf91   : > { %13088 = vmatpush3.bf16.xpose.msra.mxu0 %v17687_v55  ;;  %v10852_v55 = vld [vmem:[#allocation2 + $0x188] sm:$0xff] }
 0xf92   : > { %15209 = vmatprep.subr.msk.bf16.mxu0 %vm550_vm3, %v17691_v53  ;;  %v10851_v53 = vld [vmem:[#allocation2 + $0x180] sm:$0xff] }
 0xf99   : > { %13090 = vmatpush3.bf16.xpose.msra.mxu0 %v17711_v36  ;;  %v10868_v36 = vpack.c.bf16 %v10852_v55, %v10851_v53 }
 0xf9a   : > { %15210 = vmatprep.subr.msk.bf16.mxu0 %vm550_vm3, %v17715_v11  ;;  %v10896_v11 = vsel %vm550_vm3, %v17799_v2, 0 }
 0xfa1   : > { %13092 = vmatpush3.bf16.xpose.msra.mxu0 %v17733_v26  ;;  %v12387_v26 = vld [vmem:[%s18072_s11 + $0x8] sm:$0x3] }
 0xfa2   : > { %15211 = vmatprep.subr.msk.bf16.mxu0 %vm550_vm3, %v17737_v31  ;;  %v12393_v31 = vld [vmem:[%s18072_s11 + $0xe] sm:$0x3] }
 0xfa3   : > { %13191 = vmatprep.mubr.msk.bf16.mxu1 %vm550_vm3, %v12393_v31 }
 0xfa4   : > { %13192 = vmatmul.mubr.msk.bf16.vlgmr.msra.gmra.mrb[80].mxu1 %vm550_vm3, %v12393_v31  ;;  %v11549_v31 = vld [vmem:[#allocation2 + $0x92] sm:$0xff] }
 0xfa9   : > { %13094 = vmatpush3.bf16.xpose.msra.mxu0 %v17749_v39 }
 0xfaa   : > { %15212 = vmatprep.subr.msk.bf16.mxu0 %vm550_vm3, %v17753_v35 }
 0xfb1   : > { %13096 = vmatpush3.bf16.xpose.msra.mxu0 %v17765_v44 }
 0xfb2   : > { %15213 = vmatprep.subr.msk.bf16.mxu0 %vm550_vm3, %v17769_v40 }
 0xfb9   : > { %13098 = vmatpush3.bf16.xpose.msra.mxu0 %v17781_v7  ;;  %v11284_v7 = vld [vmem:[#allocation2 + $0x1a0] sm:$0xff] }
 0xfba   : > { %15214 = vmatprep.subr.msk.bf16.mxu0 %vm550_vm3, %v17785_v57  ;;  %v11557_v57 = vld [vmem:[#allocation2 + $0xf2] sm:$0xff] }
 0xfc1   : > { %13100 = vmatpush3.bf16.xpose.msra.mxu0 %v17797_v20  ;;  %v11328_v20 = vsel %vm550_vm3, %v17813_v6, 0 }
 0xfc2   : > { %15215 = vmatprep.subr.msk.bf16.mxu0 %vm550_vm3, %v17813_v6  ;;  %v11543_v6 = vld [vmem:[#allocation2 + $0x4a] sm:$0xff] }
 0xfc8   : > { %13102 = vmatmul.mubr.msk.bf16.vlgmr.msra.gmra.mrb[156].mxu0 %vm550_vm3, %v12383_v21 }
 0xfc9   : > { %13104 = vmatpush3.bf16.xpose.msra.mxu0 %v17827_v19  ;;  %13119 = vmatprep.mubr.msk.bf16.mxu0 %vm550_vm3, %v12385_v10  ;;  %v11573_v19 = vpack.c.bf16 %v11542_v4, %v11541_v49 }
 0xfca   : > { %15216 = vmatprep.subr.msk.bf16.mxu0 %vm550_vm3, %v17831_v54 }
 0xfd1   : > { %13106 = vmatpush3.bf16.xpose.msra.mxu0 %v17840_v37 }
 0xfd2   : > { %15217 = vmatprep.subr.msk.bf16.mxu0 %vm550_vm3, %v17842_v16 }
 0xfd9   : > { %13108 = vmatpush3.bf16.xpose.msra.mxu0 %v17851_v47 }
 0xfda   : > { %15218 = vmatprep.subr.msk.bf16.mxu0 %vm550_vm3, %v17853_v27 }
 0xfe1   : > { %13110 = vmatpush3.bf16.xpose.msra.mxu0 %v17862_v34 }
 0xfe2   : > { %15219 = vmatprep.subr.msk.bf16.mxu0 %vm550_vm3, %v17864_v18 }
 0xfe9   : > { %13112 = vmatpush3.bf16.xpose.msra.mxu0 %v17873_v3 }
 0xfea   : > { %15220 = vmatprep.subr.msk.bf16.mxu0 %vm550_vm3, %v17875_v5 }
 0xff1   : > { %13114 = vmatpush3.bf16.xpose.msra.mxu0 %v17884_v28 }
 0xff2   : > { %15221 = vmatprep.subr.msk.bf16.mxu0 %vm550_vm3, %v17886_v32 }
 0xff9   : > { %13116 = vmatpush3.bf16.xpose.msra.mxu0 %v17897_v58 }
 0xffa   : > { %15222 = vmatprep.subr.msk.bf16.mxu0 %vm550_vm3, %v10868_v36 }
0x1001   : > { %13118 = vmatpush3.bf16.xpose.msra.mxu0 %v10896_v11 }
0x1002   : > { %15223 = vmatprep.subr.msk.bf16.mxu0 %vm550_vm3, %v17673_v59 }
0x1008   : > { %13120 = vmatmul.mubr.msk.bf16.vlgmr.msra.gmra.mrb[160].mxu0 %vm550_vm3, %v12385_v10  ;;  %v11685_v10 = vld [vmem:[%s18073_s12] sm:$0x7] }
0x1009   : > { %13122 = vmatpush3.bf16.xpose.msra.mxu0 %v17679_v38  ;;  %13137 = vmatprep.mubr.msk.bf16.mxu0 %vm550_vm3, %v12387_v26 }
0x100a   : > { %15224 = vmatprep.subr.msk.bf16.mxu0 %vm550_vm3, %v17689_v60  ;;  %v10980_v60 = vld [vmem:[#allocation2 + $0xc9] sm:$0xff]  ;;  %11688 = vperm.xlu0 %15358, %v11685_v10  }
0x1011   : > { %13124 = vmatpush3.bf16.xpose.msra.mxu0 %v17707_v1  ;;  %v10979_v1 = vld [vmem:[#allocation2 + $0xc1] sm:$0xff] }
0x1012   : > { %15225 = vmatprep.subr.msk.bf16.mxu0 %vm550_vm3, %v17713_v30  ;;  %v11004_v30 = vpack.c.bf16 %v10980_v60, %v10979_v1 }
0x1019   : > { %13126 = vmatpush3.bf16.xpose.msra.mxu0 %v17730_v13  ;;  %v11040_v13 = vsel %vm550_vm3, %v11004_v30, 0  ;;  %v11551_v30 = vld [vmem:[#allocation2 + $0xaa] sm:$0xff] }
0x101a   : > { %15226 = vmatprep.subr.msk.bf16.mxu0 %vm550_vm3, %v17735_v25  ;;  %v12391_v25 = vld [vmem:[%s18072_s11 + $0xc] sm:$0x3] }
0x101b   : > { %v10578_v59 = vpop.f32.mrb[148].mxu0 }
0x101c   : > { %v10580_v38 = vpop.f32.mrb[149].mxu0 }
0x101d   : > { %v10582_v39 = vpop.f32.mrb[150].mxu0 }
0x101e   : > { %v10583_v35 = vpop.f32.mrb[151].mxu0  ;;  %v11567_v39 = vld [vmem:[#allocation2 + $0x16a] sm:$0xff] }
0x101f   : > { %v11568_v35 = vld [vmem:[#allocation2 + $0x172] sm:$0xff] }
0x1020   : > { %v11586_v1 = vpack.c.bf16 %v11568_v35, %v11567_v39 }
0x1021   : > { %13128 = vmatpush3.bf16.xpose.msra.mxu0 %v17746_v9 }
0x1022   : > { %15227 = vmatprep.subr.msk.bf16.mxu0 %vm550_vm3, %v17751_v42 }
0x1024   : > { %v11244_v45 = vpop.f32.mrb[76].mxu1 }
0x1025   : > { %v11246_v55 = vpop.f32.mrb[77].mxu1 }
0x1026   : > { %v11248_v53 = vpop.f32.mrb[78].mxu1 }
0x1029   : > { %13130 = vmatpush3.bf16.xpose.msra.mxu0 %v17762_v12 }
0x102a   : > { %15228 = vmatprep.subr.msk.bf16.mxu0 %vm550_vm3, %v17767_v8 }
0x1031   : > { %13132 = vmatpush3.bf16.xpose.msra.mxu0 %v17778_v17  ;;  %v11283_v17 = vld [vmem:[#allocation2 + $0x198] sm:$0xff] }
0x1032   : > { %15229 = vmatprep.subr.msk.bf16.mxu0 %vm550_vm3, %v17783_v56  ;;  %v11300_v56 = vpack.c.bf16 %v11284_v7, %v11283_v17  ;;  %v11571_v17 = vld [vmem:[#allocation2 + $0x19a] sm:$0xff]  ;;  %v11572_v7 = vld [vmem:[#allocation2 + $0x1a2] sm:$0xff] }
0x1039   : > { %13134 = vmatpush3.bf16.xpose.msra.mxu0 %v17794_v15  ;;  %v11558_v15 = vld [vmem:[#allocation2 + $0xfa] sm:$0xff] }
0x103a   : > { %15230 = vmatprep.subr.msk.bf16.mxu0 %vm550_vm3, %v17888_v50  ;;  %v11581_v2 = vpack.c.bf16 %v11558_v15, %v11557_v57  ;;  %v11601_v50 = vsel %vm550_vm3, %v11575_v52, 0  ;;  %v11588_v57 = vpack.c.bf16 %v11572_v7, %v11571_v17 }
0x1041   : > { %13136 = vmatpush3.bf16.xpose.msra.mxu0 %v11040_v13  ;;  %v11552_v13 = vld [vmem:[#allocation2 + $0xb2] sm:$0xff] }
0x1042   : > { %15239 = vmatprep.subr.msk.bf16.mxu0 %vm550_vm3, %v17831_v54  ;;  %v11559_v54 = vld [vmem:[#allocation2 + $0x10a] sm:$0xff] }
0x1048   : > { %13138 = vmatmul.mubr.msk.bf16.vlgmr.msra.gmra.mrb[164].mxu0 %vm550_vm3, %v12387_v26  ;;  %v11249_v26 = vpop.f32.mrb[79].mxu1 }
0x1049   : > { %13158 = vmatpush3.bf16.xpose.msra.mxu0 %v17840_v37  ;;  %13173 = vmatprep.mubr.msk.bf16.mxu0 %vm550_vm3, %v12391_v25  ;;  %v11560_v37 = vld [vmem:[#allocation2 + $0x112] sm:$0xff] }
0x104a   : > { %15240 = vmatprep.subr.msk.bf16.mxu0 %vm550_vm3, %v17842_v16  ;;  %v18029_v16 = vld [vmem:[%s18072_s11 + $0x10] sm:$0x3] }
0x1051   : > { %13160 = vmatpush3.bf16.xpose.msra.mxu0 %v17851_v47  ;;  %v11595_v47 = vsel %vm550_vm3, %v11573_v19, 0 }
0x1052   : > { %15241 = vmatprep.subr.msk.bf16.mxu0 %vm550_vm3, %v17853_v27  ;;  %v11582_v27 = vpack.c.bf16 %v11560_v37, %v11559_v54 }
0x1059   : > { %13162 = vmatpush3.bf16.xpose.msra.mxu0 %v17862_v34  ;;  %v11544_v34 = vld [vmem:[#allocation2 + $0x52] sm:$0xff] }
0x105a   : > { %15242 = vmatprep.subr.msk.bf16.mxu0 %vm550_vm3, %v17864_v18  ;;  %v11574_v18 = vpack.c.bf16 %v11544_v34, %v11543_v6 }
0x105b   : > { %v10670_v9 = vpop.f32.mrb[152].mxu0 }
0x105c   : > { %v10671_v42 = vadd.f32 %v10670_v9, %v10578_v59  ;;  %v10672_v12 = vpop.f32.mrb[153].mxu0  ;;  %v11598_v14 = vsel %vm550_vm3, %v11574_v18, 0  ;;  %v11550_v59 = vld [vmem:[#allocation2 + $0x9a] sm:$0xff]  ;;  %v11569_v9 = vld [vmem:[#allocation2 + $0x182] sm:$0xff] }
0x105d   : > { %v10673_v44 = vadd.f32 %v10672_v12, %v10580_v38  ;;  %v10674_v8 = vpop.f32.mrb[154].mxu0  ;;  %v11577_v38 = vpack.c.bf16 %v11550_v59, %v11549_v31 }
0x105e   : > { %v10675_v40 = vpop.f32.mrb[155].mxu0  ;;  %v11553_v8 = vld [vmem:[#allocation2 + $0xc2] sm:$0xff] }
0x105f   : > { %v11607_v60 = vsel %vm550_vm3, %v11577_v38, 0  ;;  %v11554_v40 = vld [vmem:[#allocation2 + $0xca] sm:$0xff] }
0x1061   : > { %13164 = vmatpush3.bf16.xpose.msra.mxu0 %v17873_v3  ;;  %v11561_v3 = vld [vmem:[#allocation2 + $0x122] sm:$0xff] }
0x1062   : > { %15243 = vmatprep.subr.msk.bf16.mxu0 %vm550_vm3, %v17875_v5  ;;  %v11562_v5 = vld [vmem:[#allocation2 + $0x12a] sm:$0xff] }
0x1063   : > { %v11583_v33 = vpack.c.bf16 %v11562_v5, %v11561_v3 }
0x1069   : > { %13166 = vmatpush3.bf16.xpose.msra.mxu0 %v17884_v28  ;;  %v11563_v28 = vld [vmem:[#allocation2 + $0x13a] sm:$0xff] }
0x106a   : > { %15244 = vmatprep.subr.msk.bf16.mxu0 %vm550_vm3, %v17886_v32  ;;  %v11564_v32 = vld [vmem:[#allocation2 + $0x142] sm:$0xff] }
0x106b   : > { %v11584_v46 = vpack.c.bf16 %v11564_v32, %v11563_v28 }
0x1071   : > { %13168 = vmatpush3.bf16.xpose.msra.mxu0 %v17897_v58  ;;  %v11565_v58 = vld [vmem:[#allocation2 + $0x152] sm:$0xff] }
0x1072   : > { %15245 = vmatprep.subr.msk.bf16.mxu0 %vm550_vm3, %v10868_v36  ;;  %v11604_v36 = vsel %vm550_vm3, %v11576_v43, 0 }
0x1077   : > { %v11532_v34 = vpop.f32.mrb[80].mxu1 }
0x1078   : > { %v11534_v18 = vpop.f32.mrb[81].mxu1 }
0x1079   : > { %13170 = vmatpush3.bf16.xpose.msra.mxu0 %v10896_v11  ;;  %v11585_v11 = vpack.c.bf16 %v11566_v22, %v11565_v58  ;;  %v11536_v3 = vpop.f32.mrb[82].mxu1 }
0x107a   : > { %15246 = vmatprep.subr.msk.bf16.mxu0 %vm550_vm3, %v11300_v56  ;;  %v11579_v56 = vpack.c.bf16 %v11554_v40, %v11553_v8  ;;  %v11537_v5 = vpop.f32.mrb[83].mxu1 }
0x107c   : > { %v11613_v15 = vsel %vm550_vm3, %v11579_v56, 0 }
0x1081   : > { %13172 = vmatpush3.bf16.xpose.msra.mxu0 %v11328_v20  ;;  %v11555_v20 = vld [vmem:[#allocation2 + $0xda] sm:$0xff] }
0x1082   : > { %15255 = vmatprep.subr.msk.bf16.mxu0 %vm550_vm3, %v11581_v2  ;;  %v11556_v2 = vld [vmem:[#allocation2 + $0xe2] sm:$0xff] }
0x1083   : > { %v11580_v49 = vpack.c.bf16 %v11556_v2, %v11555_v20 }
0x1085   : > { %v11616_v4 = vsel %vm550_vm3, %v11580_v49, 0 }
0x1088   : > { %13174 = vmatmul.mubr.msk.bf16.vlgmr.msra.gmra.mrb[168].mxu0 %vm550_vm3, %v12391_v25  ;;  %v11578_v25 = vpack.c.bf16 %v11552_v13, %v11551_v30 }
0x1089   : > { %13194 = vmatpush3.bf16.xpose.msra.mxu0 %v11595_v47  ;;  %13209 = vmatprep.mubr.msk.bf16.mxu0 %vm550_vm3, %v18029_v16  ;;  %v11689_v58 = vpop.permute.xlu0 %11688 }
0x108a   : > { %15256 = vmatprep.subr.msk.bf16.mxu0 %vm550_vm3, %v11582_v27  ;;  %v11610_v12 = vsel %vm550_vm3, %v11578_v25, 0 }
0x1091   : > { %13196 = vmatpush3.bf16.xpose.msra.mxu0 %v11598_v14 }
0x1092   : > { %15257 = vmatprep.subr.msk.bf16.mxu0 %vm550_vm3, %v11583_v33 }
0x1099   : > { %13198 = vmatpush3.bf16.xpose.msra.mxu0 %v11601_v50 }
0x109a   : > { %15258 = vmatprep.subr.msk.bf16.mxu0 %vm550_vm3, %v11584_v46 }
0x109b   : > { %v10812_v51 = vpop.f32.mrb[156].mxu0 }
0x109c   : > { %v10819_v23 = vadd.f32 %v10812_v51, %v10671_v42  ;;  %v10814_v24 = vpop.f32.mrb[157].mxu0  ;;  %v11570_v42 = vld [vmem:[#allocation2 + $0x18a] sm:$0xff] }
0x109d   : > { %v10820_v41 = vadd.f32 %v10814_v24, %v10673_v44  ;;  %v10816_v62 = vpop.f32.mrb[158].mxu0  ;;  %v11587_v44 = vpack.c.bf16 %v11570_v42, %v11569_v9 }
0x109e   : > { %v10817_v21 = vpop.f32.mrb[159].mxu0 }
0x10a1   : > { %13200 = vmatpush3.bf16.xpose.msra.mxu0 %v11604_v36 }
0x10a2   : > { %15259 = vmatprep.subr.msk.bf16.mxu0 %vm550_vm3, %v11585_v11 }
0x10a9   : > { %13202 = vmatpush3.bf16.xpose.msra.mxu0 %v11607_v60 }
0x10aa   : > { %15260 = vmatprep.subr.msk.bf16.mxu0 %vm550_vm3, %v11586_v1 }
0x10b1   : > { %13204 = vmatpush3.bf16.xpose.msra.mxu0 %v11610_v12 }
0x10b2   : > { %15261 = vmatprep.subr.msk.bf16.mxu0 %vm550_vm3, %v11587_v44 }
0x10b9   : > { %13206 = vmatpush3.bf16.xpose.msra.mxu0 %v11613_v15 }
0x10ba   : > { %15262 = vmatprep.subr.msk.bf16.mxu0 %vm550_vm3, %v11588_v57 }
0x10c1   : > { %13208 = vmatpush3.bf16.xpose.msra.mxu0 %v11616_v4 }
0x10c8   : > { %13210 = vmatmul.mubr.msk.bf16.vlgmr.msra.gmra.mrb[172].mxu0 %vm550_vm3, %v18029_v16 }
0x10db   : > { %v10956_v19 = vpop.f32.mrb[160].mxu0 }
0x10dc   : > { %v10963_v54 = vadd.f32 %v10956_v19, %v10819_v23  ;;  %v10958_v37 = vpop.f32.mrb[161].mxu0 }
0x10dd   : > { %v10964_v47 = vadd.f32 %v10958_v37, %v10820_v41  ;;  %v10960_v27 = vpop.f32.mrb[162].mxu0 }
0x10de   : > { %v10961_v6 = vpop.f32.mrb[163].mxu0 }
0x111b   : > { %v11100_v14 = vpop.f32.mrb[164].mxu0 }
0x111c   : > { %v11107_v33 = vadd.f32 %v11100_v14, %v10963_v54  ;;  %v11102_v48 = vpop.f32.mrb[165].mxu0 }
0x111d   : > { %v11108_v0 = vadd.f32 %v11102_v48, %v10964_v47  ;;  %v11104_v52 = vpop.f32.mrb[166].mxu0 }
0x111e   : > { %v11251_v28 = vadd.f32 %v11244_v45, %v11107_v33  ;;  %v11105_v32 = vpop.f32.mrb[167].mxu0 }
0x111f   : > { %v11252_v50 = vadd.f32 %v11246_v55, %v11108_v0 }
0x115b   : > { %v11388_v46 = vpop.f32.mrb[168].mxu0 }
0x115c   : > { %v11395_v16 = vadd.f32 %v11388_v46, %v11251_v28  ;;  %v11390_v63 = vpop.f32.mrb[169].mxu0 }
0x115d   : > { %v11396_v61 = vadd.f32 %v11390_v63, %v11252_v50  ;;  %v11392_v51 = vpop.f32.mrb[170].mxu0 }
0x115e   : > { %v11539_v23 = vadd.f32 %v11532_v34, %v11395_v16  ;;  %v11393_v24 = vpop.f32.mrb[171].mxu0 }
0x115f   : > { %v11540_v43 = vadd.f32 %v11534_v18, %v11396_v61 }
0x119b   : > { %v11676_v41 = vpop.f32.mrb[172].mxu0 }
0x119c   : > { %v11683_v22 = vadd.f32 %v11676_v41, %v11539_v23  ;;  %v11678_v62 = vpop.f32.mrb[173].mxu0 }
0x119d   : > { %v11684_v21 = vadd.f32 %v11678_v62, %v11540_v43  ;;  %v11680_v29 = vpop.f32.mrb[174].mxu0 }
0x119e   : > { %v11691_v10 = vadd.f32 %v11689_v58, %v11683_v22  ;;  %v11681_v53 = vpop.f32.mrb[175].mxu0 }
0x119f   : > { %v11692_v45 = vadd.f32 %v11689_v58, %v11684_v21 }
0x11a0   : > { %15426 = vtanh.f32 %v11691_v10 }
0x11a1   : > { %15428 = vtanh.f32 %v11692_v45 }
0x11aa   : > { %v15427_v55 = vpop.eup %15426 }
0x11ab   : > { %v15429_v36 = vpop.eup %15428 }
0x11ac   : > { %v11697_v11 = vcombine.low %v15427_v55, %v15429_v36 }
0x11ae   : > { %11699 = vst [vmem:[%s548_s29] sm:$0x77] %v11697_v11 }
0x11af PF: > { %s27_s24 = sadd.s32 1, %s15436_s24  }
0x11b0   : > { %p24_p4 = scmp.ge.s32.totalorder %s27_s24, 4  }
0x11b2   :  { %26 = sbr.rel (!%p24_p4) target bundleno = 3 (0x3), region = 149 }

</bundles_post_ra>
